<compile_context>
chip_gen: v7x
topology: tpu7x:2x2x1
jax: 0.10.0
libtpu: 0.0.40
codegen_flags: <defaults>
</compile_context>

<pallas_src>
import functools

import jax
import jax.numpy as jnp
from jax import lax
from jax.experimental import pallas as pl
from jax.experimental.pallas import tpu as pltpu


# ----------------------------------------------------------------------------
# helpers
# ----------------------------------------------------------------------------
def _pick_batch_tile(batch, max_tile=8):
    """Images per grid step: amortize the ~0.35us/step overhead while keeping
    >= 2 grid programs so v7x's two TensorCores both get work."""
    for tb in (max_tile, 4, 2):
        if batch % tb == 0 and batch // tb >= 2:
            return tb
    return 1


# ----------------------------------------------------------------------------
# Pallas kernels
# ----------------------------------------------------------------------------
def _conv_from_planes_kernel(x_ref, w_ref, b_ref, o_ref, *, tap_specs, m_out, act):
    """Generic strided conv / conv-transpose-phase kernel.

    x_ref: (TB, n_planes, plane_rows, C_in)  phase/column-window planes (bf16)
    w_ref: (n_taps, C_in, N)                 per-tap weight slabs (bf16)
    b_ref: (1, N)                            bias (f32)
    o_ref: (TB, m_out, N)                    output (m_out = Ho*Wo spatial rows)
    Each tap is an offset pl.ds slice of one plane; taps accumulate in f32.
    """
    tb = o_ref.shape[0]
    n_out = o_ref.shape[2]
    c_in = x_ref.shape[3]
    for ib in range(tb):                           # static unroll over batch tile
        acc = jnp.zeros((m_out, n_out), jnp.float32)
        for t, (plane, row0) in enumerate(tap_specs):
            tap = x_ref[ib, plane, pl.ds(row0, m_out), :]        # (m_out, C_in)
            if c_in == 1:
                # 1-channel first layer: VPU broadcast-FMA (K=1 matmul is degenerate).
                acc = acc + tap.astype(jnp.float32) * w_ref[t].astype(jnp.float32)
            else:
                acc = acc + jnp.dot(tap, w_ref[t],
                                    preferred_element_type=jnp.float32)
        acc = acc + b_ref[...]
        if act == "relu":
            acc = jnp.maximum(acc, 0.0)
        elif act == "sigmoid":
            acc = jax.nn.sigmoid(acc)
        o_ref[ib] = acc.astype(o_ref.dtype)


def _fc_vae_kernel(h_ref, eps_ref, wmu_ref, bmu_ref, wlv_ref, blv_ref,
                   wd_ref, bd_ref, mu_ref, lv_ref, d_ref):
    """Fused fc_mu + fc_logvar + reparameterize + fc_decode."""
    tb = h_ref.shape[0]
    for ib in range(tb):
        h = h_ref[ib]                                            # (1, K) bf16
        mu = jnp.dot(h, wmu_ref[...], preferred_element_type=jnp.float32) + bmu_ref[...]
        lv = jnp.dot(h, wlv_ref[...], preferred_element_type=jnp.float32) + blv_ref[...]
        z = mu + eps_ref[ib] * jnp.exp(0.5 * lv)                 # reparameterize
        d = jnp.dot(z.astype(wd_ref.dtype), wd_ref[...],
                    preferred_element_type=jnp.float32) + bd_ref[...]
        mu_ref[ib] = mu
        lv_ref[ib] = lv
        d_ref[ib] = d.astype(d_ref.dtype)


# ----------------------------------------------------------------------------
# pallas_call wrappers
# ----------------------------------------------------------------------------
def _conv_from_planes(planes, w_taps, bias, tap_specs, m_out, act, out_dtype):
    B, n_planes, plane_rows, c_in = planes.shape
    n_taps, c_w, n_out = w_taps.shape
    assert c_in == c_w and n_taps == len(tap_specs)
    tb = _pick_batch_tile(B)
    kernel = functools.partial(_conv_from_planes_kernel,
                               tap_specs=tuple(tap_specs), m_out=m_out, act=act)
    return pl.pallas_call(
        kernel,
        out_shape=jax.ShapeDtypeStruct((B, m_out, n_out), out_dtype),
        grid=(B // tb,),
        in_specs=[
            pl.BlockSpec((tb, n_planes, plane_rows, c_in), lambda i: (i, 0, 0, 0)),
            pl.BlockSpec((n_taps, c_w, n_out), lambda i: (0, 0, 0)),
            pl.BlockSpec((1, n_out), lambda i: (0, 0)),
        ],
        out_specs=pl.BlockSpec((tb, m_out, n_out), lambda i: (i, 0, 0)),
        compiler_params=pltpu.CompilerParams(dimension_semantics=("parallel",)),
    )(planes, w_taps, bias)


def conv2d_s2(x, w_taps, bias, act, out_dtype=jnp.bfloat16):
    """3x3 / stride-2 / pad-1 conv, NHWC.  Host builds compact phase+column-window
    planes (~1.5x the activation, NOT the 9x im2col duplication); the 9 taps are
    offset-sliced and accumulated inside the Pallas kernel."""
    B, H, W, C = x.shape
    Ho, Wo = (H - 1) // 2 + 1, (W - 1) // 2 + 1
    xp = jnp.pad(x, ((0, 0), (1, 1), (1, 1), (0, 0)))
    planes = []
    for ri in (0, 1):                                 # row phase of the padded input
        rp = xp[:, ri::2, :, :]
        for (rj, dj) in ((0, 0), (1, 0), (0, 1)):     # the 3 column variants used by kj=0,1,2
            planes.append(rp[:, :, rj::2, :][:, :, dj:dj + Wo, :])
    planes = jnp.stack(planes, axis=1)                # (B, 6, Hh, Wo, C)
    hh = planes.shape[2]
    planes = planes.reshape(B, 6, hh * Wo, C)         # free row-major reshape
    # tap t = ki*3 + kj  ->  plane (ki%2)*3 + kj, starting flat row (ki//2)*Wo
    tap_specs = [((ki % 2) * 3 + kj, (ki // 2) * Wo)
                 for ki in range(3) for kj in range(3)]
    out = _conv_from_planes(planes, w_taps, bias, tap_specs, Ho * Wo, act, out_dtype)
    return out.reshape(B, Ho, Wo, -1)


def conv_transpose2d_s2(x, w_taps, bias, act, out_dtype=jnp.bfloat16):
    """3x3 / stride-2 / pad-1 / out-pad-1 ConvTranspose2d, NHWC, via the
    4-output-phase decomposition.  Kernel emits the phase-packed (H*W, 4*C_out)
    block; the 2x2 phase interleave is one small host transpose."""
    B, H, W, C = x.shape
    xp = jnp.pad(x, ((0, 0), (0, 1), (0, 1), (0, 0)))
    planes = jnp.stack([xp[:, :, dj:dj + W, :] for dj in (0, 1)], axis=1)
    planes = planes.reshape(B, 2, (H + 1) * W, C)     # (B, 2, (H+1)*W, C)
    # tap t = di*2 + dj  ->  plane dj, starting flat row di*W
    tap_specs = [(dj, di * W) for di in (0, 1) for dj in (0, 1)]
    out = _conv_from_planes(planes, w_taps, bias, tap_specs, H * W, act, out_dtype)
    c_out = w_taps.shape[2] // 4
    out = out.reshape(B, H, W, 2, 2, c_out).transpose(0, 1, 3, 2, 4, 5)
    return out.reshape(B, 2 * H, 2 * W, c_out)


def fc_mu_logvar_reparam_decode(h, eps, w_mu, b_mu, w_lv, b_lv, w_dec, b_dec):
    """mu/logvar/decoded feature map from one fused kernel, tiled over batch."""
    B, K = h.shape
    L = w_mu.shape[1]
    Nd = w_dec.shape[1]
    tb = _pick_batch_tile(B)
    h3 = h.astype(jnp.bfloat16).reshape(B, 1, K)
    e3 = eps.astype(jnp.float32).reshape(B, 1, L)
    mu, lv, d = pl.pallas_call(
        _fc_vae_kernel,
        out_shape=(jax.ShapeDtypeStruct((B, 1, L), jnp.float32),
                   jax.ShapeDtypeStruct((B, 1, L), jnp.float32),
                   jax.ShapeDtypeStruct((B, 1, Nd), jnp.bfloat16)),
        grid=(B // tb,),
        in_specs=[
            pl.BlockSpec((tb, 1, K), lambda i: (i, 0, 0)),
            pl.BlockSpec((tb, 1, L), lambda i: (i, 0, 0)),
            pl.BlockSpec((K, L), lambda i: (0, 0)),
            pl.BlockSpec((1, L), lambda i: (0, 0)),
            pl.BlockSpec((K, L), lambda i: (0, 0)),
            pl.BlockSpec((1, L), lambda i: (0, 0)),
            pl.BlockSpec((L, Nd), lambda i: (0, 0)),
            pl.BlockSpec((1, Nd), lambda i: (0, 0)),
        ],
        out_specs=(pl.BlockSpec((tb, 1, L), lambda i: (i, 0, 0)),
                   pl.BlockSpec((tb, 1, L), lambda i: (i, 0, 0)),
                   pl.BlockSpec((tb, 1, Nd), lambda i: (i, 0, 0))),
        compiler_params=pltpu.CompilerParams(dimension_semantics=("parallel",)),
    )(h3, e3, w_mu, b_mu, w_lv, b_lv, w_dec, b_dec)
    return mu.reshape(B, L), lv.reshape(B, L), d.reshape(B, Nd)


# ----------------------------------------------------------------------------
# ConvVAE parameters (PyTorch layouts) + one-time layout preparation
# ----------------------------------------------------------------------------
def init_params(key, latent_dim=32):
    ks = jax.random.split(key, 12)
    w = lambda k, shape, s: s * jax.random.normal(k, shape, jnp.float32)
    return {
        "enc1_w": w(ks[0], (16, 1, 3, 3), 0.3), "enc1_b": w(ks[1], (16,), 0.1),
        "enc2_w": w(ks[2], (32, 16, 3, 3), 0.1), "enc2_b": w(ks[3], (32,), 0.1),
        "fc_mu_w": w(ks[4], (32 * 7 * 7, latent_dim), 0.03),
        "fc_mu_b": w(ks[5], (latent_dim,), 0.03),
        "fc_lv_w": w(ks[6], (32 * 7 * 7, latent_dim), 0.03),
        "fc_lv_b": w(ks[7], (latent_dim,), 0.03),
        "fc_dec_w": w(ks[8], (latent_dim, 32 * 7 * 7), 0.1),
        "fc_dec_b": w(ks[9], (32 * 7 * 7,), 0.05),
        "dec1_w": w(ks[10], (32, 16, 3, 3), 0.1),          # ConvTranspose: (in,out,kh,kw)
        "dec1_b": 0.05 * jnp.ones((16,), jnp.float32),
        "dec2_w": w(ks[11], (16, 1, 3, 3), 0.1),
        "dec2_b": 0.05 * jnp.ones((1,), jnp.float32),
    }


def prepare_params(params):
    """One-time (outside jit) weight-layout transforms + bf16 casts."""
    f32, bf16 = jnp.float32, jnp.bfloat16

    def conv_taps(w):                        # (O, C, 3, 3) -> (9, C, O), tap = ki*3+kj
        o, c = w.shape[0], w.shape[1]
        return jnp.transpose(w, (2, 3, 1, 0)).reshape(9, c, o).astype(bf16)

    def deconv_taps(w):                      # (C_in, C_out, 3, 3) -> (4, C_in, 4*C_out)
        c_in, c_out = w.shape[0], w.shape[1]
        w_eq = jnp.flip(w, axis=(2, 3)).transpose(1, 0, 2, 3)        # (O, C, 3, 3)
        # (output phase bit, tap offset) -> equivalent forward-conv kernel index;
        # (phase 0, offset 1) never contributes and stays zero.
        amap = {(0, 0): 1, (1, 0): 0, (1, 1): 2}
        wt = jnp.zeros((2, 2, c_in, 2, 2, c_out), f32)               # (di,dj,c,py,px,o)
        for (py, di), a in amap.items():
            for (px, dj), kb in amap.items():
                wt = wt.at[di, dj, :, py, px, :].set(w_eq[:, :, a, kb].T)
        return wt.reshape(4, c_in, 4 * c_out).astype(bf16)

    def fc_rows_nhwc(wfc):                   # rows NCHW-flat (c,i,j) -> NHWC-flat (i,j,c)
        return wfc.reshape(32, 7, 7, -1).transpose(1, 2, 0, 3).reshape(32 * 7 * 7, -1)

    def fc_cols_nhwc(wfc):                   # cols NCHW-flat -> NHWC-flat
        return wfc.reshape(-1, 32, 7, 7).transpose(0, 2, 3, 1).reshape(-1, 32 * 7 * 7)

    return {
        "enc1_w": conv_taps(params["enc1_w"]),
        "enc1_b": params["enc1_b"].reshape(1, -1).astype(f32),
        "enc2_w": conv_taps(params["enc2_w"]),
        "enc2_b": params["enc2_b"].reshape(1, -1).astype(f32),
        "fc_mu_w": fc_rows_nhwc(params["fc_mu_w"]).astype(bf16),
        "fc_mu_b": params["fc_mu_b"].reshape(1, -1).astype(f32),
        "fc_lv_w": fc_rows_nhwc(params["fc_lv_w"]).astype(bf16),
        "fc_lv_b": params["fc_lv_b"].reshape(1, -1).astype(f32),
        "fc_dec_w": fc_cols_nhwc(params["fc_dec_w"]).astype(bf16),
        "fc_dec_b": params["fc_dec_b"].reshape(32, 7, 7).transpose(1, 2, 0)
                                      .reshape(1, -1).astype(f32),
        "dec1_w": deconv_taps(params["dec1_w"]),
        "dec1_b": jnp.tile(params["dec1_b"], 4).reshape(1, -1).astype(f32),
        "dec2_w": deconv_taps(params["dec2_w"]),
        "dec2_b": jnp.tile(params["dec2_b"], 4).reshape(1, -1).astype(f32),
    }


# ----------------------------------------------------------------------------
# forward
# ----------------------------------------------------------------------------
def conv_vae_forward(prep, x, eps):
    B = x.shape[0]

    # NCHW (PyTorch) -> NHWC at the boundary; C=1 so this is metadata-only.
    xh = jnp.transpose(x, (0, 2, 3, 1)).astype(jnp.bfloat16)         # (B,28,28,1)

    # ---- encoder ----
    h1 = conv2d_s2(xh, prep["enc1_w"], prep["enc1_b"], "relu")        # (B,14,14,16)
    h2 = conv2d_s2(h1, prep["enc2_w"], prep["enc2_b"], "relu")        # (B,7,7,32)
    h = h2.reshape(B, 7 * 7 * 32)       # NHWC-flat; fc weight rows pre-permuted to match

    # ---- fused fc_mu + fc_logvar + reparameterize + fc_decode ----
    mu, logvar, d = fc_mu_logvar_reparam_decode(
        h, eps, prep["fc_mu_w"], prep["fc_mu_b"], prep["fc_lv_w"], prep["fc_lv_b"],
        prep["fc_dec_w"], prep["fc_dec_b"])
    d = d.reshape(B, 7, 7, 32)          # NHWC feature map (fc_dec cols pre-permuted)

    # ---- decoder ----
    u1 = conv_transpose2d_s2(d, prep["dec1_w"], prep["dec1_b"], "relu")          # (B,14,14,16)
    u2 = conv_transpose2d_s2(u1, prep["dec2_w"], prep["dec2_b"], "sigmoid",
                             out_dtype=jnp.float32)                              # (B,28,28,1)

    out = jnp.transpose(u2, (0, 3, 1, 2))      # NHWC -> NCHW; C=1 so metadata-only
    return out, mu, logvar


# ----------------------------------------------------------------------------
# Pure-JAX reference (correctness check only)
# ----------------------------------------------------------------------------
def _ref_conv(x, w, b, stride, padding):
    dn = lax.conv_dimension_numbers(x.shape, w.shape, ("NCHW", "OIHW", "NCHW"))
    y = lax.conv_general_dilated(x, w, (stride, stride), [(padding, padding)] * 2,
                                 dimension_numbers=dn, precision=lax.Precision.HIGHEST)
    return y + b[None, :, None, None]


def _ref_deconv(x, w, b, stride, padding, output_padding):
    w_eq = jnp.flip(w, axis=(2, 3)).transpose(1, 0, 2, 3)
    dn = lax.conv_dimension_numbers(x.shape, w_eq.shape, ("NCHW", "OIHW", "NCHW"))
    k = w.shape[2]
    pad = (k - 1 - padding, k - 1 - padding + output_padding)
    y = lax.conv_general_dilated(x, w_eq, (1, 1), [pad, pad], lhs_dilation=(stride, stride),
                                 dimension_numbers=dn, precision=lax.Precision.HIGHEST)
    return y + b[None, :, None, None]


def _ref_forward(params, x, eps):
    h = jax.nn.relu(_ref_conv(x, params["enc1_w"], params["enc1_b"], 2, 1))
    h = jax.nn.relu(_ref_conv(h, params["enc2_w"], params["enc2_b"], 2, 1))
    B = x.shape[0]
    h = h.reshape(B, -1)
    mu = h @ params["fc_mu_w"] + params["fc_mu_b"]
    logvar = h @ params["fc_lv_w"] + params["fc_lv_b"]
    z = mu + eps * jnp.exp(0.5 * logvar)
    d = (z @ params["fc_dec_w"] + params["fc_dec_b"]).reshape(B, 32, 7, 7)
    d = jax.nn.relu(_ref_deconv(d, params["dec1_w"], params["dec1_b"], 2, 1, 1))
    out = jax.nn.sigmoid(_ref_deconv(d, params["dec2_w"], params["dec2_b"], 2, 1, 1))
    return out, mu, logvar


if __name__ == "__main__":
    key = jax.random.PRNGKey(0)
    k_param, k_x, k_eps = jax.random.split(key, 3)
    latent_dim = 32

    params = init_params(k_param, latent_dim)
    prep = prepare_params(params)          # one-time weight-layout transforms (outside jit)

    x = jax.random.uniform(k_x, (2, 1, 28, 28), jnp.float32)     # NCHW, like PyTorch
    # eps for reparameterize is drawn host-side (deterministic) and fed in.
    eps = jax.random.normal(k_eps, (2, latent_dim), jnp.float32)

    fwd = jax.jit(conv_vae_forward)
    out, mu, logvar = jax.block_until_ready(fwd(prep, x, eps))
    assert out.shape == (2, 1, 28, 28)
    assert mu.shape == (2, latent_dim) and logvar.shape == (2, latent_dim)

    r_out, r_mu, r_lv = _ref_forward(params, x, eps)
    # bf16 MXU operands with f32 accumulation: tolerance covers the rounding.
    assert jnp.allclose(out, r_out, atol=2e-2, rtol=2e-2)
    assert jnp.allclose(mu, r_mu, atol=2e-2, rtol=2e-2)
    assert jnp.allclose(logvar, r_lv, atol=2e-2, rtol=2e-2)

    print("KERNEL_OK")
</pallas_src>

<mosaic_0001>
module attributes {stable_mosaic.version = 11 : i64} {
  func.func @_conv_from_planes_kernel(%arg0: i32, %arg1: memref<1x6x210x1xbf16, #tpu.memory_space<vmem>>, %arg2: memref<9x1x16xbf16, #tpu.memory_space<vmem>>, %arg3: memref<1x16xf32, #tpu.memory_space<vmem>>, %arg4: memref<1x196x16xbf16, #tpu.memory_space<vmem>>) attributes {dimension_semantics = [#tpu.dimension_semantics<parallel>], iteration_bounds = array<i64: 2>, scalar_prefetch = 0 : i64, scratch_operands = 0 : i64, tpu.core_type = #tpu.core_type<tc>, window_params = [{transform_indices = @transform_0, window_bounds = array<i64: 1, 6, 210, 1>}, {pipeline_mode = #tpu.pipeline_mode<synchronous>, transform_indices = @transform_1, window_bounds = array<i64: 9, 1, 16>}, {pipeline_mode = #tpu.pipeline_mode<synchronous>, transform_indices = @transform_2, window_bounds = array<i64: 1, 16>}, {transform_indices = @transform_3, window_bounds = array<i64: 1, 196, 16>}]} {
    %cst = arith.constant 0.000000e+00 : f32
    %0 = vector.broadcast %cst : f32 to vector<196x16xf32>
    %c0 = arith.constant 0 : index
    %c0_0 = arith.constant 0 : index
    %c0_1 = arith.constant 0 : index
    %c0_2 = arith.constant 0 : index
    %1 = vector.load %arg1[%c0, %c0_0, %c0_1, %c0_2] : memref<1x6x210x1xbf16, #tpu.memory_space<vmem>>, vector<1x1x196x1xbf16>
    %2 = vector.shape_cast %1 : vector<1x1x196x1xbf16> to vector<196x1xbf16>
    %3 = arith.extf %2 : vector<196x1xbf16> to vector<196x1xf32>
    %c0_3 = arith.constant 0 : index
    %c0_4 = arith.constant 0 : index
    %c0_5 = arith.constant 0 : index
    %4 = vector.load %arg2[%c0_3, %c0_4, %c0_5] : memref<9x1x16xbf16, #tpu.memory_space<vmem>>, vector<1x1x16xbf16>
    %5 = vector.shape_cast %4 : vector<1x1x16xbf16> to vector<1x16xbf16>
    %6 = arith.extf %5 : vector<1x16xbf16> to vector<1x16xf32>
    %7 = vector.broadcast %3 : vector<196x1xf32> to vector<196x16xf32>
    %8 = vector.broadcast %6 : vector<1x16xf32> to vector<196x16xf32>
    %9 = arith.mulf %7, %8 : vector<196x16xf32>
    %10 = arith.addf %0, %9 : vector<196x16xf32>
    %c0_6 = arith.constant 0 : index
    %c1 = arith.constant 1 : index
    %c0_7 = arith.constant 0 : index
    %c0_8 = arith.constant 0 : index
    %11 = vector.load %arg1[%c0_6, %c1, %c0_7, %c0_8] : memref<1x6x210x1xbf16, #tpu.memory_space<vmem>>, vector<1x1x196x1xbf16>
    %12 = vector.shape_cast %11 : vector<1x1x196x1xbf16> to vector<196x1xbf16>
    %13 = arith.extf %12 : vector<196x1xbf16> to vector<196x1xf32>
    %c1_9 = arith.constant 1 : index
    %c0_10 = arith.constant 0 : index
    %c0_11 = arith.constant 0 : index
    %14 = vector.load %arg2[%c1_9, %c0_10, %c0_11] : memref<9x1x16xbf16, #tpu.memory_space<vmem>>, vector<1x1x16xbf16>
    %15 = vector.shape_cast %14 : vector<1x1x16xbf16> to vector<1x16xbf16>
    %16 = arith.extf %15 : vector<1x16xbf16> to vector<1x16xf32>
    %17 = vector.broadcast %13 : vector<196x1xf32> to vector<196x16xf32>
    %18 = vector.broadcast %16 : vector<1x16xf32> to vector<196x16xf32>
    %19 = arith.mulf %17, %18 : vector<196x16xf32>
    %20 = arith.addf %10, %19 : vector<196x16xf32>
    %c0_12 = arith.constant 0 : index
    %c2 = arith.constant 2 : index
    %c0_13 = arith.constant 0 : index
    %c0_14 = arith.constant 0 : index
    %21 = vector.load %arg1[%c0_12, %c2, %c0_13, %c0_14] : memref<1x6x210x1xbf16, #tpu.memory_space<vmem>>, vector<1x1x196x1xbf16>
    %22 = vector.shape_cast %21 : vector<1x1x196x1xbf16> to vector<196x1xbf16>
    %23 = arith.extf %22 : vector<196x1xbf16> to vector<196x1xf32>
    %c2_15 = arith.constant 2 : index
    %c0_16 = arith.constant 0 : index
    %c0_17 = arith.constant 0 : index
    %24 = vector.load %arg2[%c2_15, %c0_16, %c0_17] : memref<9x1x16xbf16, #tpu.memory_space<vmem>>, vector<1x1x16xbf16>
    %25 = vector.shape_cast %24 : vector<1x1x16xbf16> to vector<1x16xbf16>
    %26 = arith.extf %25 : vector<1x16xbf16> to vector<1x16xf32>
    %27 = vector.broadcast %23 : vector<196x1xf32> to vector<196x16xf32>
    %28 = vector.broadcast %26 : vector<1x16xf32> to vector<196x16xf32>
    %29 = arith.mulf %27, %28 : vector<196x16xf32>
    %30 = arith.addf %20, %29 : vector<196x16xf32>
    %c0_18 = arith.constant 0 : index
    %c3 = arith.constant 3 : index
    %c0_19 = arith.constant 0 : index
    %c0_20 = arith.constant 0 : index
    %31 = vector.load %arg1[%c0_18, %c3, %c0_19, %c0_20] : memref<1x6x210x1xbf16, #tpu.memory_space<vmem>>, vector<1x1x196x1xbf16>
    %32 = vector.shape_cast %31 : vector<1x1x196x1xbf16> to vector<196x1xbf16>
    %33 = arith.extf %32 : vector<196x1xbf16> to vector<196x1xf32>
    %c3_21 = arith.constant 3 : index
    %c0_22 = arith.constant 0 : index
    %c0_23 = arith.constant 0 : index
    %34 = vector.load %arg2[%c3_21, %c0_22, %c0_23] : memref<9x1x16xbf16, #tpu.memory_space<vmem>>, vector<1x1x16xbf16>
    %35 = vector.shape_cast %34 : vector<1x1x16xbf16> to vector<1x16xbf16>
    %36 = arith.extf %35 : vector<1x16xbf16> to vector<1x16xf32>
    %37 = vector.broadcast %33 : vector<196x1xf32> to vector<196x16xf32>
    %38 = vector.broadcast %36 : vector<1x16xf32> to vector<196x16xf32>
    %39 = arith.mulf %37, %38 : vector<196x16xf32>
    %40 = arith.addf %30, %39 : vector<196x16xf32>
    %c0_24 = arith.constant 0 : index
    %c4 = arith.constant 4 : index
    %c0_25 = arith.constant 0 : index
    %c0_26 = arith.constant 0 : index
    %41 = vector.load %arg1[%c0_24, %c4, %c0_25, %c0_26] : memref<1x6x210x1xbf16, #tpu.memory_space<vmem>>, vector<1x1x196x1xbf16>
    %42 = vector.shape_cast %41 : vector<1x1x196x1xbf16> to vector<196x1xbf16>
    %43 = arith.extf %42 : vector<196x1xbf16> to vector<196x1xf32>
    %c4_27 = arith.constant 4 : index
    %c0_28 = arith.constant 0 : index
    %c0_29 = arith.constant 0 : index
    %44 = vector.load %arg2[%c4_27, %c0_28, %c0_29] : memref<9x1x16xbf16, #tpu.memory_space<vmem>>, vector<1x1x16xbf16>
    %45 = vector.shape_cast %44 : vector<1x1x16xbf16> to vector<1x16xbf16>
    %46 = arith.extf %45 : vector<1x16xbf16> to vector<1x16xf32>
    %47 = vector.broadcast %43 : vector<196x1xf32> to vector<196x16xf32>
    %48 = vector.broadcast %46 : vector<1x16xf32> to vector<196x16xf32>
    %49 = arith.mulf %47, %48 : vector<196x16xf32>
    %50 = arith.addf %40, %49 : vector<196x16xf32>
    %c0_30 = arith.constant 0 : index
    %c5 = arith.constant 5 : index
    %c0_31 = arith.constant 0 : index
    %c0_32 = arith.constant 0 : index
    %51 = vector.load %arg1[%c0_30, %c5, %c0_31, %c0_32] : memref<1x6x210x1xbf16, #tpu.memory_space<vmem>>, vector<1x1x196x1xbf16>
    %52 = vector.shape_cast %51 : vector<1x1x196x1xbf16> to vector<196x1xbf16>
    %53 = arith.extf %52 : vector<196x1xbf16> to vector<196x1xf32>
    %c5_33 = arith.constant 5 : index
    %c0_34 = arith.constant 0 : index
    %c0_35 = arith.constant 0 : index
    %54 = vector.load %arg2[%c5_33, %c0_34, %c0_35] : memref<9x1x16xbf16, #tpu.memory_space<vmem>>, vector<1x1x16xbf16>
    %55 = vector.shape_cast %54 : vector<1x1x16xbf16> to vector<1x16xbf16>
    %56 = arith.extf %55 : vector<1x16xbf16> to vector<1x16xf32>
    %57 = vector.broadcast %53 : vector<196x1xf32> to vector<196x16xf32>
    %58 = vector.broadcast %56 : vector<1x16xf32> to vector<196x16xf32>
    %59 = arith.mulf %57, %58 : vector<196x16xf32>
    %60 = arith.addf %50, %59 : vector<196x16xf32>
    %c0_36 = arith.constant 0 : index
    %c0_37 = arith.constant 0 : index
    %c14 = arith.constant 14 : index
    %c0_38 = arith.constant 0 : index
    %61 = vector.load %arg1[%c0_36, %c0_37, %c14, %c0_38] : memref<1x6x210x1xbf16, #tpu.memory_space<vmem>>, vector<1x1x196x1xbf16>
    %62 = vector.shape_cast %61 : vector<1x1x196x1xbf16> to vector<196x1xbf16>
    %63 = arith.extf %62 : vector<196x1xbf16> to vector<196x1xf32>
    %c6 = arith.constant 6 : index
    %c0_39 = arith.constant 0 : index
    %c0_40 = arith.constant 0 : index
    %64 = vector.load %arg2[%c6, %c0_39, %c0_40] : memref<9x1x16xbf16, #tpu.memory_space<vmem>>, vector<1x1x16xbf16>
    %65 = vector.shape_cast %64 : vector<1x1x16xbf16> to vector<1x16xbf16>
    %66 = arith.extf %65 : vector<1x16xbf16> to vector<1x16xf32>
    %67 = vector.broadcast %63 : vector<196x1xf32> to vector<196x16xf32>
    %68 = vector.broadcast %66 : vector<1x16xf32> to vector<196x16xf32>
    %69 = arith.mulf %67, %68 : vector<196x16xf32>
    %70 = arith.addf %60, %69 : vector<196x16xf32>
    %c0_41 = arith.constant 0 : index
    %c1_42 = arith.constant 1 : index
    %c14_43 = arith.constant 14 : index
    %c0_44 = arith.constant 0 : index
    %71 = vector.load %arg1[%c0_41, %c1_42, %c14_43, %c0_44] : memref<1x6x210x1xbf16, #tpu.memory_space<vmem>>, vector<1x1x196x1xbf16>
    %72 = vector.shape_cast %71 : vector<1x1x196x1xbf16> to vector<196x1xbf16>
    %73 = arith.extf %72 : vector<196x1xbf16> to vector<196x1xf32>
    %c7 = arith.constant 7 : index
    %c0_45 = arith.constant 0 : index
    %c0_46 = arith.constant 0 : index
    %74 = vector.load %arg2[%c7, %c0_45, %c0_46] : memref<9x1x16xbf16, #tpu.memory_space<vmem>>, vector<1x1x16xbf16>
    %75 = vector.shape_cast %74 : vector<1x1x16xbf16> to vector<1x16xbf16>
    %76 = arith.extf %75 : vector<1x16xbf16> to vector<1x16xf32>
    %77 = vector.broadcast %73 : vector<196x1xf32> to vector<196x16xf32>
    %78 = vector.broadcast %76 : vector<1x16xf32> to vector<196x16xf32>
    %79 = arith.mulf %77, %78 : vector<196x16xf32>
    %80 = arith.addf %70, %79 : vector<196x16xf32>
    %c0_47 = arith.constant 0 : index
    %c2_48 = arith.constant 2 : index
    %c14_49 = arith.constant 14 : index
    %c0_50 = arith.constant 0 : index
    %81 = vector.load %arg1[%c0_47, %c2_48, %c14_49, %c0_50] : memref<1x6x210x1xbf16, #tpu.memory_space<vmem>>, vector<1x1x196x1xbf16>
    %82 = vector.shape_cast %81 : vector<1x1x196x1xbf16> to vector<196x1xbf16>
    %83 = arith.extf %82 : vector<196x1xbf16> to vector<196x1xf32>
    %c8 = arith.constant 8 : index
    %c0_51 = arith.constant 0 : index
    %c0_52 = arith.constant 0 : index
    %84 = vector.load %arg2[%c8, %c0_51, %c0_52] : memref<9x1x16xbf16, #tpu.memory_space<vmem>>, vector<1x1x16xbf16>
    %85 = vector.shape_cast %84 : vector<1x1x16xbf16> to vector<1x16xbf16>
    %86 = arith.extf %85 : vector<1x16xbf16> to vector<1x16xf32>
    %87 = vector.broadcast %83 : vector<196x1xf32> to vector<196x16xf32>
    %88 = vector.broadcast %86 : vector<1x16xf32> to vector<196x16xf32>
    %89 = arith.mulf %87, %88 : vector<196x16xf32>
    %90 = arith.addf %80, %89 : vector<196x16xf32>
    %c0_53 = arith.constant 0 : index
    %c0_54 = arith.constant 0 : index
    %91 = vector.load %arg3[%c0_53, %c0_54] : memref<1x16xf32, #tpu.memory_space<vmem>>, vector<1x16xf32>
    %92 = vector.broadcast %91 : vector<1x16xf32> to vector<196x16xf32>
    %93 = arith.addf %90, %92 : vector<196x16xf32>
    %cst_55 = arith.constant 0.000000e+00 : f32
    %94 = vector.broadcast %cst_55 : f32 to vector<196x16xf32>
    %95 = arith.maximumf %93, %94 : vector<196x16xf32>
    %96 = arith.truncf %95 : vector<196x16xf32> to vector<196x16xbf16>
    %c0_56 = arith.constant 0 : index
    %c0_57 = arith.constant 0 : index
    %c0_58 = arith.constant 0 : index
    %97 = vector.load %arg4[%c0_56, %c0_57, %c0_58] : memref<1x196x16xbf16, #tpu.memory_space<vmem>>, vector<1x196x16xbf16>
    %98 = vector.shape_cast %97 : vector<1x196x16xbf16> to vector<196x16xbf16>
    %99 = vector.shape_cast %96 : vector<196x16xbf16> to vector<1x196x16xbf16>
    tpu.vector_store %arg4[%c0_56, %c0_57, %c0_58], %99 {strides = array<i32>} : memref<1x196x16xbf16, #tpu.memory_space<vmem>>, vector<1x196x16xbf16>,
    return
  }
  func.func @transform_0(%arg0: i32) -> (i32, i32, i32, i32) {
    %c0_i32 = arith.constant 0 : i32
    %c0_i32_0 = arith.constant 0 : i32
    %c0_i32_1 = arith.constant 0 : i32
    %c0_i32_2 = arith.constant 0 : i32
    return %arg0, %c0_i32, %c0_i32_0, %c0_i32_1 : i32, i32, i32, i32
  }
  func.func @transform_1(%arg0: i32) -> (i32, i32, i32) {
    %c0_i32 = arith.constant 0 : i32
    %c0_i32_0 = arith.constant 0 : i32
    %c0_i32_1 = arith.constant 0 : i32
    %c0_i32_2 = arith.constant 0 : i32
    return %c0_i32, %c0_i32_0, %c0_i32_1 : i32, i32, i32
  }
  func.func @transform_2(%arg0: i32) -> (i32, i32) {
    %c0_i32 = arith.constant 0 : i32
    %c0_i32_0 = arith.constant 0 : i32
    %c0_i32_1 = arith.constant 0 : i32
    return %c0_i32, %c0_i32_0 : i32, i32
  }
  func.func @transform_3(%arg0: i32) -> (i32, i32, i32) {
    %c0_i32 = arith.constant 0 : i32
    %c0_i32_0 = arith.constant 0 : i32
    %c0_i32_1 = arith.constant 0 : i32
    return %arg0, %c0_i32, %c0_i32_0 : i32, i32, i32
  }
}

module attributes {stable_mosaic.version = 11 : i64} {
  func.func @_conv_from_planes_kernel(%arg0: i32, %arg1: memref<1x6x56x16xbf16, #tpu.memory_space<vmem>>, %arg2: memref<9x16x32xbf16, #tpu.memory_space<vmem>>, %arg3: memref<1x32xf32, #tpu.memory_space<vmem>>, %arg4: memref<1x49x32xbf16, #tpu.memory_space<vmem>>) attributes {dimension_semantics = [#tpu.dimension_semantics<parallel>], iteration_bounds = array<i64: 2>, scalar_prefetch = 0 : i64, scratch_operands = 0 : i64, tpu.core_type = #tpu.core_type<tc>, window_params = [{transform_indices = @transform_0, window_bounds = array<i64: 1, 6, 56, 16>}, {pipeline_mode = #tpu.pipeline_mode<synchronous>, transform_indices = @transform_1, window_bounds = array<i64: 9, 16, 32>}, {pipeline_mode = #tpu.pipeline_mode<synchronous>, transform_indices = @transform_2, window_bounds = array<i64: 1, 32>}, {transform_indices = @transform_3, window_bounds = array<i64: 1, 49, 32>}]} {
    %cst = arith.constant 0.000000e+00 : f32
    %0 = vector.broadcast %cst : f32 to vector<49x32xf32>
    %c0 = arith.constant 0 : index
    %c0_0 = arith.constant 0 : index
    %c0_1 = arith.constant 0 : index
    %c0_2 = arith.constant 0 : index
    %1 = vector.load %arg1[%c0, %c0_0, %c0_1, %c0_2] : memref<1x6x56x16xbf16, #tpu.memory_space<vmem>>, vector<1x1x49x16xbf16>
    %2 = vector.shape_cast %1 : vector<1x1x49x16xbf16> to vector<49x16xbf16>
    %c0_3 = arith.constant 0 : index
    %c0_4 = arith.constant 0 : index
    %c0_5 = arith.constant 0 : index
    %3 = vector.load %arg2[%c0_3, %c0_4, %c0_5] : memref<9x16x32xbf16, #tpu.memory_space<vmem>>, vector<1x16x32xbf16>
    %4 = vector.shape_cast %3 : vector<1x16x32xbf16> to vector<16x32xbf16>
    %cst_6 = arith.constant dense<0.000000e+00> : vector<49x32xf32>
    %5 = tpu.matmul %2, %4, %cst_6 {dimension_numbers = #tpu.dot_dimension_numbers<[1], [0], [0], [1], [0, 0, 1, 1], [], []>} : vector<49x16xbf16>, vector<16x32xbf16>, vector<49x32xf32> -> vector<49x32xf32>
    %6 = arith.addf %0, %5 : vector<49x32xf32>
    %c0_7 = arith.constant 0 : index
    %c1 = arith.constant 1 : index
    %c0_8 = arith.constant 0 : index
    %c0_9 = arith.constant 0 : index
    %7 = vector.load %arg1[%c0_7, %c1, %c0_8, %c0_9] : memref<1x6x56x16xbf16, #tpu.memory_space<vmem>>, vector<1x1x49x16xbf16>
    %8 = vector.shape_cast %7 : vector<1x1x49x16xbf16> to vector<49x16xbf16>
    %c1_10 = arith.constant 1 : index
    %c0_11 = arith.constant 0 : index
    %c0_12 = arith.constant 0 : index
    %9 = vector.load %arg2[%c1_10, %c0_11, %c0_12] : memref<9x16x32xbf16, #tpu.memory_space<vmem>>, vector<1x16x32xbf16>
    %10 = vector.shape_cast %9 : vector<1x16x32xbf16> to vector<16x32xbf16>
    %cst_13 = arith.constant dense<0.000000e+00> : vector<49x32xf32>
    %11 = tpu.matmul %8, %10, %cst_13 {dimension_numbers = #tpu.dot_dimension_numbers<[1], [0], [0], [1], [0, 0, 1, 1], [], []>} : vector<49x16xbf16>, vector<16x32xbf16>, vector<49x32xf32> -> vector<49x32xf32>
    %12 = arith.addf %6, %11 : vector<49x32xf32>
    %c0_14 = arith.constant 0 : index
    %c2 = arith.constant 2 : index
    %c0_15 = arith.constant 0 : index
    %c0_16 = arith.constant 0 : index
    %13 = vector.load %arg1[%c0_14, %c2, %c0_15, %c0_16] : memref<1x6x56x16xbf16, #tpu.memory_space<vmem>>, vector<1x1x49x16xbf16>
    %14 = vector.shape_cast %13 : vector<1x1x49x16xbf16> to vector<49x16xbf16>
    %c2_17 = arith.constant 2 : index
    %c0_18 = arith.constant 0 : index
    %c0_19 = arith.constant 0 : index
    %15 = vector.load %arg2[%c2_17, %c0_18, %c0_19] : memref<9x16x32xbf16, #tpu.memory_space<vmem>>, vector<1x16x32xbf16>
    %16 = vector.shape_cast %15 : vector<1x16x32xbf16> to vector<16x32xbf16>
    %cst_20 = arith.constant dense<0.000000e+00> : vector<49x32xf32>
    %17 = tpu.matmul %14, %16, %cst_20 {dimension_numbers = #tpu.dot_dimension_numbers<[1], [0], [0], [1], [0, 0, 1, 1], [], []>} : vector<49x16xbf16>, vector<16x32xbf16>, vector<49x32xf32> -> vector<49x32xf32>
    %18 = arith.addf %12, %17 : vector<49x32xf32>
    %c0_21 = arith.constant 0 : index
    %c3 = arith.constant 3 : index
    %c0_22 = arith.constant 0 : index
    %c0_23 = arith.constant 0 : index
    %19 = vector.load %arg1[%c0_21, %c3, %c0_22, %c0_23] : memref<1x6x56x16xbf16, #tpu.memory_space<vmem>>, vector<1x1x49x16xbf16>
    %20 = vector.shape_cast %19 : vector<1x1x49x16xbf16> to vector<49x16xbf16>
    %c3_24 = arith.constant 3 : index
    %c0_25 = arith.constant 0 : index
    %c0_26 = arith.constant 0 : index
    %21 = vector.load %arg2[%c3_24, %c0_25, %c0_26] : memref<9x16x32xbf16, #tpu.memory_space<vmem>>, vector<1x16x32xbf16>
    %22 = vector.shape_cast %21 : vector<1x16x32xbf16> to vector<16x32xbf16>
    %cst_27 = arith.constant dense<0.000000e+00> : vector<49x32xf32>
    %23 = tpu.matmul %20, %22, %cst_27 {dimension_numbers = #tpu.dot_dimension_numbers<[1], [0], [0], [1], [0, 0, 1, 1], [], []>} : vector<49x16xbf16>, vector<16x32xbf16>, vector<49x32xf32> -> vector<49x32xf32>
    %24 = arith.addf %18, %23 : vector<49x32xf32>
    %c0_28 = arith.constant 0 : index
    %c4 = arith.constant 4 : index
    %c0_29 = arith.constant 0 : index
    %c0_30 = arith.constant 0 : index
    %25 = vector.load %arg1[%c0_28, %c4, %c0_29, %c0_30] : memref<1x6x56x16xbf16, #tpu.memory_space<vmem>>, vector<1x1x49x16xbf16>
    %26 = vector.shape_cast %25 : vector<1x1x49x16xbf16> to vector<49x16xbf16>
    %c4_31 = arith.constant 4 : index
    %c0_32 = arith.constant 0 : index
    %c0_33 = arith.constant 0 : index
    %27 = vector.load %arg2[%c4_31, %c0_32, %c0_33] : memref<9x16x32xbf16, #tpu.memory_space<vmem>>, vector<1x16x32xbf16>
    %28 = vector.shape_cast %27 : vector<1x16x32xbf16> to vector<16x32xbf16>
    %cst_34 = arith.constant dense<0.000000e+00> : vector<49x32xf32>
    %29 = tpu.matmul %26, %28, %cst_34 {dimension_numbers = #tpu.dot_dimension_numbers<[1], [0], [0], [1], [0, 0, 1, 1], [], []>} : vector<49x16xbf16>, vector<16x32xbf16>, vector<49x32xf32> -> vector<49x32xf32>
    %30 = arith.addf %24, %29 : vector<49x32xf32>
    %c0_35 = arith.constant 0 : index
    %c5 = arith.constant 5 : index
    %c0_36 = arith.constant 0 : index
    %c0_37 = arith.constant 0 : index
    %31 = vector.load %arg1[%c0_35, %c5, %c0_36, %c0_37] : memref<1x6x56x16xbf16, #tpu.memory_space<vmem>>, vector<1x1x49x16xbf16>
    %32 = vector.shape_cast %31 : vector<1x1x49x16xbf16> to vector<49x16xbf16>
    %c5_38 = arith.constant 5 : index
    %c0_39 = arith.constant 0 : index
    %c0_40 = arith.constant 0 : index
    %33 = vector.load %arg2[%c5_38, %c0_39, %c0_40] : memref<9x16x32xbf16, #tpu.memory_space<vmem>>, vector<1x16x32xbf16>
    %34 = vector.shape_cast %33 : vector<1x16x32xbf16> to vector<16x32xbf16>
    %cst_41 = arith.constant dense<0.000000e+00> : vector<49x32xf32>
    %35 = tpu.matmul %32, %34, %cst_41 {dimension_numbers = #tpu.dot_dimension_numbers<[1], [0], [0], [1], [0, 0, 1, 1], [], []>} : vector<49x16xbf16>, vector<16x32xbf16>, vector<49x32xf32> -> vector<49x32xf32>
    %36 = arith.addf %30, %35 : vector<49x32xf32>
    %c0_42 = arith.constant 0 : index
    %c0_43 = arith.constant 0 : index
    %c7 = arith.constant 7 : index
    %c0_44 = arith.constant 0 : index
    %37 = vector.load %arg1[%c0_42, %c0_43, %c7, %c0_44] : memref<1x6x56x16xbf16, #tpu.memory_space<vmem>>, vector<1x1x49x16xbf16>
    %38 = vector.shape_cast %37 : vector<1x1x49x16xbf16> to vector<49x16xbf16>
    %c6 = arith.constant 6 : index
    %c0_45 = arith.constant 0 : index
    %c0_46 = arith.constant 0 : index
    %39 = vector.load %arg2[%c6, %c0_45, %c0_46] : memref<9x16x32xbf16, #tpu.memory_space<vmem>>, vector<1x16x32xbf16>
    %40 = vector.shape_cast %39 : vector<1x16x32xbf16> to vector<16x32xbf16>
    %cst_47 = arith.constant dense<0.000000e+00> : vector<49x32xf32>
    %41 = tpu.matmul %38, %40, %cst_47 {dimension_numbers = #tpu.dot_dimension_numbers<[1], [0], [0], [1], [0, 0, 1, 1], [], []>} : vector<49x16xbf16>, vector<16x32xbf16>, vector<49x32xf32> -> vector<49x32xf32>
    %42 = arith.addf %36, %41 : vector<49x32xf32>
    %c0_48 = arith.constant 0 : index
    %c1_49 = arith.constant 1 : index
    %c7_50 = arith.constant 7 : index
    %c0_51 = arith.constant 0 : index
    %43 = vector.load %arg1[%c0_48, %c1_49, %c7_50, %c0_51] : memref<1x6x56x16xbf16, #tpu.memory_space<vmem>>, vector<1x1x49x16xbf16>
    %44 = vector.shape_cast %43 : vector<1x1x49x16xbf16> to vector<49x16xbf16>
    %c7_52 = arith.constant 7 : index
    %c0_53 = arith.constant 0 : index
    %c0_54 = arith.constant 0 : index
    %45 = vector.load %arg2[%c7_52, %c0_53, %c0_54] : memref<9x16x32xbf16, #tpu.memory_space<vmem>>, vector<1x16x32xbf16>
    %46 = vector.shape_cast %45 : vector<1x16x32xbf16> to vector<16x32xbf16>
    %cst_55 = arith.constant dense<0.000000e+00> : vector<49x32xf32>
    %47 = tpu.matmul %44, %46, %cst_55 {dimension_numbers = #tpu.dot_dimension_numbers<[1], [0], [0], [1], [0, 0, 1, 1], [], []>} : vector<49x16xbf16>, vector<16x32xbf16>, vector<49x32xf32> -> vector<49x32xf32>
    %48 = arith.addf %42, %47 : vector<49x32xf32>
    %c0_56 = arith.constant 0 : index
    %c2_57 = arith.constant 2 : index
    %c7_58 = arith.constant 7 : index
    %c0_59 = arith.constant 0 : index
    %49 = vector.load %arg1[%c0_56, %c2_57, %c7_58, %c0_59] : memref<1x6x56x16xbf16, #tpu.memory_space<vmem>>, vector<1x1x49x16xbf16>
    %50 = vector.shape_cast %49 : vector<1x1x49x16xbf16> to vector<49x16xbf16>
    %c8 = arith.constant 8 : index
    %c0_60 = arith.constant 0 : index
    %c0_61 = arith.constant 0 : index
    %51 = vector.load %arg2[%c8, %c0_60, %c0_61] : memref<9x16x32xbf16, #tpu.memory_space<vmem>>, vector<1x16x32xbf16>
    %52 = vector.shape_cast %51 : vector<1x16x32xbf16> to vector<16x32xbf16>
    %cst_62 = arith.constant dense<0.000000e+00> : vector<49x32xf32>
    %53 = tpu.matmul %50, %52, %cst_62 {dimension_numbers = #tpu.dot_dimension_numbers<[1], [0], [0], [1], [0, 0, 1, 1], [], []>} : vector<49x16xbf16>, vector<16x32xbf16>, vector<49x32xf32> -> vector<49x32xf32>
    %54 = arith.addf %48, %53 : vector<49x32xf32>
    %c0_63 = arith.constant 0 : index
    %c0_64 = arith.constant 0 : index
    %55 = vector.load %arg3[%c0_63, %c0_64] : memref<1x32xf32, #tpu.memory_space<vmem>>, vector<1x32xf32>
    %56 = vector.broadcast %55 : vector<1x32xf32> to vector<49x32xf32>
    %57 = arith.addf %54, %56 : vector<49x32xf32>
    %cst_65 = arith.constant 0.000000e+00 : f32
    %58 = vector.broadcast %cst_65 : f32 to vector<49x32xf32>
    %59 = arith.maximumf %57, %58 : vector<49x32xf32>
    %60 = arith.truncf %59 : vector<49x32xf32> to vector<49x32xbf16>
    %c0_66 = arith.constant 0 : index
    %c0_67 = arith.constant 0 : index
    %c0_68 = arith.constant 0 : index
    %61 = vector.load %arg4[%c0_66, %c0_67, %c0_68] : memref<1x49x32xbf16, #tpu.memory_space<vmem>>, vector<1x49x32xbf16>
    %62 = vector.shape_cast %61 : vector<1x49x32xbf16> to vector<49x32xbf16>
    %63 = vector.shape_cast %60 : vector<49x32xbf16> to vector<1x49x32xbf16>
    tpu.vector_store %arg4[%c0_66, %c0_67, %c0_68], %63 {strides = array<i32>} : memref<1x49x32xbf16, #tpu.memory_space<vmem>>, vector<1x49x32xbf16>,
    return
  }
  func.func @transform_0(%arg0: i32) -> (i32, i32, i32, i32) {
    %c0_i32 = arith.constant 0 : i32
    %c0_i32_0 = arith.constant 0 : i32
    %c0_i32_1 = arith.constant 0 : i32
    %c0_i32_2 = arith.constant 0 : i32
    return %arg0, %c0_i32, %c0_i32_0, %c0_i32_1 : i32, i32, i32, i32
  }
  func.func @transform_1(%arg0: i32) -> (i32, i32, i32) {
    %c0_i32 = arith.constant 0 : i32
    %c0_i32_0 = arith.constant 0 : i32
    %c0_i32_1 = arith.constant 0 : i32
    %c0_i32_2 = arith.constant 0 : i32
    return %c0_i32, %c0_i32_0, %c0_i32_1 : i32, i32, i32
  }
  func.func @transform_2(%arg0: i32) -> (i32, i32) {
    %c0_i32 = arith.constant 0 : i32
    %c0_i32_0 = arith.constant 0 : i32
    %c0_i32_1 = arith.constant 0 : i32
    return %c0_i32, %c0_i32_0 : i32, i32
  }
  func.func @transform_3(%arg0: i32) -> (i32, i32, i32) {
    %c0_i32 = arith.constant 0 : i32
    %c0_i32_0 = arith.constant 0 : i32
    %c0_i32_1 = arith.constant 0 : i32
    return %arg0, %c0_i32, %c0_i32_0 : i32, i32, i32
  }
}

module attributes {stable_mosaic.version = 11 : i64} {
  func.func @_fc_vae_kernel(%arg0: i32, %arg1: memref<1x1x1568xbf16, #tpu.memory_space<vmem>>, %arg2: memref<1x1x32xf32, #tpu.memory_space<vmem>>, %arg3: memref<1568x32xbf16, #tpu.memory_space<vmem>>, %arg4: memref<1x32xf32, #tpu.memory_space<vmem>>, %arg5: memref<1568x32xbf16, #tpu.memory_space<vmem>>, %arg6: memref<1x32xf32, #tpu.memory_space<vmem>>, %arg7: memref<32x1568xbf16, #tpu.memory_space<vmem>>, %arg8: memref<1x1568xf32, #tpu.memory_space<vmem>>, %arg9: memref<1x1x32xf32, #tpu.memory_space<vmem>>, %arg10: memref<1x1x32xf32, #tpu.memory_space<vmem>>, %arg11: memref<1x1x1568xbf16, #tpu.memory_space<vmem>>) attributes {dimension_semantics = [#tpu.dimension_semantics<parallel>], iteration_bounds = array<i64: 2>, scalar_prefetch = 0 : i64, scratch_operands = 0 : i64, tpu.core_type = #tpu.core_type<tc>, window_params = [{transform_indices = @transform_0, window_bounds = array<i64: 1, 1, 1568>}, {transform_indices = @transform_1, window_bounds = array<i64: 1, 1, 32>}, {pipeline_mode = #tpu.pipeline_mode<synchronous>, transform_indices = @transform_2, window_bounds = array<i64: 1568, 32>}, {pipeline_mode = #tpu.pipeline_mode<synchronous>, transform_indices = @transform_3, window_bounds = array<i64: 1, 32>}, {pipeline_mode = #tpu.pipeline_mode<synchronous>, transform_indices = @transform_4, window_bounds = array<i64: 1568, 32>}, {pipeline_mode = #tpu.pipeline_mode<synchronous>, transform_indices = @transform_5, window_bounds = array<i64: 1, 32>}, {pipeline_mode = #tpu.pipeline_mode<synchronous>, transform_indices = @transform_6, window_bounds = array<i64: 32, 1568>}, {pipeline_mode = #tpu.pipeline_mode<synchronous>, transform_indices = @transform_7, window_bounds = array<i64: 1, 1568>}, {transform_indices = @transform_8, window_bounds = array<i64: 1, 1, 32>}, {transform_indices = @transform_9, window_bounds = array<i64: 1, 1, 32>}, {transform_indices = @transform_10, window_bounds = array<i64: 1, 1, 1568>}]} {
    %c0 = arith.constant 0 : index
    %c0_0 = arith.constant 0 : index
    %c0_1 = arith.constant 0 : index
    %0 = vector.load %arg1[%c0, %c0_0, %c0_1] : memref<1x1x1568xbf16, #tpu.memory_space<vmem>>, vector<1x1x1568xbf16>
    %1 = vector.shape_cast %0 : vector<1x1x1568xbf16> to vector<1x1568xbf16>
    %c0_2 = arith.constant 0 : index
    %c0_3 = arith.constant 0 : index
    %2 = vector.load %arg3[%c0_2, %c0_3] : memref<1568x32xbf16, #tpu.memory_space<vmem>>, vector<1568x32xbf16>
    %cst = arith.constant dense<0.000000e+00> : vector<1x32xf32>
    %3 = tpu.matmul %1, %2, %cst {dimension_numbers = #tpu.dot_dimension_numbers<[1], [0], [0], [1], [0, 0, 1, 1], [], []>} : vector<1x1568xbf16>, vector<1568x32xbf16>, vector<1x32xf32> -> vector<1x32xf32>
    %c0_4 = arith.constant 0 : index
    %c0_5 = arith.constant 0 : index
    %4 = vector.load %arg4[%c0_4, %c0_5] : memref<1x32xf32, #tpu.memory_space<vmem>>, vector<1x32xf32>
    %5 = arith.addf %3, %4 : vector<1x32xf32>
    %c0_6 = arith.constant 0 : index
    %c0_7 = arith.constant 0 : index
    %6 = vector.load %arg5[%c0_6, %c0_7] : memref<1568x32xbf16, #tpu.memory_space<vmem>>, vector<1568x32xbf16>
    %cst_8 = arith.constant dense<0.000000e+00> : vector<1x32xf32>
    %7 = tpu.matmul %1, %6, %cst_8 {dimension_numbers = #tpu.dot_dimension_numbers<[1], [0], [0], [1], [0, 0, 1, 1], [], []>} : vector<1x1568xbf16>, vector<1568x32xbf16>, vector<1x32xf32> -> vector<1x32xf32>
    %c0_9 = arith.constant 0 : index
    %c0_10 = arith.constant 0 : index
    %8 = vector.load %arg6[%c0_9, %c0_10] : memref<1x32xf32, #tpu.memory_space<vmem>>, vector<1x32xf32>
    %9 = arith.addf %7, %8 : vector<1x32xf32>
    %c0_11 = arith.constant 0 : index
    %c0_12 = arith.constant 0 : index
    %c0_13 = arith.constant 0 : index
    %10 = vector.load %arg2[%c0_11, %c0_12, %c0_13] : memref<1x1x32xf32, #tpu.memory_space<vmem>>, vector<1x1x32xf32>
    %11 = vector.shape_cast %10 : vector<1x1x32xf32> to vector<1x32xf32>
    %cst_14 = arith.constant 5.000000e-01 : f32
    %12 = vector.broadcast %cst_14 : f32 to vector<1x32xf32>
    %13 = arith.mulf %12, %9 : vector<1x32xf32>
    %14 = math.exp %13 : vector<1x32xf32>
    %15 = arith.mulf %11, %14 : vector<1x32xf32>
    %16 = arith.addf %5, %15 : vector<1x32xf32>
    %17 = arith.truncf %16 : vector<1x32xf32> to vector<1x32xbf16>
    %c0_15 = arith.constant 0 : index
    %c0_16 = arith.constant 0 : index
    %18 = vector.load %arg7[%c0_15, %c0_16] : memref<32x1568xbf16, #tpu.memory_space<vmem>>, vector<32x1568xbf16>
    %cst_17 = arith.constant dense<0.000000e+00> : vector<1x1568xf32>
    %19 = tpu.matmul %17, %18, %cst_17 {dimension_numbers = #tpu.dot_dimension_numbers<[1], [0], [0], [1], [0, 0, 1, 1], [], []>} : vector<1x32xbf16>, vector<32x1568xbf16>, vector<1x1568xf32> -> vector<1x1568xf32>
    %c0_18 = arith.constant 0 : index
    %c0_19 = arith.constant 0 : index
    %20 = vector.load %arg8[%c0_18, %c0_19] : memref<1x1568xf32, #tpu.memory_space<vmem>>, vector<1x1568xf32>
    %21 = arith.addf %19, %20 : vector<1x1568xf32>
    %c0_20 = arith.constant 0 : index
    %c0_21 = arith.constant 0 : index
    %c0_22 = arith.constant 0 : index
    %22 = vector.load %arg9[%c0_20, %c0_21, %c0_22] : memref<1x1x32xf32, #tpu.memory_space<vmem>>, vector<1x1x32xf32>
    %23 = vector.shape_cast %22 : vector<1x1x32xf32> to vector<1x32xf32>
    %24 = vector.shape_cast %5 : vector<1x32xf32> to vector<1x1x32xf32>
    tpu.vector_store %arg9[%c0_20, %c0_21, %c0_22], %24 {strides = array<i32>} : memref<1x1x32xf32, #tpu.memory_space<vmem>>, vector<1x1x32xf32>,
    %c0_23 = arith.constant 0 : index
    %c0_24 = arith.constant 0 : index
    %c0_25 = arith.constant 0 : index
    %25 = vector.load %arg10[%c0_23, %c0_24, %c0_25] : memref<1x1x32xf32, #tpu.memory_space<vmem>>, vector<1x1x32xf32>
    %26 = vector.shape_cast %25 : vector<1x1x32xf32> to vector<1x32xf32>
    %27 = vector.shape_cast %9 : vector<1x32xf32> to vector<1x1x32xf32>
    tpu.vector_store %arg10[%c0_23, %c0_24, %c0_25], %27 {strides = array<i32>} : memref<1x1x32xf32, #tpu.memory_space<vmem>>, vector<1x1x32xf32>,
    %28 = arith.truncf %21 : vector<1x1568xf32> to vector<1x1568xbf16>
    %c0_26 = arith.constant 0 : index
    %c0_27 = arith.constant 0 : index
    %c0_28 = arith.constant 0 : index
    %29 = vector.load %arg11[%c0_26, %c0_27, %c0_28] : memref<1x1x1568xbf16, #tpu.memory_space<vmem>>, vector<1x1x1568xbf16>
    %30 = vector.shape_cast %29 : vector<1x1x1568xbf16> to vector<1x1568xbf16>
    %31 = vector.shape_cast %28 : vector<1x1568xbf16> to vector<1x1x1568xbf16>
    tpu.vector_store %arg11[%c0_26, %c0_27, %c0_28], %31 {strides = array<i32>} : memref<1x1x1568xbf16, #tpu.memory_space<vmem>>, vector<1x1x1568xbf16>,
    return
  }
  func.func @transform_0(%arg0: i32) -> (i32, i32, i32) {
    %c0_i32 = arith.constant 0 : i32
    %c0_i32_0 = arith.constant 0 : i32
    %c0_i32_1 = arith.constant 0 : i32
    return %arg0, %c0_i32, %c0_i32_0 : i32, i32, i32
  }
  func.func @transform_1(%arg0: i32) -> (i32, i32, i32) {
    %c0_i32 = arith.constant 0 : i32
    %c0_i32_0 = arith.constant 0 : i32
    %c0_i32_1 = arith.constant 0 : i32
    return %arg0, %c0_i32, %c0_i32_0 : i32, i32, i32
  }
  func.func @transform_2(%arg0: i32) -> (i32, i32) {
    %c0_i32 = arith.constant 0 : i32
    %c0_i32_0 = arith.constant 0 : i32
    %c0_i32_1 = arith.constant 0 : i32
    return %c0_i32, %c0_i32_0 : i32, i32
  }
  func.func @transform_3(%arg0: i32) -> (i32, i32) {
    %c0_i32 = arith.constant 0 : i32
    %c0_i32_0 = arith.constant 0 : i32
    %c0_i32_1 = arith.constant 0 : i32
    return %c0_i32, %c0_i32_0 : i32, i32
  }
  func.func @transform_4(%arg0: i32) -> (i32, i32) {
    %c0_i32 = arith.constant 0 : i32
    %c0_i32_0 = arith.constant 0 : i32
    %c0_i32_1 = arith.constant 0 : i32
    return %c0_i32, %c0_i32_0 : i32, i32
  }
  func.func @transform_5(%arg0: i32) -> (i32, i32) {
    %c0_i32 = arith.constant 0 : i32
    %c0_i32_0 = arith.constant 0 : i32
    %c0_i32_1 = arith.constant 0 : i32
    return %c0_i32, %c0_i32_0 : i32, i32
  }
  func.func @transform_6(%arg0: i32) -> (i32, i32) {
    %c0_i32 = arith.constant 0 : i32
    %c0_i32_0 = arith.constant 0 : i32
    %c0_i32_1 = arith.constant 0 : i32
    return %c0_i32, %c0_i32_0 : i32, i32
  }
  func.func @transform_7(%arg0: i32) -> (i32, i32) {
    %c0_i32 = arith.constant 0 : i32
    %c0_i32_0 = arith.constant 0 : i32
    %c0_i32_1 = arith.constant 0 : i32
    return %c0_i32, %c0_i32_0 : i32, i32
  }
  func.func @transform_8(%arg0: i32) -> (i32, i32, i32) {
    %c0_i32 = arith.constant 0 : i32
    %c0_i32_0 = arith.constant 0 : i32
    %c0_i32_1 = arith.constant 0 : i32
    return %arg0, %c0_i32, %c0_i32_0 : i32, i32, i32
  }
  func.func @transform_9(%arg0: i32) -> (i32, i32, i32) {
    %c0_i32 = arith.constant 0 : i32
    %c0_i32_0 = arith.constant 0 : i32
    %c0_i32_1 = arith.constant 0 : i32
    return %arg0, %c0_i32, %c0_i32_0 : i32, i32, i32
  }
  func.func @transform_10(%arg0: i32) -> (i32, i32, i32) {
    %c0_i32 = arith.constant 0 : i32
    %c0_i32_0 = arith.constant 0 : i32
    %c0_i32_1 = arith.constant 0 : i32
    return %arg0, %c0_i32, %c0_i32_0 : i32, i32, i32
  }
}

module attributes {stable_mosaic.version = 11 : i64} {
  func.func @_conv_from_planes_kernel(%arg0: i32, %arg1: memref<1x2x56x32xbf16, #tpu.memory_space<vmem>>, %arg2: memref<4x32x64xbf16, #tpu.memory_space<vmem>>, %arg3: memref<1x64xf32, #tpu.memory_space<vmem>>, %arg4: memref<1x49x64xbf16, #tpu.memory_space<vmem>>) attributes {dimension_semantics = [#tpu.dimension_semantics<parallel>], iteration_bounds = array<i64: 2>, scalar_prefetch = 0 : i64, scratch_operands = 0 : i64, tpu.core_type = #tpu.core_type<tc>, window_params = [{transform_indices = @transform_0, window_bounds = array<i64: 1, 2, 56, 32>}, {pipeline_mode = #tpu.pipeline_mode<synchronous>, transform_indices = @transform_1, window_bounds = array<i64: 4, 32, 64>}, {pipeline_mode = #tpu.pipeline_mode<synchronous>, transform_indices = @transform_2, window_bounds = array<i64: 1, 64>}, {transform_indices = @transform_3, window_bounds = array<i64: 1, 49, 64>}]} {
    %cst = arith.constant 0.000000e+00 : f32
    %0 = vector.broadcast %cst : f32 to vector<49x64xf32>
    %c0 = arith.constant 0 : index
    %c0_0 = arith.constant 0 : index
    %c0_1 = arith.constant 0 : index
    %c0_2 = arith.constant 0 : index
    %1 = vector.load %arg1[%c0, %c0_0, %c0_1, %c0_2] : memref<1x2x56x32xbf16, #tpu.memory_space<vmem>>, vector<1x1x49x32xbf16>
    %2 = vector.shape_cast %1 : vector<1x1x49x32xbf16> to vector<49x32xbf16>
    %c0_3 = arith.constant 0 : index
    %c0_4 = arith.constant 0 : index
    %c0_5 = arith.constant 0 : index
    %3 = vector.load %arg2[%c0_3, %c0_4, %c0_5] : memref<4x32x64xbf16, #tpu.memory_space<vmem>>, vector<1x32x64xbf16>
    %4 = vector.shape_cast %3 : vector<1x32x64xbf16> to vector<32x64xbf16>
    %cst_6 = arith.constant dense<0.000000e+00> : vector<49x64xf32>
    %5 = tpu.matmul %2, %4, %cst_6 {dimension_numbers = #tpu.dot_dimension_numbers<[1], [0], [0], [1], [0, 0, 1, 1], [], []>} : vector<49x32xbf16>, vector<32x64xbf16>, vector<49x64xf32> -> vector<49x64xf32>
    %6 = arith.addf %0, %5 : vector<49x64xf32>
    %c0_7 = arith.constant 0 : index
    %c1 = arith.constant 1 : index
    %c0_8 = arith.constant 0 : index
    %c0_9 = arith.constant 0 : index
    %7 = vector.load %arg1[%c0_7, %c1, %c0_8, %c0_9] : memref<1x2x56x32xbf16, #tpu.memory_space<vmem>>, vector<1x1x49x32xbf16>
    %8 = vector.shape_cast %7 : vector<1x1x49x32xbf16> to vector<49x32xbf16>
    %c1_10 = arith.constant 1 : index
    %c0_11 = arith.constant 0 : index
    %c0_12 = arith.constant 0 : index
    %9 = vector.load %arg2[%c1_10, %c0_11, %c0_12] : memref<4x32x64xbf16, #tpu.memory_space<vmem>>, vector<1x32x64xbf16>
    %10 = vector.shape_cast %9 : vector<1x32x64xbf16> to vector<32x64xbf16>
    %cst_13 = arith.constant dense<0.000000e+00> : vector<49x64xf32>
    %11 = tpu.matmul %8, %10, %cst_13 {dimension_numbers = #tpu.dot_dimension_numbers<[1], [0], [0], [1], [0, 0, 1, 1], [], []>} : vector<49x32xbf16>, vector<32x64xbf16>, vector<49x64xf32> -> vector<49x64xf32>
    %12 = arith.addf %6, %11 : vector<49x64xf32>
    %c0_14 = arith.constant 0 : index
    %c0_15 = arith.constant 0 : index
    %c7 = arith.constant 7 : index
    %c0_16 = arith.constant 0 : index
    %13 = vector.load %arg1[%c0_14, %c0_15, %c7, %c0_16] : memref<1x2x56x32xbf16, #tpu.memory_space<vmem>>, vector<1x1x49x32xbf16>
    %14 = vector.shape_cast %13 : vector<1x1x49x32xbf16> to vector<49x32xbf16>
    %c2 = arith.constant 2 : index
    %c0_17 = arith.constant 0 : index
    %c0_18 = arith.constant 0 : index
    %15 = vector.load %arg2[%c2, %c0_17, %c0_18] : memref<4x32x64xbf16, #tpu.memory_space<vmem>>, vector<1x32x64xbf16>
    %16 = vector.shape_cast %15 : vector<1x32x64xbf16> to vector<32x64xbf16>
    %cst_19 = arith.constant dense<0.000000e+00> : vector<49x64xf32>
    %17 = tpu.matmul %14, %16, %cst_19 {dimension_numbers = #tpu.dot_dimension_numbers<[1], [0], [0], [1], [0, 0, 1, 1], [], []>} : vector<49x32xbf16>, vector<32x64xbf16>, vector<49x64xf32> -> vector<49x64xf32>
    %18 = arith.addf %12, %17 : vector<49x64xf32>
    %c0_20 = arith.constant 0 : index
    %c1_21 = arith.constant 1 : index
    %c7_22 = arith.constant 7 : index
    %c0_23 = arith.constant 0 : index
    %19 = vector.load %arg1[%c0_20, %c1_21, %c7_22, %c0_23] : memref<1x2x56x32xbf16, #tpu.memory_space<vmem>>, vector<1x1x49x32xbf16>
    %20 = vector.shape_cast %19 : vector<1x1x49x32xbf16> to vector<49x32xbf16>
    %c3 = arith.constant 3 : index
    %c0_24 = arith.constant 0 : index
    %c0_25 = arith.constant 0 : index
    %21 = vector.load %arg2[%c3, %c0_24, %c0_25] : memref<4x32x64xbf16, #tpu.memory_space<vmem>>, vector<1x32x64xbf16>
    %22 = vector.shape_cast %21 : vector<1x32x64xbf16> to vector<32x64xbf16>
    %cst_26 = arith.constant dense<0.000000e+00> : vector<49x64xf32>
    %23 = tpu.matmul %20, %22, %cst_26 {dimension_numbers = #tpu.dot_dimension_numbers<[1], [0], [0], [1], [0, 0, 1, 1], [], []>} : vector<49x32xbf16>, vector<32x64xbf16>, vector<49x64xf32> -> vector<49x64xf32>
    %24 = arith.addf %18, %23 : vector<49x64xf32>
    %c0_27 = arith.constant 0 : index
    %c0_28 = arith.constant 0 : index
    %25 = vector.load %arg3[%c0_27, %c0_28] : memref<1x64xf32, #tpu.memory_space<vmem>>, vector<1x64xf32>
    %26 = vector.broadcast %25 : vector<1x64xf32> to vector<49x64xf32>
    %27 = arith.addf %24, %26 : vector<49x64xf32>
    %cst_29 = arith.constant 0.000000e+00 : f32
    %28 = vector.broadcast %cst_29 : f32 to vector<49x64xf32>
    %29 = arith.maximumf %27, %28 : vector<49x64xf32>
    %30 = arith.truncf %29 : vector<49x64xf32> to vector<49x64xbf16>
    %c0_30 = arith.constant 0 : index
    %c0_31 = arith.constant 0 : index
    %c0_32 = arith.constant 0 : index
    %31 = vector.load %arg4[%c0_30, %c0_31, %c0_32] : memref<1x49x64xbf16, #tpu.memory_space<vmem>>, vector<1x49x64xbf16>
    %32 = vector.shape_cast %31 : vector<1x49x64xbf16> to vector<49x64xbf16>
    %33 = vector.shape_cast %30 : vector<49x64xbf16> to vector<1x49x64xbf16>
    tpu.vector_store %arg4[%c0_30, %c0_31, %c0_32], %33 {strides = array<i32>} : memref<1x49x64xbf16, #tpu.memory_space<vmem>>, vector<1x49x64xbf16>,
    return
  }
  func.func @transform_0(%arg0: i32) -> (i32, i32, i32, i32) {
    %c0_i32 = arith.constant 0 : i32
    %c0_i32_0 = arith.constant 0 : i32
    %c0_i32_1 = arith.constant 0 : i32
    %c0_i32_2 = arith.constant 0 : i32
    return %arg0, %c0_i32, %c0_i32_0, %c0_i32_1 : i32, i32, i32, i32
  }
  func.func @transform_1(%arg0: i32) -> (i32, i32, i32) {
    %c0_i32 = arith.constant 0 : i32
    %c0_i32_0 = arith.constant 0 : i32
    %c0_i32_1 = arith.constant 0 : i32
    %c0_i32_2 = arith.constant 0 : i32
    return %c0_i32, %c0_i32_0, %c0_i32_1 : i32, i32, i32
  }
  func.func @transform_2(%arg0: i32) -> (i32, i32) {
    %c0_i32 = arith.constant 0 : i32
    %c0_i32_0 = arith.constant 0 : i32
    %c0_i32_1 = arith.constant 0 : i32
    return %c0_i32, %c0_i32_0 : i32, i32
  }
  func.func @transform_3(%arg0: i32) -> (i32, i32, i32) {
    %c0_i32 = arith.constant 0 : i32
    %c0_i32_0 = arith.constant 0 : i32
    %c0_i32_1 = arith.constant 0 : i32
    return %arg0, %c0_i32, %c0_i32_0 : i32, i32, i32
  }
}

module attributes {stable_mosaic.version = 11 : i64} {
  func.func @_conv_from_planes_kernel(%arg0: i32, %arg1: memref<1x2x210x16xbf16, #tpu.memory_space<vmem>>, %arg2: memref<4x16x4xbf16, #tpu.memory_space<vmem>>, %arg3: memref<1x4xf32, #tpu.memory_space<vmem>>, %arg4: memref<1x196x4xf32, #tpu.memory_space<vmem>>) attributes {dimension_semantics = [#tpu.dimension_semantics<parallel>], iteration_bounds = array<i64: 2>, scalar_prefetch = 0 : i64, scratch_operands = 0 : i64, tpu.core_type = #tpu.core_type<tc>, window_params = [{transform_indices = @transform_0, window_bounds = array<i64: 1, 2, 210, 16>}, {pipeline_mode = #tpu.pipeline_mode<synchronous>, transform_indices = @transform_1, window_bounds = array<i64: 4, 16, 4>}, {pipeline_mode = #tpu.pipeline_mode<synchronous>, transform_indices = @transform_2, window_bounds = array<i64: 1, 4>}, {transform_indices = @transform_3, window_bounds = array<i64: 1, 196, 4>}]} {
    %cst = arith.constant 0.000000e+00 : f32
    %0 = vector.broadcast %cst : f32 to vector<196x4xf32>
    %c0 = arith.constant 0 : index
    %c0_0 = arith.constant 0 : index
    %c0_1 = arith.constant 0 : index
    %c0_2 = arith.constant 0 : index
    %1 = vector.load %arg1[%c0, %c0_0, %c0_1, %c0_2] : memref<1x2x210x16xbf16, #tpu.memory_space<vmem>>, vector<1x1x196x16xbf16>
    %2 = vector.shape_cast %1 : vector<1x1x196x16xbf16> to vector<196x16xbf16>
    %c0_3 = arith.constant 0 : index
    %c0_4 = arith.constant 0 : index
    %c0_5 = arith.constant 0 : index
    %3 = vector.load %arg2[%c0_3, %c0_4, %c0_5] : memref<4x16x4xbf16, #tpu.memory_space<vmem>>, vector<1x16x4xbf16>
    %4 = vector.shape_cast %3 : vector<1x16x4xbf16> to vector<16x4xbf16>
    %cst_6 = arith.constant dense<0.000000e+00> : vector<196x4xf32>
    %5 = tpu.matmul %2, %4, %cst_6 {dimension_numbers = #tpu.dot_dimension_numbers<[1], [0], [0], [1], [0, 0, 1, 1], [], []>} : vector<196x16xbf16>, vector<16x4xbf16>, vector<196x4xf32> -> vector<196x4xf32>
    %6 = arith.addf %0, %5 : vector<196x4xf32>
    %c0_7 = arith.constant 0 : index
    %c1 = arith.constant 1 : index
    %c0_8 = arith.constant 0 : index
    %c0_9 = arith.constant 0 : index
    %7 = vector.load %arg1[%c0_7, %c1, %c0_8, %c0_9] : memref<1x2x210x16xbf16, #tpu.memory_space<vmem>>, vector<1x1x196x16xbf16>
    %8 = vector.shape_cast %7 : vector<1x1x196x16xbf16> to vector<196x16xbf16>
    %c1_10 = arith.constant 1 : index
    %c0_11 = arith.constant 0 : index
    %c0_12 = arith.constant 0 : index
    %9 = vector.load %arg2[%c1_10, %c0_11, %c0_12] : memref<4x16x4xbf16, #tpu.memory_space<vmem>>, vector<1x16x4xbf16>
    %10 = vector.shape_cast %9 : vector<1x16x4xbf16> to vector<16x4xbf16>
    %cst_13 = arith.constant dense<0.000000e+00> : vector<196x4xf32>
    %11 = tpu.matmul %8, %10, %cst_13 {dimension_numbers = #tpu.dot_dimension_numbers<[1], [0], [0], [1], [0, 0, 1, 1], [], []>} : vector<196x16xbf16>, vector<16x4xbf16>, vector<196x4xf32> -> vector<196x4xf32>
    %12 = arith.addf %6, %11 : vector<196x4xf32>
    %c0_14 = arith.constant 0 : index
    %c0_15 = arith.constant 0 : index
    %c14 = arith.constant 14 : index
    %c0_16 = arith.constant 0 : index
    %13 = vector.load %arg1[%c0_14, %c0_15, %c14, %c0_16] : memref<1x2x210x16xbf16, #tpu.memory_space<vmem>>, vector<1x1x196x16xbf16>
    %14 = vector.shape_cast %13 : vector<1x1x196x16xbf16> to vector<196x16xbf16>
    %c2 = arith.constant 2 : index
    %c0_17 = arith.constant 0 : index
    %c0_18 = arith.constant 0 : index
    %15 = vector.load %arg2[%c2, %c0_17, %c0_18] : memref<4x16x4xbf16, #tpu.memory_space<vmem>>, vector<1x16x4xbf16>
    %16 = vector.shape_cast %15 : vector<1x16x4xbf16> to vector<16x4xbf16>
    %cst_19 = arith.constant dense<0.000000e+00> : vector<196x4xf32>
    %17 = tpu.matmul %14, %16, %cst_19 {dimension_numbers = #tpu.dot_dimension_numbers<[1], [0], [0], [1], [0, 0, 1, 1], [], []>} : vector<196x16xbf16>, vector<16x4xbf16>, vector<196x4xf32> -> vector<196x4xf32>
    %18 = arith.addf %12, %17 : vector<196x4xf32>
    %c0_20 = arith.constant 0 : index
    %c1_21 = arith.constant 1 : index
    %c14_22 = arith.constant 14 : index
    %c0_23 = arith.constant 0 : index
    %19 = vector.load %arg1[%c0_20, %c1_21, %c14_22, %c0_23] : memref<1x2x210x16xbf16, #tpu.memory_space<vmem>>, vector<1x1x196x16xbf16>
    %20 = vector.shape_cast %19 : vector<1x1x196x16xbf16> to vector<196x16xbf16>
    %c3 = arith.constant 3 : index
    %c0_24 = arith.constant 0 : index
    %c0_25 = arith.constant 0 : index
    %21 = vector.load %arg2[%c3, %c0_24, %c0_25] : memref<4x16x4xbf16, #tpu.memory_space<vmem>>, vector<1x16x4xbf16>
    %22 = vector.shape_cast %21 : vector<1x16x4xbf16> to vector<16x4xbf16>
    %cst_26 = arith.constant dense<0.000000e+00> : vector<196x4xf32>
    %23 = tpu.matmul %20, %22, %cst_26 {dimension_numbers = #tpu.dot_dimension_numbers<[1], [0], [0], [1], [0, 0, 1, 1], [], []>} : vector<196x16xbf16>, vector<16x4xbf16>, vector<196x4xf32> -> vector<196x4xf32>
    %24 = arith.addf %18, %23 : vector<196x4xf32>
    %c0_27 = arith.constant 0 : index
    %c0_28 = arith.constant 0 : index
    %25 = vector.load %arg3[%c0_27, %c0_28] : memref<1x4xf32, #tpu.memory_space<vmem>>, vector<1x4xf32>
    %26 = vector.broadcast %25 : vector<1x4xf32> to vector<196x4xf32>
    %27 = arith.addf %24, %26 : vector<196x4xf32>
    %28 = arith.negf %27 : vector<196x4xf32>
    %29 = math.exp %28 : vector<196x4xf32>
    %cst_29 = arith.constant 1.000000e+00 : f32
    %30 = vector.broadcast %cst_29 : f32 to vector<196x4xf32>
    %31 = arith.addf %30, %29 : vector<196x4xf32>
    %32 = arith.divf %30, %31 : vector<196x4xf32>
    %c0_30 = arith.constant 0 : index
    %c0_31 = arith.constant 0 : index
    %c0_32 = arith.constant 0 : index
    %33 = vector.load %arg4[%c0_30, %c0_31, %c0_32] : memref<1x196x4xf32, #tpu.memory_space<vmem>>, vector<1x196x4xf32>
    %34 = vector.shape_cast %33 : vector<1x196x4xf32> to vector<196x4xf32>
    %35 = vector.shape_cast %32 : vector<196x4xf32> to vector<1x196x4xf32>
    tpu.vector_store %arg4[%c0_30, %c0_31, %c0_32], %35 {strides = array<i32>} : memref<1x196x4xf32, #tpu.memory_space<vmem>>, vector<1x196x4xf32>,
    return
  }
  func.func @transform_0(%arg0: i32) -> (i32, i32, i32, i32) {
    %c0_i32 = arith.constant 0 : i32
    %c0_i32_0 = arith.constant 0 : i32
    %c0_i32_1 = arith.constant 0 : i32
    %c0_i32_2 = arith.constant 0 : i32
    return %arg0, %c0_i32, %c0_i32_0, %c0_i32_1 : i32, i32, i32, i32
  }
  func.func @transform_1(%arg0: i32) -> (i32, i32, i32) {
    %c0_i32 = arith.constant 0 : i32
    %c0_i32_0 = arith.constant 0 : i32
    %c0_i32_1 = arith.constant 0 : i32
    %c0_i32_2 = arith.constant 0 : i32
    return %c0_i32, %c0_i32_0, %c0_i32_1 : i32, i32, i32
  }
  func.func @transform_2(%arg0: i32) -> (i32, i32) {
    %c0_i32 = arith.constant 0 : i32
    %c0_i32_0 = arith.constant 0 : i32
    %c0_i32_1 = arith.constant 0 : i32
    return %c0_i32, %c0_i32_0 : i32, i32
  }
  func.func @transform_3(%arg0: i32) -> (i32, i32, i32) {
    %c0_i32 = arith.constant 0 : i32
    %c0_i32_0 = arith.constant 0 : i32
    %c0_i32_1 = arith.constant 0 : i32
    return %arg0, %c0_i32, %c0_i32_0 : i32, i32, i32
  }
}

</mosaic_0001>

<bundles_post_ra>
// kernel: conv_vae_forward.5
= control target key start
LH: loop header
LB: loop body
LE: loop exit
PB: predicated region body
PF: predicated region fallthrough
CT: control target
= control target key end

     0   :  { %s4210_s12 = smov 0   ;;  %s5746_s0 = inlined_call_operand.vmem [shape: bf16[2,6,210,1], index: 0, kind: input, shape index: {}]   ;;  %s5747_s1 = inlined_call_operand.vmem [shape: bf16[9,1,16], index: 1, kind: input, shape index: {}]   ;;  %s5748_s2 = inlined_call_operand.vmem [shape: f32[1,16], index: 2, kind: input, shape index: {}]   ;;  %s5749_s3 = inlined_call_operand.vmem [shape: bf16[2,196,16], index: 3, kind: output, shape index: {}]  }
   0x1 LB: > { %s2834_s13 = sadd.s32 4294967295, %s4187_s12   ;;  %p2838_p0 = scmp.ge.s32.totalorder %s4187_s12, 1  ;;  %s4187_s12 = sphi %s4210_s12, %s13_s12  }
   0x2   : > { %p137_p1 = scmp.lt.s32.totalorder %s4187_s12, 3 }
   0x4   : > { %p138_p2 = pnand %p2838_p0, %p137_p1 }
   0x6   : > { %141 = sbr.rel (%p138_p2) target bundleno = 426 (0x1aa), region = 32 }
   0xd   : > { %p161_p3 = scmp.lt.s32.totalorder %s2834_s13, 1  ;;  %v4189_v0 = vmov 0   ;;  %vm1808_vm0 = vcmask 1041408   ;;  %vm2752_vm1 = vcmask 125952   ;;  %vm2777_vm2 = vcmask 123904  }
   0xe   : > { %3620 = vset.pattern.permute.xlu1 %v4189_v0  ;;  %3609 = vset.pattern.permute.xlu0 %v4189_v0 }
   0xf   : > { %s5794_s13 = smov (!%p161_p3, %s2834_s13), 1 }
  0x10   : > { %s3598_s14 = smul.u32 648, %s5794_s13 }
  0x11   : > { %s3599_s11 = smul.u32 100, %s5794_s13 }
  0x12   : > { %s4224_s17 = scalar_lea.vmem %s5746_s0, %s3598_s14 }
  0x13   : > { %v4227_v1 = vld [vmem:[%s4224_s17 + $0x10] sm:$0xff]   ;;  %v3080_v2 = vld [vmem:[%s4224_s17] sm:$0xff]   ;;  %v4231_v3 = vld [vmem:[%s4224_s17 + $0x18] sm:$0xff]   ;;  %s5576_s15 = scalar_lea.vmem %s5749_s3, %s3599_s11 }
  0x14   : > { %v3089_v4 = vunpack.c.l.bf16 %v4227_v1  ;;  %v3090_v5 = vunpack.c.h.bf16 %v4227_v1  ;;  %v3081_v6 = vunpack.c.l.bf16 %v3080_v2  ;;  %v3082_v7 = vunpack.c.h.bf16 %v3080_v2  ;;  %v4236_v8 = vld [vmem:[%s4224_s17 + $0x8] sm:$0xff]   ;;  %v4246_v14 = vld [vmem:[%s4224_s17 + $0x20] sm:$0xff]   ;;  %v4265_v23 = vld [vmem:[%s4224_s17 + $0x38] sm:$0xff]  }
  0x15   : > { %v4239_v9 = vld [vmem:[%s4224_s17 + $0x28] sm:$0xff]   ;;  %v3093_v10 = vunpack.c.l.bf16 %v4231_v3  ;;  %v3094_v11 = vunpack.c.h.bf16 %v4231_v3  ;;  %v3085_v12 = vunpack.c.l.bf16 %v4236_v8  ;;  %v3086_v13 = vunpack.c.h.bf16 %v4236_v8  ;;  %v4268_v24 = vld [vmem:[%s4224_s17 + $0x30] sm:$0xff]   ;;  %v4286_v32 = vld [vmem:[%s4224_s17 + $0x40] sm:$0xff]  }
  0x16   : > { %v3621_v15 = vpack.i.bf16 %v3090_v5, %v3089_v4  ;;  %v3610_v16 = vpack.i.bf16 %v3082_v7, %v3081_v6  ;;  %v3101_v17 = vunpack.c.l.bf16 %v4239_v9  ;;  %v3102_v18 = vunpack.c.h.bf16 %v4239_v9  ;;  %v4283_v31 = vld [vmem:[%s4224_s17 + $0x48] sm:$0xff]   ;;  %v3505_v39 = vld [vmem:[%s4224_s17 + $0x58] sm:$0xff]   ;;  %v4302_v40 = vld [vmem:[%s4224_s17 + $0x50] sm:$0xff]  }
  0x17   : > { %v3626_v19 = vpack.i.bf16 %v3094_v11, %v3093_v10  ;;  %v3615_v20 = vpack.i.bf16 %v3086_v13, %v3085_v12  ;;  %v3097_v21 = vunpack.c.l.bf16 %v4246_v14  ;;  %v3098_v22 = vunpack.c.h.bf16 %v4246_v14  ;;  %v3506_v47 = vld [vmem:[%s4224_s17 + $0x70] sm:$0xff]   ;;  %v195_v48 = vld [vmem:[%s4224_s17 + $0x60] sm:$0x3]  ;;  %v4317_v49 = vld [vmem:[%s4224_s17 + $0x6c] ss:$92 sps:$4 sm:$0xff]  }
  0x18   : > { %3622 = vperm.xlu1 %3620, %v3621_v15   ;;  %3611 = vperm.xlu0 %3609, %v3610_v16   ;;  %v3636_v25 = vpack.i.bf16 %v3102_v18, %v3101_v17  ;;  %v3109_v26 = vunpack.c.l.bf16 %v4265_v23  ;;  %v3110_v28 = vunpack.c.h.bf16 %v4265_v23  ;;  %v3105_v29 = vunpack.c.l.bf16 %v4268_v24  ;;  %v3508_v56 = vld [vmem:[%s4224_s17 + $0x80] sm:$0xff]   ;;  %v3507_v57 = vld [vmem:[%s4224_s17 + $0x78] sm:$0xff]   ;;  %v3510_v0 = vld [vmem:[%s4224_s17 + $0x90] sm:$0xff]  }
  0x19   : > { %v3631_v27 = vpack.i.bf16 %v3098_v22, %v3097_v21  ;;  %v3106_v30 = vunpack.c.h.bf16 %v4268_v24  ;;  %v3117_v33 = vunpack.c.l.bf16 %v4283_v31  ;;  %v3118_v34 = vunpack.c.h.bf16 %v4283_v31  ;;  %v3509_v2 = vld [vmem:[%s4224_s17 + $0x88] sm:$0xff]  }
  0x1a   : > { %v3646_v35 = vpack.i.bf16 %v3110_v28, %v3109_v26  ;;  %v3113_v37 = vunpack.c.l.bf16 %v4286_v32  ;;  %v3114_v38 = vunpack.c.h.bf16 %v4286_v32  ;;  %v3125_v42 = vunpack.c.l.bf16 %v3505_v39 }
  0x1b   : > { %v3641_v36 = vpack.i.bf16 %v3106_v30, %v3105_v29  ;;  %v3656_v41 = vpack.i.bf16 %v3118_v34, %v3117_v33  ;;  %v3126_v44 = vunpack.c.h.bf16 %v3505_v39  ;;  %v3121_v45 = vunpack.c.l.bf16 %v4302_v40 }
  0x1c   : > { %3627 = vperm.xlu1 %3620, %v3626_v19   ;;  %3616 = vperm.xlu0 %3609, %v3615_v20   ;;  %v3651_v43 = vpack.i.bf16 %v3114_v38, %v3113_v37  ;;  %v3122_v46 = vunpack.c.h.bf16 %v4302_v40  ;;  %v3129_v50 = vunpack.c.l.bf16 %v3506_v47  ;;  %v3130_v51 = vunpack.c.h.bf16 %v3506_v47  ;;  %v3513_v47 = vld [vmem:[%s4224_s17 + $0xa8] sm:$0xff]  }
  0x1d   : > { %v3666_v52 = vpack.i.bf16 %v3126_v44, %v3125_v42  ;;  %v220_v54 = vunpack.c.l.bf16 %v195_v48  ;;  %v428_v55 = vunpack.c.l.bf16 %v4317_v49  ;;  %v3137_v59 = vunpack.c.l.bf16 %v3508_v56  ;;  %v3514_v44 = vld [vmem:[%s4224_s17 + $0xb0] sm:$0xff]  }
  0x1e   : > { %v3661_v53 = vpack.i.bf16 %v3122_v46, %v3121_v45  ;;  %v3676_v58 = vpack.i.bf16 %v3130_v51, %v3129_v50  ;;  %v3138_v61 = vunpack.c.h.bf16 %v3508_v56  ;;  %v3133_v62 = vunpack.c.l.bf16 %v3507_v57  ;;  %v3515_v56 = vld [vmem:[%s4224_s17 + $0xb8] sm:$0xff]  }
  0x1f   : > { %v3671_v60 = vpack.i.bf16 %v428_v55, %v220_v54  ;;  %v3134_v63 = vunpack.c.h.bf16 %v3507_v57  ;;  %v3145_v6 = vunpack.c.l.bf16 %v3510_v0  ;;  %v3146_v7 = vunpack.c.h.bf16 %v3510_v0  ;;  %v3516_v55 = vld [vmem:[%s4224_s17 + $0xc0] sm:$0xff]   ;;  %v2865_v0 = vld [vmem:[%s4224_s17 + $0xcc] sm:$0x3] }
  0x20   : > { %3637 = vperm.xlu1 %3620, %v3636_v25   ;;  %3632 = vperm.xlu0 %3609, %v3631_v27   ;;  %v3686_v15 = vpack.i.bf16 %v3138_v61, %v3137_v59  ;;  %v3141_v19 = vunpack.c.l.bf16 %v3509_v2  ;;  %v3142_v20 = vunpack.c.h.bf16 %v3509_v2  ;;  %v3512_v25 = vld [vmem:[%s4224_s17 + $0xa0] sm:$0xff]   ;;  %v3511_v27 = vld [vmem:[%s4224_s17 + $0x98] sm:$0xff]   ;;  %v3161_v48 = vunpack.c.l.bf16 %v3514_v44 }
  0x21   : > { %v3681_v16 = vpack.i.bf16 %v3134_v63, %v3133_v62  ;;  %v3149_v42 = vunpack.c.l.bf16 %v3511_v27  ;;  %v3162_v50 = vunpack.c.h.bf16 %v3514_v44  ;;  %v3158_v54 = vunpack.c.h.bf16 %v3513_v47  ;;  %v3517_v63 = vld [vmem:[%s4224_s17 + $0xd8] sm:$0xff]   ;;  %v3520_v44 = vld [vmem:[%s4224_s17 + $0xf0] sm:$0xff]  }
  0x22   : > { %v3691_v39 = vpack.i.bf16 %v3142_v20, %v3141_v19  ;;  %v3165_v61 = vunpack.c.l.bf16 %v3515_v56  ;;  %v3166_v62 = vunpack.c.h.bf16 %v3515_v56  ;;  %v3173_v2 = vunpack.c.l.bf16 %v3517_v63  ;;  %v3519_v20 = vld [vmem:[%s4224_s17 + $0xe8] sm:$0xff]   ;;  %v3522_v56 = vld [vmem:[%s4224_s17 + $0x100] sm:$0xff]  }
  0x23   : > { %v3716_v57 = vpack.i.bf16 %v3162_v50, %v3161_v48  ;;  %v452_v19 = vunpack.c.l.bf16 %v2865_v0  ;;  %v4373_v1 = vpack.i.bf16 %v3109_v26, %v3106_v30  ;;  %v4385_v3 = vpack.i.bf16 %v3117_v33, %v3114_v38  ;;  %v2891_v26 = vld [vmem:[%s4224_s17 + $0x138] sm:$0x3]  ;;  %v3530_v38 = vld [vmem:[%s4224_s17 + $0x150] sm:$0xff]  }
  0x24   : > { %3647 = vperm.xlu1 %3620, %v3646_v35   ;;  %3642 = vperm.xlu0 %3609, %v3641_v36   ;;  %v3696_v35 = vpack.i.bf16 %v3146_v7, %v3145_v6  ;;  %v3153_v36 = vunpack.c.l.bf16 %v3512_v25  ;;  %v3174_v6 = vunpack.c.h.bf16 %v3517_v63  ;;  %v4393_v9 = vpack.i.bf16 %v3113_v37, %v3110_v28  ;;  %v3528_v28 = vld [vmem:[%s4224_s17 + $0x130] sm:$0xff]  }
  0x25   : > { %v4399_v14 = vpack.i.bf16 %v3121_v45, %v3118_v34  ;;  %v685_v30 = vunpack.c.l.bf16 %v2891_v26  ;;  %v3217_v34 = vunpack.c.l.bf16 %v3528_v28  ;;  %v3218_v37 = vunpack.c.h.bf16 %v3528_v28  ;;  %v3529_v45 = vld [vmem:[%s4224_s17 + $0x148] sm:$0xff]  }
  0x28   : > { %3657 = vperm.xlu1 %3620, %v3656_v41   ;;  %3652 = vperm.xlu0 %3609, %v3651_v43   ;;  %v3154_v41 = vunpack.c.h.bf16 %v3512_v25  ;;  %v3150_v43 = vunpack.c.h.bf16 %v3511_v27  ;;  %v3518_v25 = vld [vmem:[%s4224_s17 + $0xe0] sm:$0xff]   ;;  %v3736_v27 = vpack.i.bf16 %v3174_v6, %v3173_v2  ;;  %v4349_v6 = vpack.i.bf16 %v3093_v10, %v3090_v5 }
  0x2a   : > { %v3706_v51 = vpack.i.bf16 %v3154_v41, %v3153_v36  ;;  %v3177_v41 = vunpack.c.l.bf16 %v3518_v25 }
  0x2c   : > { %3667 = vperm.xlu1 %3620, %v3666_v52   ;;  %3662 = vperm.xlu0 %3609, %v3661_v53   ;;  %v3701_v52 = vpack.i.bf16 %v3150_v43, %v3149_v42  ;;  %v3157_v53 = vunpack.c.l.bf16 %v3513_v47  ;;  %v3178_v42 = vunpack.c.h.bf16 %v3518_v25  ;;  %v3521_v43 = vld [vmem:[%s4224_s17 + $0xf8] sm:$0xff]   ;;  %v3523_v47 = vld [vmem:[%s4224_s17 + $0x108] sm:$0xff]   ;;  %v3225_v25 = vunpack.c.l.bf16 %v3530_v38 }
  0x2d   : > { %v3189_v48 = vunpack.c.l.bf16 %v3521_v43  ;;  %v3190_v50 = vunpack.c.h.bf16 %v3521_v43 }
  0x2e   : > { %v3711_v59 = vpack.i.bf16 %v3158_v54, %v3157_v53  ;;  %v3186_v53 = vunpack.c.h.bf16 %v3520_v44  ;;  %v3197_v54 = vunpack.c.l.bf16 %v3523_v47 }
  0x30   : > { %3677 = vperm.xlu1 %3620, %v3676_v58   ;;  %3672 = vperm.xlu0 %3609, %v3671_v60   ;;  %v3169_v58 = vunpack.c.l.bf16 %v3516_v55  ;;  %v3170_v60 = vunpack.c.h.bf16 %v3516_v55  ;;  %v3198_v55 = vunpack.c.h.bf16 %v3523_v47 }
  0x32   : > { %v3726_v7 = vpack.i.bf16 %v3170_v60, %v3169_v58  ;;  %v3524_v58 = vld [vmem:[%s4224_s17 + $0x110] sm:$0xff]   ;;  %v3766_v63 = vpack.i.bf16 %v3198_v55, %v3197_v54 }
  0x33   : > { %v3202_v5 = vunpack.c.h.bf16 %v3524_v58 }
  0x34   : > { %3687 = vperm.xlu1 %3620, %v3686_v15   ;;  %3682 = vperm.xlu0 %3609, %v3681_v16   ;;  %v3721_v15 = vpack.i.bf16 %v3166_v62, %v3165_v61  ;;  %v451_v16 = vunpack.c.h.bf16 %v4317_v49  ;;  %v3193_v61 = vunpack.c.l.bf16 %v3522_v56  ;;  %v3194_v62 = vunpack.c.h.bf16 %v3522_v56 }
  0x36   : > { %v3731_v36 = vpack.i.bf16 %v452_v19, %v451_v16  ;;  %v4361_v16 = vpack.i.bf16 %v3101_v17, %v3098_v22  ;;  %v4367_v19 = vpack.i.bf16 %v3097_v21, %v3094_v11  ;;  %v3761_v10 = vpack.i.bf16 %v3194_v62, %v3193_v61  ;;  %v3527_v11 = vld [vmem:[%s4224_s17 + $0x128] sm:$0xff]  }
  0x37   : > { %v3214_v22 = vunpack.c.h.bf16 %v3527_v11 }
  0x38   : > { %3697 = vperm.xlu1 %3620, %v3696_v35   ;;  %3692 = vperm.xlu0 %3609, %v3691_v39   ;;  %v3181_v35 = vunpack.c.l.bf16 %v3519_v20  ;;  %v3182_v39 = vunpack.c.h.bf16 %v3519_v20 }
  0x3a   : > { %v3746_v49 = vpack.i.bf16 %v3182_v39, %v3181_v35  ;;  %v3226_v35 = vunpack.c.h.bf16 %v3530_v38  ;;  %v3222_v39 = vunpack.c.h.bf16 %v3529_v45 }
  0x3c   : > { %3707 = vperm.xlu1 %3620, %v3706_v51   ;;  %3702 = vperm.xlu0 %3609, %v3701_v52   ;;  %v3741_v51 = vpack.i.bf16 %v3178_v42, %v3177_v41  ;;  %v3185_v52 = vunpack.c.l.bf16 %v3520_v44  ;;  %v3532_v41 = vld [vmem:[%s4224_s17 + $0x160] sm:$0xff]   ;;  %v3531_v42 = vld [vmem:[%s4224_s17 + $0x158] sm:$0xff]   ;;  %v3806_v47 = vpack.i.bf16 %v3226_v35, %v3225_v25  ;;  %v3543_v35 = vld [vmem:[%s4224_s17 + $0x1c8] sm:$0xff]  }
  0x3d   : > { %v3233_v43 = vunpack.c.l.bf16 %v3532_v41  ;;  %v3234_v44 = vunpack.c.h.bf16 %v3532_v41  ;;  %v3278_v41 = vunpack.c.h.bf16 %v3543_v35 }
  0x3e   : > { %v3751_v60 = vpack.i.bf16 %v3186_v53, %v3185_v52  ;;  %v3533_v52 = vld [vmem:[%s4224_s17 + $0x168] sm:$0xff]  }
  0x3f   : > { %v3816_v53 = vpack.i.bf16 %v3234_v44, %v3233_v43 }
  0x40   : > { %3717 = vperm.xlu1 %3620, %v3716_v57   ;;  %3712 = vperm.xlu0 %3609, %v3711_v59   ;;  %v3525_v57 = vld [vmem:[%s4224_s17 + $0x118] sm:$0xff]   ;;  %v3756_v59 = vpack.i.bf16 %v3190_v50, %v3189_v48  ;;  %v3229_v50 = vunpack.c.l.bf16 %v3531_v42 }
  0x41   : > { %v3205_v0 = vunpack.c.l.bf16 %v3525_v57  ;;  %v3206_v2 = vunpack.c.h.bf16 %v3525_v57  ;;  %v3237_v57 = vunpack.c.l.bf16 %v3533_v52 }
  0x43   : > { %v3776_v17 = vpack.i.bf16 %v3206_v2, %v3205_v0 }
  0x44   : > { %3727 = vperm.xlu1 %3620, %v3726_v7   ;;  %3722 = vperm.xlu0 %3609, %v3721_v15   ;;  %v3201_v7 = vunpack.c.l.bf16 %v3524_v58  ;;  %v4355_v15 = vpack.i.bf16 %v3089_v4, %v3086_v13  ;;  %v4379_v4 = vpack.i.bf16 %v3105_v29, %v3102_v18  ;;  %v3526_v13 = vld [vmem:[%s4224_s17 + $0x120] sm:$0xff]   ;;  %v3213_v18 = vunpack.c.l.bf16 %v3527_v11 }
  0x45   : > { %v3209_v24 = vunpack.c.l.bf16 %v3526_v13  ;;  %v3210_v23 = vunpack.c.h.bf16 %v3526_v13  ;;  %v4403_v29 = vld [vmem:[%s4224_s17 + $0x144] ss:$92 sps:$4 sm:$0xff]   ;;  %v3238_v58 = vunpack.c.h.bf16 %v3533_v52 }
  0x46   : > { %v3771_v21 = vpack.i.bf16 %v3202_v5, %v3201_v7  ;;  %v894_v31 = vunpack.c.l.bf16 %v4403_v29  ;;  %v3786_v32 = vpack.i.bf16 %v3214_v22, %v3213_v18  ;;  %v3538_v5 = vld [vmem:[%s4224_s17 + $0x190] sm:$0xff]   ;;  %v917_v26 = vunpack.c.h.bf16 %v4403_v29 }
  0x47   : > { %v3781_v33 = vpack.i.bf16 %v3210_v23, %v3209_v24  ;;  %v3821_v0 = vpack.i.bf16 %v3238_v58, %v3237_v57  ;;  %v3257_v13 = vunpack.c.l.bf16 %v3538_v5  ;;  %v3258_v18 = vunpack.c.h.bf16 %v3538_v5  ;;  %v2917_v24 = vld [vmem:[%s4224_s17 + $0x1a4] sm:$0x3]  ;;  %v3539_v23 = vld [vmem:[%s4224_s17 + $0x198] sm:$0xff]  }
  0x48   : > { %3737 = vperm.xlu1 %3620, %v3736_v27   ;;  %3732 = vperm.xlu0 %3609, %v3731_v36   ;;  %v3796_v20 = vpack.i.bf16 %v894_v31, %v685_v30  ;;  %v3791_v27 = vpack.i.bf16 %v3218_v37, %v3217_v34  ;;  %v3221_v36 = vunpack.c.l.bf16 %v3529_v45  ;;  %v918_v28 = vunpack.c.l.bf16 %v2917_v24  ;;  %v3541_v34 = vld [vmem:[%s4224_s17 + $0x1b8] sm:$0xff]   ;;  %v3540_v37 = vld [vmem:[%s4224_s17 + $0x1b0] sm:$0xff]   ;;  %v3546_v57 = vld [vmem:[%s4224_s17 + $0x1e0] sm:$0xff]  }
  0x49   : > { %v3846_v30 = vpack.i.bf16 %v3258_v18, %v3257_v13  ;;  %v3269_v45 = vunpack.c.l.bf16 %v3541_v34  ;;  %v3270_v25 = vunpack.c.h.bf16 %v3541_v34  ;;  %v3265_v29 = vunpack.c.l.bf16 %v3540_v37  ;;  %v3551_v18 = vld [vmem:[%s4224_s17 + $0x208] sm:$0xff]  }
  0x4a   : > { %v3801_v48 = vpack.i.bf16 %v3222_v39, %v3221_v36  ;;  %v3856_v38 = vpack.i.bf16 %v918_v28, %v917_v26  ;;  %v3542_v36 = vld [vmem:[%s4224_s17 + $0x1c0] sm:$0xff]   ;;  %v3277_v39 = vunpack.c.l.bf16 %v3543_v35  ;;  %v3310_v24 = vunpack.c.h.bf16 %v3551_v18 }
  0x4b   : > { %v3273_v44 = vunpack.c.l.bf16 %v3542_v36  ;;  %v348_v35 = vlaneseq }
  0x4c   : > { %3747 = vperm.xlu1 %3620, %v3746_v49   ;;  %3742 = vperm.xlu0 %3609, %v3741_v51   ;;  %v3230_v49 = vunpack.c.h.bf16 %v3531_v42  ;;  %v3534_v51 = vld [vmem:[%s4224_s17 + $0x170] sm:$0xff]   ;;  %v3866_v42 = vpack.i.bf16 %v3270_v25, %v3269_v45 }
  0x4d   : > { %v3241_v54 = vunpack.c.l.bf16 %v3534_v51  ;;  %v3242_v56 = vunpack.c.h.bf16 %v3534_v51 }
  0x4e   : > { %v3811_v55 = vpack.i.bf16 %v3230_v49, %v3229_v50  ;;  %v3544_v50 = vld [vmem:[%s4224_s17 + $0x1d0] sm:$0xff]   ;;  %v3876_v49 = vpack.i.bf16 %v3278_v41, %v3277_v39 }
  0x50   : > { %3757 = vperm.xlu1 %3620, %v3756_v59   ;;  %3752 = vperm.xlu0 %3609, %v3751_v60   ;;  %v3536_v59 = vld [vmem:[%s4224_s17 + $0x180] sm:$0xff]   ;;  %v3535_v60 = vld [vmem:[%s4224_s17 + $0x178] sm:$0xff]  }
  0x51   : > { %v3249_v61 = vunpack.c.l.bf16 %v3536_v59  ;;  %v3250_v62 = vunpack.c.h.bf16 %v3536_v59  ;;  %v3245_v2 = vunpack.c.l.bf16 %v3535_v60  ;;  %v3246_v7 = vunpack.c.h.bf16 %v3535_v60 }
  0x53   : > { %v3836_v11 = vpack.i.bf16 %v3250_v62, %v3249_v61  ;;  %v3289_v62 = vunpack.c.l.bf16 %v3546_v57 }
  0x54   : > { %3767 = vperm.xlu1 %3620, %v3766_v63   ;;  %3762 = vperm.xlu0 %3609, %v3761_v10   ;;  %v3826_v63 = vpack.i.bf16 %v3242_v56, %v3241_v54  ;;  %v3537_v10 = vld [vmem:[%s4224_s17 + $0x188] sm:$0xff]   ;;  %v3281_v54 = vunpack.c.l.bf16 %v3544_v50 }
  0x55   : > { %v3254_v22 = vunpack.c.h.bf16 %v3537_v10  ;;  %v3547_v56 = vld [vmem:[%s4224_s17 + $0x1e8] sm:$0xff]  }
  0x56   : > { %v3293_v58 = vunpack.c.l.bf16 %v3547_v56  ;;  %v3294_v59 = vunpack.c.h.bf16 %v3547_v56  ;;  %v221_v56 = vld [vmem:[%s5747_s1] sm:$0x1] }
  0x58   : > { %3777 = vperm.xlu1 %3620, %v3776_v17   ;;  %3772 = vperm.xlu0 %3609, %v3771_v21   ;;  %v3831_v17 = vpack.i.bf16 %v3246_v7, %v3245_v2  ;;  %v3253_v21 = vunpack.c.l.bf16 %v3537_v10  ;;  %v3548_v2 = vld [vmem:[%s4224_s17 + $0x1f0] sm:$0xff]   ;;  %v3896_v7 = vpack.i.bf16 %v3294_v59, %v3293_v58 }
  0x59   : > { %v3297_v13 = vunpack.c.l.bf16 %v3548_v2 }
  0x5a   : > { %v3841_v31 = vpack.i.bf16 %v3254_v22, %v3253_v21  ;;  %v3550_v21 = vld [vmem:[%s4224_s17 + $0x200] sm:$0xff]   ;;  %v3309_v22 = vunpack.c.l.bf16 %v3551_v18 }
  0x5b   : > { %v3305_v28 = vunpack.c.l.bf16 %v3550_v21  ;;  %v1567_v18 = vld [vmem:[%s4224_s17 + $0x4] sm:$0x8] }
  0x5c   : > { %3787 = vperm.xlu1 %3620, %v3786_v32   ;;  %3782 = vperm.xlu0 %3609, %v3781_v33   ;;  %v3261_v32 = vunpack.c.l.bf16 %v3539_v23  ;;  %v3262_v33 = vunpack.c.h.bf16 %v3539_v23  ;;  %v3916_v34 = vpack.i.bf16 %v3310_v24, %v3309_v22 }
  0x60   : > { %3797 = vperm.xlu1 %3620, %v3796_v20   ;;  %3792 = vperm.xlu0 %3609, %v3791_v27   ;;  %v3851_v20 = vpack.i.bf16 %v3262_v33, %v3261_v32  ;;  %v3266_v27 = vunpack.c.h.bf16 %v3540_v37  ;;  %v2943_v32 = vld [vmem:[%s4224_s17 + $0x210] sm:$0x3]  ;;  %v4435_v33 = vld [vmem:[%s4224_s17 + $0x21c] ss:$92 sps:$4 sm:$0xff]  }
  0x61   : > { %v1360_v25 = vunpack.c.l.bf16 %v4435_v33 }
  0x62   : > { %v3861_v43 = vpack.i.bf16 %v3266_v27, %v3265_v29  ;;  %v3554_v29 = vld [vmem:[%s4224_s17 + $0x230] sm:$0xff]   ;;  %v3553_v27 = vld [vmem:[%s4224_s17 + $0x228] sm:$0xff]  }
  0x63   : > { %v3322_v39 = vunpack.c.h.bf16 %v3554_v29 }
  0x64   : > { %3807 = vperm.xlu1 %3620, %v3806_v47   ;;  %3802 = vperm.xlu0 %3609, %v3801_v48   ;;  %v3274_v47 = vunpack.c.h.bf16 %v3542_v36  ;;  %v3545_v48 = vld [vmem:[%s4224_s17 + $0x1d8] sm:$0xff]   ;;  %v3321_v36 = vunpack.c.l.bf16 %v3554_v29 }
  0x65   : > { %v3285_v51 = vunpack.c.l.bf16 %v3545_v48 }
  0x66   : > { %v3871_v52 = vpack.i.bf16 %v3274_v47, %v3273_v44  ;;  %v3318_v44 = vunpack.c.h.bf16 %v3553_v27  ;;  %v3556_v47 = vld [vmem:[%s4224_s17 + $0x240] sm:$0xff]  }
  0x68   : > { %3817 = vperm.xlu1 %3620, %v3816_v53   ;;  %3812 = vperm.xlu0 %3609, %v3811_v55   ;;  %v3286_v53 = vunpack.c.h.bf16 %v3545_v48  ;;  %v3282_v55 = vunpack.c.h.bf16 %v3544_v50  ;;  %v3555_v48 = vld [vmem:[%s4224_s17 + $0x238] sm:$0xff]   ;;  %v3558_v50 = vld [vmem:[%s4224_s17 + $0x250] sm:$0xff]  }
  0x69   : > { %v3326_v58 = vunpack.c.h.bf16 %v3555_v48  ;;  %v3337_v59 = vunpack.c.l.bf16 %v3558_v50 }
  0x6a   : > { %v3886_v60 = vpack.i.bf16 %v3286_v53, %v3285_v51  ;;  %v3881_v61 = vpack.i.bf16 %v3282_v55, %v3281_v54  ;;  %v3557_v51 = vld [vmem:[%s4224_s17 + $0x248] sm:$0xff]   ;;  %v3329_v53 = vunpack.c.l.bf16 %v3556_v47  ;;  %v3330_v54 = vunpack.c.h.bf16 %v3556_v47 }
  0x6b   : > { %v3325_v55 = vunpack.c.l.bf16 %v3555_v48 }
  0x6c   : > { %3827 = vperm.xlu1 %3620, %v3826_v63   ;;  %3822 = vperm.xlu0 %3609, %v3821_v0   ;;  %v3290_v63 = vunpack.c.h.bf16 %v3546_v57  ;;  %v3549_v0 = vld [vmem:[%s4224_s17 + $0x1f8] sm:$0xff]  }
  0x6d   : > { %v3301_v5 = vunpack.c.l.bf16 %v3549_v0 }
  0x6e   : > { %v3891_v10 = vpack.i.bf16 %v3290_v63, %v3289_v62  ;;  %v3334_v62 = vunpack.c.h.bf16 %v3557_v51  ;;  %v3560_v63 = vld [vmem:[%s4224_s17 + $0x260] sm:$0xff]  }
  0x6f   : > { %v3345_v24 = vunpack.c.l.bf16 %v3560_v63 }
  0x70   : > { %3837 = vperm.xlu1 %3620, %v3836_v11   ;;  %3832 = vperm.xlu0 %3609, %v3831_v17   ;;  %v3302_v11 = vunpack.c.h.bf16 %v3549_v0  ;;  %v3298_v17 = vunpack.c.h.bf16 %v3548_v2  ;;  %v3559_v0 = vld [vmem:[%s4224_s17 + $0x258] sm:$0xff]   ;;  %v3562_v2 = vld [vmem:[%s4224_s17 + $0x270] sm:$0xff]  }
  0x72   : > { %v3906_v23 = vpack.i.bf16 %v3302_v11, %v3301_v5  ;;  %v3901_v26 = vpack.i.bf16 %v3298_v17, %v3297_v13  ;;  %v3946_v13 = vpack.i.bf16 %v3330_v54, %v3329_v53  ;;  %v3561_v17 = vld [vmem:[%s4224_s17 + $0x268] sm:$0xff]   ;;  %v3575_v54 = vld [vmem:[%s4224_s17 + $0x78] sm:$0xff]  }
  0x73   : > { %v3350_v29 = vunpack.c.h.bf16 %v3561_v17 }
  0x74   : > { %3847 = vperm.xlu1 %3620, %v3846_v30   ;;  %3842 = vperm.xlu0 %3609, %v3841_v31   ;;  %v3306_v30 = vunpack.c.h.bf16 %v3550_v21  ;;  %v3552_v31 = vld [vmem:[%s4224_s17 + $0x220] sm:$0xff]   ;;  %v3941_v21 = vpack.i.bf16 %v3326_v58, %v3325_v55  ;;  %v2972_v55 = vld [vmem:[%s4224_s17 + $0x70] sm:$0x8] }
  0x75   : > { %v3313_v37 = vunpack.c.l.bf16 %v3552_v31  ;;  %v3314_v45 = vunpack.c.h.bf16 %v3552_v31 }
  0x77   : > { %v3926_v41 = vpack.i.bf16 %v3314_v45, %v3313_v37  ;;  %v3353_v37 = vunpack.c.l.bf16 %v3562_v2  ;;  %v1592_v45 = vld [vmem:[%s4224_s17 + $0x68] sm:$0x1] }
  0x78   : > { %3857 = vperm.xlu1 %3620, %v3856_v38   ;;  %3852 = vperm.xlu0 %3609, %v3851_v20   ;;  %v3911_v38 = vpack.i.bf16 %v3306_v30, %v3305_v28  ;;  %v1151_v20 = vunpack.c.l.bf16 %v2943_v32  ;;  %v2866_v28 = vld [vmem:[%s5747_s1 + $0x1] sm:$0x1]  ;;  %v3573_v30 = vld [vmem:[%s4224_s17 + $0x58] sm:$0xff]   ;;  %v3341_v32 = vunpack.c.l.bf16 %v3559_v0  ;;  %v1618_v47 = vunpack.c.l.bf16 %v1592_v45 }
  0x79   : > { %v3398_v48 = vunpack.c.h.bf16 %v3573_v30 }
  0x7c   : > { %3867 = vperm.xlu1 %3620, %v3866_v42   ;;  %3862 = vperm.xlu0 %3609, %v3861_v43   ;;  %v3921_v42 = vpack.i.bf16 %v1360_v25, %v1151_v20  ;;  %v3317_v43 = vunpack.c.l.bf16 %v3553_v27  ;;  %v3354_v20 = vunpack.c.h.bf16 %v3562_v2  ;;  %v3349_v25 = vunpack.c.l.bf16 %v3561_v17  ;;  %v3578_v17 = vld [vmem:[%s4224_s17 + $0x90] sm:$0xff]  }
  0x7d   : > { %v1593_v27 = vunpack.c.l.bf16 %v1567_v18  ;;  %v3405_v18 = vunpack.c.l.bf16 %v3575_v54 }
  0x7e   : > { %v3931_v57 = vpack.i.bf16 %v3318_v44, %v3317_v43  ;;  %v3397_v43 = vunpack.c.l.bf16 %v3573_v30  ;;  %v3976_v53 = vpack.i.bf16 %v3354_v20, %v3353_v37  ;;  %v3417_v20 = vunpack.c.l.bf16 %v3578_v17 }
  0x80   : > { %3877 = vperm.xlu1 %3620, %v3876_v49   ;;  %3872 = vperm.xlu0 %3609, %v3871_v52   ;;  %v349_v49 = vshrl.u32 %v348_v35, 7  ;;  %v3936_v52 = vpack.i.bf16 %v3322_v39, %v3321_v36  ;;  %v1383_v39 = vunpack.c.h.bf16 %v4435_v33  ;;  %v4498_v2 = vpack.i.bf16 %v3397_v43, %v3122_v46 }
  0x82   : > { %v4450_v5 = vsub.s32 0, %v349_v49  ;;  %v2892_v49 = vld [vmem:[%s5747_s1 + $0x2] sm:$0x1] }
  0x84   : > { %3887 = vperm.xlu1 %3620, %v3886_v60   ;;  %3882 = vperm.xlu0 %3609, %v3881_v61   ;;  %v3338_v60 = vunpack.c.h.bf16 %v3558_v50  ;;  %v3333_v61 = vunpack.c.l.bf16 %v3557_v51  ;;  %5756 = vst [vmem:[#allocation2_spill] sm:$0xff] %v4450_v5 }
  0x86   : > { %v3956_v22 = vpack.i.bf16 %v3338_v60, %v3337_v59  ;;  %v3951_v31 = vpack.i.bf16 %v3334_v62, %v3333_v61  ;;  %v3971_v59 = vpack.i.bf16 %v3350_v29, %v3349_v25  ;;  %v4487_v60 = vpack.i.bf16 %v3085_v12, %v1593_v27  ;;  %v3585_v29 = vld [vmem:[%s4224_s17 + $0xc8] sm:$0xff]  }
  0x87   : > { %v688_v12 = vunpack.c.l.bf16 %v2892_v49  ;;  %v3418_v25 = vunpack.c.h.bf16 %v3578_v17 }
  0x88   : > { %3897 = vperm.xlu1 %3620, %v3896_v7   ;;  %3892 = vperm.xlu0 %3609, %v3891_v10   ;;  %v222_v7 = vunpack.c.l.bf16 %v221_v56  ;;  %v4479_v56 = vld [vmem:[%s4224_s17 + $0x74] ss:$92 sps:$4 sm:$0xff]  }
  0x8a   : > { %v4474_v51 = vrot.slane %v222_v7, %v4450_v5 }
  0x8c   : > { %3907 = vperm.xlu1 %3620, %v3906_v23   ;;  %3902 = vperm.xlu0 %3609, %v3901_v26   ;;  %v3346_v23 = vunpack.c.h.bf16 %v3560_v63  ;;  %v2969_v26 = vld [vmem:[%s4224_s17 + $0x27c] sm:$0x3]  ;;  %v3577_v63 = vld [vmem:[%s4224_s17 + $0x88] sm:$0xff]  }
  0x8d   : > { %v3413_v40 = vunpack.c.l.bf16 %v3577_v63  ;;  %v3414_v46 = vunpack.c.h.bf16 %v3577_v63 }
  0x8e   : > { %v3966_v33 = vpack.i.bf16 %v3346_v23, %v3345_v24  ;;  %v1936_v24 = vunpack.c.l.bf16 %v2972_v55  ;;  %v3581_v23 = vld [vmem:[%s4224_s17 + $0xa8] sm:$0xff]   ;;  %v3446_v55 = vunpack.c.h.bf16 %v3585_v29 }
  0x8f   : > { %v3429_v27 = vunpack.c.l.bf16 %v3581_v23 }
  0x90   : > { %3917 = vperm.xlu1 %3620, %v3916_v34   ;;  %3912 = vperm.xlu0 %3609, %v3911_v38   ;;  %v3342_v34 = vunpack.c.h.bf16 %v3559_v0  ;;  %v3574_v38 = vld [vmem:[%s4224_s17 + $0x60] sm:$0xff]  }
  0x91   : > { %v3402_v44 = vunpack.c.h.bf16 %v3574_v38  ;;  %v3401_v50 = vunpack.c.l.bf16 %v3574_v38  ;;  %v3576_v0 = vld [vmem:[%s4224_s17 + $0x80] sm:$0xff]  }
  0x92   : > { %v3410_v30 = vunpack.c.h.bf16 %v3576_v0 }
  0x93   : > { %v4500_v7 = vpack.i.bf16 %v1618_v47, %v3402_v44  ;;  %v4502_v8 = vpack.i.bf16 %v3401_v50, %v3398_v48  ;;  %v4517_v50 = vrot.slane %v688_v12, %v4450_v5  ;;  %v2999_v12 = vld [vmem:[%s4224_s17 + $0xdc] sm:$0x8] }
  0x94   : > { %3927 = vperm.xlu1 %3620, %v3926_v41   ;;  %3922 = vperm.xlu0 %3609, %v3921_v42   ;;  %v1384_v41 = vunpack.c.l.bf16 %v2969_v26  ;;  %v455_v42 = vunpack.c.l.bf16 %v2866_v28  ;;  %v3580_v26 = vld [vmem:[%s4224_s17 + $0xa0] sm:$0xff]   ;;  %v3409_v28 = vunpack.c.l.bf16 %v3576_v0 }
  0x95   : > { %5757 = vst [vmem:[#allocation3_spill] sm:$0xff] %v4517_v50 }
  0x96   : > { %v4489_v61 = vpack.i.bf16 %v1384_v41, %v1383_v39  ;;  %v4492_v62 = vrot.slane %v455_v42, %v4450_v5  ;;  %v3430_v39 = vunpack.c.h.bf16 %v3581_v23  ;;  %v3425_v41 = vunpack.c.l.bf16 %v3580_v26 }
  0x97   : > { %v4452_v10 = vpop.permute.xlu1 %3622  ;;  %v4454_v11 = vpop.permute.xlu0 %3611  ;;  %v3426_v42 = vunpack.c.h.bf16 %v3580_v26  ;;  %v4530_v17 = vpack.i.bf16 %v3410_v30, %v3409_v28  ;;  %v4537_v26 = vpack.i.bf16 %v3418_v25, %v3417_v20  ;;  %v2278_v25 = vunpack.c.l.bf16 %v2999_v12 }
  0x98   : > { %3937 = vperm.xlu1 %3620, %v3936_v52   ;;  %3932 = vperm.xlu0 %3609, %v3931_v57   ;;  %v3961_v52 = vpack.i.bf16 %v3342_v34, %v3341_v32  ;;  %v3582_v32 = vld [vmem:[%s4224_s17 + $0xb0] sm:$0xff]  }
  0x99   : > { %v3433_v47 = vunpack.c.l.bf16 %v3582_v32  ;;  %v3434_v48 = vunpack.c.h.bf16 %v3582_v32  ;;  %5759 = vst [vmem:[#allocation5_spill] sm:$0xff] %v4530_v17  ;;  %5761 = vst [vmem:[#allocation7_spill] sm:$0xff] %v4537_v26  ;;  %v3589_v32 = vld [vmem:[%s4224_s17 + $0xf8] sm:$0xff]   ;;  %v4588_v17 = vld [vmem:[%s4224_s17 + $0x128] sm:$0xff]  }
  0x9b   : > { %v4465_v35 = vpop.permute.xlu1 %3627  ;;  %v4467_v36 = vpop.permute.xlu0 %3616  ;;  %v4550_v30 = vpack.i.bf16 %v3434_v48, %v3433_v47 }
  0x9c   : > { %3947 = vperm.xlu1 %3620, %v3946_v13   ;;  %3942 = vperm.xlu0 %3609, %v3941_v21   ;;  %v3579_v13 = vld [vmem:[%s4224_s17 + $0x98] sm:$0xff]   ;;  %v3406_v21 = vunpack.c.h.bf16 %v3575_v54  ;;  %v3445_v54 = vunpack.c.l.bf16 %v3585_v29  ;;  %v1960_v29 = vunpack.c.h.bf16 %v4479_v56 }
  0x9d   : > { %v3421_v38 = vunpack.c.l.bf16 %v3579_v13  ;;  %v3422_v45 = vunpack.c.h.bf16 %v3579_v13  ;;  %v4528_v13 = vpack.i.bf16 %v3414_v46, %v3413_v40  ;;  %v3587_v40 = vld [vmem:[%s4224_s17 + $0xe8] sm:$0xff]   ;;  %v3588_v46 = vld [vmem:[%s4224_s17 + $0xf0] sm:$0xff]   ;;  %5765 = vst [vmem:[#allocation11_spill] sm:$0xff] %v4550_v30  ;;  %v4565_v30 = vld [vmem:[%s4224_s17 + $0x120] sm:$0xff]  }
  0x9e   : > { %v4519_v49 = vpack.i.bf16 %v3406_v21, %v3405_v18  ;;  %v3586_v18 = vld [vmem:[%s4224_s17 + $0xe0] sm:$0xff]   ;;  %v2997_v21 = vld [vmem:[%s4224_s17 + $0xd4] sm:$0x1]  ;;  %v3454_v47 = vunpack.c.h.bf16 %v3587_v40  ;;  %v3457_v48 = vunpack.c.l.bf16 %v3588_v46  ;;  %5767 = vst [vmem:[#allocation13_spill] sm:$0xff] %v4565_v30  ;;  %v3481_v26 = vunpack.c.l.bf16 %v4565_v30 }
  0x9f   : > { %v4481_v57 = vpop.permute.xlu1 %3637  ;;  %v4483_v58 = vpop.permute.xlu0 %3632  ;;  %5758 = vst [vmem:[#allocation4_spill] sm:$0xff] %v4528_v13  ;;  %v4532_v23 = vpack.i.bf16 %v3422_v45, %v3421_v38  ;;  %v3590_v38 = vld [vmem:[%s4224_s17 + $0x100] sm:$0xff]   ;;  %v4554_v45 = vpack.i.bf16 %v3446_v55, %v3445_v54  ;;  %v3449_v20 = vunpack.c.l.bf16 %v3586_v18  ;;  %v3450_v54 = vunpack.c.h.bf16 %v3586_v18  ;;  %v4591_v13 = vld [vmem:[%s4224_s17 + $0x130] sm:$0xff]  }
  0xa0   : > { %3957 = vperm.xlu1 %3620, %v3956_v22   ;;  %3952 = vperm.xlu0 %3609, %v3951_v31   ;;  %v1937_v22 = vunpack.c.l.bf16 %v4479_v56  ;;  %v3583_v31 = vld [vmem:[%s4224_s17 + $0xb8] sm:$0xff]   ;;  %v3453_v55 = vunpack.c.l.bf16 %v3587_v40  ;;  %v3462_v56 = vunpack.c.h.bf16 %v3589_v32  ;;  %v3465_v12 = vunpack.c.l.bf16 %v3590_v38  ;;  %5768 = vst [vmem:[#allocation14_spill] sm:$0xff] %v4591_v13 }
  0xa1   : > { %v3437_v43 = vunpack.c.l.bf16 %v3583_v31  ;;  %v3438_v44 = vunpack.c.h.bf16 %v3583_v31  ;;  %5760 = vst [vmem:[#allocation6_spill] sm:$0xff] %v4532_v23  ;;  %v4539_v31 = vpack.i.bf16 %v3430_v39, %v3429_v27  ;;  %5766 = vst [vmem:[#allocation12_spill] sm:$0xff] %v4554_v45  ;;  %v3591_v27 = vld [vmem:[%s4224_s17 + $0x108] sm:$0xff]   ;;  %v3592_v39 = vld [vmem:[%s4224_s17 + $0x110] sm:$0xff]   ;;  %v3458_v45 = vunpack.c.h.bf16 %v3588_v46 }
  0xa2   : > { %v4526_v0 = vpack.i.bf16 %v1937_v22, %v1936_v24  ;;  %v4541_v24 = vpack.i.bf16 %v3426_v42, %v3425_v41  ;;  %v2918_v22 = vld [vmem:[%s5747_s1 + $0x3] sm:$0x1]  ;;  %v4576_v18 = vpack.i.bf16 %v3449_v20, %v2278_v25  ;;  %v3474_v40 = vunpack.c.h.bf16 %v3592_v39 }
  0xa3   : > { %v4511_v34 = vpop.permute.xlu1 %3647  ;;  %v4513_v37 = vpop.permute.xlu0 %3642  ;;  %5762 = vst [vmem:[#allocation8_spill] sm:$0xff] %v4539_v31  ;;  %v4548_v28 = vpack.i.bf16 %v3438_v44, %v3437_v43  ;;  %v921_v43 = vunpack.c.l.bf16 %v2918_v22  ;;  %v1961_v44 = vunpack.c.l.bf16 %v2997_v21  ;;  %v3473_v31 = vunpack.c.l.bf16 %v3592_v39 }
  0xa4   : > { %3967 = vperm.xlu1 %3620, %v3966_v33   ;;  %3962 = vperm.xlu0 %3609, %v3961_v52   ;;  %v3584_v33 = vld [vmem:[%s4224_s17 + $0xc0] sm:$0xff]   ;;  %5763 = vst [vmem:[#allocation9_spill] sm:$0xff] %v4541_v24  ;;  %v3470_v24 = vunpack.c.h.bf16 %v3591_v27  ;;  %v3466_v22 = vunpack.c.h.bf16 %v3590_v38  ;;  %v3469_v21 = vunpack.c.l.bf16 %v3591_v27  ;;  %v4585_v27 = vpack.i.bf16 %v3457_v48, %v3454_v47 }
  0xa5   : > { %5764 = vst [vmem:[#allocation10_spill] sm:$0xff] %v4548_v28  ;;  %v3461_v28 = vunpack.c.l.bf16 %v3589_v32  ;;  %v4581_v32 = vrot.slane %v921_v43, %v4450_v5  ;;  %v4583_v38 = vpack.i.bf16 %v1961_v44, %v1960_v29  ;;  %v4596_v20 = vpack.i.bf16 %v3465_v12, %v3462_v56 }
  0xa6   : > { %v4601_v25 = vpack.i.bf16 %v3473_v31, %v3470_v24  ;;  %v4603_v29 = vpack.i.bf16 %v3469_v21, %v3466_v22  ;;  %v3614_v43 = vunpack.i.h.bf16 %v4454_v11  ;;  %v3630_v31 = vunpack.i.h.bf16 %v4465_v35 }
  0xa7   : > { %v4522_v52 = vpop.permute.xlu1 %3657  ;;  %v4524_v63 = vpop.permute.xlu0 %3652  ;;  %v3629_v24 = vunpack.i.l.bf16 %v4465_v35  ;;  %v3639_v35 = vunpack.i.l.bf16 %v4481_v57  ;;  %v3650_v12 = vunpack.i.h.bf16 %v4511_v34  ;;  %v3649_v22 = vunpack.i.l.bf16 %v4511_v34 }
  0xa8   : > { %3977 = vperm.xlu1 %3620, %v3976_v53   ;;  %3972 = vperm.xlu0 %3609, %v3971_v59   ;;  %v3441_v53 = vunpack.c.l.bf16 %v3584_v33  ;;  %v3442_v59 = vunpack.c.h.bf16 %v3584_v33  ;;  %v3593_v33 = vld [vmem:[%s4224_s17 + $0x118] sm:$0xff]   ;;  %5769 = vst [vmem:[#allocation15_spill] sm:$0xff] %v4601_v25  ;;  %5770 = vst [vmem:[#allocation16_spill] sm:$0xff] %v4603_v29  ;;  %v353_v56 = vmul.f32 %v3614_v43, %v4474_v51  ;;  %v3645_v21 = vunpack.i.h.bf16 %v4513_v37 }
  0xa9   : > { %v3478_v50 = vunpack.c.h.bf16 %v3593_v33  ;;  %v3477_v46 = vunpack.c.l.bf16 %v3593_v33 }
  0xab   : > { %v4559_v41 = vpop.permute.xlu1 %3667  ;;  %v4561_v42 = vpop.permute.xlu0 %3662  ;;  %v4605_v39 = vpack.i.bf16 %v3481_v26, %v3478_v50  ;;  %v4612_v48 = vpack.i.bf16 %v3477_v46, %v3474_v40  ;;  %v3655_v50 = vunpack.i.h.bf16 %v4524_v63 }
  0xac   : > { %3987 = vperm.xlu1 %3620, %v4487_v60   ;;  %3982 = vperm.xlu0 %3609, %v4489_v61   ;;  %v4574_v61 = vpack.i.bf16 %v3442_v59, %v3441_v53  ;;  %v3625_v53 = vunpack.i.h.bf16 %v4452_v10  ;;  %v4594_v59 = vpack.i.bf16 %v3453_v55, %v3450_v54  ;;  %v3618_v54 = vunpack.i.l.bf16 %v4467_v36 }
  0xad   : > { %5771 = vst [vmem:[#allocation17_spill] sm:$0xff] %v4605_v39  ;;  %5772 = vst [vmem:[#allocation18_spill] sm:$0xff] %v4612_v48  ;;  %v3640_v55 = vunpack.i.h.bf16 %v4481_v57  ;;  %v4646_v57 = vmul.f32 %v3630_v31, %v4474_v51  ;;  %v4663_v31 = vmul.f32 %v3639_v35, %v4474_v51  ;;  %v3665_v33 = vunpack.i.h.bf16 %v4561_v42 }
  0xae   : > { %v4623_v26 = vmul.f32 %v3625_v53, %v4474_v51  ;;  %v3644_v53 = vunpack.i.l.bf16 %v4513_v37  ;;  %v4673_v37 = vmul.f32 %v3650_v12, %v4474_v51  ;;  %v3654_v12 = vunpack.i.l.bf16 %v4524_v63 }
  0xaf   : > { %v4570_v23 = vpop.permute.xlu1 %3677  ;;  %v4572_v60 = vpop.permute.xlu0 %3672  ;;  %v4659_v43 = vmul.f32 %v3640_v55, %v4474_v51  ;;  %v3659_v55 = vunpack.i.l.bf16 %v4522_v52  ;;  %v3664_v5 = vunpack.i.l.bf16 %v4561_v42  ;;  %v4713_v29 = vmul.f32 %v3655_v50, %v4474_v51 }
  0xb0   : > { %3997 = vperm.xlu1 %3620, %v4349_v6   ;;  %3992 = vperm.xlu0 %3609, %v4355_v15   ;;  %v4598_v6 = vpack.i.bf16 %v3461_v28, %v3458_v45  ;;  %v3624_v15 = vunpack.i.l.bf16 %v4452_v10  ;;  %v3613_v10 = vunpack.i.l.bf16 %v4454_v11  ;;  %v3619_v45 = vunpack.i.h.bf16 %v4467_v36 }
  0xb1   : > { %v3680_v28 = vunpack.i.h.bf16 %v4570_v23  ;;  %v4716_v42 = vmul.f32 %v3654_v12, %v4474_v51  ;;  %v4731_v12 = vmul.f32 %v3665_v33, %v4474_v51 }
  0xb2   : > { %v4629_v11 = vmul.f32 %v3624_v15, %v4474_v51  ;;  %v4643_v46 = vmul.f32 %v3613_v10, %v4474_v51  ;;  %v4655_v34 = vmul.f32 %v3619_v45, %v4474_v51  ;;  %v354_v15 = vmul.f32 %v3618_v54, %v4474_v51 }
  0xb3   : > { %v4608_v44 = vpop.permute.xlu1 %3687  ;;  %v4610_v47 = vpop.permute.xlu0 %3682  ;;  %v3660_v10 = vunpack.i.h.bf16 %v4522_v52  ;;  %v4676_v45 = vmul.f32 %v3649_v22, %v4474_v51  ;;  %v4679_v54 = vmul.f32 %v3645_v21, %v4474_v51  ;;  %v3670_v52 = vunpack.i.h.bf16 %v4559_v41 }
  0xb4   : > { %4007 = vperm.xlu1 %3620, %v4361_v16   ;;  %4002 = vperm.xlu0 %3609, %v4367_v19   ;;  %v3635_v16 = vunpack.i.h.bf16 %v4483_v58  ;;  %v3634_v19 = vunpack.i.l.bf16 %v4483_v58  ;;  %v4649_v58 = vmul.f32 %v3629_v24, %v4474_v51  ;;  %v3669_v21 = vunpack.i.l.bf16 %v4559_v41 }
  0xb5   : > { %v4695_v22 = vmul.f32 %v3660_v10, %v4474_v51  ;;  %v3689_v10 = vunpack.i.l.bf16 %v4608_v44  ;;  %v3685_v48 = vunpack.i.h.bf16 %v4610_v47 }
  0xb6   : > { %v4666_v24 = vmul.f32 %v3635_v16, %v4474_v51 }
  0xb7   : > { %v4638_v36 = vpop.permute.xlu1 %3697  ;;  %v4640_v40 = vpop.permute.xlu0 %3692 }
  0xb8   : > { %4017 = vperm.xlu1 %3620, %v4373_v1   ;;  %4012 = vperm.xlu0 %3609, %v4379_v4   ;;  %v4669_v1 = vmul.f32 %v3634_v19, %v4474_v51  ;;  %v3679_v4 = vunpack.i.l.bf16 %v4570_v23  ;;  %v4687_v19 = vmul.f32 %v3644_v53, %v4474_v51  ;;  %v3675_v53 = vunpack.i.h.bf16 %v4572_v60 }
  0xb9   : > { %v3674_v23 = vunpack.i.l.bf16 %v4572_v60  ;;  %v587_v60 = vmul.f32 %v3680_v28, %v4492_v62  ;;  %v3699_v25 = vunpack.i.l.bf16 %v4638_v36  ;;  %v4734_v28 = vmul.f32 %v3664_v5, %v4474_v51 }
  0xba   : > { %v586_v63 = vmul.f32 %v3679_v4, %v4492_v62  ;;  %v3684_v4 = vunpack.i.l.bf16 %v4610_v47  ;;  %v585_v50 = vmul.f32 %v3675_v53, %v4492_v62  ;;  %v3700_v53 = vunpack.i.h.bf16 %v4638_v36 }
  0xbb   : > { %v4682_v35 = vpop.permute.xlu1 %3707  ;;  %v4684_v16 = vpop.permute.xlu0 %3702  ;;  %v4747_v33 = vadd.f32 %v587_v60, %v354_v15 }
  0xbc   : > { %4027 = vperm.xlu1 %3620, %v4385_v3   ;;  %4022 = vperm.xlu0 %3609, %v4393_v9   ;;  %v4705_v3 = vmul.f32 %v3659_v55, %v4474_v51  ;;  %v3690_v9 = vunpack.i.h.bf16 %v4608_v44  ;;  %v4723_v44 = vmul.f32 %v3670_v52, %v4474_v51  ;;  %v4726_v55 = vmul.f32 %v3669_v21, %v4474_v51 }
  0xbd   : > { %v4736_v47 = vadd.f32 %v586_v63, %v353_v56  ;;  %v590_v52 = vmul.f32 %v3689_v10, %v4492_v62  ;;  %v589_v21 = vmul.f32 %v3685_v48, %v4492_v62  ;;  %v588_v5 = vmul.f32 %v3684_v4, %v4492_v62 }
  0xbe   : > { %v3695_v56 = vunpack.i.h.bf16 %v4640_v40  ;;  %v4755_v63 = vadd.f32 %v585_v50, %v4643_v46  ;;  %v594_v48 = vmul.f32 %v3699_v25, %v4492_v62  ;;  %v3710_v36 = vunpack.i.h.bf16 %v4682_v35 }
  0xbf   : > { %v3718_v41 = vpop.permute.xlu1 %3717  ;;  %v4710_v39 = vpop.permute.xlu0 %3712  ;;  %v3709_v15 = vunpack.i.l.bf16 %v4682_v35  ;;  %v595_v25 = vmul.f32 %v3700_v53, %v4492_v62  ;;  %v4777_v4 = vadd.f32 %v588_v5, %v4655_v34 }
  0xc0   : > { %4037 = vperm.xlu1 %3620, %v4498_v2   ;;  %4032 = vperm.xlu0 %3609, %v4399_v14   ;;  %v4739_v14 = vmul.f32 %v3674_v23, %v4474_v51  ;;  %v591_v2 = vmul.f32 %v3690_v9, %v4492_v62  ;;  %v3694_v51 = vunpack.i.l.bf16 %v4640_v40  ;;  %v3705_v23 = vunpack.i.h.bf16 %v4684_v16 }
  0xc1   : > { %v3704_v9 = vunpack.i.l.bf16 %v4684_v16  ;;  %v3720_v10 = vunpack.i.h.bf16 %v3718_v41  ;;  %v3719_v60 = vunpack.i.l.bf16 %v3718_v41  ;;  %v4763_v40 = vadd.f32 %v590_v52, %v4623_v26 }
  0xc2   : > { %v593_v16 = vmul.f32 %v3695_v56, %v4492_v62  ;;  %v592_v26 = vmul.f32 %v3694_v51, %v4492_v62  ;;  %v3715_v41 = vunpack.i.h.bf16 %v4710_v39  ;;  %v598_v50 = vmul.f32 %v3709_v15, %v4492_v62  ;;  %v5773_v15 = vld [vmem:[#allocation4_spill] sm:$0xff] }
  0xc3   : > { %v3728_v30 = vpop.permute.xlu1 %3727  ;;  %v4745_v13 = vpop.permute.xlu0 %3722  ;;  %v597_v34 = vmul.f32 %v3705_v23, %v4492_v62  ;;  %v596_v52 = vmul.f32 %v3704_v9, %v4492_v62  ;;  %v602_v53 = vmul.f32 %v3719_v60, %v4492_v62  ;;  %v5774_v23 = vld [vmem:[#allocation5_spill] sm:$0xff] }
  0xc4   : > { %4047 = vperm.xlu1 %3620, %v4500_v7   ;;  %4042 = vperm.xlu0 %3609, %v4502_v8   ;;  %v4766_v7 = vadd.f32 %v591_v2, %v4649_v58  ;;  %v4769_v8 = vadd.f32 %v589_v21, %v4629_v11  ;;  %v619_v11 = vadd.f32 %v594_v48, %v4666_v24  ;;  %v3714_v2 = vunpack.i.l.bf16 %v4710_v39 }
  0xc5   : > { %v599_v58 = vmul.f32 %v3710_v36, %v4492_v62  ;;  %v603_v21 = vmul.f32 %v3720_v10, %v4492_v62  ;;  %v3729_v5 = vunpack.i.l.bf16 %v3728_v30  ;;  %v3724_v24 = vunpack.i.l.bf16 %v4745_v13 }
  0xc6   : > { %v617_v39 = vadd.f32 %v592_v26, %v4646_v57  ;;  %v618_v48 = vadd.f32 %v593_v16, %v4669_v1  ;;  %v601_v36 = vmul.f32 %v3715_v41, %v4492_v62  ;;  %v600_v10 = vmul.f32 %v3714_v2, %v4492_v62  ;;  %v5775_v2 = vld [vmem:[#allocation6_spill] sm:$0xff] }
  0xc7   : > { %v4772_v46 = vpop.permute.xlu1 %3737  ;;  %v4774_v35 = vpop.permute.xlu0 %3732  ;;  %v4808_v9 = vadd.f32 %v599_v58, %v4676_v45  ;;  %v3725_v60 = vunpack.i.h.bf16 %v4745_v13  ;;  %v621_v57 = vadd.f32 %v596_v52, %v4659_v43  ;;  %v622_v1 = vadd.f32 %v597_v34, %v4687_v19 }
  0xc8   : > { %4057 = vperm.xlu1 %3620, %v4519_v49   ;;  %4052 = vperm.xlu0 %3609, %v4526_v0   ;;  %v4793_v49 = vadd.f32 %v595_v25, %v4663_v31  ;;  %v3730_v0 = vunpack.i.h.bf16 %v3728_v30  ;;  %v3485_v31 = vunpack.c.l.bf16 %v4588_v17  ;;  %v623_v30 = vadd.f32 %v598_v50, %v4679_v54 }
  0xc9   : > { %v4815_v25 = vadd.f32 %v602_v53, %v4713_v29  ;;  %v4818_v16 = vadd.f32 %v603_v21, %v4705_v3  ;;  %v606_v54 = vmul.f32 %v3729_v5, %v4492_v62  ;;  %v604_v45 = vmul.f32 %v3724_v24, %v4492_v62  ;;  %v5776_v3 = vld [vmem:[#allocation7_spill] sm:$0xff] }
  0xca   : > { %v607_v26 = vmul.f32 %v3730_v0, %v4492_v62  ;;  %v3739_v41 = vunpack.i.l.bf16 %v4772_v46  ;;  %v626_v43 = vadd.f32 %v601_v36, %v4716_v42  ;;  %v625_v34 = vadd.f32 %v600_v10, %v4673_v37  ;;  %v5777_v5 = vld [vmem:[#allocation3_spill] sm:$0xff] }
  0xcb   : > { %v4796_v56 = vpop.permute.xlu1 %3747  ;;  %v4798_v51 = vpop.permute.xlu0 %3742  ;;  %v605_v52 = vmul.f32 %v3725_v60, %v4492_v62  ;;  %v3740_v21 = vunpack.i.h.bf16 %v4772_v46  ;;  %v3735_v53 = vunpack.i.h.bf16 %v4774_v35  ;;  %v3734_v0 = vunpack.i.l.bf16 %v4774_v35 }
  0xcc   : > { %4067 = vperm.xlu1 %3620, %v5773_v15   ;;  %4062 = vperm.xlu0 %3609, %v5774_v23   ;;  %v4839_v15 = vadd.f32 %v606_v54, %v4731_v12  ;;  %v4842_v23 = vadd.f32 %v607_v26, %v4726_v55  ;;  %v4845_v37 = vadd.f32 %v604_v45, %v4695_v22  ;;  %v5779_v12 = vld [vmem:[#allocation9_spill] sm:$0xff] }
  0xcd   : > { %v818_v46 = vmul.f32 %v3739_v41, %v5777_v5  ;;  %v630_v55 = vadd.f32 %v605_v52, %v4734_v28  ;;  %v4858_v45 = vmul.f32 %v3740_v21, %v5777_v5 }
  0xcf   : > { %v3758_v58 = vpop.permute.xlu1 %3757  ;;  %v4824_v13 = vpop.permute.xlu0 %3752  ;;  %v4864_v41 = vadd.f32 %v818_v46, %v4755_v63 }
  0xd0   : > { %v3760_v19 = vunpack.i.h.bf16 %v3758_v58  ;;  %v3759_v50 = vunpack.i.l.bf16 %v3758_v58  ;;  %v3755_v29 = vunpack.i.h.bf16 %v4824_v13  ;;  %4077 = vperm.xlu1 %3620, %v5775_v2   ;;  %4072 = vperm.xlu0 %3609, %v5776_v3  }
  0xd2   : > { %v827_v42 = vmul.f32 %v3760_v19, %v5777_v5  ;;  %v826_v24 = vmul.f32 %v3759_v50, %v5777_v5  ;;  %v825_v36 = vmul.f32 %v3755_v29, %v5777_v5  ;;  %v5778_v29 = vld [vmem:[#allocation8_spill] sm:$0xff] }
  0xd3   : > { %v3768_v10 = vpop.permute.xlu1 %3767  ;;  %v3763_v60 = vpop.permute.xlu0 %3762 }
  0xd4   : > { %v4848_v35 = vadd.f32 %v826_v24, %v618_v48  ;;  %v4850_v58 = vadd.f32 %v827_v42, %v619_v11  ;;  %v4852_v19 = vadd.f32 %v825_v36, %v617_v39  ;;  %v3770_v50 = vunpack.i.h.bf16 %v3768_v10  ;;  %4087 = vperm.xlu1 %3620, %v5778_v29   ;;  %4082 = vperm.xlu0 %3609, %v5779_v12  }
  0xd5   : > { %v3769_v26 = vunpack.i.l.bf16 %v3768_v10  ;;  %v3765_v22 = vunpack.i.h.bf16 %v3763_v60  ;;  %v3764_v54 = vunpack.i.l.bf16 %v3763_v60  ;;  %v609_v48 = vmul.f32 %v3735_v53, %v4492_v62  ;;  %v5780_v10 = vld [vmem:[#allocation10_spill] sm:$0xff] }
  0xd6   : > { %v608_v11 = vmul.f32 %v3734_v0, %v4492_v62  ;;  %v831_v39 = vmul.f32 %v3770_v50, %v5777_v5  ;;  %v5781_v62 = vld [vmem:[#allocation11_spill] sm:$0xff]  ;;  %v3749_v50 = vunpack.i.l.bf16 %v4796_v56 }
  0xd7   : > { %v830_v2 = vmul.f32 %v3769_v26, %v5777_v5  ;;  %v829_v3 = vmul.f32 %v3765_v22, %v5777_v5  ;;  %v828_v28 = vmul.f32 %v3764_v54, %v5777_v5  ;;  %v3778_v52 = vpop.permute.xlu1 %3777  ;;  %v3773_v42 = vpop.permute.xlu0 %3772  ;;  %v634_v26 = vadd.f32 %v609_v48, %v4739_v14 }
  0xd8   : > { %v4869_v24 = vadd.f32 %v831_v39, %v623_v30  ;;  %v3780_v21 = vunpack.i.h.bf16 %v3778_v52  ;;  %v3779_v36 = vunpack.i.l.bf16 %v3778_v52  ;;  %v3775_v53 = vunpack.i.h.bf16 %v3773_v42  ;;  %4097 = vperm.xlu1 %3620, %v5780_v10   ;;  %4092 = vperm.xlu0 %3609, %v5781_v62   ;;  %v5782_v52 = vld [vmem:[#allocation12_spill] sm:$0xff] }
  0xd9   : > { %v4873_v0 = vadd.f32 %v830_v2, %v622_v1  ;;  %v4876_v63 = vadd.f32 %v828_v28, %v4793_v49  ;;  %v4878_v46 = vadd.f32 %v829_v3, %v621_v57  ;;  %v3774_v60 = vunpack.i.l.bf16 %v3773_v42 }
  0xda   : > { %v835_v30 = vmul.f32 %v3780_v21, %v5777_v5  ;;  %v834_v29 = vmul.f32 %v3779_v36, %v5777_v5  ;;  %v833_v12 = vmul.f32 %v3775_v53, %v5777_v5  ;;  %v3750_v22 = vunpack.i.h.bf16 %v4796_v56 }
  0xdb   : > { %v3744_v1 = vunpack.i.l.bf16 %v4798_v51  ;;  %v832_v49 = vmul.f32 %v3774_v60, %v5777_v5  ;;  %v3788_v54 = vpop.permute.xlu1 %3787  ;;  %v3783_v57 = vpop.permute.xlu0 %3782  ;;  %v633_v21 = vadd.f32 %v608_v11, %v4723_v44 }
  0xdc   : > { %v4888_v39 = vadd.f32 %v834_v29, %v626_v43  ;;  %v4891_v2 = vadd.f32 %v835_v30, %v4815_v25  ;;  %v4893_v3 = vadd.f32 %v833_v12, %v625_v34  ;;  %v3790_v28 = vunpack.i.h.bf16 %v3788_v54  ;;  %4107 = vperm.xlu1 %3620, %v5782_v52   ;;  %4102 = vperm.xlu0 %3609, %v4574_v61  }
  0xdd   : > { %v4898_v14 = vadd.f32 %v832_v49, %v4808_v9  ;;  %v3789_v56 = vunpack.i.l.bf16 %v3788_v54  ;;  %v3785_v48 = vunpack.i.h.bf16 %v3783_v57  ;;  %v3784_v42 = vunpack.i.l.bf16 %v3783_v57 }
  0xde   : > { %v822_v43 = vmul.f32 %v3749_v50, %v5777_v5  ;;  %v3745_v25 = vunpack.i.h.bf16 %v4798_v51  ;;  %v839_v34 = vmul.f32 %v3790_v28, %v5777_v5  ;;  %v820_v36 = vmul.f32 %v3744_v1, %v5777_v5 }
  0xdf   : > { %v838_v53 = vmul.f32 %v3789_v56, %v5777_v5  ;;  %v837_v61 = vmul.f32 %v3785_v48, %v5777_v5  ;;  %v836_v9 = vmul.f32 %v3784_v42, %v5777_v5  ;;  %v3798_v10 = vpop.permute.xlu1 %3797  ;;  %v3793_v62 = vpop.permute.xlu0 %3792  ;;  %v3754_v1 = vunpack.i.l.bf16 %v4824_v13 }
  0xe0   : > { %v4909_v60 = vadd.f32 %v839_v34, %v4839_v15  ;;  %v3800_v44 = vunpack.i.h.bf16 %v3798_v10  ;;  %v3799_v11 = vunpack.i.l.bf16 %v3798_v10  ;;  %v3795_v50 = vunpack.i.h.bf16 %v3793_v62  ;;  %4117 = vperm.xlu1 %3620, %v4576_v18   ;;  %4112 = vperm.xlu0 %3609, %v4583_v38  }
  0xe1   : > { %v4913_v51 = vadd.f32 %v838_v53, %v630_v55  ;;  %v4916_v30 = vadd.f32 %v836_v9, %v4818_v16  ;;  %v4919_v29 = vadd.f32 %v837_v61, %v4845_v37  ;;  %v3794_v12 = vunpack.i.l.bf16 %v3793_v62 }
  0xe2   : > { %v1051_v15 = vmul.f32 %v3800_v44, %v4581_v32  ;;  %v842_v49 = vmul.f32 %v3799_v11, %v5777_v5  ;;  %v841_v54 = vmul.f32 %v3795_v50, %v5777_v5  ;;  %v844_v18 = vadd.f32 %v4858_v45, %v4736_v47 }
  0xe3   : > { %v823_v38 = vmul.f32 %v3750_v22, %v5777_v5  ;;  %v821_v16 = vmul.f32 %v3745_v25, %v5777_v5  ;;  %v840_v55 = vmul.f32 %v3794_v12, %v5777_v5  ;;  %v3808_v37 = vpop.permute.xlu1 %3807  ;;  %v3803_v57 = vpop.permute.xlu0 %3802  ;;  %v847_v42 = vadd.f32 %v822_v43, %v4769_v8 }
  0xe4   : > { %v4930_v28 = vadd.f32 %v842_v49, %v634_v26  ;;  %v4933_v13 = vadd.f32 %v1051_v15, %v4864_v41  ;;  %v4935_v52 = vadd.f32 %v841_v54, %v633_v21  ;;  %v3810_v56 = vunpack.i.h.bf16 %v3808_v37  ;;  %4127 = vperm.xlu1 %3620, %v4585_v27   ;;  %4122 = vperm.xlu0 %3609, %v4594_v59   ;;  %v5784_v15 = vld [vmem:[#allocation14_spill] sm:$0xff] }
  0xe5   : > { %v4940_v47 = vadd.f32 %v840_v55, %v4842_v23  ;;  %v3809_v45 = vunpack.i.l.bf16 %v3808_v37  ;;  %v3805_v22 = vunpack.i.h.bf16 %v3803_v57  ;;  %v3804_v48 = vunpack.i.l.bf16 %v3803_v57  ;;  %v3597_v55 = vld [vmem:[%s4224_s17 + $0x138] sm:$0xff]   ;;  %v3024_v37 = vld [vmem:[%s4224_s17 + $0x140] sm:$0x1] }
  0xe6   : > { %v845_v26 = vadd.f32 %v820_v36, %v4747_v33  ;;  %v824_v41 = vmul.f32 %v3754_v1, %v5777_v5  ;;  %v1055_v21 = vmul.f32 %v3810_v56, %v4581_v32  ;;  %v846_v25 = vadd.f32 %v821_v16, %v4777_v4 }
  0xe7   : > { %v1054_v27 = vmul.f32 %v3809_v45, %v4581_v32  ;;  %v1053_v59 = vmul.f32 %v3805_v22, %v4581_v32  ;;  %v1052_v23 = vmul.f32 %v3804_v48, %v4581_v32  ;;  %v3818_v34 = vpop.permute.xlu1 %3817  ;;  %v3813_v53 = vpop.permute.xlu0 %3812  ;;  %v5783_v1 = vunpack.c.h.bf16 %v4588_v17  ;;  %v5788_v45 = vld [vmem:[#allocation15_spill] sm:$0xff]  ;;  %v5789_v22 = vld [vmem:[#allocation16_spill] sm:$0xff] }
  0xe8   : > { %v4950_v61 = vadd.f32 %v1055_v21, %v847_v42  ;;  %v3820_v9 = vunpack.i.h.bf16 %v3818_v34  ;;  %v3819_v8 = vunpack.i.l.bf16 %v3818_v34  ;;  %v3815_v43 = vunpack.i.h.bf16 %v3813_v53  ;;  %4137 = vperm.xlu1 %3620, %v4596_v20   ;;  %4132 = vperm.xlu0 %3609, %v4598_v6  }
  0xe9   : > { %v4954_v33 = vadd.f32 %v1054_v27, %v846_v25  ;;  %v4956_v4 = vadd.f32 %v1052_v23, %v844_v18  ;;  %v4958_v5 = vadd.f32 %v1053_v59, %v845_v26  ;;  %v3814_v36 = vunpack.i.l.bf16 %v3813_v53  ;;  %v5786_v18 = vld [vmem:[#allocation13_spill] sm:$0xff] }
  0xea   : > { %v849_v10 = vadd.f32 %v824_v41, %v4766_v7  ;;  %v1059_v62 = vmul.f32 %v3820_v9, %v4581_v32  ;;  %v1058_v44 = vmul.f32 %v3819_v8, %v4581_v32  ;;  %v1057_v11 = vmul.f32 %v3815_v43, %v4581_v32 }
  0xeb   : > { %v848_v20 = vadd.f32 %v823_v38, %v4763_v40  ;;  %v1056_v6 = vmul.f32 %v3814_v36, %v4581_v32  ;;  %v3828_v50 = vpop.permute.xlu1 %3827  ;;  %v3823_v12 = vpop.permute.xlu0 %3822  ;;  %v5785_v49 = vunpack.c.l.bf16 %v5784_v15  ;;  %v5787_v16 = vunpack.c.h.bf16 %v5786_v18  ;;  %v5790_v36 = vld [vmem:[#allocation17_spill] sm:$0xff] }
  0xec   : > { %v4977_v57 = vadd.f32 %v1058_v44, %v4852_v19  ;;  %v4980_v40 = vadd.f32 %v1059_v62, %v4848_v35  ;;  %v4982_v38 = vadd.f32 %v1057_v11, %v849_v10  ;;  %v3830_v56 = vunpack.i.h.bf16 %v3828_v50  ;;  %4147 = vperm.xlu1 %3620, %v5788_v45   ;;  %4142 = vperm.xlu0 %3609, %v5789_v22   ;;  %v5791_v10 = vld [vmem:[#allocation18_spill] sm:$0xff] }
  0xed   : > { %v4166_v54 = vpack.i.bf16 %v5785_v49, %v5783_v1  ;;  %v4161_v7 = vpack.i.bf16 %v3485_v31, %v5787_v16  ;;  %v4986_v48 = vadd.f32 %v1056_v6, %v848_v20  ;;  %v3829_v42 = vunpack.i.l.bf16 %v3828_v50 }
  0xee   : > { %v3825_v17 = vunpack.i.h.bf16 %v3823_v12  ;;  %v3824_v31 = vunpack.i.l.bf16 %v3823_v12  ;;  %v1063_v26 = vmul.f32 %v3830_v56, %v4581_v32  ;;  %v3494_v41 = vunpack.c.h.bf16 %v3597_v55 }
  0xef   : > { %v2303_v19 = vunpack.c.l.bf16 %v3024_v37  ;;  %v3490_v21 = vunpack.c.h.bf16 %v5784_v15  ;;  %v1062_v35 = vmul.f32 %v3829_v42, %v4581_v32  ;;  %v3838_v59 = vpop.permute.xlu1 %3837  ;;  %v3833_v23 = vpop.permute.xlu0 %3832  ;;  %v3493_v34 = vunpack.c.l.bf16 %v3597_v55 }
  0xf0   : > { %v1061_v25 = vmul.f32 %v3825_v17, %v4581_v32  ;;  %v1060_v27 = vmul.f32 %v3824_v31, %v4581_v32  ;;  %v4994_v53 = vadd.f32 %v1063_v26, %v4873_v0  ;;  %v3840_v9 = vunpack.i.h.bf16 %v3838_v59  ;;  %4157 = vperm.xlu1 %3620, %v5790_v36   ;;  %4152 = vperm.xlu0 %3609, %v5791_v10  }
  0xf1   : > { %v3839_v8 = vunpack.i.l.bf16 %v3838_v59  ;;  %v3835_v43 = vunpack.i.h.bf16 %v3833_v23  ;;  %v4999_v62 = vadd.f32 %v1062_v35, %v4878_v46  ;;  %v3834_v20 = vunpack.i.l.bf16 %v3833_v23  ;;  %v5792_v23 = vld [vmem:[#allocation2_spill] sm:$0xff] }
  0xf2   : > { %v5002_v44 = vadd.f32 %v1060_v27, %v4850_v58  ;;  %v5005_v11 = vadd.f32 %v1061_v25, %v4876_v63  ;;  %v1067_v0 = vmul.f32 %v3840_v9, %v4581_v32  ;;  %v4176_v49 = vpack.i.bf16 %v2303_v19, %v3494_v41  ;;  %v2944_v58 = vld [vmem:[%s5747_s1 + $0x4] sm:$0x1] }
  0xf3   : > { %v1066_v6 = vmul.f32 %v3839_v8, %v4581_v32  ;;  %v1065_v50 = vmul.f32 %v3835_v43, %v4581_v32  ;;  %v1064_v12 = vmul.f32 %v3834_v20, %v4581_v32  ;;  %v3848_v1 = vpop.permute.xlu1 %3847  ;;  %v3843_v15 = vpop.permute.xlu0 %3842  ;;  %v4171_v46 = vpack.i.bf16 %v3493_v34, %v3490_v21 }
  0xf4   : > { %v5018_v18 = vadd.f32 %v1067_v0, %v4888_v39  ;;  %v3850_v55 = vunpack.i.h.bf16 %v3848_v1  ;;  %4167 = vperm.xlu1 %3620, %v4166_v54   ;;  %4162 = vperm.xlu0 %3609, %v4161_v7   ;;  %v3849_v56 = vunpack.i.l.bf16 %v3848_v1  ;;  %v3845_v45 = vunpack.i.h.bf16 %v3843_v15 }
  0xf5   : > { %v5015_v63 = vadd.f32 %v1066_v6, %v4893_v3  ;;  %v5021_v16 = vadd.f32 %v1065_v50, %v4898_v14  ;;  %v5024_v37 = vadd.f32 %v1064_v12, %v4869_v24  ;;  %v3844_v22 = vunpack.i.l.bf16 %v3843_v15 }
  0xf6   : > { %v1071_v42 = vmul.f32 %v3850_v55, %v4581_v32  ;;  %v1154_v17 = vunpack.c.l.bf16 %v2944_v58  ;;  %v1070_v3 = vmul.f32 %v3849_v56, %v4581_v32  ;;  %v1069_v39 = vmul.f32 %v3845_v45, %v4581_v32 }
  0xf7   : > { %v1068_v31 = vmul.f32 %v3844_v22, %v4581_v32  ;;  %v3858_v14 = vpop.permute.xlu1 %3857  ;;  %v3853_v26 = vpop.permute.xlu0 %3852 }
  0xf8   : > { %v5031_v54 = vadd.f32 %v1071_v42, %v4913_v51  ;;  %v3860_v7 = vunpack.i.h.bf16 %v3858_v14  ;;  %v3859_v24 = vunpack.i.l.bf16 %v3858_v14  ;;  %v3855_v41 = vunpack.i.h.bf16 %v3853_v26  ;;  %4177 = vperm.xlu1 %3620, %v4176_v49   ;;  %4172 = vperm.xlu0 %3609, %v4171_v46  }
  0xf9   : > { %v5034_v19 = vadd.f32 %v1070_v3, %v4919_v29  ;;  %v5037_v21 = vadd.f32 %v1068_v31, %v4891_v2  ;;  %v5040_v35 = vadd.f32 %v1069_v39, %v4916_v30  ;;  %v3854_v25 = vunpack.i.l.bf16 %v3853_v26 }
  0xfa   : > { %v1075_v27 = vmul.f32 %v3860_v7, %v4581_v32  ;;  %v1074_v51 = vmul.f32 %v3859_v24, %v4581_v32  ;;  %v1073_v59 = vmul.f32 %v3855_v41, %v4581_v32  ;;  %v5046_v34 = vrot.slane %v1154_v17, %v5792_v23 }
  0xfb   : > { %v1072_v9 = vmul.f32 %v3854_v25, %v4581_v32  ;;  %v3868_v29 = vpop.permute.xlu1 %3867  ;;  %v3863_v8 = vpop.permute.xlu0 %3862 }
  0xfc   : > { %v5050_v2 = vadd.f32 %v1074_v51, %v4935_v52  ;;  %v5053_v30 = vadd.f32 %v1075_v27, %v4930_v28  ;;  %v5056_v43 = vadd.f32 %v1073_v59, %v4940_v47  ;;  %v3870_v36 = vunpack.i.h.bf16 %v3868_v29 }
  0xfd   : > { %v5059_v10 = vadd.f32 %v1072_v9, %v4909_v60  ;;  %v3869_v20 = vunpack.i.l.bf16 %v3868_v29  ;;  %v3865_v0 = vunpack.i.h.bf16 %v3863_v8  ;;  %v3864_v6 = vunpack.i.l.bf16 %v3863_v8 }
  0xfe   : > { %v1287_v32 = vmul.f32 %v3870_v36, %v5046_v34 }
  0xff   : > { %v1286_v50 = vmul.f32 %v3869_v20, %v5046_v34  ;;  %v1285_v52 = vmul.f32 %v3865_v0, %v5046_v34  ;;  %v1284_v12 = vmul.f32 %v3864_v6, %v5046_v34  ;;  %v3878_v28 = vpop.permute.xlu1 %3877  ;;  %v3873_v1 = vpop.permute.xlu0 %3872 }
 0x100   : > { %v5066_v47 = vadd.f32 %v1287_v32, %v4954_v33  ;;  %v3880_v15 = vunpack.i.h.bf16 %v3878_v28  ;;  %v3879_v49 = vunpack.i.l.bf16 %v3878_v28  ;;  %v3875_v60 = vunpack.i.h.bf16 %v3873_v1 }
 0x101   : > { %v5069_v46 = vadd.f32 %v1286_v50, %v4958_v5  ;;  %v5072_v58 = vadd.f32 %v1284_v12, %v4933_v13  ;;  %v5075_v55 = vadd.f32 %v1285_v52, %v4956_v4  ;;  %v3874_v56 = vunpack.i.l.bf16 %v3873_v1 }
 0x102   : > { %v1291_v45 = vmul.f32 %v3880_v15, %v5046_v34  ;;  %v1290_v22 = vmul.f32 %v3879_v49, %v5046_v34  ;;  %v1289_v33 = vmul.f32 %v3875_v60, %v5046_v34 }
 0x103   : > { %v1288_v42 = vmul.f32 %v3874_v56, %v5046_v34  ;;  %v3888_v17 = vpop.permute.xlu1 %3887  ;;  %v3883_v3 = vpop.permute.xlu0 %3882 }
 0x104   : > { %v5082_v5 = vadd.f32 %v1290_v22, %v4982_v38  ;;  %v5085_v13 = vadd.f32 %v1291_v45, %v4977_v57  ;;  %v5088_v4 = vadd.f32 %v1289_v33, %v4986_v48  ;;  %v3890_v39 = vunpack.i.h.bf16 %v3888_v17 }
 0x105   : > { %v5091_v31 = vadd.f32 %v1288_v42, %v4950_v61  ;;  %v3889_v14 = vunpack.i.l.bf16 %v3888_v17  ;;  %v3885_v26 = vunpack.i.h.bf16 %v3883_v3  ;;  %v3884_v7 = vunpack.i.l.bf16 %v3883_v3 }
 0x106   : > { %v1295_v24 = vmul.f32 %v3890_v39, %v5046_v34 }
 0x107   : > { %v1294_v41 = vmul.f32 %v3889_v14, %v5046_v34  ;;  %v1293_v38 = vmul.f32 %v3885_v26, %v5046_v34  ;;  %v1292_v25 = vmul.f32 %v3884_v7, %v5046_v34  ;;  %v3898_v57 = vpop.permute.xlu1 %3897  ;;  %v3893_v27 = vpop.permute.xlu0 %3892 }
 0x108   : > { %v5098_v48 = vadd.f32 %v1295_v24, %v4999_v62  ;;  %v3900_v51 = vunpack.i.h.bf16 %v3898_v57  ;;  %v3899_v59 = vunpack.i.l.bf16 %v3898_v57  ;;  %v3895_v61 = vunpack.i.h.bf16 %v3893_v27 }
 0x109   : > { %v5101_v9 = vadd.f32 %v1294_v41, %v5005_v11  ;;  %v5104_v29 = vadd.f32 %v1292_v25, %v4980_v40  ;;  %v5107_v8 = vadd.f32 %v1293_v38, %v5002_v44  ;;  %v3894_v36 = vunpack.i.l.bf16 %v3893_v27  ;;  %v2970_v11 = vld [vmem:[%s5747_s1 + $0x5] sm:$0x1] }
 0x10a   : > { %v1299_v20 = vmul.f32 %v3900_v51, %v5046_v34  ;;  %v1298_v0 = vmul.f32 %v3899_v59, %v5046_v34  ;;  %v1297_v62 = vmul.f32 %v3895_v61, %v5046_v34  ;;  %v1387_v56 = vunpack.c.l.bf16 %v2970_v11 }
 0x10b   : > { %v1296_v6 = vmul.f32 %v3894_v36, %v5046_v34  ;;  %v3908_v32 = vpop.permute.xlu1 %3907  ;;  %v3903_v50 = vpop.permute.xlu0 %3902 }
 0x10c   : > { %v5117_v40 = vadd.f32 %v1298_v0, %v5021_v16  ;;  %v5120_v44 = vadd.f32 %v1299_v20, %v5015_v63  ;;  %v5123_v52 = vadd.f32 %v1297_v62, %v5024_v37  ;;  %v3910_v12 = vunpack.i.h.bf16 %v3908_v32 }
 0x10d   : > { %v5126_v28 = vadd.f32 %v1296_v6, %v4994_v53  ;;  %v3909_v1 = vunpack.i.l.bf16 %v3908_v32  ;;  %v3905_v15 = vunpack.i.h.bf16 %v3903_v50  ;;  %v3904_v49 = vunpack.i.l.bf16 %v3903_v50 }
 0x10e   : > { %v1303_v60 = vmul.f32 %v3910_v12, %v5046_v34  ;;  %v5148_v41 = vrot.slane %v1387_v56, %v5792_v23 }
 0x10f   : > { %v1302_v45 = vmul.f32 %v3909_v1, %v5046_v34  ;;  %v1301_v16 = vmul.f32 %v3905_v15, %v5046_v34  ;;  %v1300_v63 = vmul.f32 %v3904_v49, %v5046_v34  ;;  %v3918_v22 = vpop.permute.xlu1 %3917  ;;  %v3913_v33 = vpop.permute.xlu0 %3912 }
 0x110   : > { %v5133_v37 = vadd.f32 %v1303_v60, %v5034_v19  ;;  %v3920_v42 = vunpack.i.h.bf16 %v3918_v22  ;;  %v3919_v53 = vunpack.i.l.bf16 %v3918_v22  ;;  %v3915_v17 = vunpack.i.h.bf16 %v3913_v33 }
 0x111   : > { %v5136_v3 = vadd.f32 %v1302_v45, %v5040_v35  ;;  %v5139_v39 = vadd.f32 %v1300_v63, %v5018_v18  ;;  %v5142_v14 = vadd.f32 %v1301_v16, %v5037_v21  ;;  %v3914_v26 = vunpack.i.l.bf16 %v3913_v33 }
 0x112   : > { %v1307_v7 = vmul.f32 %v3920_v42, %v5046_v34  ;;  %v1306_v24 = vmul.f32 %v3919_v53, %v5046_v34  ;;  %v1305_v19 = vmul.f32 %v3915_v17, %v5046_v34 }
 0x113   : > { %v1304_v38 = vmul.f32 %v3914_v26, %v5046_v34  ;;  %v3928_v35 = vpop.permute.xlu1 %3927  ;;  %v3923_v25 = vpop.permute.xlu0 %3922 }
 0x114   : > { %v5152_v18 = vadd.f32 %v1306_v24, %v5056_v43  ;;  %v5155_v21 = vadd.f32 %v1307_v7, %v5050_v2  ;;  %v5158_v57 = vadd.f32 %v1305_v19, %v5059_v10  ;;  %v3930_v27 = vunpack.i.h.bf16 %v3928_v35 }
 0x115   : > { %v5161_v51 = vadd.f32 %v1304_v38, %v5031_v54  ;;  %v3929_v59 = vunpack.i.l.bf16 %v3928_v35  ;;  %v3925_v61 = vunpack.i.h.bf16 %v3923_v25  ;;  %v3924_v36 = vunpack.i.l.bf16 %v3923_v25 }
 0x116   : > { %v1519_v20 = vmul.f32 %v3930_v27, %v5148_v41 }
 0x117   : > { %v1518_v0 = vmul.f32 %v3929_v59, %v5148_v41  ;;  %v1517_v43 = vmul.f32 %v3925_v61, %v5148_v41  ;;  %v1308_v62 = vmul.f32 %v3924_v36, %v5046_v34  ;;  %v3938_v2 = vpop.permute.xlu1 %3937  ;;  %v3933_v6 = vpop.permute.xlu0 %3932 }
 0x118   : > { %v5168_v10 = vadd.f32 %v1519_v20, %v5069_v46  ;;  %v3940_v32 = vunpack.i.h.bf16 %v3938_v2  ;;  %v3939_v50 = vunpack.i.l.bf16 %v3938_v2  ;;  %v3935_v54 = vunpack.i.h.bf16 %v3933_v6 }
 0x119   : > { %v5171_v11 = vadd.f32 %v1518_v0, %v5075_v55  ;;  %v5174_v12 = vadd.f32 %v1308_v62, %v5053_v30  ;;  %v5177_v1 = vadd.f32 %v1517_v43, %v5072_v58  ;;  %v3934_v15 = vunpack.i.l.bf16 %v3933_v6 }
 0x11a   : > { %v1523_v34 = vmul.f32 %v3940_v32, %v5148_v41  ;;  %v1522_v49 = vmul.f32 %v3939_v50, %v5148_v41  ;;  %v1521_v46 = vmul.f32 %v3935_v54, %v5148_v41 }
 0x11b   : > { %v1520_v60 = vmul.f32 %v3934_v15, %v5148_v41  ;;  %v3948_v56 = vpop.permute.xlu1 %3947  ;;  %v3943_v45 = vpop.permute.xlu0 %3942 }
 0x11c   : > { %v5184_v55 = vadd.f32 %v1522_v49, %v5088_v4  ;;  %v5187_v30 = vadd.f32 %v1523_v34, %v5082_v5  ;;  %v5190_v58 = vadd.f32 %v1521_v46, %v5091_v31  ;;  %v3950_v16 = vunpack.i.h.bf16 %v3948_v56 }
 0x11d   : > { %v5193_v63 = vadd.f32 %v1520_v60, %v5066_v47  ;;  %v3949_v22 = vunpack.i.l.bf16 %v3948_v56  ;;  %v3945_v33 = vunpack.i.h.bf16 %v3943_v45  ;;  %v3944_v42 = vunpack.i.l.bf16 %v3943_v45 }
 0x11e   : > { %v1527_v53 = vmul.f32 %v3950_v16, %v5148_v41 }
 0x11f   : > { %v1526_v17 = vmul.f32 %v3949_v22, %v5148_v41  ;;  %v1525_v4 = vmul.f32 %v3945_v33, %v5148_v41  ;;  %v1524_v26 = vmul.f32 %v3944_v42, %v5148_v41  ;;  %v3958_v5 = vpop.permute.xlu1 %3957  ;;  %v3953_v7 = vpop.permute.xlu0 %3952 }
 0x120   : > { %v5200_v31 = vadd.f32 %v1527_v53, %v5101_v9  ;;  %v3960_v24 = vunpack.i.h.bf16 %v3958_v5  ;;  %v3959_v19 = vunpack.i.l.bf16 %v3958_v5  ;;  %v3955_v47 = vunpack.i.h.bf16 %v3953_v7 }
 0x121   : > { %v5203_v38 = vadd.f32 %v1526_v17, %v5107_v8  ;;  %v5206_v35 = vadd.f32 %v1524_v26, %v5085_v13  ;;  %v5209_v25 = vadd.f32 %v1525_v4, %v5104_v29  ;;  %v3954_v27 = vunpack.i.l.bf16 %v3953_v7  ;;  %v2971_v8 = vld [vmem:[%s5747_s1 + $0x6] sm:$0x1] }
 0x122   : > { %v1531_v59 = vmul.f32 %v3960_v24, %v5148_v41  ;;  %v1530_v61 = vmul.f32 %v3959_v19, %v5148_v41  ;;  %v1529_v9 = vmul.f32 %v3955_v47, %v5148_v41  ;;  %v1621_v15 = vunpack.c.l.bf16 %v2971_v8 }
 0x123   : > { %v1528_v36 = vmul.f32 %v3954_v27, %v5148_v41  ;;  %v3968_v20 = vpop.permute.xlu1 %3967  ;;  %v3963_v0 = vpop.permute.xlu0 %3962 }
 0x124   : > { %v5219_v13 = vadd.f32 %v1530_v61, %v5123_v52  ;;  %v5222_v29 = vadd.f32 %v1531_v59, %v5117_v40  ;;  %v5225_v43 = vadd.f32 %v1529_v9, %v5126_v28  ;;  %v3970_v62 = vunpack.i.h.bf16 %v3968_v20 }
 0x125   : > { %v5228_v2 = vadd.f32 %v1528_v36, %v5098_v48  ;;  %v3969_v6 = vunpack.i.l.bf16 %v3968_v20  ;;  %v3965_v32 = vunpack.i.h.bf16 %v3963_v0  ;;  %v3964_v50 = vunpack.i.l.bf16 %v3963_v0 }
 0x126   : > { %v1535_v54 = vmul.f32 %v3970_v62, %v5148_v41  ;;  %v5250_v17 = vrot.slane %v1621_v15, %v5792_v23  ;;  %v3025_v62 = vld [vmem:[%s5747_s1 + $0x8] sm:$0x1] }
 0x127   : > { %v1534_v34 = vmul.f32 %v3969_v6, %v5148_v41  ;;  %v1533_v52 = vmul.f32 %v3965_v32, %v5148_v41  ;;  %v1532_v40 = vmul.f32 %v3964_v50, %v5148_v41  ;;  %v3978_v49 = vpop.permute.xlu1 %3977  ;;  %v3973_v46 = vpop.permute.xlu0 %3972 }
 0x128   : > { %v5235_v28 = vadd.f32 %v1535_v54, %v5136_v3  ;;  %v3980_v60 = vunpack.i.h.bf16 %v3978_v49  ;;  %v3979_v48 = vunpack.i.l.bf16 %v3978_v49  ;;  %v3975_v56 = vunpack.i.h.bf16 %v3973_v46 }
 0x129   : > { %v5238_v45 = vadd.f32 %v1534_v34, %v5142_v14  ;;  %v5241_v16 = vadd.f32 %v1532_v40, %v5120_v44  ;;  %v5244_v22 = vadd.f32 %v1533_v52, %v5139_v39  ;;  %v3974_v33 = vunpack.i.l.bf16 %v3973_v46 }
 0x12a   : > { %v1539_v42 = vmul.f32 %v3980_v60, %v5148_v41  ;;  %v1538_v53 = vmul.f32 %v3979_v48, %v5148_v41  ;;  %v1537_v3 = vmul.f32 %v3975_v56, %v5148_v41  ;;  %v2306_v60 = vunpack.c.l.bf16 %v3025_v62 }
 0x12b   : > { %v1536_v4 = vmul.f32 %v3974_v33, %v5148_v41  ;;  %v3988_v14 = vpop.permute.xlu1 %3987  ;;  %v3983_v26 = vpop.permute.xlu0 %3982 }
 0x12c   : > { %v5254_v44 = vadd.f32 %v1538_v53, %v5158_v57  ;;  %v5257_v39 = vadd.f32 %v1539_v42, %v5152_v18  ;;  %v5260_v5 = vadd.f32 %v1537_v3, %v5161_v51  ;;  %v3990_v7 = vunpack.i.h.bf16 %v3988_v14  ;;  %v2998_v51 = vld [vmem:[%s5747_s1 + $0x7] sm:$0x1] }
 0x12d   : > { %v5263_v24 = vadd.f32 %v1536_v4, %v5133_v37  ;;  %v3989_v19 = vunpack.i.l.bf16 %v3988_v14  ;;  %v3985_v47 = vunpack.i.h.bf16 %v3983_v26  ;;  %v3984_v27 = vunpack.i.l.bf16 %v3983_v26 }
 0x12e   : > { %v1757_v59 = vmul.f32 %v3990_v7, %v5250_v17  ;;  %v1964_v52 = vunpack.c.l.bf16 %v2998_v51 }
 0x12f   : > { %v1756_v61 = vmul.f32 %v3989_v19, %v5250_v17  ;;  %v1541_v57 = vmul.f32 %v3985_v47, %v5148_v41  ;;  %v1540_v18 = vmul.f32 %v3984_v27, %v5148_v41  ;;  %v3998_v9 = vpop.permute.xlu1 %3997  ;;  %v3993_v36 = vpop.permute.xlu0 %3992 }
 0x130   : > { %v1810_v37 = vrot.slane %v1757_v59, 6  ;;  %v4000_v20 = vunpack.i.h.bf16 %v3998_v9  ;;  %v3999_v0 = vunpack.i.l.bf16 %v3998_v9  ;;  %v3995_v8 = vunpack.i.h.bf16 %v3993_v36 }
 0x131   : > { %v1809_v6 = vrot.slane %v1756_v61, 6  ;;  %v5276_v32 = vadd.f32 %v1540_v18, %v5155_v21  ;;  %v5279_v41 = vadd.f32 %v1541_v57, %v5174_v12  ;;  %v3994_v50 = vunpack.i.l.bf16 %v3993_v36 }
 0x132   : > { %v1761_v54 = vmul.f32 %v4000_v20, %v5250_v17  ;;  %v1760_v15 = vmul.f32 %v3999_v0, %v5250_v17  ;;  %v1759_v34 = vmul.f32 %v3995_v8, %v5250_v17  ;;  %v5288_v26 = vrot.slane %v1964_v52, %v5792_v23 }
 0x133   : > { %v1758_v40 = vmul.f32 %v3994_v50, %v5250_v17  ;;  %v4008_v49 = vpop.permute.xlu1 %4007  ;;  %v4003_v46 = vpop.permute.xlu0 %4002  ;;  %v1811_v48 = vsel %vm1808_vm0, %v1809_v6, %v1810_v37  ;;  %v5298_v61 = vrot.slane %v2306_v60, %v5792_v23 }
 0x134   : > { %v1818_v21 = vrot.slane %v1761_v54, 6  ;;  %v1816_v56 = vrot.slane %v1760_v15, 6  ;;  %v1814_v33 = vrot.slane %v1759_v34, 6  ;;  %v4010_v42 = vunpack.i.h.bf16 %v4008_v49 }
 0x135   : > { %v1812_v12 = vrot.slane %v1758_v40, 6  ;;  %v4009_v53 = vunpack.i.l.bf16 %v4008_v49  ;;  %v4005_v3 = vunpack.i.h.bf16 %v4003_v46  ;;  %v4004_v14 = vunpack.i.l.bf16 %v4003_v46 }
 0x136   : > { %v1819_v4 = vsel %vm1808_vm0, %v1816_v56, %v1818_v21  ;;  %v5291_v7 = vadd.f32 %v1811_v48, %v5177_v1  ;;  %v1817_v47 = vsel %vm1808_vm0, %v1814_v33, %v1816_v56  ;;  %v1765_v9 = vmul.f32 %v4010_v42, %v5250_v17 }
 0x137   : > { %v5294_v19 = vadd.f32 %v1819_v4, %v5190_v58  ;;  %v4018_v27 = vpop.permute.xlu1 %4017  ;;  %v4013_v59 = vpop.permute.xlu0 %4012  ;;  %v1813_v57 = vsel %vm1808_vm0, %v1810_v37, %v1812_v12  ;;  %v1815_v18 = vsel %vm1808_vm0, %v1812_v12, %v1814_v33  ;;  %v1764_v36 = vmul.f32 %v4009_v53, %v5250_v17 }
 0x138   : > { %v1763_v1 = vmul.f32 %v4005_v3, %v5250_v17  ;;  %v1762_v58 = vmul.f32 %v4004_v14, %v5250_v17  ;;  %v4020_v51 = vunpack.i.h.bf16 %v4018_v27  ;;  %v4019_v20 = vunpack.i.l.bf16 %v4018_v27 }
 0x139   : > { %v1826_v0 = vrot.slane %v1765_v9, 6  ;;  %v1824_v8 = vrot.slane %v1764_v36, 6  ;;  %v4015_v62 = vunpack.i.h.bf16 %v4013_v59  ;;  %v4014_v6 = vunpack.i.l.bf16 %v4013_v59 }
 0x13a   : > { %v1822_v23 = vrot.slane %v1763_v1, 6  ;;  %v1820_v50 = vrot.slane %v1762_v58, 6  ;;  %v1769_v37 = vmul.f32 %v4020_v51, %v5250_v17  ;;  %v1768_v54 = vmul.f32 %v4019_v20, %v5250_v17 }
 0x13b   : > { %v4028_v15 = vpop.permute.xlu1 %4027  ;;  %v4023_v34 = vpop.permute.xlu0 %4022  ;;  %v1827_v52 = vsel %vm1808_vm0, %v1824_v8, %v1826_v0  ;;  %v1767_v40 = vmul.f32 %v4015_v62, %v5250_v17  ;;  %v1766_v49 = vmul.f32 %v4014_v6, %v5250_v17  ;;  %v5312_v60 = vadd.f32 %v1813_v57, %v5171_v11 }
 0x13c   : > { %v4030_v46 = vunpack.i.h.bf16 %v4028_v15  ;;  %v5315_v48 = vadd.f32 %v1815_v18, %v5168_v10  ;;  %v5318_v56 = vadd.f32 %v1817_v47, %v5193_v63  ;;  %v5321_v33 = vadd.f32 %v1827_v52, %v5209_v25 }
 0x13d   : > { %v1825_v12 = vsel %vm1808_vm0, %v1822_v23, %v1824_v8  ;;  %v1821_v42 = vsel %vm1808_vm0, %v1818_v21, %v1820_v50  ;;  %v1823_v53 = vsel %vm1808_vm0, %v1820_v50, %v1822_v23  ;;  %v1834_v3 = vrot.slane %v1769_v37, 6 }
 0x13e   : > { %v1832_v4 = vrot.slane %v1768_v54, 6  ;;  %v1830_v14 = vrot.slane %v1767_v40, 6  ;;  %v1828_v11 = vrot.slane %v1766_v49, 6  ;;  %v1773_v27 = vmul.f32 %v4030_v46, %v5250_v17 }
 0x13f   : > { %v4038_v10 = vpop.permute.xlu1 %4037  ;;  %v4033_v59 = vpop.permute.xlu0 %4032  ;;  %v4029_v57 = vunpack.i.l.bf16 %v4028_v15  ;;  %v4025_v63 = vunpack.i.h.bf16 %v4023_v34  ;;  %v4024_v47 = vunpack.i.l.bf16 %v4023_v34  ;;  %v5328_v25 = vadd.f32 %v1821_v42, %v5184_v55 }
 0x140   : > { %v4040_v18 = vunpack.i.h.bf16 %v4038_v10  ;;  %v5331_v9 = vadd.f32 %v1823_v53, %v5187_v30  ;;  %v5334_v21 = vadd.f32 %v1825_v12, %v5206_v35  ;;  %v1835_v36 = vsel %vm1808_vm0, %v1832_v4, %v1834_v3 }
 0x141   : > { %v5338_v1 = vadd.f32 %v1835_v36, %v5225_v43  ;;  %v1833_v58 = vsel %vm1808_vm0, %v1830_v14, %v1832_v4  ;;  %v1829_v51 = vsel %vm1808_vm0, %v1826_v0, %v1828_v11  ;;  %v1831_v20 = vsel %vm1808_vm0, %v1828_v11, %v1830_v14 }
 0x142   : > { %v1842_v8 = vrot.slane %v1773_v27, 6  ;;  %v1772_v55 = vmul.f32 %v4029_v57, %v5250_v17  ;;  %v1771_v30 = vmul.f32 %v4025_v63, %v5250_v17  ;;  %v1770_v62 = vmul.f32 %v4024_v47, %v5250_v17 }
 0x143   : > { %v4048_v35 = vpop.permute.xlu1 %4047  ;;  %v4043_v6 = vpop.permute.xlu0 %4042  ;;  %v1777_v23 = vmul.f32 %v4040_v18, %v5250_v17  ;;  %v4039_v50 = vunpack.i.l.bf16 %v4038_v10  ;;  %v4035_v43 = vunpack.i.h.bf16 %v4033_v59  ;;  %v4034_v37 = vunpack.i.l.bf16 %v4033_v59 }
 0x144   : > { %v1840_v54 = vrot.slane %v1772_v55, 6  ;;  %v1838_v15 = vrot.slane %v1771_v30, 6  ;;  %v1836_v34 = vrot.slane %v1770_v62, 6  ;;  %v4050_v0 = vunpack.i.h.bf16 %v4048_v35 }
 0x145   : > { %v5348_v52 = vadd.f32 %v1829_v51, %v5203_v38  ;;  %v1776_v40 = vmul.f32 %v4039_v50, %v5250_v17  ;;  %v1775_v49 = vmul.f32 %v4035_v43, %v5250_v17  ;;  %v1774_v46 = vmul.f32 %v4034_v37, %v5250_v17 }
 0x146   : > { %v5354_v12 = vadd.f32 %v1831_v20, %v5200_v31  ;;  %v5357_v42 = vadd.f32 %v1833_v58, %v5228_v2  ;;  %v1843_v53 = vsel %vm1808_vm0, %v1840_v54, %v1842_v8  ;;  %v1850_v4 = vrot.slane %v1777_v23, 6 }
 0x147   : > { %v4058_v14 = vpop.permute.xlu1 %4057  ;;  %v4053_v11 = vpop.permute.xlu0 %4052  ;;  %v5361_v38 = vadd.f32 %v1843_v53, %v5244_v22  ;;  %v1841_v27 = vsel %vm1808_vm0, %v1838_v15, %v1840_v54  ;;  %v1837_v10 = vsel %vm1808_vm0, %v1834_v3, %v1836_v34  ;;  %v1839_v59 = vsel %vm1808_vm0, %v1836_v34, %v1838_v15 }
 0x148   : > { %v1848_v57 = vrot.slane %v1776_v40, 6  ;;  %v1846_v31 = vrot.slane %v1775_v49, 6  ;;  %v1844_v63 = vrot.slane %v1774_v46, 6  ;;  %v1781_v2 = vmul.f32 %v4050_v0, %v5250_v17 }
 0x149   : > { %v4049_v47 = vunpack.i.l.bf16 %v4048_v35  ;;  %v4045_v18 = vunpack.i.h.bf16 %v4043_v6  ;;  %v4044_v36 = vunpack.i.l.bf16 %v4043_v6  ;;  %v4060_v58 = vunpack.i.h.bf16 %v4058_v14 }
 0x14a   : > { %v5368_v51 = vadd.f32 %v1837_v10, %v5219_v13  ;;  %v5371_v22 = vadd.f32 %v1839_v59, %v5222_v29  ;;  %v1851_v20 = vsel %vm1808_vm0, %v1848_v57, %v1850_v4  ;;  %v1849_v3 = vsel %vm1808_vm0, %v1846_v31, %v1848_v57 }
 0x14b   : > { %v4068_v55 = vpop.permute.xlu1 %4067  ;;  %v4063_v30 = vpop.permute.xlu0 %4062  ;;  %v5376_v62 = vadd.f32 %v1851_v20, %v5260_v5  ;;  %v1845_v35 = vsel %vm1808_vm0, %v1842_v8, %v1844_v63  ;;  %v1847_v6 = vsel %vm1808_vm0, %v1844_v63, %v1846_v31  ;;  %v5381_v23 = vadd.f32 %v1849_v3, %v5263_v24 }
 0x14c   : > { %v1858_v13 = vrot.slane %v1781_v2, 6  ;;  %v1780_v29 = vmul.f32 %v4049_v47, %v5250_v17  ;;  %v1779_v50 = vmul.f32 %v4045_v18, %v5250_v17  ;;  %v1778_v43 = vmul.f32 %v4044_v36, %v5250_v17 }
 0x14d   : > { %v2102_v37 = vmul.f32 %v4060_v58, %v5288_v26  ;;  %v4059_v54 = vunpack.i.l.bf16 %v4058_v14  ;;  %v4055_v15 = vunpack.i.h.bf16 %v4053_v11  ;;  %v4054_v5 = vunpack.i.l.bf16 %v4053_v11 }
 0x14e   : > { %v1856_v34 = vrot.slane %v1780_v29, 6  ;;  %v1854_v0 = vrot.slane %v1779_v50, 6  ;;  %v1852_v8 = vrot.slane %v1778_v43, 6  ;;  %v4070_v40 = vunpack.i.h.bf16 %v4068_v55 }
 0x14f   : > { %v4078_v49 = vpop.permute.xlu1 %4077  ;;  %v4073_v46 = vpop.permute.xlu0 %4072  ;;  %v2156_v24 = vrot.slane %v2102_v37, 6  ;;  %v2101_v53 = vmul.f32 %v4059_v54, %v5288_v26  ;;  %v2100_v10 = vmul.f32 %v4055_v15, %v5288_v26  ;;  %v2099_v59 = vmul.f32 %v4054_v5, %v5288_v26 }
 0x150   : > { %v1859_v17 = vsel %vm1808_vm0, %v1856_v34, %v1858_v13  ;;  %v1857_v57 = vsel %vm1808_vm0, %v1854_v0, %v1856_v34  ;;  %v1853_v14 = vsel %vm1808_vm0, %v1850_v4, %v1852_v8  ;;  %v1855_v11 = vsel %vm1808_vm0, %v1852_v8, %v1854_v0 }
 0x151   : > { %v5395_v31 = vadd.f32 %v1859_v17, %v5279_v41  ;;  %v5398_v63 = vadd.f32 %v1853_v14, %v5254_v44  ;;  %v5401_v2 = vadd.f32 %v1855_v11, %v5257_v39  ;;  %v5404_v47 = vadd.f32 %v1857_v57, %v5276_v32 }
 0x152   : > { %v2154_v18 = vrot.slane %v2101_v53, 6  ;;  %v2152_v36 = vrot.slane %v2100_v10, 6  ;;  %v2151_v58 = vrot.slane %v2099_v59, 6  ;;  %v2106_v20 = vmul.f32 %v4070_v40, %v5288_v26 }
 0x153   : > { %v4088_v4 = vpop.permute.xlu1 %4087  ;;  %v4069_v3 = vunpack.i.l.bf16 %v4068_v55  ;;  %v4065_v13 = vunpack.i.h.bf16 %v4063_v30  ;;  %v4064_v29 = vunpack.i.l.bf16 %v4063_v30  ;;  %v4080_v41 = vunpack.i.h.bf16 %v4078_v49  ;;  %v4083_v43 = vpop.permute.xlu0 %4082 }
 0x154   : > { %v5408_v50 = vadd.f32 %v1841_v27, %v5241_v16  ;;  %v5411_v44 = vadd.f32 %v1845_v35, %v5238_v45  ;;  %v5414_v39 = vadd.f32 %v1847_v6, %v5235_v28  ;;  %v2157_v32 = vsel %vm1808_vm0, %v2154_v18, %v2156_v24 }
 0x155   : > { %v2155_v37 = vsel %vm1808_vm0, %v2152_v36, %v2154_v18  ;;  %v2153_v54 = vsel %vm1808_vm0, %v2151_v58, %v2152_v36  ;;  %v2164_v55 = vrot.slane %v2106_v20, 6  ;;  %v2105_v30 = vmul.f32 %v4069_v3, %v5288_v26 }
 0x156   : > { %v2104_v15 = vmul.f32 %v4065_v13, %v5288_v26  ;;  %v2103_v16 = vmul.f32 %v4064_v29, %v5288_v26  ;;  %v5423_v45 = vmul.f32 %v4080_v41, %v5288_v26  ;;  %v4079_v27 = vunpack.i.l.bf16 %v4078_v49 }
 0x157   : > { %v4098_v28 = vpop.permute.xlu1 %4097  ;;  %v2162_v35 = vrot.slane %v2105_v30, 6  ;;  %v4075_v6 = vunpack.i.h.bf16 %v4073_v46  ;;  %v4074_v5 = vunpack.i.l.bf16 %v4073_v46  ;;  %v4090_v34 = vunpack.i.h.bf16 %v4088_v4  ;;  %v4093_v11 = vpop.permute.xlu0 %4092 }
 0x158   : > { %v5426_v0 = vadd.f32 %v2157_v32, %v5315_v48  ;;  %v2160_v8 = vrot.slane %v2104_v15, 6  ;;  %v2158_v40 = vrot.slane %v2103_v16, 6  ;;  %v2109_v53 = vmul.f32 %v4079_v27, %v5288_v26 }
 0x159   : > { %v2165_v10 = vsel %vm1808_vm0, %v2162_v35, %v2164_v55  ;;  %v2172_v59 = vrot.slane %v5423_v45, 6  ;;  %v2108_v17 = vmul.f32 %v4075_v6, %v5288_v26  ;;  %v2107_v49 = vmul.f32 %v4074_v5, %v5288_v26 }
 0x15a   : > { %v5434_v57 = vadd.f32 %v2153_v54, %v5291_v7  ;;  %v5437_v46 = vadd.f32 %v2155_v37, %v5312_v60  ;;  %v2159_v48 = vsel %vm1808_vm0, %v2156_v24, %v2158_v40  ;;  %v5441_v14 = vmul.f32 %v4090_v34, %v5288_v26 }
 0x15b   : > { %v5444_v18 = vadd.f32 %v2165_v10, %v5331_v9  ;;  %v2163_v36 = vsel %vm1808_vm0, %v2160_v8, %v2162_v35  ;;  %v2161_v58 = vsel %vm1808_vm0, %v2158_v40, %v2160_v8  ;;  %v2170_v20 = vrot.slane %v2109_v53, 6  ;;  %v4108_v29 = vpop.permute.xlu1 %4107  ;;  %v4103_v35 = vpop.permute.xlu0 %4102 }
 0x15c   : > { %v5449_v7 = vadd.f32 %v2159_v48, %v5318_v56  ;;  %v2168_v3 = vrot.slane %v2108_v17, 6  ;;  %v2166_v60 = vrot.slane %v2107_v49, 6  ;;  %v4089_v13 = vunpack.i.l.bf16 %v4088_v4 }
 0x15d   : > { %v2173_v24 = vsel %vm1808_vm0, %v2170_v20, %v2172_v59  ;;  %v4085_v41 = vunpack.i.h.bf16 %v4083_v43  ;;  %v4084_v32 = vunpack.i.l.bf16 %v4083_v43  ;;  %v4100_v37 = vunpack.i.h.bf16 %v4098_v28 }
 0x15e   : > { %v5453_v9 = vadd.f32 %v2161_v58, %v5294_v19  ;;  %v5456_v54 = vadd.f32 %v2163_v36, %v5328_v25  ;;  %v5459_v30 = vadd.f32 %v2173_v24, %v5354_v12  ;;  %v2180_v56 = vrot.slane %v5441_v14, 6 }
 0x15f   : > { %v2171_v15 = vsel %vm1808_vm0, %v2168_v3, %v2170_v20  ;;  %v2167_v4 = vsel %vm1808_vm0, %v2164_v55, %v2166_v60  ;;  %v2169_v16 = vsel %vm1808_vm0, %v2166_v60, %v2168_v3  ;;  %v2113_v43 = vmul.f32 %v4089_v13, %v5288_v26  ;;  %v4118_v10 = vpop.permute.xlu1 %4117 }
 0x160   : > { %v2112_v45 = vmul.f32 %v4085_v41, %v5288_v26  ;;  %v2111_v19 = vmul.f32 %v4084_v32, %v5288_v26  ;;  %v2118_v25 = vmul.f32 %v4100_v37, %v5288_v26  ;;  %v4099_v27 = vunpack.i.l.bf16 %v4098_v28  ;;  %v4113_v41 = vpop.permute.xlu0 %4112 }
 0x161   : > { %v2178_v12 = vrot.slane %v2113_v43, 6  ;;  %v4095_v6 = vunpack.i.h.bf16 %v4093_v11  ;;  %v4094_v5 = vunpack.i.l.bf16 %v4093_v11  ;;  %v4110_v34 = vunpack.i.h.bf16 %v4108_v29 }
 0x162   : > { %v5470_v8 = vadd.f32 %v2167_v4, %v5334_v21  ;;  %v2176_v55 = vrot.slane %v2112_v45, 6  ;;  %v2174_v40 = vrot.slane %v2111_v19, 6  ;;  %v2117_v53 = vmul.f32 %v4099_v27, %v5288_v26 }
 0x163   : > { %v2181_v17 = vsel %vm1808_vm0, %v2178_v12, %v2180_v56  ;;  %v2188_v49 = vrot.slane %v2118_v25, 6  ;;  %v2116_v48 = vmul.f32 %v4095_v6, %v5288_v26  ;;  %v2115_v28 = vmul.f32 %v4094_v5, %v5288_v26  ;;  %v4128_v43 = vpop.permute.xlu1 %4127 }
 0x164   : > { %v5477_v14 = vadd.f32 %v2169_v16, %v5321_v33  ;;  %v5480_v11 = vadd.f32 %v2171_v15, %v5348_v52  ;;  %v2175_v21 = vsel %vm1808_vm0, %v2172_v59, %v2174_v40  ;;  %v5484_v36 = vmul.f32 %v4110_v34, %v5288_v26 }
 0x165   : > { %v5487_v58 = vadd.f32 %v2181_v17, %v5371_v22  ;;  %v2179_v20 = vsel %vm1808_vm0, %v2176_v55, %v2178_v12  ;;  %v2177_v3 = vsel %vm1808_vm0, %v2174_v40, %v2176_v55  ;;  %v2186_v60 = vrot.slane %v2117_v53, 6  ;;  %v4123_v53 = vpop.permute.xlu0 %4122 }
 0x166   : > { %v5492_v13 = vadd.f32 %v2175_v21, %v5357_v42  ;;  %v2184_v33 = vrot.slane %v2116_v48, 6  ;;  %v2182_v24 = vrot.slane %v2115_v28, 6  ;;  %v4109_v52 = vunpack.i.l.bf16 %v4108_v29 }
 0x167   : > { %v2189_v59 = vsel %vm1808_vm0, %v2186_v60, %v2188_v49  ;;  %v4105_v32 = vunpack.i.h.bf16 %v4103_v35  ;;  %v4104_v37 = vunpack.i.l.bf16 %v4103_v35  ;;  %v4120_v15 = vunpack.i.h.bf16 %v4118_v10 }
 0x168   : > { %v5496_v22 = vadd.f32 %v2177_v3, %v5338_v1  ;;  %v5499_v4 = vadd.f32 %v2179_v20, %v5368_v51  ;;  %v5502_v16 = vadd.f32 %v2189_v59, %v5414_v39  ;;  %v2196_v42 = vrot.slane %v5484_v36, 6  ;;  %v4138_v3 = vpop.permute.xlu1 %4137 }
 0x169   : > { %v2187_v29 = vsel %vm1808_vm0, %v2184_v33, %v2186_v60  ;;  %v2183_v45 = vsel %vm1808_vm0, %v2180_v56, %v2182_v24  ;;  %v2185_v19 = vsel %vm1808_vm0, %v2182_v24, %v2184_v33  ;;  %v2121_v25 = vmul.f32 %v4109_v52, %v5288_v26 }
 0x16a   : > { %v2120_v1 = vmul.f32 %v4105_v32, %v5288_v26  ;;  %v2119_v27 = vmul.f32 %v4104_v37, %v5288_v26  ;;  %v2442_v51 = vmul.f32 %v4120_v15, %v5298_v61  ;;  %v4119_v35 = vunpack.i.l.bf16 %v4118_v10 }
 0x16b   : > { %v2194_v39 = vrot.slane %v2121_v25, 6  ;;  %v4115_v12 = vunpack.i.h.bf16 %v4113_v41  ;;  %v4114_v6 = vunpack.i.l.bf16 %v4113_v41  ;;  %v4130_v5 = vunpack.i.h.bf16 %v4128_v43 }
 0x16c   : > { %v5513_v34 = vadd.f32 %v2183_v45, %v5408_v50  ;;  %v2192_v55 = vrot.slane %v2120_v1, 6  ;;  %v2190_v56 = vrot.slane %v2119_v27, 6  ;;  %v2441_v40 = vmul.f32 %v4119_v35, %v5298_v61 }
 0x16d   : > { %v5517_v17 = vadd.f32 %v2185_v19, %v5361_v38  ;;  %v2197_v48 = vsel %vm1808_vm0, %v2194_v39, %v2196_v42  ;;  %v2494_v28 = vrot.slane %v2442_v51, 6  ;;  %v5521_v10 = vmul.f32 %v4114_v6, %v5288_v26 }
 0x16e   : > { %v5524_v21 = vadd.f32 %v2187_v29, %v5411_v44  ;;  %v2191_v50 = vsel %vm1808_vm0, %v2188_v49, %v2190_v56  ;;  %v2193_v36 = vsel %vm1808_vm0, %v2190_v56, %v2192_v55  ;;  %v5529_v20 = vmul.f32 %v4130_v5, %v5298_v61 }
 0x16f   : > { %v5532_v38 = vadd.f32 %v2197_v48, %v5401_v2  ;;  %v2195_v60 = vsel %vm1808_vm0, %v2192_v55, %v2194_v39  ;;  %v2493_v33 = vrot.slane %v2441_v40, 6  ;;  %v5536_v24 = vmul.f32 %v4115_v12, %v5288_v26  ;;  %v5548_v2 = vld [vmem:[%s5748_s2] ss:$0 sm:$0xff] }
 0x170   : > { %v5539_v44 = vadd.f32 %v2191_v50, %v5381_v23  ;;  %v5542_v49 = vadd.f32 %v2193_v36, %v5376_v62  ;;  %v2198_v52 = vrot.slane %v5521_v10, 6  ;;  %v4129_v41 = vunpack.i.l.bf16 %v4128_v43  ;;  %v4133_v43 = vpop.permute.xlu0 %4132  ;;  %v4148_v36 = vpop.permute.xlu1 %4147 }
 0x171   : > { %v2495_v59 = vsel %vm1808_vm0, %v2493_v33, %v2494_v28  ;;  %v4125_v32 = vunpack.i.h.bf16 %v4123_v53  ;;  %v4124_v37 = vunpack.i.l.bf16 %v4123_v53  ;;  %v4140_v26 = vunpack.i.h.bf16 %v4138_v3 }
 0x172   : > { %v5552_v15 = vadd.f32 %v2195_v60, %v5398_v63  ;;  %v2569_v23 = vadd.f32 %v2495_v59, %v5434_v57  ;;  %v2502_v62 = vrot.slane %v5529_v20, 6  ;;  %v2445_v29 = vmul.f32 %v4129_v41, %v5298_v61 }
 0x173   : > { %v2200_v45 = vrot.slane %v5536_v24, 6  ;;  %v5562_v19 = vsel %vm1808_vm0, %v2196_v42, %v2198_v52  ;;  %v2444_v25 = vmul.f32 %v4125_v32, %v5298_v61  ;;  %v2443_v63 = vmul.f32 %v4124_v37, %v5298_v61 }
 0x174   : > { %v2601_v1 = vadd.f32 %v5548_v2, %v2569_v23  ;;  %v2500_v57 = vrot.slane %v2445_v29, 6  ;;  %v5568_v27 = vmul.f32 %v4140_v26, %v5298_v61  ;;  %v4139_v51 = vunpack.i.l.bf16 %v4138_v3 }
 0x175   : > { %v2498_v35 = vrot.slane %v2444_v25, 6  ;;  %v2496_v39 = vrot.slane %v2443_v63, 6  ;;  %v4135_v12 = vunpack.i.h.bf16 %v4133_v43  ;;  %v4134_v6 = vunpack.i.l.bf16 %v4133_v43 }
 0x176   : > { %v2626_v5 = vmax.f32 %v2601_v1, 0.0  ;;  %v2503_v55 = vsel %vm1808_vm0, %v2500_v57, %v2502_v62  ;;  %v2510_v42 = vrot.slane %v5568_v27, 6  ;;  %v2449_v56 = vmul.f32 %v4139_v51, %v5298_v61 }
 0x177   : > { %v2573_v40 = vadd.f32 %v2503_v55, %v5453_v9  ;;  %v2501_v53 = vsel %vm1808_vm0, %v2498_v35, %v2500_v57  ;;  %v2497_v48 = vsel %vm1808_vm0, %v2494_v28, %v2496_v39  ;;  %v2499_v50 = vsel %vm1808_vm0, %v2496_v39, %v2498_v35 }
 0x178   : > { %v3054_v20 = vpack.c.bf16 %v2626_v5, %v2626_v5  ;;  %v2570_v3 = vadd.f32 %v2497_v48, %v5437_v46  ;;  %v2571_v60 = vadd.f32 %v2499_v50, %v5426_v0  ;;  %v2572_v33 = vadd.f32 %v2501_v53, %v5449_v7 }
 0x179   : > { %v2605_v41 = vadd.f32 %v5548_v2, %v2573_v40  ;;  %v2508_v59 = vrot.slane %v2449_v56, 6  ;;  %v2448_v32 = vmul.f32 %v4135_v12, %v5298_v61  ;;  %v2447_v9 = vmul.f32 %v4134_v6, %v5298_v61  ;;  %v4143_v12 = vpop.permute.xlu0 %4142 }
 0x17a   : > { %2753 = vst.msk [vmem:[%s5576_s15] sm:$0xf] %vm2752_vm1, %v3054_v20  ;;  %v2602_v28 = vadd.f32 %v5548_v2, %v2570_v3  ;;  %v2603_v37 = vadd.f32 %v5548_v2, %v2571_v60  ;;  %v2604_v26 = vadd.f32 %v5548_v2, %v2572_v33  ;;  %v4150_v46 = vunpack.i.h.bf16 %v4148_v36  ;;  %v4158_v60 = vpop.permute.xlu1 %4157 }
 0x17b   : > { %v2630_v23 = vmax.f32 %v2605_v41, 0.0  ;;  %v2511_v0 = vsel %vm1808_vm0, %v2508_v59, %v2510_v42  ;;  %v2506_v7 = vrot.slane %v2448_v32, 6  ;;  %v2504_v29 = vrot.slane %v2447_v9, 6 }
 0x17c   : > { %v2627_v43 = vmax.f32 %v2602_v28, 0.0  ;;  %v2628_v25 = vmax.f32 %v2603_v37, 0.0  ;;  %v2629_v63 = vmax.f32 %v2604_v26, 0.0  ;;  %v2577_v1 = vadd.f32 %v2511_v0, %v5477_v14 }
 0x17d   : > { %v3058_v57 = vpack.c.bf16 %v2630_v23, %v2630_v23  ;;  %v2509_v51 = vsel %vm1808_vm0, %v2506_v7, %v2508_v59  ;;  %v2505_v35 = vsel %vm1808_vm0, %v2502_v62, %v2504_v29  ;;  %v2507_v39 = vsel %vm1808_vm0, %v2504_v29, %v2506_v7 }
 0x17e   : > { %v3055_v6 = vpack.c.bf16 %v2627_v43, %v2627_v43  ;;  %v3056_v5 = vpack.c.bf16 %v2628_v25, %v2628_v25  ;;  %v3057_v55 = vpack.c.bf16 %v2629_v63, %v2629_v63  ;;  %v2609_v56 = vadd.f32 %v5548_v2, %v2577_v1  ;;  %v4153_v1 = vpop.permute.xlu0 %4152 }
 0x17f   : > { %2757 = vst.msk [vmem:[%s5576_s15 + $0x10] sm:$0xf] %vm2752_vm1, %v3058_v57  ;;  %v2574_v40 = vadd.f32 %v2505_v35, %v5456_v54  ;;  %v2575_v14 = vadd.f32 %v2507_v39, %v5444_v18  ;;  %v2576_v53 = vadd.f32 %v2509_v51, %v5470_v8  ;;  %v5607_v48 = vmul.f32 %v4150_v46, %v5298_v61 }
 0x180   : > { %2754 = vst.msk [vmem:[%s5576_s15 + $0x4] sm:$0xf] %vm2752_vm1, %v3055_v6  ;;  %2755 = vst.msk [vmem:[%s5576_s15 + $0x8] sm:$0xf] %vm2752_vm1, %v3056_v5  ;;  %v2634_v62 = vmax.f32 %v2609_v56, 0.0  ;;  %v4149_v50 = vunpack.i.l.bf16 %v4148_v36  ;;  %v4145_v20 = vunpack.i.h.bf16 %v4143_v12  ;;  %v4144_v3 = vunpack.i.l.bf16 %v4143_v12  ;;  %v4168_v56 = vpop.permute.xlu1 %4167 }
 0x181   : > { %2756 = vst.msk [vmem:[%s5576_s15 + $0xc] sm:$0xf] %vm2752_vm1, %v3057_v55  ;;  %v2606_v54 = vadd.f32 %v5548_v2, %v2574_v40  ;;  %v2607_v18 = vadd.f32 %v5548_v2, %v2575_v14  ;;  %v2608_v8 = vadd.f32 %v5548_v2, %v2576_v53  ;;  %v2518_v33 = vrot.slane %v5607_v48, 6 }
 0x182   : > { %v3062_v41 = vpack.c.bf16 %v2634_v62, %v2634_v62  ;;  %v2453_v59 = vmul.f32 %v4149_v50, %v5298_v61  ;;  %v2452_v32 = vmul.f32 %v4145_v20, %v5298_v61  ;;  %v2451_v9 = vmul.f32 %v4144_v3, %v5298_v61 }
 0x183   : > { %v2631_v36 = vmax.f32 %v2606_v54, 0.0  ;;  %v2632_v28 = vmax.f32 %v2607_v18, 0.0  ;;  %v2633_v37 = vmax.f32 %v2608_v8, 0.0  ;;  %v4160_v26 = vunpack.i.h.bf16 %v4158_v60 }
 0x184   : > { %2761 = vst.msk [vmem:[%s5576_s15 + $0x20] sm:$0xf] %vm2752_vm1, %v3062_v41  ;;  %v2516_v46 = vrot.slane %v2453_v59, 6  ;;  %v2514_v23 = vrot.slane %v2452_v32, 6  ;;  %v2512_v0 = vrot.slane %v2451_v9, 6  ;;  %v4159_v7 = vunpack.i.l.bf16 %v4158_v60 }
 0x185   : > { %v3059_v29 = vpack.c.bf16 %v2631_v36, %v2631_v36  ;;  %v3060_v43 = vpack.c.bf16 %v2632_v28, %v2632_v28  ;;  %v3061_v25 = vpack.c.bf16 %v2633_v37, %v2633_v37  ;;  %v5625_v63 = vmul.f32 %v4160_v26, %v5298_v61  ;;  %v4163_v37 = vpop.permute.xlu0 %4162 }
 0x186   : > { %v2519_v57 = vsel %vm1808_vm0, %v2516_v46, %v2518_v33  ;;  %v2517_v51 = vsel %vm1808_vm0, %v2514_v23, %v2516_v46  ;;  %v2513_v35 = vsel %vm1808_vm0, %v2510_v42, %v2512_v0  ;;  %v2515_v39 = vsel %vm1808_vm0, %v2512_v0, %v2514_v23 }
 0x187   : > { %2758 = vst.msk [vmem:[%s5576_s15 + $0x14] sm:$0xf] %vm2752_vm1, %v3059_v29  ;;  %2759 = vst.msk [vmem:[%s5576_s15 + $0x18] sm:$0xf] %vm2752_vm1, %v3060_v43  ;;  %v2581_v12 = vadd.f32 %v2519_v57, %v5496_v22  ;;  %v2578_v6 = vadd.f32 %v2513_v35, %v5480_v11  ;;  %v2579_v5 = vadd.f32 %v2515_v39, %v5459_v30  ;;  %v2526_v27 = vrot.slane %v5625_v63, 6 }
 0x188   : > { %2760 = vst.msk [vmem:[%s5576_s15 + $0x1c] sm:$0xf] %vm2752_vm1, %v3061_v25  ;;  %v2580_v55 = vadd.f32 %v2517_v51, %v5492_v13  ;;  %v2457_v42 = vmul.f32 %v4159_v7, %v5298_v61  ;;  %v4155_v40 = vunpack.i.h.bf16 %v4153_v1  ;;  %v4154_v14 = vunpack.i.l.bf16 %v4153_v1  ;;  %v4178_v7 = vpop.permute.xlu1 %4177 }
 0x189   : > { %v2613_v53 = vadd.f32 %v5548_v2, %v2581_v12  ;;  %v2610_v48 = vadd.f32 %v5548_v2, %v2578_v6  ;;  %v2611_v62 = vadd.f32 %v5548_v2, %v2579_v5  ;;  %v4170_v50 = vunpack.i.h.bf16 %v4168_v56  ;;  %v4173_v24 = vpop.permute.xlu0 %4172 }
 0x18a   : > { %v2612_v22 = vadd.f32 %v5548_v2, %v2580_v55  ;;  %v2524_v11 = vrot.slane %v2457_v42, 6  ;;  %v2456_v30 = vmul.f32 %v4155_v40, %v5298_v61  ;;  %v2455_v13 = vmul.f32 %v4154_v14, %v5298_v61 }
 0x18b   : > { %v2638_v20 = vmax.f32 %v2613_v53, 0.0  ;;  %v2635_v3 = vmax.f32 %v2610_v48, 0.0  ;;  %v2636_v60 = vmax.f32 %v2611_v62, 0.0  ;;  %v5655_v59 = vmul.f32 %v4170_v50, %v5298_v61 }
 0x18c   : > { %v2637_v54 = vmax.f32 %v2612_v22, 0.0  ;;  %v2527_v18 = vsel %vm1808_vm0, %v2524_v11, %v2526_v27  ;;  %v2522_v8 = vrot.slane %v2456_v30, 6  ;;  %v2520_v41 = vrot.slane %v2455_v13, 6 }
 0x18d   : > { %v3066_v32 = vpack.c.bf16 %v2638_v20, %v2638_v20  ;;  %v3063_v9 = vpack.c.bf16 %v2635_v3, %v2635_v3  ;;  %v3064_v36 = vpack.c.bf16 %v2636_v60, %v2636_v60  ;;  %v2585_v26 = vadd.f32 %v2527_v18, %v5517_v17 }
 0x18e   : > { %v3065_v28 = vpack.c.bf16 %v2637_v54, %v2637_v54  ;;  %v2525_v46 = vsel %vm1808_vm0, %v2522_v8, %v2524_v11  ;;  %v2521_v23 = vsel %vm1808_vm0, %v2518_v33, %v2520_v41  ;;  %v2523_v0 = vsel %vm1808_vm0, %v2520_v41, %v2522_v8 }
 0x18f   : > { %2765 = vst.msk [vmem:[%s5576_s15 + $0x30] sm:$0xf] %vm2752_vm1, %v3066_v32  ;;  %2762 = vst.msk [vmem:[%s5576_s15 + $0x24] sm:$0xf] %vm2752_vm1, %v3063_v9  ;;  %v2582_v29 = vadd.f32 %v2521_v23, %v5499_v4  ;;  %v2583_v43 = vadd.f32 %v2523_v0, %v5487_v58  ;;  %v2584_v17 = vadd.f32 %v2525_v46, %v5513_v34  ;;  %v2534_v25 = vrot.slane %v5655_v59, 6 }
 0x190   : > { %2763 = vst.msk [vmem:[%s5576_s15 + $0x28] sm:$0xf] %vm2752_vm1, %v3064_v36  ;;  %2764 = vst.msk [vmem:[%s5576_s15 + $0x2c] sm:$0xf] %vm2752_vm1, %v3065_v28  ;;  %v2617_v33 = vadd.f32 %v5548_v2, %v2585_v26  ;;  %v4169_v1 = vunpack.i.l.bf16 %v4168_v56  ;;  %v4165_v57 = vunpack.i.h.bf16 %v4163_v37  ;;  %v4164_v51 = vunpack.i.l.bf16 %v4163_v37 }
 0x191   : > { %v2614_v35 = vadd.f32 %v5548_v2, %v2582_v29  ;;  %v2615_v39 = vadd.f32 %v5548_v2, %v2583_v43  ;;  %v2616_v12 = vadd.f32 %v5548_v2, %v2584_v17  ;;  %v4180_v6 = vunpack.i.h.bf16 %v4178_v7 }
 0x192   : > { %v2642_v5 = vmax.f32 %v2617_v33, 0.0  ;;  %v2461_v4 = vmul.f32 %v4169_v1, %v5298_v61  ;;  %v2460_v58 = vmul.f32 %v4165_v57, %v5298_v61  ;;  %v2459_v34 = vmul.f32 %v4164_v51, %v5298_v61 }
 0x193   : > { %v2201_v55 = vsel %vm1808_vm0, %v2198_v52, %v2200_v45  ;;  %v2639_v56 = vmax.f32 %v2614_v35, 0.0  ;;  %v2640_v42 = vmax.f32 %v2615_v39, 0.0  ;;  %v2641_v40 = vmax.f32 %v2616_v12, 0.0 }
 0x194   : > { %v3070_v14 = vpack.c.bf16 %v2642_v5, %v2642_v5  ;;  %v2532_v53 = vrot.slane %v2461_v4, 6  ;;  %v2530_v48 = vrot.slane %v2460_v58, 6  ;;  %v2528_v62 = vrot.slane %v2459_v34, 6 }
 0x195   : > { %v3067_v22 = vpack.c.bf16 %v2639_v56, %v2639_v56  ;;  %v3068_v11 = vpack.c.bf16 %v2640_v42, %v2640_v42  ;;  %v3069_v30 = vpack.c.bf16 %v2641_v40, %v2641_v40  ;;  %v2466_v13 = vmul.f32 %v4180_v6, %v5298_v61 }
 0x196   : > { %2769 = vst.msk [vmem:[%s5576_s15 + $0x40] sm:$0xf] %vm2752_vm1, %v3070_v14  ;;  %v2535_v10 = vsel %vm1808_vm0, %v2532_v53, %v2534_v25  ;;  %v2533_v52 = vsel %vm1808_vm0, %v2530_v48, %v2532_v53  ;;  %v2529_v45 = vsel %vm1808_vm0, %v2526_v27, %v2528_v62  ;;  %v2531_v50 = vsel %vm1808_vm0, %v2528_v62, %v2530_v48 }
 0x197   : > { %2766 = vst.msk [vmem:[%s5576_s15 + $0x34] sm:$0xf] %vm2752_vm1, %v3067_v22  ;;  %2767 = vst.msk [vmem:[%s5576_s15 + $0x38] sm:$0xf] %vm2752_vm1, %v3068_v11  ;;  %v2589_v20 = vadd.f32 %v2535_v10, %v5542_v49  ;;  %v2586_v3 = vadd.f32 %v2529_v45, %v5524_v21  ;;  %v2587_v60 = vadd.f32 %v2531_v50, %v5502_v16  ;;  %v4179_v27 = vunpack.i.l.bf16 %v4178_v7 }
 0x198   : > { %2768 = vst.msk [vmem:[%s5576_s15 + $0x3c] sm:$0xf] %vm2752_vm1, %v3069_v30  ;;  %v2588_v54 = vadd.f32 %v2533_v52, %v5539_v44  ;;  %v2250_v63 = vadd.f32 %v5562_v19, %v5404_v47  ;;  %v4175_v18 = vunpack.i.h.bf16 %v4173_v24  ;;  %v4174_v8 = vunpack.i.l.bf16 %v4173_v24 }
 0x199   : > { %v2621_v41 = vadd.f32 %v5548_v2, %v2589_v20  ;;  %v2618_v32 = vadd.f32 %v5548_v2, %v2586_v3  ;;  %v2619_v9 = vadd.f32 %v5548_v2, %v2587_v60  ;;  %v2542_v36 = vrot.slane %v2466_v13, 6 }
 0x19a   : > { %v2620_v49 = vadd.f32 %v5548_v2, %v2588_v54  ;;  %v2465_v21 = vmul.f32 %v4179_v27, %v5298_v61  ;;  %v2464_v16 = vmul.f32 %v4175_v18, %v5298_v61  ;;  %v2463_v44 = vmul.f32 %v4174_v8, %v5298_v61 }
 0x19b   : > { %v2646_v28 = vmax.f32 %v2621_v41, 0.0  ;;  %v2643_v47 = vmax.f32 %v2618_v32, 0.0  ;;  %v2644_v19 = vmax.f32 %v2619_v9, 0.0  ;;  %v2251_v26 = vadd.f32 %v2201_v55, %v5395_v31 }
 0x19c   : > { %v2645_v37 = vmax.f32 %v2620_v49, 0.0  ;;  %v2540_v46 = vrot.slane %v2465_v21, 6  ;;  %v2538_v23 = vrot.slane %v2464_v16, 6  ;;  %v2536_v0 = vrot.slane %v2463_v44, 6 }
 0x19d   : > { %v3074_v7 = vpack.c.bf16 %v2646_v28, %v2646_v28  ;;  %v3071_v29 = vpack.c.bf16 %v2643_v47, %v2643_v47  ;;  %v3072_v43 = vpack.c.bf16 %v2644_v19, %v2644_v19 }
 0x19e   : > { %v3073_v17 = vpack.c.bf16 %v2645_v37, %v2645_v37  ;;  %v2543_v33 = vsel %vm1808_vm0, %v2540_v46, %v2542_v36  ;;  %v2541_v61 = vsel %vm1808_vm0, %v2538_v23, %v2540_v46  ;;  %v2537_v1 = vsel %vm1808_vm0, %v2534_v25, %v2536_v0 }
 0x19f   : > { %v2539_v57 = vsel %vm1808_vm0, %v2536_v0, %v2538_v23  ;;  %2773 = vst.msk [vmem:[%s5576_s15 + $0x50] sm:$0xf] %vm2752_vm1, %v3074_v7  ;;  %2770 = vst.msk [vmem:[%s5576_s15 + $0x44] sm:$0xf] %vm2752_vm1, %v3071_v29  ;;  %v2593_v31 = vadd.f32 %v2543_v33, %v2251_v26  ;;  %v2590_v51 = vadd.f32 %v2537_v1, %v5552_v15 }
 0x1a0   : > { %2771 = vst.msk [vmem:[%s5576_s15 + $0x48] sm:$0xf] %vm2752_vm1, %v3072_v43  ;;  %2772 = vst.msk [vmem:[%s5576_s15 + $0x4c] sm:$0xf] %vm2752_vm1, %v3073_v17  ;;  %v2591_v35 = vadd.f32 %v2539_v57, %v5532_v38  ;;  %v2592_v59 = vadd.f32 %v2541_v61, %v2250_v63 }
 0x1a1   : > { %v2625_v25 = vadd.f32 %v5548_v2, %v2593_v31  ;;  %v2622_v39 = vadd.f32 %v5548_v2, %v2590_v51 }
 0x1a2   : > { %v2623_v12 = vadd.f32 %v5548_v2, %v2591_v35  ;;  %v2624_v6 = vadd.f32 %v5548_v2, %v2592_v59 }
 0x1a3   : > { %v2650_v5 = vmax.f32 %v2625_v25, 0.0  ;;  %v2647_v4 = vmax.f32 %v2622_v39, 0.0 }
 0x1a4   : > { %v2648_v58 = vmax.f32 %v2623_v12, 0.0  ;;  %v2649_v34 = vmax.f32 %v2624_v6, 0.0 }
 0x1a5   : > { %v3078_v15 = vpack.c.bf16 %v2650_v5, %v2650_v5  ;;  %v3075_v55 = vpack.c.bf16 %v2647_v4, %v2647_v4 }
 0x1a6   : > { %v3076_v38 = vpack.c.bf16 %v2648_v58, %v2648_v58  ;;  %v3077_v56 = vpack.c.bf16 %v2649_v34, %v2649_v34 }
 0x1a7   : > { %2778 = vst.msk [vmem:[%s5576_s15 + $0x60] sm:$0x3] %vm2777_vm2, %v3078_v15 }
 0x1a8   : > { %2774 = vst.msk [vmem:[%s5576_s15 + $0x54] sm:$0xf] %vm2752_vm1, %v3075_v55  ;;  %2775 = vst.msk [vmem:[%s5576_s15 + $0x58] sm:$0xf] %vm2752_vm1, %v3076_v38 }
 0x1a9   : > { %2776 = vst.msk [vmem:[%s5576_s15 + $0x5c] sm:$0xf] %vm2752_vm1, %v3077_v56 }
 0x1aa PF: > { %s13_s12 = sadd.s32 1, %s4187_s12  }
 0x1ab   : > { %p10_p4 = scmp.ge.s32.totalorder %s13_s12, 4  }
 0x1ad   :  { %12 = sbr.rel (!%p10_p4) target bundleno = 1 (0x1), region = 75 }

// kernel: conv_vae_forward.6
= control target key start
LH: loop header
LB: loop body
LE: loop exit
PB: predicated region body
PF: predicated region fallthrough
CT: control target
= control target key end

     0   :  { %s1783_s12 = smov 0   ;;  %s1956_s0 = inlined_call_operand.vmem [shape: bf16[2,6,56,16], index: 0, kind: input, shape index: {}]   ;;  %s1957_s1 = inlined_call_operand.vmem [shape: bf16[9,16,32], index: 1, kind: input, shape index: {}]   ;;  %s1958_s2 = inlined_call_operand.vmem [shape: f32[1,32], index: 2, kind: input, shape index: {}]   ;;  %s1959_s3 = inlined_call_operand.vmem [shape: bf16[2,49,32], index: 3, kind: output, shape index: {}]  }
   0x1 LB: > { %s1383_s13 = sadd.s32 4294967295, %s1761_s12   ;;  %p1387_p0 = scmp.ge.s32.totalorder %s1761_s12, 1  ;;  %s1761_s12 = sphi %s1783_s12, %s13_s12  }
   0x2   : > { %p137_p1 = scmp.lt.s32.totalorder %s1761_s12, 3 }
   0x4   : > { %p138_p2 = pnand %p1387_p0, %p137_p1 }
   0x5   : > { %v1716_v0 = vld [vmem:[%s1957_s1 + $0x8] sm:$0xff] (!%p138_p2)   ;;  %p161_p3 = scmp.lt.s32.totalorder (!%p138_p2), %s1383_s13, 1  ;;  %v1797_v1 = vld [vmem:[%s1957_s1 + $0x20] sm:$0xff] (!%p138_p2)   ;;  %vm216_vm0 = vcmask (!%p138_p2), 130048   ;;  %v1731_v6 = vld [vmem:[%s1957_s1 + $0x10] sm:$0xff] (!%p138_p2)   ;;  %vm1315_vm2 = vcmask (!%p138_p2), 257024  }
   0x6   : > { %141 = sbr.rel (%p138_p2) target bundleno = 317 (0x13d), region = 32  ;;  %1582 = vmatprep.subr.bf16.mxu1 (!%p138_p2), %v1716_v0  ;;  %v1720_v2 = vld [vmem:[%s1957_s1] sm:$0xff] (!%p138_p2)   ;;  %1622 = vmatprep.subr.bf16.mxu0 (!%p138_p2), %v1797_v1  ;;  %v1724_v3 = vld [vmem:[%s1957_s1 + $0x28] sm:$0xff] (!%p138_p2)   ;;  %v1732_v10 = vld [vmem:[%s1957_s1 + $0x30] sm:$0xff] (!%p138_p2)   ;;  %vm876_vm1 = vsmask.f32 (!%p138_p2), 4352 }
   0x7   : > { %1583 = vmatpush3.bf16.msra.mxu1 (!%p138_p2), %v1716_v0  ;;  %1623 = vmatpush3.bf16.msra.mxu0 (!%p138_p2), %v1797_v1  ;;  %v1741_v31 = vld [vmem:[%s1957_s1 + $0x38] sm:$0xff] (!%p138_p2)   ;;  %vm1322_vm3 = vcmask (!%p138_p2), 253952   ;;  %vm1323_vm4 = vsmask.f32 (!%p138_p2), 256 }
   0x8   : > { %1592 = vmatprep.subr.bf16.mxu1 (!%p138_p2), %v1720_v2  ;;  %1632 = vmatprep.subr.bf16.mxu0 (!%p138_p2), %v1724_v3  ;;  %v1740_v35 = vld [vmem:[%s1957_s1 + $0x18] sm:$0xff] (!%p138_p2)   ;;  %vm1324_vm5 = vmand (!%p138_p2), %vm1322_vm3, %vm1323_vm4 }
   0xd   : > { %s1961_s13 = smov (!%p161_p3, %s1383_s13), 1 }
   0xe   : > { %s1706_s22 = smul.u32 168, %s1961_s13 }
   0xf   : > { %s1707_s11 = smul.u32 28, %s1961_s13 }
  0x10   : > { %s1813_s25 = scalar_lea.vmem %s1956_s0, %s1706_s22 }
  0x11   : > { %v1390_v4 = vld [vmem:[%s1813_s25 + $0x1c] sm:$0xf]  ;;  %v1817_v5 = vld [vmem:[%s1813_s25 + $0x20] sm:$0xf]  ;;  %v1721_v8 = vld [vmem:[%s1813_s25 + $0x70] sm:$0xff]   ;;  %s1935_s13 = scalar_lea.vmem %s1959_s3, %s1707_s11 }
  0x12   : > { %v1399_v7 = vcombine.low %v1390_v4, %v1817_v5  ;;  %v1825_v9 = vld [vmem:[%s1813_s25 + $0x24] sm:$0xff]   ;;  %1624 = vmatprep.mubr.msk.bf16.mxu0 %vm216_vm0, %v1721_v8  ;;  %v1723_v11 = vld [vmem:[%s1813_s25 + $0x78] sm:$0xff]   ;;  %v1836_v12 = vld [vmem:[%s1813_s25 + $0x2c] sm:$0xff]  }
  0x13   : > { %v1727_v13 = vld [vmem:[%s1813_s25 + $0x8c] sm:$0xff]   ;;  %1625 = vmatmul.mubr.msk.bf16.vlgmr.msra.gmra.mrb[0].mxu0 %vm216_vm0, %v1723_v11  ;;  %v1726_v14 = vld [vmem:[%s1813_s25 + $0x34] ss:$0 sps:$4 sm:$0x11]   ;;  %v172_v15 = vld [vmem:[%s1813_s25] sm:$0xf] }
  0x14   : > { %1584 = vmatprep.mubr.msk.bf16.mxu1 %vm216_vm0, %v1399_v7  ;;  %1633 = vmatpush3.bf16.msra.mxu0 %v1724_v3  ;;  %v173_v16 = vld [vmem:[%s1813_s25 + $0x4] sm:$0xf]  ;;  %v865_v18 = vld [vmem:[%s1813_s25] sm:$0x8]  ;;  %v1733_v20 = vld [vmem:[%s1813_s25 + $0x8] sm:$0xff]   ;;  %v1018_v57 = vshrl.u32 %v1825_v9, 16 }
  0x15   : > { %1585 = vmatmul.mubr.msk.bf16.vlgmr.msra.gmra.mrb[0].mxu1 %vm216_vm0, %v1825_v9  ;;  %1634 = vmatprep.mubr.msk.bf16.mxu0 %vm216_vm0, %v1727_v13  ;;  %v1408_v17 = vcombine.low %v172_v15, %v173_v16  ;;  %v1491_v19 = vcombine.low %v865_v18, %v173_v16  ;;  %v1736_v21 = vld [vmem:[%s1813_s25 + $0x10] sm:$0xff]   ;;  %v885_v25 = vshrl.u32 %v1733_v20, 16  ;;  %v1734_v26 = vld [vmem:[%s1813_s25 + $0x9c] sm:$0xff]   ;;  %v888_v27 = vshll.u32 %v1733_v20, 16  ;;  %v1743_v36 = vld [vmem:[%s1813_s25 + $0x18] ss:$0 sps:$4 sm:$0xff]  }
  0x16   : > { %1593 = vmatpush3.bf16.msra.mxu1 %v1720_v2  ;;  %1588 = vmatprep.mubr.msk.bf16.mxu1 %vm216_vm0, %v1836_v12  ;;  %v1728_v24 = vld [vmem:[%s1813_s25 + $0x94] sm:$0xff]   ;;  %v893_v32 = vshrl.u32 %v1736_v21, 16  ;;  %v896_v33 = vshll.u32 %v1736_v21, 16  ;;  %v1498_v37 = vld [vmem:[%s1813_s25 + $0x1c] sm:$0x8]  ;;  %v902_v42 = vshrl.u32 %v1743_v36, 16 }
  0x17   : > { %1602 = vmatprep.subr.bf16.mxu1 %v1731_v6  ;;  %1642 = vmatprep.subr.bf16.mxu0 %v1732_v10  ;;  %v878_v22 = vshrl.u32 %v1491_v19, 16  ;;  %v881_v23 = vshll.u32 %v1491_v19, 16  ;;  %v887_v30 = vrot.slane %v885_v25, 3  ;;  %v890_v34 = vrot.slane %v888_v27, 4  ;;  %v1417_v41 = vld [vmem:[%s1813_s25 + $0x38] sm:$0xf] }
  0x18   : > { %v1735_v38 = vld [vmem:[%s1813_s25 + $0xa4] ss:$0 sps:$4 sm:$0x11]   ;;  %v905_v43 = vshll.u32 %v1743_v36, 16  ;;  %v1418_v45 = vld [vmem:[%s1813_s25 + $0x3c] sm:$0xf]  ;;  %v1502_v46 = vcombine.low %v1498_v37, %v1817_v5 }
  0x19   : > { %v880_v28 = vrot.slane %v878_v22, 3  ;;  %v883_v29 = vrot.slane %v881_v23, 4  ;;  %v891_v40 = vor.u32 %v890_v34, %v887_v30  ;;  %v1737_v44 = vld [vmem:[%s1813_s25 + $0x18] ss:$0 sps:$4 sm:$0x11]   ;;  %v895_v47 = vrot.slane %v893_v32, 3 }
  0x1a   : > { %v898_v48 = vrot.slane %v896_v33, 4  ;;  %v904_v50 = vrot.slane %v902_v42, 3  ;;  %v907_v51 = vrot.slane %v905_v43, 4  ;;  %v1426_v52 = vcombine.low %v1417_v41, %v1418_v45  ;;  %v1742_v62 = vld [vmem:[%s1813_s25 + $0x40] sm:$0xff]   ;;  %v1749_v4 = vld [vmem:[%s1813_s25 + $0x34] ss:$0 sps:$4 sm:$0xff]  }
  0x1b   : > { %v884_v39 = vor.u32 %v883_v29, %v880_v28  ;;  %v1011_v53 = vshrl.u32 %v1502_v46, 16  ;;  %v1014_v54 = vshll.u32 %v1502_v46, 16  ;;  %v1021_v58 = vshll.u32 %v1825_v9, 16  ;;  %v1747_v3 = vld [vmem:[%s1957_s1 + $0x40] sm:$0xff]   ;;  %v1744_v5 = vld [vmem:[%s1813_s25 + $0x48] sm:$0xff]  }
  0x1c   : > { %v899_v55 = vor.u32 %v898_v48, %v895_v47  ;;  %v908_v56 = vor.u32 %v907_v51, %v904_v50  ;;  %v1020_v0 = vrot.slane %v1018_v57, 3  ;;  %v1029_v7 = vshll.u32 %v1836_v12, 16  ;;  %v1509_v8 = vld [vmem:[%s1813_s25 + $0x38] sm:$0x8]  ;;  %v1748_v29 = vld [vmem:[%s1813_s25 + $0x5c] sm:$0xff]  }
  0x1d   : > { %1589 = vmatmul.mubr.msk.bf16.gmra.mrb[4].mxu1 %vm216_vm0, %v1726_v14  ;;  %v892_v49 = vsel %vm876_vm1, %v884_v39, %v891_v40  ;;  %v1013_v59 = vrot.slane %v1011_v53, 3  ;;  %v1016_v60 = vrot.slane %v1014_v54, 4  ;;  %v1023_v2 = vrot.slane %v1021_v58, 4  ;;  %v1745_v16 = vld [vmem:[%s1813_s25 + $0x50] ss:$0 sps:$4 sm:$0x11]  }
  0x1e   : > { %1594 = vmatprep.mubr.msk.bf16.mxu1 %vm216_vm0, %v1408_v17  ;;  %v900_v61 = vsel %vm876_vm1, %v891_v40, %v899_v55  ;;  %v909_v63 = vsel %vm876_vm1, %v899_v55, %v908_v56  ;;  %v1035_v11 = vshrl.u32 %v1749_v4, 16  ;;  %v1038_v13 = vshll.u32 %v1749_v4, 16  ;;  %v1754_v34 = vld [vmem:[%s1813_s25 + $0x50] ss:$0 sps:$4 sm:$0xff]   ;;  %v1752_v48 = vld [vmem:[%s1813_s25 + $0x80] sm:$0xff]  }
  0x1f   : > { %1635 = vmatmul.mubr.msk.bf16.vlgmr.msra.gmra.mrb[0].mxu0 %vm216_vm0, %v1728_v24  ;;  %v1017_v9 = vor.u32 %v1016_v60, %v1013_v59  ;;  %v1513_v15 = vcombine.low %v1509_v8, %v1418_v45  ;;  %v1151_v25 = vshrl.u32 %v1742_v62, 16  ;;  %v1159_v36 = vshrl.u32 %v1744_v5, 16  ;;  %v1753_v51 = vld [vmem:[%s1813_s25 + $0x88] ss:$0 sps:$4 sm:$0x11]  }
  0x20   : > { %1643 = vmatpush3.bf16.msra.mxu0 %v1732_v10  ;;  %1638 = vmatprep.mubr.msk.bf16.mxu0 %vm216_vm0, %v1734_v26  ;;  %v1024_v10 = vor.u32 %v1023_v2, %v1020_v0  ;;  %v1037_v18 = vrot.slane %v1035_v11, 3  ;;  %v1040_v19 = vrot.slane %v1038_v13, 4  ;;  %v1154_v26 = vshll.u32 %v1742_v62, 16 }
  0x21   : > { %1652 = vmatprep.subr.bf16.mxu0 %v1741_v31  ;;  %v1144_v22 = vshrl.u32 %v1513_v15, 16  ;;  %v1147_v24 = vshll.u32 %v1513_v15, 16  ;;  %v1153_v32 = vrot.slane %v1151_v25, 3  ;;  %v1162_v37 = vshll.u32 %v1744_v5, 16 }
  0x22   : > { %v1025_v17 = vsel %vm876_vm1, %v1017_v9, %v1024_v10  ;;  %v1041_v23 = vor.u32 %v1040_v19, %v1037_v18  ;;  %v1156_v33 = vrot.slane %v1154_v26, 4  ;;  %v1168_v40 = vshrl.u32 %v1754_v34, 16 }
  0x23   : > { %v1146_v28 = vrot.slane %v1144_v22, 3  ;;  %v1171_v41 = vshll.u32 %v1754_v34, 16  ;;  %v1161_v42 = vrot.slane %v1159_v36, 3  ;;  %v1164_v43 = vrot.slane %v1162_v37, 4 }
  0x24   : > { %v1157_v39 = vor.u32 %v1156_v33, %v1153_v32  ;;  %v1170_v46 = vrot.slane %v1168_v40, 3  ;;  %v1520_v32 = vld [vmem:[%s1958_s2] ss:$0 sm:$0xff] }
  0x25   : > { %1595 = vmatmul.mubr.msk.bf16.vlgmr.msra.gmra.mrb[0].mxu1 %vm216_vm0, %v1733_v20  ;;  %v1746_v20 = vld [vmem:[%s1813_s25 + $0x54] sm:$0xff]   ;;  %v1173_v47 = vrot.slane %v1171_v41, 4 }
  0x26   : > { %1603 = vmatpush3.bf16.msra.mxu1 %v1731_v6  ;;  %1598 = vmatprep.mubr.msk.bf16.mxu1 %vm216_vm0, %v1736_v21  ;;  %v1026_v6 = vshrl.u32 %v1836_v12, 16  ;;  %v1031_v12 = vrot.slane %v1029_v7, 4 }
  0x27   : > { %1612 = vmatprep.subr.bf16.mxu1 %v1740_v35  ;;  %1639 = vmatmul.mubr.msk.bf16.gmra.mrb[4].mxu0 %vm216_vm0, %v1735_v38 }
  0x28   : > { %1644 = vmatprep.mubr.msk.bf16.mxu0 %vm216_vm0, %v892_v49  ;;  %v1028_v14 = vrot.slane %v1026_v6, 3  ;;  %v1165_v49 = vor.u32 %v1164_v43, %v1161_v42 }
  0x2a   : > { %v1032_v21 = vor.u32 %v1031_v12, %v1028_v14 }
  0x2c   : > { %v1033_v27 = vsel %vm876_vm1, %v1024_v10, %v1032_v21  ;;  %v1042_v30 = vsel %vm876_vm1, %v1032_v21, %v1041_v23 }
  0x2d   : > { %1599 = vmatmul.mubr.msk.bf16.gmra.mrb[8].mxu1 %vm216_vm0, %v1737_v44  ;;  %v1751_v44 = vld [vmem:[%s1813_s25 + $0x6c] ss:$0 sps:$4 sm:$0x11]  }
  0x2e   : > { %1604 = vmatprep.mubr.msk.bf16.mxu1 %vm216_vm0, %v1426_v52 }
  0x2f   : > { %1645 = vmatmul.mubr.msk.bf16.vlgmr.msra.gmra.mrb[0].mxu0 %vm216_vm0, %v900_v61 }
  0x30   : > { %1653 = vmatpush3.bf16.msra.mxu0 %v1741_v31  ;;  %1648 = vmatprep.mubr.msk.bf16.mxu0 %vm216_vm0, %v909_v63  ;;  %v1149_v31 = vrot.slane %v1147_v24, 4 }
  0x31   : > { %1662 = vmatprep.subr.bf16.mxu0 %v1747_v3 }
  0x32   : > { %v1150_v38 = vor.u32 %v1149_v31, %v1146_v28 }
  0x34   : > { %v1158_v45 = vsel %vm876_vm1, %v1150_v38, %v1157_v39 }
  0x35   : > { %1605 = vmatmul.mubr.msk.bf16.vlgmr.msra.gmra.mrb[0].mxu1 %vm216_vm0, %v1742_v62 }
  0x36   : > { %1613 = vmatpush3.bf16.msra.mxu1 %v1740_v35  ;;  %1608 = vmatprep.mubr.msk.bf16.mxu1 %vm216_vm0, %v1744_v5  ;;  %v1750_v35 = vld [vmem:[%s1813_s25 + $0x64] sm:$0xff]  }
  0x37   : > { %1672 = vmatprep.subr.bf16.mxu1 %v1797_v1  ;;  %1649 = vmatmul.mubr.msk.bf16.gmra.mrb[8].mxu0 %vm216_vm0, %v904_v50  ;;  %v1174_v50 = vor.u32 %v1173_v47, %v1170_v46 }
  0x38   : > { %1654 = vmatprep.mubr.msk.bf16.mxu0 %vm216_vm0, %v1025_v17 }
  0x39   : > { %v1175_v52 = vsel %vm876_vm1, %v1165_v49, %v1174_v50 }
  0x3d   : > { %1609 = vmatmul.mubr.msk.bf16.gmra.mrb[12].mxu1 %vm216_vm0, %v1745_v16 }
  0x3e   : > { %1614 = vmatprep.mubr.msk.bf16.mxu1 %vm216_vm0, %v1746_v20 }
  0x3f   : > { %1655 = vmatmul.mubr.msk.bf16.vlgmr.msra.gmra.mrb[0].mxu0 %vm216_vm0, %v1033_v27 }
  0x40   : > { %1663 = vmatpush3.bf16.msra.mxu0 %v1747_v3  ;;  %1658 = vmatprep.mubr.msk.bf16.mxu0 %vm216_vm0, %v1042_v30 }
  0x45   : > { %1615 = vmatmul.mubr.msk.bf16.vlgmr.msra.gmra.mrb[0].mxu1 %vm216_vm0, %v1748_v29 }
  0x46   : > { %1673 = vmatpush3.bf16.msra.mxu1 %v1797_v1  ;;  %1618 = vmatprep.mubr.msk.bf16.mxu1 %vm216_vm0, %v1750_v35  ;;  %v1166_v1 = vsel %vm876_vm1, %v1157_v39, %v1165_v49 }
  0x47   : > { %1659 = vmatmul.mubr.msk.bf16.gmra.mrb[12].mxu0 %vm216_vm0, %v1037_v18 }
  0x48   : > { %1664 = vmatprep.mubr.msk.bf16.mxu0 %vm216_vm0, %v1158_v45 }
  0x4d   : > { %1619 = vmatmul.mubr.msk.bf16.gmra.mrb[16].mxu1 %vm216_vm0, %v1751_v44 }
  0x4e   : > { %1628 = vmatprep.mubr.msk.bf16.mxu1 %vm216_vm0, %v1752_v48 }
  0x4f   : > { %1665 = vmatmul.mubr.msk.bf16.vlgmr.msra.gmra.mrb[0].mxu0 %vm216_vm0, %v1166_v1 }
  0x50   : > { %1668 = vmatprep.mubr.msk.bf16.mxu0 %vm216_vm0, %v1175_v52 }
  0x55   : > { %1629 = vmatmul.mubr.msk.bf16.vlgmr.msra.gmra.mrb[20].mxu1 %vm216_vm0, %v1753_v51 }
  0x57   : > { %1669 = vmatmul.mubr.msk.bf16.gmra.mrb[16].mxu0 %vm216_vm0, %v1170_v46 }
  0xf0   : > { %v1590_v53 = vpop.f32.mrb[4].mxu1 }
  0xf1   : > { %v279_v54 = vpop.f32.mrb[5].mxu1 }
  0xf2   : > { %v1591_v55 = vpop.f32.mrb[6].mxu1 }
  0xf3   : > { %v282_v56 = vpop.f32.mrb[7].mxu1 }
  0xfa   : > { %v1640_v57 = vpop.f32.mrb[4].mxu0 }
  0xfb   : > { %v844_v58 = vpop.f32.mrb[5].mxu0 }
  0xfc   : > { %v1641_v59 = vpop.f32.mrb[6].mxu0 }
  0xfd   : > { %v1924_v62 = vpop.f32.mrb[7].mxu0 }
 0x100   : > { %v1600_v60 = vpop.f32.mrb[8].mxu1 }
 0x101   : > { %v388_v61 = vadd.f32 %v1600_v60, %v1590_v53  ;;  %v379_v63 = vpop.f32.mrb[9].mxu1 }
 0x102   : > { %v380_v0 = vadd.f32 %v379_v63, %v279_v54  ;;  %v1601_v2 = vpop.f32.mrb[10].mxu1 }
 0x103   : > { %v382_v3 = vpop.f32.mrb[11].mxu1 }
 0x104   : > { %v383_v4 = vadd.f32 %v382_v3, %v282_v56 }
 0x10a   : > { %v1650_v5 = vpop.f32.mrb[8].mxu0 }
 0x10b   : > { %v978_v6 = vpop.f32.mrb[9].mxu0 }
 0x10c   : > { %v1651_v7 = vpop.f32.mrb[10].mxu0 }
 0x10d   : > { %v1926_v10 = vpop.f32.mrb[11].mxu0 }
 0x110   : > { %v1610_v8 = vpop.f32.mrb[12].mxu1 }
 0x111   : > { %v510_v9 = vadd.f32 %v1610_v8, %v388_v61  ;;  %v490_v11 = vpop.f32.mrb[13].mxu1 }
 0x112   : > { %v508_v13 = vadd.f32 %v490_v11, %v380_v0  ;;  %v1611_v14 = vpop.f32.mrb[14].mxu1 }
 0x113   : > { %v493_v12 = vpop.f32.mrb[15].mxu1 }
 0x114   : > { %v509_v15 = vadd.f32 %v493_v12, %v383_v4 }
 0x118   : > { %v1616_v16 = vpop.f32.mrb[0].mxu1 }
 0x119   : > { %v592_v17 = vpop.f32.mrb[1].mxu1 }
 0x11a   : > { %v1617_v18 = vpop.f32.mrb[2].mxu1  ;;  %v1660_v20 = vpop.f32.mrb[12].mxu0 }
 0x11b   : > { %v595_v19 = vpop.f32.mrb[3].mxu1  ;;  %v1111_v21 = vpop.f32.mrb[13].mxu0 }
 0x11c   : > { %v1661_v22 = vpop.f32.mrb[14].mxu0 }
 0x11d   : > { %v1114_v25 = vpop.f32.mrb[15].mxu0 }
 0x120   : > { %v1620_v23 = vpop.f32.mrb[16].mxu1 }
 0x121   : > { %v628_v24 = vadd.f32 %v1620_v23, %v510_v9  ;;  %v608_v26 = vpop.f32.mrb[17].mxu1 }
 0x122   : > { %v626_v27 = vadd.f32 %v608_v26, %v508_v13  ;;  %v1621_v28 = vpop.f32.mrb[18].mxu1  ;;  %v1666_v31 = vpop.f32.mrb[0].mxu0 }
 0x123   : > { %v611_v29 = vpop.f32.mrb[19].mxu1  ;;  %v1674_v33 = vadd.f32 %v1666_v31, %v1616_v16  ;;  %v1228_v34 = vpop.f32.mrb[1].mxu0 }
 0x124   : > { %v627_v30 = vadd.f32 %v611_v29, %v509_v15  ;;  %v1675_v35 = vadd.f32 %v1228_v34, %v592_v17  ;;  %v1667_v36 = vpop.f32.mrb[2].mxu0  ;;  %v1325_v15 = vld [vmem:[%s1935_s13 + $0x18] sm:$0x1] }
 0x125   : > { %v1274_v38 = vadd.f32 %v1674_v33, %v1520_v32  ;;  %v1676_v39 = vadd.f32 %v1667_v36, %v1617_v18  ;;  %v1231_v40 = vpop.f32.mrb[3].mxu0 }
 0x126   : > { %v1272_v43 = vadd.f32 %v1675_v35, %v1520_v32  ;;  %v1677_v44 = vadd.f32 %v1231_v40, %v595_v19 }
 0x127   : > { %v1281_v47 = vmax.f32 %v1274_v38, 0.0  ;;  %v1275_v48 = vadd.f32 %v1676_v39, %v1520_v32 }
 0x128   : > { %v1630_v37 = vpop.f32.mrb[20].mxu1  ;;  %v1279_v1 = vmax.f32 %v1272_v43, 0.0  ;;  %v1273_v51 = vadd.f32 %v1677_v44, %v1520_v32 }
 0x129   : > { %v746_v41 = vadd.f32 %v1630_v37, %v628_v24  ;;  %v726_v42 = vpop.f32.mrb[21].mxu1  ;;  %v1532_v54 = vpack.c.bf16 %v1281_v47, %v1281_v47  ;;  %v1282_v55 = vmax.f32 %v1275_v48, 0.0 }
 0x12a   : > { %v744_v45 = vadd.f32 %v726_v42, %v626_v27  ;;  %v1631_v46 = vpop.f32.mrb[22].mxu1  ;;  %v1530_v59 = vpack.c.bf16 %v1279_v1, %v1279_v1  ;;  %v1280_v60 = vmax.f32 %v1273_v51, 0.0  ;;  %v1670_v61 = vpop.f32.mrb[16].mxu0 }
 0x12b   : > { %v864_v49 = vadd.f32 %v1640_v57, %v746_v41  ;;  %v729_v50 = vpop.f32.mrb[23].mxu1  ;;  %1318 = vst.msk [vmem:[%s1935_s13 + $0x8] sm:$0xf] %vm1315_vm2, %v1532_v54  ;;  %v1533_v0 = vpack.c.bf16 %v1282_v55, %v1282_v55  ;;  %v1244_v3 = vpop.f32.mrb[17].mxu0 }
 0x12c   : > { %v862_v52 = vadd.f32 %v844_v58, %v744_v45  ;;  %v745_v53 = vadd.f32 %v729_v50, %v627_v30  ;;  %1316 = vst.msk [vmem:[%s1935_s13] sm:$0xf] %vm1315_vm2, %v1530_v59  ;;  %v1531_v58 = vpack.c.bf16 %v1280_v60, %v1280_v60  ;;  %v1671_v7 = vpop.f32.mrb[18].mxu0 }
 0x12d   : > { %v998_v56 = vadd.f32 %v1650_v5, %v864_v49  ;;  %1319 = vst.msk [vmem:[%s1935_s13 + $0xc] sm:$0xf] %vm1315_vm2, %v1533_v0  ;;  %v1247_v9 = vpop.f32.mrb[19].mxu0 }
 0x12e   : > { %v863_v57 = vadd.f32 %v1924_v62, %v745_v53  ;;  %v996_v63 = vadd.f32 %v978_v6, %v862_v52  ;;  %1317 = vst.msk [vmem:[%s1935_s13 + $0x4] sm:$0xf] %vm1315_vm2, %v1531_v58 }
 0x12f   : > { %v1131_v2 = vadd.f32 %v1660_v20, %v998_v56 }
 0x130   : > { %v1129_v4 = vadd.f32 %v1111_v21, %v996_v63  ;;  %v997_v5 = vadd.f32 %v1926_v10, %v863_v57 }
 0x131   : > { %v1264_v8 = vadd.f32 %v1670_v61, %v1131_v2 }
 0x132   : > { %v1262_v62 = vadd.f32 %v1244_v3, %v1129_v4  ;;  %v1130_v6 = vadd.f32 %v1114_v25, %v997_v5 }
 0x133   : > { %v1278_v11 = vadd.f32 %v1520_v32, %v1264_v8 }
 0x134   : > { %v1276_v13 = vadd.f32 %v1520_v32, %v1262_v62  ;;  %v1263_v14 = vadd.f32 %v1247_v9, %v1130_v6 }
 0x135   : > { %v1285_v12 = vmax.f32 %v1278_v11, 0.0 }
 0x136   : > { %v1283_v10 = vmax.f32 %v1276_v13, 0.0  ;;  %v1277_v16 = vadd.f32 %v1520_v32, %v1263_v14 }
 0x137   : > { %v1536_v17 = vpack.c.bf16 %v1285_v12, %v1285_v12 }
 0x138   : > { %v1534_v18 = vpack.c.bf16 %v1283_v10, %v1283_v10  ;;  %v1284_v19 = vmax.f32 %v1277_v16, 0.0 }
 0x139   : > { %v1326_v20 = vsel %vm1324_vm5, %v1536_v17, %v1325_v15 }
 0x13a   : > { %1327 = vst [vmem:[%s1935_s13 + $0x18] sm:$0x1] %v1326_v20  ;;  %1320 = vst.msk [vmem:[%s1935_s13 + $0x10] sm:$0xf] %vm1315_vm2, %v1534_v18  ;;  %v1535_v21 = vpack.c.bf16 %v1284_v19, %v1284_v19 }
 0x13c   : > { %1321 = vst.msk [vmem:[%s1935_s13 + $0x14] sm:$0xf] %vm1315_vm2, %v1535_v21 }
 0x13d PF: > { %s13_s12 = sadd.s32 1, %s1761_s12  }
 0x13e   : > { %p10_p4 = scmp.ge.s32.totalorder %s13_s12, 4  }
 0x140   :  { %12 = sbr.rel (!%p10_p4) target bundleno = 1 (0x1), region = 75 }

// kernel: conv_vae_forward.8
= control target key start
LH: loop header
LB: loop body
LE: loop exit
PB: predicated region body
PF: predicated region fallthrough
CT: control target
= control target key end

     0   :  { %s1033_s12 = smov 0   ;;  %s1149_s0 = inlined_call_operand.vmem [shape: bf16[2,2,56,32], index: 0, kind: input, shape index: {}]   ;;  %s1150_s1 = inlined_call_operand.vmem [shape: bf16[4,32,64], index: 1, kind: input, shape index: {}]   ;;  %s1151_s2 = inlined_call_operand.vmem [shape: f32[1,64], index: 2, kind: input, shape index: {}]   ;;  %s1152_s3 = inlined_call_operand.vmem [shape: bf16[2,49,64], index: 3, kind: output, shape index: {}]  }
   0x1 LB: > { %s810_s13 = sadd.s32 4294967295, %s1011_s12   ;;  %p814_p0 = scmp.ge.s32.totalorder %s1011_s12, 1  ;;  %s1011_s12 = sphi %s1033_s12, %s13_s12  }
   0x2   : > { %p137_p1 = scmp.lt.s32.totalorder %s1011_s12, 3 }
   0x4   : > { %p138_p2 = pnand %p814_p0, %p137_p1 }
   0x5   : > { %v985_v0 = vld [vmem:[%s1150_s1 + $0x10] sm:$0xff] (!%p138_p2)   ;;  %p161_p3 = scmp.lt.s32.totalorder (!%p138_p2), %s810_s13, 1  ;;  %v986_v1 = vld [vmem:[%s1150_s1 + $0x18] sm:$0xff] (!%p138_p2)   ;;  %v987_v2 = vld [vmem:[%s1150_s1 + $0x20] sm:$0xff] (!%p138_p2)   ;;  %vm226_vm0 = vcmask (!%p138_p2), 261120   ;;  %vm742_vm2 = vcmask (!%p138_p2), 519168  }
   0x6   : > { %141 = sbr.rel (%p138_p2) target bundleno = 278 (0x116), region = 32  ;;  %915 = vmatprep.subr.bf16.mxu1 (!%p138_p2), %v985_v0  ;;  %v991_v3 = vld [vmem:[%s1150_s1] sm:$0xff] (!%p138_p2)   ;;  %939 = vmatprep.subr.bf16.mxu0 (!%p138_p2), %v987_v2  ;;  %v992_v4 = vld [vmem:[%s1150_s1 + $0x28] sm:$0xff] (!%p138_p2)   ;;  %v1067_v5 = vld [vmem:[%s1150_s1 + $0x30] sm:$0xff] (!%p138_p2)   ;;  %vm422_vm1 = vsmask.f32 (!%p138_p2), 4352 }
   0x7   : > { %916 = vmatpush3.bf16.msra.mxu1 (!%p138_p2), %v985_v0  ;;  %940 = vmatpush3.bf16.msra.mxu0 (!%p138_p2), %v987_v2  ;;  %v999_v22 = vld [vmem:[%s1150_s1 + $0x8] sm:$0xff] (!%p138_p2)   ;;  %v1001_v50 = vld [vmem:[%s1150_s1 + $0x38] sm:$0xff] (!%p138_p2)   ;;  %vm749_vm3 = vcmask (!%p138_p2), 516096   ;;  %vm750_vm4 = vsmask.f32 (!%p138_p2), 256 }
   0x8   : > { %917 = vmatprep.subr.bf16.mxu1 (!%p138_p2), %v986_v1  ;;  %941 = vmatprep.subr.bf16.mxu0 (!%p138_p2), %v992_v4  ;;  %vm751_vm5 = vmand (!%p138_p2), %vm749_vm3, %vm750_vm4 }
   0xb   : > { %918 = vmatpush3.bf16.msra.mxu1 (!%p138_p2), %v986_v1  ;;  %942 = vmatpush3.bf16.msra.mxu0 (!%p138_p2), %v992_v4 }
   0xc   : > { %927 = vmatprep.subr.bf16.mxu1 (!%p138_p2), %v991_v3  ;;  %951 = vmatprep.subr.bf16.mxu0 (!%p138_p2), %v1067_v5 }
   0xd   : > { %s1154_s13 = smov (!%p161_p3, %s810_s13), 1 }
   0xe   : > { %s975_s22 = smul.u32 56, %s1154_s13 }
   0xf   : > { %s976_s9 = smul.u32 28, %s1154_s13 }
  0x10   : > { %s1062_s27 = scalar_lea.vmem %s1149_s0, %s975_s22 }
  0x11   : > { %v817_v6 = vld [vmem:[%s1062_s27 + $0x1c] sm:$0xf]  ;;  %v818_v7 = vld [vmem:[%s1062_s27 + $0x20] sm:$0xf]  ;;  %v990_v10 = vld [vmem:[%s1062_s27 + $0x24] sm:$0xff]   ;;  %s1130_s14 = scalar_lea.vmem %s1152_s3, %s976_s9 }
  0x12   : > { %v860_v8 = vld [vmem:[%s1062_s27 + $0x1c] sm:$0x8]  ;;  %v828_v9 = vcombine.low %v817_v6, %v818_v7  ;;  %v173_v11 = vld [vmem:[%s1062_s27 + $0x4] sm:$0xf]  ;;  %v1076_v12 = vld [vmem:[%s1062_s27 + $0x8] sm:$0xff]   ;;  %v572_v40 = vshrl.u32 %v990_v10, 16 }
  0x13   : > { %v409_v13 = vld [vmem:[%s1062_s27] sm:$0x8]  ;;  %v1081_v14 = vld [vmem:[%s1062_s27 + $0x2c] sm:$0xff]   ;;  %v866_v15 = vcombine.low %v860_v8, %v818_v7  ;;  %v431_v17 = vshrl.u32 %v1076_v12, 16  ;;  %v434_v18 = vshll.u32 %v1076_v12, 16  ;;  %v575_v41 = vshll.u32 %v990_v10, 16 }
  0x14   : > { %919 = vmatprep.mubr.msk.bf16.mxu1 %vm226_vm0, %v828_v9  ;;  %v852_v16 = vcombine.low %v409_v13, %v173_v11  ;;  %v997_v21 = vld [vmem:[%s1062_s27 + $0x10] sm:$0xff]   ;;  %v1000_v28 = vld [vmem:[%s1062_s27 + $0x18] ss:$0 sps:$4 sm:$0xff]   ;;  %v172_v39 = vld [vmem:[%s1062_s27] sm:$0xf]  ;;  %v574_v51 = vrot.slane %v572_v40, 3 }
  0x15   : > { %920 = vmatmul.mubr.msk.bf16.vlgmr.msra.gmra.mrb[0].mxu1 %vm226_vm0, %v990_v10  ;;  %v433_v23 = vrot.slane %v431_v17, 3  ;;  %v436_v24 = vrot.slane %v434_v18, 4  ;;  %v565_v25 = vshrl.u32 %v866_v15, 16  ;;  %v568_v29 = vshll.u32 %v866_v15, 16  ;;  %v1004_v53 = vld [vmem:[%s1062_s27 + $0x34] ss:$0 sps:$4 sm:$0xff]  }
  0x16   : > { %928 = vmatpush3.bf16.msra.mxu1 %v991_v3  ;;  %923 = vmatprep.mubr.msk.bf16.mxu1 %vm226_vm0, %v1081_v14  ;;  %v424_v19 = vshrl.u32 %v852_v16, 16  ;;  %v427_v20 = vshll.u32 %v852_v16, 16  ;;  %v439_v31 = vshrl.u32 %v997_v21, 16  ;;  %v442_v32 = vshll.u32 %v997_v21, 16 }
  0x17   : > { %929 = vmatprep.subr.bf16.mxu1 %v999_v22  ;;  %v437_v30 = vor.u32 %v436_v24, %v433_v23  ;;  %v998_v33 = vld [vmem:[%s1062_s27 + $0x34] ss:$0 sps:$4 sm:$0x11]   ;;  %v448_v35 = vshrl.u32 %v1000_v28, 16  ;;  %v451_v36 = vshll.u32 %v1000_v28, 16  ;;  %v838_v45 = vcombine.low %v172_v39, %v173_v11 }
  0x18   : > { %v426_v26 = vrot.slane %v424_v19, 3  ;;  %v429_v27 = vrot.slane %v427_v20, 4  ;;  %v441_v37 = vrot.slane %v439_v31, 3  ;;  %v444_v38 = vrot.slane %v442_v32, 4  ;;  %v874_v28 = vld [vmem:[%s1151_s2] ss:$0 sm:$0xff] }
  0x19   : > { %v450_v43 = vrot.slane %v448_v35, 3  ;;  %v453_v44 = vrot.slane %v451_v36, 4  ;;  %v567_v46 = vrot.slane %v565_v25, 3  ;;  %v570_v48 = vrot.slane %v568_v29, 4 }
  0x1a   : > { %930 = vmatpush3.bf16.msra.mxu1 %v999_v22  ;;  %v430_v34 = vor.u32 %v429_v27, %v426_v26  ;;  %v445_v47 = vor.u32 %v444_v38, %v441_v37  ;;  %v577_v52 = vrot.slane %v575_v41, 4  ;;  %v580_v56 = vshrl.u32 %v1081_v14, 16  ;;  %v1003_v3 = vld [vmem:[%s1062_s27 + $0x18] ss:$0 sps:$4 sm:$0x11]  }
  0x1b   : > { %v454_v49 = vor.u32 %v453_v44, %v450_v43  ;;  %v583_v57 = vshll.u32 %v1081_v14, 16  ;;  %v571_v58 = vor.u32 %v570_v48, %v567_v46  ;;  %v589_v60 = vshrl.u32 %v1004_v53, 16 }
  0x1c   : > { %v438_v42 = vsel %vm422_vm1, %v430_v34, %v437_v30  ;;  %v446_v54 = vsel %vm422_vm1, %v437_v30, %v445_v47  ;;  %v578_v59 = vor.u32 %v577_v52, %v574_v51  ;;  %v592_v61 = vshll.u32 %v1004_v53, 16 }
  0x1d   : > { %924 = vmatmul.mubr.msk.bf16.gmra.mrb[4].mxu1 %vm226_vm0, %v998_v33  ;;  %943 = vmatprep.mubr.msk.bf16.mxu0 %vm226_vm0, %v438_v42  ;;  %v455_v55 = vsel %vm422_vm1, %v445_v47, %v454_v49  ;;  %v582_v62 = vrot.slane %v580_v56, 3  ;;  %v585_v63 = vrot.slane %v583_v57, 4  ;;  %v591_v1 = vrot.slane %v589_v60, 3 }
  0x1e   : > { %931 = vmatprep.mubr.msk.bf16.mxu1 %vm226_vm0, %v838_v45  ;;  %944 = vmatmul.mubr.msk.bf16.vlgmr.msra.gmra.mrb[0].mxu0 %vm226_vm0, %v446_v54  ;;  %v579_v0 = vsel %vm422_vm1, %v571_v58, %v578_v59  ;;  %v594_v2 = vrot.slane %v592_v61, 4  ;;  %v752_v61 = vld [vmem:[%s1130_s14 + $0x18] sm:$0x1] }
  0x1f   : > { %952 = vmatpush3.bf16.msra.mxu0 %v1067_v5  ;;  %947 = vmatprep.mubr.msk.bf16.mxu0 %vm226_vm0, %v455_v55  ;;  %v586_v4 = vor.u32 %v585_v63, %v582_v62 }
  0x20   : > { %953 = vmatprep.subr.bf16.mxu0 %v1001_v50  ;;  %v595_v5 = vor.u32 %v594_v2, %v591_v1 }
  0x21   : > { %v587_v6 = vsel %vm422_vm1, %v578_v59, %v586_v4 }
  0x22   : > { %v596_v7 = vsel %vm422_vm1, %v586_v4, %v595_v5 }
  0x23   : > { %954 = vmatpush3.bf16.msra.mxu0 %v1001_v50 }
  0x25   : > { %932 = vmatmul.mubr.msk.bf16.vlgmr.msra.gmra.mrb[0].mxu1 %vm226_vm0, %v1076_v12 }
  0x26   : > { %935 = vmatprep.mubr.msk.bf16.mxu1 %vm226_vm0, %v997_v21  ;;  %948 = vmatmul.mubr.msk.bf16.gmra.mrb[4].mxu0 %vm226_vm0, %v450_v43 }
  0x27   : > { %955 = vmatprep.mubr.msk.bf16.mxu0 %vm226_vm0, %v579_v0 }
  0x2d   : > { %936 = vmatmul.mubr.msk.bf16.gmra.mrb[8].mxu1 %vm226_vm0, %v1003_v3 }
  0x2e   : > { %956 = vmatmul.mubr.msk.bf16.vlgmr.msra.gmra.mrb[0].mxu0 %vm226_vm0, %v587_v6 }
  0x2f   : > { %959 = vmatprep.mubr.msk.bf16.mxu0 %vm226_vm0, %v596_v7 }
  0x36   : > { %960 = vmatmul.mubr.msk.bf16.gmra.mrb[8].mxu0 %vm226_vm0, %v591_v1 }
  0xf0   : > { %v925_v8 = vpop.f32.mrb[4].mxu1 }
  0xf1   : > { %v289_v9 = vpop.f32.mrb[5].mxu1 }
  0xf2   : > { %v926_v10 = vpop.f32.mrb[6].mxu1 }
  0xf3   : > { %v292_v11 = vpop.f32.mrb[7].mxu1 }
  0xf8   : > { %v933_v12 = vpop.f32.mrb[0].mxu1 }
  0xf9   : > { %v379_v13 = vpop.f32.mrb[1].mxu1  ;;  %v949_v16 = vpop.f32.mrb[4].mxu0 }
  0xfa   : > { %v934_v14 = vpop.f32.mrb[2].mxu1  ;;  %v530_v17 = vpop.f32.mrb[5].mxu0 }
  0xfb   : > { %v382_v15 = vpop.f32.mrb[3].mxu1  ;;  %v950_v18 = vpop.f32.mrb[6].mxu0 }
  0xfc   : > { %v533_v19 = vpop.f32.mrb[7].mxu0 }
 0x100   : > { %v937_v20 = vpop.f32.mrb[8].mxu1 }
 0x101   : > { %v404_v21 = vadd.f32 %v937_v20, %v925_v8  ;;  %v395_v22 = vpop.f32.mrb[9].mxu1  ;;  %v957_v27 = vpop.f32.mrb[0].mxu0 }
 0x102   : > { %v396_v23 = vadd.f32 %v395_v22, %v289_v9  ;;  %v938_v24 = vpop.f32.mrb[10].mxu1  ;;  %v963_v31 = vadd.f32 %v957_v27, %v933_v12  ;;  %v655_v32 = vpop.f32.mrb[1].mxu0 }
 0x103   : > { %v398_v25 = vpop.f32.mrb[11].mxu1  ;;  %v550_v26 = vadd.f32 %v949_v16, %v404_v21  ;;  %v964_v33 = vadd.f32 %v655_v32, %v379_v13  ;;  %v958_v34 = vpop.f32.mrb[2].mxu0 }
 0x104   : > { %v399_v29 = vadd.f32 %v398_v25, %v292_v11  ;;  %v548_v30 = vadd.f32 %v530_v17, %v396_v23  ;;  %v701_v36 = vadd.f32 %v963_v31, %v874_v28  ;;  %v965_v37 = vadd.f32 %v958_v34, %v934_v14  ;;  %v658_v38 = vpop.f32.mrb[3].mxu0 }
 0x105   : > { %v699_v39 = vadd.f32 %v964_v33, %v874_v28  ;;  %v966_v40 = vadd.f32 %v658_v38, %v382_v15 }
 0x106   : > { %v549_v35 = vadd.f32 %v533_v19, %v399_v29  ;;  %v708_v41 = vmax.f32 %v701_v36, 0.0  ;;  %v702_v42 = vadd.f32 %v965_v37, %v874_v28 }
 0x107   : > { %v706_v43 = vmax.f32 %v699_v39, 0.0  ;;  %v700_v44 = vadd.f32 %v966_v40, %v874_v28 }
 0x108   : > { %v886_v45 = vpack.c.bf16 %v708_v41, %v708_v41  ;;  %v709_v46 = vmax.f32 %v702_v42, 0.0 }
 0x109   : > { %v884_v47 = vpack.c.bf16 %v706_v43, %v706_v43  ;;  %v707_v48 = vmax.f32 %v700_v44, 0.0  ;;  %v961_v49 = vpop.f32.mrb[8].mxu0 }
 0x10a   : > { %745 = vst.msk [vmem:[%s1130_s14 + $0x8] sm:$0xf] %vm742_vm2, %v886_v45  ;;  %v887_v50 = vpack.c.bf16 %v709_v46, %v709_v46  ;;  %v691_v51 = vadd.f32 %v961_v49, %v550_v26  ;;  %v671_v52 = vpop.f32.mrb[9].mxu0 }
 0x10b   : > { %743 = vst.msk [vmem:[%s1130_s14] sm:$0xf] %vm742_vm2, %v884_v47  ;;  %v885_v53 = vpack.c.bf16 %v707_v48, %v707_v48  ;;  %v689_v54 = vadd.f32 %v671_v52, %v548_v30  ;;  %v962_v55 = vpop.f32.mrb[10].mxu0 }
 0x10c   : > { %746 = vst.msk [vmem:[%s1130_s14 + $0xc] sm:$0xf] %vm742_vm2, %v887_v50  ;;  %v705_v56 = vadd.f32 %v874_v28, %v691_v51  ;;  %v674_v57 = vpop.f32.mrb[11].mxu0 }
 0x10d   : > { %744 = vst.msk [vmem:[%s1130_s14 + $0x4] sm:$0xf] %vm742_vm2, %v885_v53  ;;  %v703_v58 = vadd.f32 %v874_v28, %v689_v54  ;;  %v690_v59 = vadd.f32 %v674_v57, %v549_v35 }
 0x10e   : > { %v712_v60 = vmax.f32 %v705_v56, 0.0 }
 0x10f   : > { %v710_v62 = vmax.f32 %v703_v58, 0.0  ;;  %v704_v63 = vadd.f32 %v874_v28, %v690_v59 }
 0x110   : > { %v890_v0 = vpack.c.bf16 %v712_v60, %v712_v60 }
 0x111   : > { %v888_v1 = vpack.c.bf16 %v710_v62, %v710_v62  ;;  %v711_v2 = vmax.f32 %v704_v63, 0.0 }
 0x112   : > { %v753_v3 = vsel %vm751_vm5, %v890_v0, %v752_v61 }
 0x113   : > { %754 = vst [vmem:[%s1130_s14 + $0x18] sm:$0x1] %v753_v3  ;;  %747 = vst.msk [vmem:[%s1130_s14 + $0x10] sm:$0xf] %vm742_vm2, %v888_v1  ;;  %v889_v4 = vpack.c.bf16 %v711_v2, %v711_v2 }
 0x115   : > { %748 = vst.msk [vmem:[%s1130_s14 + $0x14] sm:$0xf] %vm742_vm2, %v889_v4 }
 0x116 PF: > { %s13_s12 = sadd.s32 1, %s1011_s12  }
 0x117   : > { %p10_p4 = scmp.ge.s32.totalorder %s13_s12, 4  }
 0x119   :  { %12 = sbr.rel (!%p10_p4) target bundleno = 1 (0x1), region = 66 }

// kernel: conv_vae_forward.7
= control target key start
LH: loop header
LB: loop body
LE: loop exit
PB: predicated region body
PF: predicated region fallthrough
CT: control target
= control target key end

     0   :  { %s5499_s0 = inlined_call_operand.vmem [shape: bf16[2,1,1568], index: 0, kind: input, shape index: {}]   ;;  %s5500_s1 = inlined_call_operand.vmem [shape: f32[2,1,32], index: 1, kind: input, shape index: {}]   ;;  %s5501_s2 = inlined_call_operand.vmem [shape: bf16[1568,32], index: 2, kind: input, shape index: {}]   ;;  %s5502_s3 = inlined_call_operand.vmem [shape: f32[1,32], index: 3, kind: input, shape index: {}]   ;;  %s5503_s4 = inlined_call_operand.vmem [shape: bf16[1568,32], index: 4, kind: input, shape index: {}]   ;;  %s5504_s5 = inlined_call_operand.vmem [shape: f32[1,32], index: 5, kind: input, shape index: {}]   ;;  %s5505_s6 = inlined_call_operand.vmem [shape: bf16[32,1568], index: 6, kind: input, shape index: {}]   ;;  %s5506_s7 = inlined_call_operand.vmem [shape: f32[1,1568], index: 7, kind: input, shape index: {}]   ;;  %s5507_s8 = inlined_call_operand.hbm [shape: f32[2,1,32], index: 8, kind: output, shape index: {0}]   ;;  %s5508_s9 = inlined_call_operand.hbm [shape: f32[2,1,32], index: 9, kind: output, shape index: {1}]   ;;  %s5509_s10 = inlined_call_operand.vmem [shape: bf16[2,1,1568], index: 10, kind: output, shape index: {2}]  }
   0x1   :  { %5514 = sst [smem:[#allocation9_spill]] %s5499_s0 }
   0x2   :  { %5515 = sst [smem:[#allocation10_spill]] %s5500_s1 }
   0x3   :  { %5516 = sst [smem:[#allocation11_spill]] %s5501_s2 }
   0x4   :  { %5517 = sst [smem:[#allocation12_spill]] %s5502_s3 }
   0x5   :  { %16 = vsyncpa [#allocation3], 0 }
   0x6   :  { %18 = vsyncpa [#allocation3 + $0x1], 0 }
   0x7   :  { %19 = vsyncpa [#allocation5], 0 }
   0x8   :  { %21 = vsyncpa [#allocation5 + $0x1], 0  ;;  %s4450_s13 = smov 0   ;;  %s4452_s14 = smov 0  }
   0x9   :  { %s4454_s15 = smov 0   ;;  %s4456_s16 = smov 0  }
   0xa LB: > { %s4471_s17 = sadd.s32 4294967295, %s4387_s16   ;;  %s3464_s18 = sadd.s32 4294967294, %s4387_s16   ;;  %s4387_s16 = sphi %s4456_s16, %s5549_s16   ;;  %s4383_s15 = sphi %s4454_s15, %s5548_s15   ;;  %s4379_s14 = sphi %s4452_s14, %s5547_s14   ;;  %s4375_s13 = sphi %s4450_s13, %s5546_s13  }
   0xb   : > { %s4475_s19 = sadd.s32 1, %s4387_s16   ;;  %s212_s20 = sadd.s32 1, %s4383_s15 }
   0xc   : > { %s209_s21 = ssub.s32 %s4387_s16, %s4475_s19  ;;  %p222_p0 = scmp.ne.s32.totalorder %s4383_s15, %s4379_s14 }
   0xd   : > { %p210_p1 = scmp.eq.s32.totalorder %s209_s21, 0  ;;  %p223_p2 = scmp.eq.s32.totalorder %s4471_s17, 1 }
   0xe   : > { %p228_p3 = scmp.ne.s32.totalorder %s4379_s14, %s4375_s13  ;;  %p229_p4 = scmp.eq.s32.totalorder %s3464_s18, 1 }
   0xf   : > { %s4486_s22 = scalar_select %p210_p1, %s4383_s15, %s212_s20  }
  0x10   : > { %p4488_p5 = por %p223_p2, %p222_p0  ;;  %p4492_p6 = por %p229_p4, %p228_p3 }
  0x11   : > { %5518 = sst [smem:[#allocation8_spill]] %s4486_s22  ;;  %p3467_p7 = scmp.ge.s32.totalorder %s4387_s16, 1 }
  0x12   : > { %p330_p8 = scmp.lt.s32.totalorder %s4387_s16, 3 }
  0x14   : > { %p331_p9 = pnand %p3467_p7, %p330_p8 }
  0x15   : > { %s5521_s2 = sld [smem:[#allocation11_spill]] (!%p331_p9)  ;;  %p377_p10 = scmp.lt.s32.totalorder (!%p331_p9), %s4471_s17, 1  ;;  %v594_v30 = vlaneseq (!%p331_p9)  ;;  %v4389_v34 = vmov (!%p331_p9), 1966171168   ;;  %vm4391_vm0 = vmmov (!%p331_p9), 0   ;;  %vm1278_vm1 = vcmask (!%p331_p9), 261120  }
  0x16   : > { %334 = sbr.rel (%p331_p9) target bundleno = 717 (0x2cd), region = 52  ;;  %s5522_s0 = sld [smem:[#allocation9_spill]] (!%p331_p9)  ;;  %v592_v35 = vunpack.c.l.s4 (!%p331_p9), %v4389_v34  ;;  %vm3152_vm2 = vcmask (!%p331_p9), 253952  }
  0x17   : > { %v4607_v36 = vshrl.u32 (!%p331_p9), %v594_v30, 7  ;;  %s5523_s3 = sld [smem:[#allocation12_spill]] (!%p331_p9)  ;;  %s5524_s1 = sld [smem:[#allocation10_spill]] (!%p331_p9) }
  0x18   : > { %v593_v39 = vunpack.c.0.s8 (!%p331_p9), %v592_v35  ;;  %s4393_s29 = smov (!%p331_p9), [#allocation2]  }
  0x19   : > { %s4297_s22 = sshll.u32 (!%p331_p9), %s4393_s29, 4  ;;  %s4298_s22 = int_to_ptr.vmem [resolvable:$false] %s4297_s22 }
  0x1a   : > { %v4616_v41 = vsub.s32 (!%p331_p9), %v593_v39, %v4607_v36 }
  0x1b   : > { %v4055_v0 = vld [vmem:[%s5521_s2 + $0x40] sm:$0xff] (!%p331_p9)   ;;  %v4059_v4 = vld [vmem:[%s5521_s2 + $0x48] sm:$0xff] (!%p331_p9)   ;;  %v4063_v8 = vld [vmem:[%s5521_s2 + $0x50] sm:$0xff] (!%p331_p9)  }
  0x1c   : > { %v4056_v1 = vld [vmem:[%s5521_s2 + $0xc0] sm:$0xff] (!%p331_p9)   ;;  %3709 = vmatprep.subr.bf16.mxu0 (!%p331_p9), %v4055_v0  ;;  %v4060_v5 = vld [vmem:[%s5521_s2 + $0xc8] sm:$0xff] (!%p331_p9)   ;;  %v4064_v9 = vld [vmem:[%s5521_s2 + $0xd0] sm:$0xff] (!%p331_p9)  }
  0x1d   : > { %v4057_v2 = vld [vmem:[%s5521_s2] sm:$0xff]   ;;  %3731 = vmatprep.subr.bf16.mxu1 %v4056_v1  ;;  %v4061_v6 = vld [vmem:[%s5521_s2 + $0x8] sm:$0xff]   ;;  %v4065_v10 = vld [vmem:[%s5521_s2 + $0x10] sm:$0xff]   ;;  %s4566_s25 = scalar_select %p377_p10, %s4471_s17, 1 }
  0x1e   : > { %v4058_v3 = vld [vmem:[%s5521_s2 + $0x80] sm:$0xff]   ;;  %3710 = vmatpush3.bf16.msra.mxu0 %v4057_v2  ;;  %v4062_v7 = vld [vmem:[%s5521_s2 + $0x88] sm:$0xff]   ;;  %v4066_v11 = vld [vmem:[%s5521_s2 + $0x90] sm:$0xff]  }
  0x1f   : > { %3732 = vmatpush3.bf16.msra.mxu1 %v4058_v3  ;;  %3711 = vmatprep.subr.bf16.mxu0 %v4059_v4  ;;  %v4067_v12 = vld [vmem:[%s5521_s2 + $0x58] sm:$0xff]   ;;  %v4071_v16 = vld [vmem:[%s5521_s2 + $0x60] sm:$0xff]   ;;  %v4075_v20 = vld [vmem:[%s5521_s2 + $0x68] sm:$0xff]   ;;  %s5510_s20 = smul.u32 13, %s4566_s25  ;;  %s383_s28 = scalar_lea.vmem %s5524_s1, %s4566_s25 }
  0x20   : > { %3733 = vmatprep.subr.bf16.mxu1 %v4060_v5  ;;  %v4068_v13 = vld [vmem:[%s5521_s2 + $0xd8] sm:$0xff]   ;;  %v4072_v17 = vld [vmem:[%s5521_s2 + $0xe0] sm:$0xff]   ;;  %v4076_v21 = vld [vmem:[%s5521_s2 + $0xe8] sm:$0xff]  }
  0x21   : > { %v4069_v14 = vld [vmem:[%s5521_s2 + $0x18] sm:$0xff]   ;;  %v4073_v18 = vld [vmem:[%s5521_s2 + $0x20] sm:$0xff]   ;;  %v4077_v22 = vld [vmem:[%s5521_s2 + $0x28] sm:$0xff]   ;;  %s4598_s21 = scalar_lea.vmem %s5522_s0, %s5510_s20  ;;  %s5231_s20 = sand.u32 1, %s4379_s14  }
  0x22   : > { %3712 = vmatpush3.bf16.msra.mxu0 %v4061_v6  ;;  %v4070_v15 = vld [vmem:[%s5521_s2 + $0x98] sm:$0xff]   ;;  %v4074_v19 = vld [vmem:[%s5521_s2 + $0xa0] sm:$0xff]   ;;  %v4078_v23 = vld [vmem:[%s5521_s2 + $0xa8] sm:$0xff]   ;;  %s5512_s30 = scalar_lea.vmem [#allocation2], %s5231_s20  ;;  %s5511_s18 = scalar_lea.vmem [#allocation4], %s5231_s20 }
  0x23   : > { %3734 = vmatpush3.bf16.msra.mxu1 %v4062_v7  ;;  %3713 = vmatprep.subr.bf16.mxu0 %v4063_v8  ;;  %v4079_v24 = vld [vmem:[%s5521_s2 + $0x70] sm:$0xff]   ;;  %v4083_v28 = vld [vmem:[%s5521_s2 + $0x78] sm:$0xff]   ;;  %v389_v33 = vld [vmem:[%s4598_s21] sm:$0xff]  ;;  %s5525_s12 = scalar_lea.vmem [#allocation2], %s5231_s20  ;;  %s3312_s27 = scalar_lea.sflag [#allocation3], %s5231_s20 }
  0x24   : > { %3735 = vmatprep.subr.bf16.mxu1 %v4064_v9  ;;  %v4080_v25 = vld [vmem:[%s5521_s2 + $0xf0] sm:$0xff]   ;;  %v4084_v29 = vld [vmem:[%s5521_s2 + $0xf8] sm:$0xff]   ;;  %v4087_v37 = vld [vmem:[%s5521_s2 + $0x140] sm:$0xff]   ;;  %v590_v40 = vcombine.high %v389_v33, %v389_v33  ;;  %v597_v42 = vrot.slane %v389_v33, %v4616_v41  ;;  %s3332_s26 = sshll.u32 %s5525_s12, 4  ;;  %s4299_s0 = scalar_lea.vmem %s4298_s22, 32  ;;  %s3333_s26 = int_to_ptr.vmem [resolvable:$true] %s3332_s26 }
  0x25   : > { %v4081_v26 = vld [vmem:[%s5521_s2 + $0x30] sm:$0xff]   ;;  %v4085_v31 = vld [vmem:[%s5521_s2 + $0x38] sm:$0xff]   ;;  %v4088_v38 = vld [vmem:[%s5521_s2 + $0x1c0] sm:$0xff]   ;;  %p4300_p0 = scmp.lt.s32.totalorder %s3333_s26, %s4298_s22 }
  0x26   : > { %3714 = vmatpush3.bf16.msra.mxu0 %v4065_v10  ;;  %v4082_v27 = vld [vmem:[%s5521_s2 + $0xb0] sm:$0xff]   ;;  %v4086_v32 = vld [vmem:[%s5521_s2 + $0xb8] sm:$0xff]   ;;  %v4620_v43 = vrot.slane %v590_v40, %v4616_v41  ;;  %v605_v44 = vcombine.high %v597_v42, %v597_v42  ;;  %v4623_v45 = vrot.slane %v597_v42, %v4616_v41  ;;  %v4089_v48 = vld [vmem:[%s5521_s2 + $0x100] sm:$0xff]  }
  0x27   : > { %3736 = vmatpush3.bf16.msra.mxu1 %v4066_v11  ;;  %3715 = vmatprep.subr.bf16.mxu0 %v4067_v12  ;;  %v4091_v51 = vld [vmem:[%s5521_s2 + $0x148] sm:$0xff]   ;;  %v4090_v53 = vld [vmem:[%s5521_s2 + $0x180] sm:$0xff]   ;;  %v4095_v57 = vld [vmem:[%s5521_s2 + $0x150] sm:$0xff]  }
  0x28   : > { %3737 = vmatprep.subr.bf16.mxu1 %v4068_v13  ;;  %v606_v46 = vcombine.high %v4620_v43, %v4620_v43  ;;  %v4628_v47 = vrot.slane %v605_v44, %v4616_v41  ;;  %v4638_v50 = vcombine.high %v4623_v45, %v4623_v45  ;;  %v4092_v54 = vld [vmem:[%s5521_s2 + $0x1c8] sm:$0xff]   ;;  %v4096_v59 = vld [vmem:[%s5521_s2 + $0x1d0] sm:$0xff]   ;;  %v4099_v61 = vld [vmem:[%s5521_s2 + $0x158] sm:$0xff]  }
  0x29   : > { %v4093_v56 = vld [vmem:[%s5521_s2 + $0x108] sm:$0xff]   ;;  %v4097_v60 = vld [vmem:[%s5521_s2 + $0x110] sm:$0xff]   ;;  %v4100_v63 = vld [vmem:[%s5521_s2 + $0x1d8] sm:$0xff]  }
  0x2a   : > { %3716 = vmatpush3.bf16.msra.mxu0 %v4069_v14  ;;  %v4634_v49 = vrot.slane %v606_v46, %v4616_v41  ;;  %1314 = vmatprep.mubr.bf16.mxu0 %v4628_v47  ;;  %v4646_v52 = vcombine.high %v4628_v47, %v4628_v47  ;;  %v4094_v58 = vld [vmem:[%s5521_s2 + $0x188] sm:$0xff]   ;;  %v4098_v62 = vld [vmem:[%s5521_s2 + $0x190] sm:$0xff]   ;;  %v4101_v0 = vld [vmem:[%s5521_s2 + $0x118] sm:$0xff]  }
  0x2b   : > { %3738 = vmatpush3.bf16.msra.mxu1 %v4070_v15  ;;  %3717 = vmatprep.subr.bf16.mxu0 %v4071_v16  ;;  %v4103_v1 = vld [vmem:[%s5521_s2 + $0x160] sm:$0xff]   ;;  %v4102_v2 = vld [vmem:[%s5521_s2 + $0x198] sm:$0xff]   ;;  %v4107_v5 = vld [vmem:[%s5521_s2 + $0x168] sm:$0xff]  }
  0x2c   : > { %3739 = vmatprep.subr.bf16.mxu1 %v4072_v17  ;;  %v4657_v55 = vcombine.high %v4634_v49, %v4634_v49  ;;  %1354 = vmatprep.mubr.bf16.mxu1 %v4646_v52  ;;  %v4104_v3 = vld [vmem:[%s5521_s2 + $0x1e0] sm:$0xff]   ;;  %v4108_v7 = vld [vmem:[%s5521_s2 + $0x1e8] sm:$0xff]   ;;  %v4111_v9 = vld [vmem:[%s5521_s2 + $0x170] sm:$0xff]   ;;  %v4740_v17 = vrot.slane %v4620_v43, %v4616_v41 }
  0x2d   : > { %v4105_v4 = vld [vmem:[%s5521_s2 + $0x120] sm:$0xff]   ;;  %v4109_v8 = vld [vmem:[%s5521_s2 + $0x128] sm:$0xff]   ;;  %v4112_v11 = vld [vmem:[%s5521_s2 + $0x1f0] sm:$0xff]  }
  0x2e   : > { %3718 = vmatpush3.bf16.msra.mxu0 %v4073_v18  ;;  %v4106_v6 = vld [vmem:[%s5521_s2 + $0x1a0] sm:$0xff]   ;;  %v4110_v10 = vld [vmem:[%s5521_s2 + $0x1a8] sm:$0xff]   ;;  %v4113_v12 = vld [vmem:[%s5521_s2 + $0x130] sm:$0xff]  }
  0x2f   : > { %3740 = vmatpush3.bf16.msra.mxu1 %v4074_v19  ;;  %3719 = vmatprep.subr.bf16.mxu0 %v4075_v20  ;;  %v4115_v13 = vld [vmem:[%s5521_s2 + $0x178] sm:$0xff]   ;;  %v4114_v14 = vld [vmem:[%s5521_s2 + $0x1b0] sm:$0xff]   ;;  %v4120_v18 = vld [vmem:[%s5521_s2 + $0x240] sm:$0xff]  }
  0x30   : > { %3741 = vmatprep.subr.bf16.mxu1 %v4076_v21  ;;  %v4116_v15 = vld [vmem:[%s5521_s2 + $0x1f8] sm:$0xff]   ;;  %v4121_v20 = vld [vmem:[%s5521_s2 + $0x2c0] sm:$0xff]   ;;  %v4130_v30 = vld [vmem:[%s5521_s2 + $0x210] sm:$0xff]  }
  0x31   : > { %v4117_v16 = vld [vmem:[%s5521_s2 + $0x138] sm:$0xff]   ;;  %v4122_v21 = vld [vmem:[%s5521_s2 + $0x200] sm:$0xff]   ;;  %v4140_v40 = vld [vmem:[%s5521_s2 + $0x268] sm:$0xff]  }
  0x32   : > { %3720 = vmatpush3.bf16.msra.mxu0 %v4077_v22  ;;  %v4118_v19 = vld [vmem:[%s5521_s2 + $0x1b8] sm:$0xff]   ;;  %v4756_v22 = vcombine.high %v4740_v17, %v4740_v17  ;;  %v4136_v35 = vld [vmem:[%s5521_s2 + $0x260] sm:$0xff]   ;;  %v4141_v43 = vld [vmem:[%s5521_s2 + $0x2e8] sm:$0xff]  }
  0x33   : > { %3742 = vmatpush3.bf16.msra.mxu1 %v4078_v23  ;;  %3721 = vmatprep.subr.bf16.mxu0 %v4079_v24  ;;  %v4124_v23 = vld [vmem:[%s5521_s2 + $0x248] sm:$0xff]   ;;  %v4123_v24 = vld [vmem:[%s5521_s2 + $0x280] sm:$0xff]   ;;  %v4133_v33 = vld [vmem:[%s5521_s2 + $0x2d8] sm:$0xff]  }
  0x34   : > { %3743 = vmatprep.subr.bf16.mxu1 %v4080_v25  ;;  %v4125_v25 = vld [vmem:[%s5521_s2 + $0x2c8] sm:$0xff]   ;;  %v4134_v34 = vld [vmem:[%s5521_s2 + $0x218] sm:$0xff]   ;;  %v4138_v39 = vld [vmem:[%s5521_s2 + $0x220] sm:$0xff]  }
  0x35   : > { %v4139_v42 = vld [vmem:[%s5521_s2 + $0x2a0] sm:$0xff]   ;;  %v4142_v44 = vld [vmem:[%s5521_s2 + $0x228] sm:$0xff]   ;;  %v4144_v46 = vld [vmem:[%s5521_s2 + $0x270] sm:$0xff]  }
  0x36   : > { %3722 = vmatpush3.bf16.msra.mxu0 %v4081_v26  ;;  %v4126_v26 = vld [vmem:[%s5521_s2 + $0x208] sm:$0xff]  }
  0x37   : > { %3744 = vmatpush3.bf16.msra.mxu1 %v4082_v27  ;;  %3723 = vmatprep.subr.bf16.mxu0 %v4083_v28  ;;  %v4128_v27 = vld [vmem:[%s5521_s2 + $0x250] sm:$0xff]   ;;  %v4127_v28 = vld [vmem:[%s5521_s2 + $0x288] sm:$0xff]  }
  0x38   : > { %3745 = vmatprep.subr.bf16.mxu1 %v4084_v29  ;;  %v4129_v29 = vld [vmem:[%s5521_s2 + $0x2d0] sm:$0xff]  }
  0x3a   : > { %3724 = vmatpush3.bf16.msra.mxu0 %v4085_v31  ;;  %v4132_v31 = vld [vmem:[%s5521_s2 + $0x258] sm:$0xff]  }
  0x3b   : > { %3746 = vmatpush3.bf16.msra.mxu1 %v4086_v32  ;;  %3753 = vmatprep.subr.bf16.mxu0 %v4087_v37  ;;  %v4131_v32 = vld [vmem:[%s5521_s2 + $0x290] sm:$0xff]   ;;  %v4135_v37 = vld [vmem:[%s5521_s2 + $0x298] sm:$0xff]  }
  0x3c   : > { %3775 = vmatprep.subr.bf16.mxu1 %v4088_v38  ;;  %v4137_v38 = vld [vmem:[%s5521_s2 + $0x2e0] sm:$0xff]  }
  0x3d   : > { %1315 = vmatmul.mubr.bf16.vlgmr.msra.gmra.mrb[0].mxu0 %v4623_v45 }
  0x3e   : > { %3754 = vmatpush3.bf16.msra.mxu0 %v4089_v48  ;;  %1355 = vmatmul.mubr.bf16.vlgmr.msra.gmra.mrb[0].mxu1 %v4638_v50  ;;  %v390_v48 = vld [vmem:[%s4598_s21 + $0x8] sm:$0x1f] }
  0x3f   : > { %3755 = vmatprep.subr.bf16.mxu0 %v4091_v51  ;;  %3776 = vmatpush3.bf16.msra.mxu1 %v4090_v53  ;;  %v4143_v51 = vld [vmem:[%s5521_s2 + $0x2a8] sm:$0xff]   ;;  %v646_v53 = vrot.slane %v390_v48, %v4616_v41 }
  0x40   : > { %1394 = vmatprep.mubr.bf16.mxu0 %v4634_v49  ;;  %3777 = vmatprep.subr.bf16.mxu1 %v4092_v54  ;;  %v4145_v54 = vld [vmem:[%s5521_s2 + $0x2f0] sm:$0xff]  }
  0x41   : > { %1434 = vmatprep.mubr.bf16.mxu1 %v4657_v55 }
  0x42   : > { %3756 = vmatpush3.bf16.msra.mxu0 %v4093_v56  ;;  %v4146_v56 = vld [vmem:[%s5521_s2 + $0x230] sm:$0xff]  }
  0x43   : > { %3757 = vmatprep.subr.bf16.mxu0 %v4095_v57  ;;  %3778 = vmatpush3.bf16.msra.mxu1 %v4094_v58  ;;  %v654_v57 = vcombine.high %v646_v53, %v646_v53  ;;  %v4148_v58 = vld [vmem:[%s5521_s2 + $0x278] sm:$0xff]  }
  0x44   : > { %3779 = vmatprep.subr.bf16.mxu1 %v4096_v59  ;;  %v4147_v59 = vld [vmem:[%s5521_s2 + $0x2b0] sm:$0xff]  }
  0x46   : > { %3758 = vmatpush3.bf16.msra.mxu0 %v4097_v60  ;;  %v4841_v60 = vrot.slane %v654_v57, %v4616_v41  ;;  %v4198_v57 = vld [vmem:[%s5503_s4 + $0x188] sm:$0xff]  }
  0x47   : > { %3759 = vmatprep.subr.bf16.mxu0 %v4099_v61  ;;  %3780 = vmatpush3.bf16.msra.mxu1 %v4098_v62  ;;  %v4149_v61 = vld [vmem:[%s5521_s2 + $0x2f8] sm:$0xff]  }
  0x48   : > { %3781 = vmatprep.subr.bf16.mxu1 %v4100_v63  ;;  %v4150_v62 = vld [vmem:[%s5521_s2 + $0x238] sm:$0xff]   ;;  %v4852_v63 = vcombine.high %v4841_v60, %v4841_v60 }
  0x4a   : > { %3760 = vmatpush3.bf16.msra.mxu0 %v4101_v0  ;;  %v4855_v0 = vrot.slane %v646_v53, %v4616_v41  ;;  %v4191_v53 = vld [vmem:[%s5503_s4 + $0x150] sm:$0xff]  }
  0x4b   : > { %3761 = vmatprep.subr.bf16.mxu0 %v4103_v1  ;;  %3782 = vmatpush3.bf16.msra.mxu1 %v4102_v2  ;;  %v4151_v1 = vld [vmem:[%s5521_s2 + $0x2b8] sm:$0xff]   ;;  %v639_v2 = vcombine.high %v390_v48, %v390_v48  ;;  %v4192_v48 = vld [vmem:[%s5503_s4 + $0x1c0] sm:$0xff]  }
  0x4c   : > { %3783 = vmatprep.subr.bf16.mxu1 %v4104_v3  ;;  %v4153_v3 = vld [vmem:[%s5503_s4 + $0x40] sm:$0xff]  }
  0x4e   : > { %3762 = vmatpush3.bf16.msra.mxu0 %v4105_v4  ;;  %v4154_v4 = vld [vmem:[%s5521_s2 + $0x300] sm:$0xff]  }
  0x4f   : > { %3763 = vmatprep.subr.bf16.mxu0 %v4107_v5  ;;  %3784 = vmatpush3.bf16.msra.mxu1 %v4106_v6  ;;  %v4390_v5 = vmov 0.0   ;;  %v4870_v6 = vcombine.high %v4855_v0, %v4855_v0 }
  0x50   : > { %3785 = vmatprep.subr.bf16.mxu1 %v4108_v7  ;;  %v4155_v7 = vld [vmem:[%s5503_s4] sm:$0xff]  }
  0x52   : > { %3764 = vmatpush3.bf16.msra.mxu0 %v4109_v8  ;;  %v653_v8 = vrot.slane %v639_v2, %v4616_v41  ;;  %v4206_v2 = vld [vmem:[%s5503_s4 + $0x198] sm:$0xff]  }
  0x53   : > { %3765 = vmatprep.subr.bf16.mxu0 %v4111_v9  ;;  %3786 = vmatpush3.bf16.msra.mxu1 %v4110_v10  ;;  %v4156_v9 = vld [vmem:[%s5503_s4 + $0x48] sm:$0xff]  }
  0x54   : > { %3787 = vmatprep.subr.bf16.mxu1 %v4112_v11  ;;  %v4157_v10 = vld [vmem:[%s5521_s2 + $0x308] sm:$0xff]   ;;  %v4160_v11 = vld [vmem:[%s5503_s4 + $0xc0] sm:$0xff]  }
  0x56   : > { %3766 = vmatpush3.bf16.msra.mxu0 %v4113_v12  ;;  %v4158_v12 = vld [vmem:[%s5503_s4 + $0x8] sm:$0xff]  }
  0x57   : > { %3767 = vmatprep.subr.bf16.mxu0 %v4115_v13  ;;  %3788 = vmatpush3.bf16.msra.mxu1 %v4114_v14  ;;  %v4895_v13 = vrot.slane %v653_v8, %v4616_v41  ;;  %v4159_v14 = vld [vmem:[%s5503_s4 + $0x50] sm:$0xff]   ;;  %v4210_v8 = vld [vmem:[%s5503_s4 + $0x1a0] sm:$0xff]  }
  0x58   : > { %3789 = vmatprep.subr.bf16.mxu1 %v4116_v15  ;;  %v4162_v15 = vld [vmem:[%s5503_s4 + $0x80] sm:$0xff]  }
  0x5a   : > { %3768 = vmatpush3.bf16.msra.mxu0 %v4117_v16  ;;  %v4164_v16 = vld [vmem:[%s5503_s4 + $0xc8] sm:$0xff]  }
  0x5b   : > { %3797 = vmatprep.subr.bf16.mxu0 %v4120_v18  ;;  %3790 = vmatpush3.bf16.msra.mxu1 %v4118_v19  ;;  %v4163_v18 = vld [vmem:[%s5503_s4 + $0x58] sm:$0xff]   ;;  %v4166_v19 = vld [vmem:[%s5503_s4 + $0x88] sm:$0xff]  }
  0x5c   : > { %3819 = vmatprep.subr.bf16.mxu1 %v4121_v20  ;;  %v4168_v20 = vld [vmem:[%s5503_s4 + $0xd0] sm:$0xff]  }
  0x5d   : > { %1395 = vmatmul.mubr.bf16.vlgmr.msra.gmra.mrb[4].mxu0 %v4740_v17 }
  0x5e   : > { %3798 = vmatpush3.bf16.msra.mxu0 %v4122_v21  ;;  %1435 = vmatmul.mubr.bf16.vlgmr.msra.gmra.mrb[4].mxu1 %v4756_v22  ;;  %v4165_v21 = vld [vmem:[%s5503_s4 + $0x18] sm:$0xff]  }
  0x5f   : > { %3799 = vmatprep.subr.bf16.mxu0 %v4124_v23  ;;  %3820 = vmatpush3.bf16.msra.mxu1 %v4123_v24  ;;  %v4167_v23 = vld [vmem:[%s5503_s4 + $0x60] sm:$0xff]   ;;  %v4172_v24 = vld [vmem:[%s5503_s4 + $0xd8] sm:$0xff]  }
  0x60   : > { %3821 = vmatprep.subr.bf16.mxu1 %v4125_v25  ;;  %1474 = vmatprep.mubr.bf16.mxu0 %v4841_v60  ;;  %v4169_v25 = vld [vmem:[%s5503_s4 + $0x20] sm:$0xff]  }
  0x61   : > { %1514 = vmatprep.mubr.bf16.mxu1 %v4852_v63 }
  0x62   : > { %3800 = vmatpush3.bf16.msra.mxu0 %v4126_v26  ;;  %v4171_v26 = vld [vmem:[%s5503_s4 + $0x68] sm:$0xff]  }
  0x63   : > { %3801 = vmatprep.subr.bf16.mxu0 %v4128_v27  ;;  %3822 = vmatpush3.bf16.msra.mxu1 %v4127_v28  ;;  %v4174_v27 = vld [vmem:[%s5503_s4 + $0x98] sm:$0xff]   ;;  %v4176_v28 = vld [vmem:[%s5503_s4 + $0xe0] sm:$0xff]  }
  0x64   : > { %3823 = vmatprep.subr.bf16.mxu1 %v4129_v29  ;;  %v4173_v29 = vld [vmem:[%s5503_s4 + $0x28] sm:$0xff]  }
  0x66   : > { %3802 = vmatpush3.bf16.msra.mxu0 %v4130_v30  ;;  %v4175_v30 = vld [vmem:[%s5503_s4 + $0x70] sm:$0xff]  }
  0x67   : > { %3803 = vmatprep.subr.bf16.mxu0 %v4132_v31  ;;  %3824 = vmatpush3.bf16.msra.mxu1 %v4131_v32  ;;  %v4178_v31 = vld [vmem:[%s5503_s4 + $0xa0] sm:$0xff]   ;;  %v4180_v32 = vld [vmem:[%s5503_s4 + $0xe8] sm:$0xff]  }
  0x68   : > { %3825 = vmatprep.subr.bf16.mxu1 %v4133_v33  ;;  %v4177_v33 = vld [vmem:[%s5503_s4 + $0x30] sm:$0xff]  }
  0x6a   : > { %3804 = vmatpush3.bf16.msra.mxu0 %v4134_v34  ;;  %v4179_v34 = vld [vmem:[%s5503_s4 + $0x78] sm:$0xff]  }
  0x6b   : > { %3805 = vmatprep.subr.bf16.mxu0 %v4136_v35  ;;  %3826 = vmatpush3.bf16.msra.mxu1 %v4135_v37  ;;  %v4182_v35 = vld [vmem:[%s5503_s4 + $0xa8] sm:$0xff]   ;;  %v4183_v37 = vld [vmem:[%s5503_s4 + $0xf0] sm:$0xff]  }
  0x6c   : > { %3827 = vmatprep.subr.bf16.mxu1 %v4137_v38  ;;  %v4181_v38 = vld [vmem:[%s5503_s4 + $0x38] sm:$0xff]  }
  0x6e   : > { %3806 = vmatpush3.bf16.msra.mxu0 %v4138_v39  ;;  %v4184_v39 = vld [vmem:[%s5503_s4 + $0x140] sm:$0xff]  }
  0x6f   : > { %3807 = vmatprep.subr.bf16.mxu0 %v4140_v40  ;;  %3828 = vmatpush3.bf16.msra.mxu1 %v4139_v42  ;;  %v4185_v40 = vld [vmem:[%s5503_s4 + $0xb0] sm:$0xff]   ;;  %v4187_v42 = vld [vmem:[%s5503_s4 + $0xf8] sm:$0xff]  }
  0x70   : > { %3829 = vmatprep.subr.bf16.mxu1 %v4141_v43  ;;  %v4186_v43 = vld [vmem:[%s5503_s4 + $0x100] sm:$0xff]  }
  0x72   : > { %3808 = vmatpush3.bf16.msra.mxu0 %v4142_v44  ;;  %v4188_v44 = vld [vmem:[%s5503_s4 + $0x148] sm:$0xff]  }
  0x73   : > { %3809 = vmatprep.subr.bf16.mxu0 %v4144_v46  ;;  %3830 = vmatpush3.bf16.msra.mxu1 %v4143_v51  ;;  %v4189_v46 = vld [vmem:[%s5503_s4 + $0xb8] sm:$0xff]   ;;  %v4190_v51 = vld [vmem:[%s5503_s4 + $0x108] sm:$0xff]  }
  0x74   : > { %3831 = vmatprep.subr.bf16.mxu1 %v4145_v54  ;;  %v4196_v54 = vld [vmem:[%s5503_s4 + $0x1c8] sm:$0xff]  }
  0x76   : > { %3810 = vmatpush3.bf16.msra.mxu0 %v4146_v56  ;;  %v4195_v56 = vld [vmem:[%s5503_s4 + $0x158] sm:$0xff]  }
  0x77   : > { %3811 = vmatprep.subr.bf16.mxu0 %v4148_v58  ;;  %3832 = vmatpush3.bf16.msra.mxu1 %v4147_v59  ;;  %v4200_v58 = vld [vmem:[%s5503_s4 + $0x1d0] sm:$0xff]   ;;  %v4199_v59 = vld [vmem:[%s5503_s4 + $0x160] sm:$0xff]  }
  0x78   : > { %3833 = vmatprep.subr.bf16.mxu1 %v4149_v61  ;;  %v4204_v61 = vld [vmem:[%s5503_s4 + $0x1d8] sm:$0xff]  }
  0x7a   : > { %3812 = vmatpush3.bf16.msra.mxu0 %v4150_v62  ;;  %v4201_v62 = vld [vmem:[%s5503_s4 + $0x120] sm:$0xff]  }
  0x7b   : > { %3982 = vmatprep.subr.bf16.mxu0 %v4390_v5  ;;  %3834 = vmatpush3.bf16.msra.mxu1 %v4151_v1  ;;  %v4203_v1 = vld [vmem:[%s5503_s4 + $0x168] sm:$0xff]  }
  0x7c   : > { %3844 = vmatprep.subr.bf16.mxu1 %v4153_v3  ;;  %v4208_v3 = vld [vmem:[%s5503_s4 + $0x1e0] sm:$0xff]  }
  0x7d   : > { %1475 = vmatmul.mubr.bf16.vlgmr.msra.gmra.mrb[8].mxu0 %v4855_v0 }
  0x7e   : > { %3983 = vmatpush3.bf16.msra.mxu0 %v4154_v4  ;;  %3986 = vmatprep.mubr.msk.bf16.mxu0 %vm4391_vm0, %v4390_v5  ;;  %v4205_v4 = vld [vmem:[%s5503_s4 + $0x128] sm:$0xff]  }
  0x7f   : > { %1515 = vmatmul.mubr.bf16.vlgmr.msra.gmra.mrb[8].mxu1 %v4870_v6  ;;  %3984 = vmatprep.subr.bf16.mxu0 %v4390_v5 }
  0x80   : > { %3845 = vmatpush3.bf16.msra.mxu1 %v4155_v7  ;;  %2379 = vmatprep.mubr.bf16.mxu1 %v4628_v47  ;;  %v4161_v47 = vld [vmem:[%s5503_s4 + $0x10] sm:$0xff]  }
  0x81   : > { %3846 = vmatprep.subr.bf16.mxu1 %v4156_v9  ;;  %v4207_v7 = vld [vmem:[%s5503_s4 + $0x170] sm:$0xff]   ;;  %v4212_v9 = vld [vmem:[%s5503_s4 + $0x1e8] sm:$0xff]  }
  0x82   : > { %3985 = vmatpush3.bf16.msra.mxu0 %v4157_v10  ;;  %v4209_v10 = vld [vmem:[%s5503_s4 + $0x130] sm:$0xff]  }
  0x83   : > { %3866 = vmatprep.subr.bf16.mxu0 %v4160_v11  ;;  %v4211_v11 = vld [vmem:[%s5503_s4 + $0x178] sm:$0xff]  }
  0x84   : > { %3847 = vmatpush3.bf16.msra.mxu1 %v4158_v12  ;;  %v4214_v12 = vld [vmem:[%s5503_s4 + $0x1a8] sm:$0xff]  }
  0x85   : > { %3987 = vmatmul.mubr.msk.bf16.vlgmr.msra.gmra.mrb[12].mxu0 %vm1278_vm1, %v4895_v13  ;;  %3848 = vmatprep.subr.bf16.mxu1 %v4159_v14  ;;  %v4215_v14 = vld [vmem:[%s5503_s4 + $0x1f0] sm:$0xff]  }
  0x86   : > { %3867 = vmatpush3.bf16.msra.mxu0 %v4162_v15  ;;  %2419 = vmatprep.mubr.bf16.mxu0 %v4646_v52  ;;  %v4170_v52 = vld [vmem:[%s5503_s4 + $0x90] sm:$0xff]   ;;  %v4213_v15 = vld [vmem:[%s5503_s4 + $0x138] sm:$0xff]  }
  0x87   : > { %3868 = vmatprep.subr.bf16.mxu0 %v4164_v16  ;;  %v4216_v16 = vld [vmem:[%s5503_s4 + $0x240] sm:$0xff]  }
  0x88   : > { %3849 = vmatpush3.bf16.msra.mxu1 %v4161_v47  ;;  %v4217_v47 = vld [vmem:[%s5503_s4 + $0x1b0] sm:$0xff]  }
  0x89   : > { %3850 = vmatprep.subr.bf16.mxu1 %v4163_v18  ;;  %v4219_v18 = vld [vmem:[%s5503_s4 + $0x1f8] sm:$0xff]  }
  0x8a   : > { %3869 = vmatpush3.bf16.msra.mxu0 %v4166_v19  ;;  %v4218_v19 = vld [vmem:[%s5503_s4 + $0x200] sm:$0xff]  }
  0x8b   : > { %3870 = vmatprep.subr.bf16.mxu0 %v4168_v20  ;;  %v4220_v20 = vld [vmem:[%s5503_s4 + $0x248] sm:$0xff]  }
  0x8c   : > { %3851 = vmatpush3.bf16.msra.mxu1 %v4165_v21  ;;  %v4221_v21 = vld [vmem:[%s5503_s4 + $0x1b8] sm:$0xff]  }
  0x8d   : > { %3852 = vmatprep.subr.bf16.mxu1 %v4167_v23  ;;  %v4224_v23 = vld [vmem:[%s5503_s4 + $0x2c0] sm:$0xff]  }
  0x8e   : > { %3871 = vmatpush3.bf16.msra.mxu0 %v4170_v52  ;;  %v4222_v52 = vld [vmem:[%s5503_s4 + $0x208] sm:$0xff]  }
  0x8f   : > { %3872 = vmatprep.subr.bf16.mxu0 %v4172_v24  ;;  %v4223_v24 = vld [vmem:[%s5503_s4 + $0x250] sm:$0xff]  }
  0x90   : > { %3853 = vmatpush3.bf16.msra.mxu1 %v4169_v25  ;;  %v4228_v25 = vld [vmem:[%s5503_s4 + $0x2c8] sm:$0xff]  }
  0x91   : > { %3854 = vmatprep.subr.bf16.mxu1 %v4171_v26  ;;  %v4227_v26 = vld [vmem:[%s5503_s4 + $0x258] sm:$0xff]  }
  0x92   : > { %3873 = vmatpush3.bf16.msra.mxu0 %v4174_v27  ;;  %v4230_v27 = vld [vmem:[%s5503_s4 + $0x288] sm:$0xff]  }
  0x93   : > { %3874 = vmatprep.subr.bf16.mxu0 %v4176_v28  ;;  %v4232_v28 = vld [vmem:[%s5503_s4 + $0x2d0] sm:$0xff]  }
  0x94   : > { %3855 = vmatpush3.bf16.msra.mxu1 %v4173_v29  ;;  %v4231_v29 = vld [vmem:[%s5503_s4 + $0x260] sm:$0xff]  }
  0x95   : > { %3856 = vmatprep.subr.bf16.mxu1 %v4175_v30  ;;  %v4236_v30 = vld [vmem:[%s5503_s4 + $0x2d8] sm:$0xff]  }
  0x96   : > { %3875 = vmatpush3.bf16.msra.mxu0 %v4178_v31  ;;  %v4233_v31 = vld [vmem:[%s5503_s4 + $0x220] sm:$0xff]  }
  0x97   : > { %3876 = vmatprep.subr.bf16.mxu0 %v4180_v32  ;;  %v4235_v32 = vld [vmem:[%s5503_s4 + $0x268] sm:$0xff]  }
  0x98   : > { %3857 = vmatpush3.bf16.msra.mxu1 %v4177_v33  ;;  %v4238_v33 = vld [vmem:[%s5503_s4 + $0x298] sm:$0xff]  }
  0x99   : > { %3858 = vmatprep.subr.bf16.mxu1 %v4179_v34  ;;  %v4240_v34 = vld [vmem:[%s5503_s4 + $0x2e0] sm:$0xff]  }
  0x9a   : > { %3877 = vmatpush3.bf16.msra.mxu0 %v4182_v35  ;;  %v4237_v35 = vld [vmem:[%s5503_s4 + $0x228] sm:$0xff]  }
  0x9b   : > { %3878 = vmatprep.subr.bf16.mxu0 %v4183_v37  ;;  %v4239_v37 = vld [vmem:[%s5503_s4 + $0x270] sm:$0xff]  }
  0x9c   : > { %3859 = vmatpush3.bf16.msra.mxu1 %v4181_v38  ;;  %v4241_v38 = vld [vmem:[%s5503_s4 + $0x230] sm:$0xff]  }
  0x9d   : > { %3888 = vmatprep.subr.bf16.mxu1 %v4184_v39  ;;  %v4242_v39 = vld [vmem:[%s5503_s4 + $0x2a0] sm:$0xff]  }
  0x9e   : > { %3879 = vmatpush3.bf16.msra.mxu0 %v4185_v40  ;;  %v4243_v40 = vld [vmem:[%s5503_s4 + $0x278] sm:$0xff]  }
  0x9f   : > { %2380 = vmatmul.mubr.bf16.vlgmr.msra.gmra.mrb[12].mxu1 %v4623_v45  ;;  %3880 = vmatprep.subr.bf16.mxu0 %v4187_v42  ;;  %v4194_v45 = vld [vmem:[%s5503_s4 + $0x180] sm:$0xff]   ;;  %v4244_v42 = vld [vmem:[%s5503_s4 + $0x2e8] sm:$0xff]  }
  0xa0   : > { %3889 = vmatpush3.bf16.msra.mxu1 %v4186_v43  ;;  %2459 = vmatprep.mubr.bf16.mxu1 %v4634_v49  ;;  %v4193_v49 = vld [vmem:[%s5503_s4 + $0x110] sm:$0xff]   ;;  %v4246_v43 = vld [vmem:[%s5503_s4 + $0x2a8] sm:$0xff]  }
  0xa1   : > { %3890 = vmatprep.subr.bf16.mxu1 %v4188_v44  ;;  %v4247_v44 = vld [vmem:[%s5503_s4 + $0x2f0] sm:$0xff]  }
  0xa2   : > { %3881 = vmatpush3.bf16.msra.mxu0 %v4189_v46  ;;  %v4245_v46 = vld [vmem:[%s5503_s4 + $0x238] sm:$0xff]  }
  0xa3   : > { %3910 = vmatprep.subr.bf16.mxu0 %v4192_v48  ;;  %v4248_v48 = vld [vmem:[%s5503_s4 + $0x2b0] sm:$0xff]  }
  0xa4   : > { %3891 = vmatpush3.bf16.msra.mxu1 %v4190_v51  ;;  %v4250_v51 = vld [vmem:[%s5503_s4 + $0x2f8] sm:$0xff]  }
  0xa5   : > { %2420 = vmatmul.mubr.bf16.vlgmr.msra.gmra.mrb[16].mxu0 %v4638_v50  ;;  %3892 = vmatprep.subr.bf16.mxu1 %v4191_v53  ;;  %v4197_v50 = vld [vmem:[%s5503_s4 + $0x118] sm:$0xff]   ;;  %v4249_v53 = vld [vmem:[%s5503_s4 + $0x300] sm:$0xff]  }
  0xa6   : > { %3911 = vmatpush3.bf16.msra.mxu0 %v4194_v45  ;;  %2499 = vmatprep.mubr.bf16.mxu0 %v4657_v55  ;;  %v4202_v55 = vld [vmem:[%s5503_s4 + $0x190] sm:$0xff]   ;;  %v4251_v45 = vld [vmem:[%s5503_s4 + $0x2b8] sm:$0xff]  }
  0xa7   : > { %3912 = vmatprep.subr.bf16.mxu0 %v4196_v54  ;;  %v4252_v54 = vld [vmem:[%s5503_s4 + $0x308] sm:$0xff]  }
  0xa8   : > { %3893 = vmatpush3.bf16.msra.mxu1 %v4193_v49 }
  0xa9   : > { %3894 = vmatprep.subr.bf16.mxu1 %v4195_v56 }
  0xaa   : > { %3913 = vmatpush3.bf16.msra.mxu0 %v4198_v57 }
  0xab   : > { %3914 = vmatprep.subr.bf16.mxu0 %v4200_v58 }
  0xac   : > { %3895 = vmatpush3.bf16.msra.mxu1 %v4197_v50 }
  0xad   : > { %3896 = vmatprep.subr.bf16.mxu1 %v4199_v59 }
  0xae   : > { %3915 = vmatpush3.bf16.msra.mxu0 %v4202_v55 }
  0xaf   : > { %3916 = vmatprep.subr.bf16.mxu0 %v4204_v61 }
  0xb0   : > { %3897 = vmatpush3.bf16.msra.mxu1 %v4201_v62 }
  0xb1   : > { %3898 = vmatprep.subr.bf16.mxu1 %v4203_v1 }
  0xb2   : > { %3917 = vmatpush3.bf16.msra.mxu0 %v4206_v2 }
  0xb3   : > { %3918 = vmatprep.subr.bf16.mxu0 %v4208_v3 }
  0xb4   : > { %3899 = vmatpush3.bf16.msra.mxu1 %v4205_v4 }
  0xb5   : > { %3900 = vmatprep.subr.bf16.mxu1 %v4207_v7 }
  0xb6   : > { %3919 = vmatpush3.bf16.msra.mxu0 %v4210_v8 }
  0xb7   : > { %3920 = vmatprep.subr.bf16.mxu0 %v4212_v9 }
  0xb8   : > { %3901 = vmatpush3.bf16.msra.mxu1 %v4209_v10 }
  0xb9   : > { %3902 = vmatprep.subr.bf16.mxu1 %v4211_v11 }
  0xba   : > { %3921 = vmatpush3.bf16.msra.mxu0 %v4214_v12 }
  0xbb   : > { %3922 = vmatprep.subr.bf16.mxu0 %v4215_v14 }
  0xbc   : > { %3903 = vmatpush3.bf16.msra.mxu1 %v4213_v15 }
  0xbd   : > { %3932 = vmatprep.subr.bf16.mxu1 %v4216_v16 }
  0xbe   : > { %3923 = vmatpush3.bf16.msra.mxu0 %v4217_v47  ;;  %v4255_v47 = vld [vmem:[%s5505_s6 + $0x4] ss:$52 sps:$4 sm:$0xff]  }
  0xbf   : > { %2460 = vmatmul.mubr.bf16.vlgmr.msra.gmra.mrb[16].mxu1 %v4740_v17  ;;  %3924 = vmatprep.subr.bf16.mxu0 %v4219_v18  ;;  %v4226_v17 = vld [vmem:[%s5503_s4 + $0x280] sm:$0xff]  }
  0xc0   : > { %3933 = vmatpush3.bf16.msra.mxu1 %v4218_v19  ;;  %2539 = vmatprep.mubr.bf16.mxu1 %v4841_v60  ;;  %v4225_v60 = vld [vmem:[%s5503_s4 + $0x210] sm:$0xff]   ;;  %v4258_v18 = vld [vmem:[%s5505_s6 + $0xc] ss:$52 sps:$4 sm:$0xff]  }
  0xc1   : > { %3934 = vmatprep.subr.bf16.mxu1 %v4220_v20  ;;  %v4253_v19 = vld [vmem:[%s5505_s6] ss:$52 sps:$4 sm:$0xff]   ;;  %v4256_v20 = vld [vmem:[%s5505_s6 + $0x8] ss:$52 sps:$4 sm:$0xff]  }
  0xc2   : > { %3925 = vmatpush3.bf16.msra.mxu0 %v4221_v21 }
  0xc3   : > { %3954 = vmatprep.subr.bf16.mxu0 %v4224_v23 }
  0xc4   : > { %3935 = vmatpush3.bf16.msra.mxu1 %v4222_v52  ;;  %v4261_v52 = vld [vmem:[%s5505_s6 + $0x6c] ss:$52 sps:$4 sm:$0xff]  }
  0xc5   : > { %2500 = vmatmul.mubr.bf16.vlgmr.msra.gmra.mrb[20].mxu0 %v4756_v22  ;;  %3936 = vmatprep.subr.bf16.mxu1 %v4223_v24  ;;  %v4229_v22 = vld [vmem:[%s5503_s4 + $0x218] sm:$0xff]   ;;  %v4264_v24 = vld [vmem:[%s5505_s6 + $0x74] ss:$52 sps:$4 sm:$0xff]  }
  0xc6   : > { %3955 = vmatpush3.bf16.msra.mxu0 %v4226_v17  ;;  %2579 = vmatprep.mubr.bf16.mxu0 %v4852_v63  ;;  %v4234_v63 = vld [vmem:[%s5503_s4 + $0x290] sm:$0xff]  }
  0xc7   : > { %3956 = vmatprep.subr.bf16.mxu0 %v4228_v25 }
  0xc8   : > { %3937 = vmatpush3.bf16.msra.mxu1 %v4225_v60 }
  0xc9   : > { %3938 = vmatprep.subr.bf16.mxu1 %v4227_v26  ;;  %v4259_v26 = vld [vmem:[%s5505_s6 + $0x68] ss:$52 sps:$4 sm:$0xff]  }
  0xca   : > { %3957 = vmatpush3.bf16.msra.mxu0 %v4230_v27  ;;  %v4262_v27 = vld [vmem:[%s5505_s6 + $0x70] ss:$52 sps:$4 sm:$0xff]  }
  0xcb   : > { %3958 = vmatprep.subr.bf16.mxu0 %v4232_v28 }
  0xcc   : > { %3939 = vmatpush3.bf16.msra.mxu1 %v4229_v22 }
  0xcd   : > { %3940 = vmatprep.subr.bf16.mxu1 %v4231_v29 }
  0xce   : > { %3959 = vmatpush3.bf16.msra.mxu0 %v4234_v63 }
  0xcf   : > { %3960 = vmatprep.subr.bf16.mxu0 %v4236_v30 }
  0xd0   : > { %3941 = vmatpush3.bf16.msra.mxu1 %v4233_v31  ;;  %v4267_v31 = vld [vmem:[%s5505_s6 + $0x14] ss:$52 sps:$4 sm:$0xff]  }
  0xd1   : > { %3942 = vmatprep.subr.bf16.mxu1 %v4235_v32 }
  0xd2   : > { %3961 = vmatpush3.bf16.msra.mxu0 %v4238_v33  ;;  %v4392_v33 = vmov 0  }
  0xd3   : > { %3962 = vmatprep.subr.bf16.mxu0 %v4240_v34  ;;  %v4270_v34 = vld [vmem:[%s5505_s6 + $0x1c] ss:$52 sps:$4 sm:$0xff]  }
  0xd4   : > { %3943 = vmatpush3.bf16.msra.mxu1 %v4237_v35 }
  0xd5   : > { %3944 = vmatprep.subr.bf16.mxu1 %v4239_v37 }
  0xd6   : > { %3963 = vmatpush3.bf16.msra.mxu0 %v4242_v39 }
  0xd7   : > { %3964 = vmatprep.subr.bf16.mxu0 %v4244_v42 }
  0xd8   : > { %3945 = vmatpush3.bf16.msra.mxu1 %v4241_v38 }
  0xd9   : > { %3946 = vmatprep.subr.bf16.mxu1 %v4243_v40 }
  0xda   : > { %3965 = vmatpush3.bf16.msra.mxu0 %v4246_v43 }
  0xdb   : > { %3966 = vmatprep.subr.bf16.mxu0 %v4247_v44 }
  0xdc   : > { %3947 = vmatpush3.bf16.msra.mxu1 %v4245_v46 }
  0xdd   : > { %3990 = vmatprep.subr.bf16.mxu1 %v4390_v5 }
  0xde   : > { %3967 = vmatpush3.bf16.msra.mxu0 %v4248_v48 }
  0xdf   : > { %2540 = vmatmul.mubr.bf16.vlgmr.msra.gmra.mrb[20].mxu1 %v4855_v0  ;;  %3968 = vmatprep.subr.bf16.mxu0 %v4250_v51  ;;  %v587_v0 = vld [vmem:[%s5523_s3] sm:$0x1] }
  0xe0   : > { %3991 = vmatpush3.bf16.msra.mxu1 %v4249_v53  ;;  %3994 = vmatprep.mubr.msk.bf16.mxu1 %vm4391_vm0, %v4390_v5  ;;  %v1758_v51 = vld [vmem:[%s5504_s5] sm:$0x1] }
  0xe1   : > { %3992 = vmatprep.subr.bf16.mxu1 %v4390_v5 }
  0xe2   : > { %3969 = vmatpush3.bf16.msra.mxu0 %v4251_v45 }
  0xe3   : > { %2866 = vmatprep.subr.bf16.mxu0 %v4255_v47 }
  0xe4   : > { %3993 = vmatpush3.bf16.msra.mxu1 %v4252_v54 }
  0xe5   : > { %2580 = vmatmul.mubr.bf16.vlgmr.msra.gmra.mrb[24].mxu0 %v4870_v6  ;;  %2907 = vmatprep.subr.bf16.mxu1 %v4258_v18 }
  0xe6   : > { %2867 = vmatpush1.bf16.msra.mxu0 %v4253_v19  ;;  %2898 = vmatprep.mubr.bf16.mxu0 %v4392_v33 }
  0xe7   : > { %3995 = vmatmul.mubr.msk.bf16.vlgmr.msra.gmra.mrb[24].mxu1 %vm1278_vm1, %v4895_v13  ;;  %2868 = vmatprep.subr.bf16.mxu0 %v4261_v52 }
  0xe8   : > { %2908 = vmatpush1.bf16.msra.mxu1 %v4256_v20  ;;  %2939 = vmatprep.mubr.bf16.mxu1 %v4392_v33 }
  0xe9   : > { %2909 = vmatprep.subr.bf16.mxu1 %v4264_v24 }
  0xea   : > { %2869 = vmatpush1.bf16.msra.mxu0 %v4259_v26  ;;  %v2627_v26 = vld [vmem:[%s383_s28] sm:$0x1]  ;;  %s4293_s28 = scalar_lea.vmem %s3333_s26, 16 }
  0xeb   : > { %2948 = vmatprep.subr.bf16.mxu0 %v4267_v31  ;;  %v4273_v31 = vld [vmem:[%s5505_s6 + $0x7c] ss:$52 sps:$4 sm:$0xff]   ;;  %p4294_p11 = scmp.ne.s32.totalorder %s3333_s26, %s4293_s28  ;;  %p4301_p1 = scmp.lt.s32.totalorder %s4299_s0, %s4293_s28 }
  0xec   : > { %2910 = vmatpush1.bf16.msra.mxu1 %v4262_v27 }
  0xed   : > { %2989 = vmatprep.subr.bf16.mxu1 %v4270_v34  ;;  %v4271_v34 = vld [vmem:[%s5505_s6 + $0x78] ss:$52 sps:$4 sm:$0xff]   ;;  %p4295_p12 = pnand %p4294_p11, %p4488_p5  ;;  %p4302_p2 = por %p4301_p1, %p4300_p0 }
  0xef   : > { %p4296_p13 = pneg %p4295_p12 }
  0xf1   : > { %p4303_p3 = pnand %p4302_p2, %p4296_p13 }
 0x110   : > { %v3725_v49 = vpop.f32.mrb[0].mxu0 }
 0x111   : > { %v3726_v56 = vpop.f32.mrb[1].mxu0  ;;  %v3747_v50 = vpop.f32.mrb[0].mxu1 }
 0x112   : > { %v3727_v57 = vadd.f32 %v3726_v56, %v3725_v49  ;;  %v3728_v58 = vpop.f32.mrb[2].mxu0  ;;  %v3748_v55 = vpop.f32.mrb[1].mxu1 }
 0x113   : > { %v3729_v59 = vpop.f32.mrb[3].mxu0  ;;  %v3749_v62 = vadd.f32 %v3748_v55, %v3747_v50  ;;  %v3750_v1 = vpop.f32.mrb[2].mxu1 }
 0x114   : > { %v1317_v61 = vadd.f32 %v3727_v57, %v587_v0  ;;  %v3751_v2 = vpop.f32.mrb[3].mxu1 }
 0x116   : > { %v1357_v3 = vadd.f32 %v3749_v62, %v1317_v61 }
 0x130   : > { %v3769_v6 = vpop.f32.mrb[4].mxu0 }
 0x131   : > { %v3770_v4 = vpop.f32.mrb[5].mxu0  ;;  %v3791_v8 = vpop.f32.mrb[4].mxu1 }
 0x132   : > { %v3771_v7 = vadd.f32 %v3770_v4, %v3769_v6  ;;  %v3772_v13 = vpop.f32.mrb[6].mxu0  ;;  %v3792_v10 = vpop.f32.mrb[5].mxu1 }
 0x133   : > { %v3773_v9 = vpop.f32.mrb[7].mxu0  ;;  %v3793_v12 = vadd.f32 %v3792_v10, %v3791_v8  ;;  %v3794_v14 = vpop.f32.mrb[6].mxu1 }
 0x134   : > { %v1397_v11 = vadd.f32 %v3771_v7, %v1357_v3  ;;  %v3795_v15 = vpop.f32.mrb[7].mxu1 }
 0x136   : > { %v1437_v16 = vadd.f32 %v3793_v12, %v1397_v11 }
 0x150   : > { %v3813_v21 = vpop.f32.mrb[8].mxu0 }
 0x151   : > { %v3814_v23 = vpop.f32.mrb[9].mxu0 }
 0x152   : > { %v3815_v17 = vadd.f32 %v3814_v23, %v3813_v21  ;;  %v3816_v25 = vpop.f32.mrb[10].mxu0  ;;  %v3835_v60 = vpop.f32.mrb[8].mxu1 }
 0x153   : > { %v3817_v28 = vpop.f32.mrb[11].mxu0  ;;  %v3836_v22 = vpop.f32.mrb[9].mxu1 }
 0x154   : > { %v1477_v29 = vadd.f32 %v3815_v17, %v1437_v16  ;;  %v3837_v63 = vadd.f32 %v3836_v22, %v3835_v60  ;;  %v3838_v30 = vpop.f32.mrb[10].mxu1 }
 0x155   : > { %v3839_v32 = vpop.f32.mrb[11].mxu1 }
 0x156   : > { %v1517_v35 = vadd.f32 %v3837_v63, %v1477_v29  ;;  %v4265_v29 = vld [vmem:[%s5505_s6 + $0x10] ss:$52 sps:$4 sm:$0xff]   ;;  %v4268_v63 = vld [vmem:[%s5505_s6 + $0x18] ss:$52 sps:$4 sm:$0xff]  }
 0x157   : > { %v4276_v32 = vld [vmem:[%s5505_s6 + $0x84] ss:$52 sps:$4 sm:$0xff]  }
 0x158   : > { %v1556_v37 = vpop.f32.mrb[12].mxu0 }
 0x159   : > { %v1557_v38 = vadd.f32 %v1556_v37, %v1517_v35  ;;  %v3988_v39 = vpop.f32.mrb[13].mxu0  ;;  %v4274_v35 = vld [vmem:[%s5505_s6 + $0x80] ss:$52 sps:$4 sm:$0xff]   ;;  %v4279_v37 = vld [vmem:[%s5505_s6 + $0x24] ss:$52 sps:$4 sm:$0xff]  }
 0x15a   : > { %v1559_v40 = vpop.f32.mrb[14].mxu0  ;;  %v4277_v39 = vld [vmem:[%s5505_s6 + $0x20] ss:$52 sps:$4 sm:$0xff]  }
 0x15b   : > { %v3989_v42 = vpop.f32.mrb[15].mxu0  ;;  %3153 = vst.msk [vmem:[%s5512_s30] sm:$0x1] %vm3152_vm2, %v1557_v38  ;;  %v4280_v40 = vld [vmem:[%s5505_s6 + $0x28] ss:$52 sps:$4 sm:$0xff]  }
 0x15c   : > { %v4285_v42 = vld [vmem:[%s5505_s6 + $0x8c] ss:$52 sps:$4 sm:$0xff]  }
 0x172   : > { %v3860_v43 = vpop.f32.mrb[12].mxu1 }
 0x173   : > { %v3861_v44 = vpop.f32.mrb[13].mxu1 }
 0x174   : > { %v3862_v46 = vadd.f32 %v3861_v44, %v3860_v43  ;;  %v3863_v48 = vpop.f32.mrb[14].mxu1  ;;  %v4288_v43 = vld [vmem:[%s5505_s6 + $0x94] ss:$52 sps:$4 sm:$0xff]  }
 0x175   : > { %v3864_v53 = vpop.f32.mrb[15].mxu1  ;;  %v4283_v44 = vld [vmem:[%s5505_s6 + $0x88] ss:$52 sps:$4 sm:$0xff]   ;;  %v4289_v48 = vld [vmem:[%s5505_s6 + $0x30] ss:$52 sps:$4 sm:$0xff]  }
 0x176   : > { %v2382_v45 = vadd.f32 %v3862_v46, %v1758_v51  ;;  %v4286_v46 = vld [vmem:[%s5505_s6 + $0x90] ss:$52 sps:$4 sm:$0xff]   ;;  %v4290_v51 = vld [vmem:[%s5505_s6 + $0x98] ss:$52 sps:$4 sm:$0xff]  }
 0x178   : > { %v3882_v54 = vpop.f32.mrb[16].mxu0 }
 0x179   : > { %v3883_v49 = vpop.f32.mrb[17].mxu0 }
 0x17a   : > { %v3884_v0 = vadd.f32 %v3883_v49, %v3882_v54  ;;  %v3885_v56 = vpop.f32.mrb[18].mxu0 }
 0x17b   : > { %v3886_v57 = vpop.f32.mrb[19].mxu0 }
 0x17c   : > { %v2422_v58 = vadd.f32 %v3884_v0, %v2382_v45 }
 0x192   : > { %v3904_v50 = vpop.f32.mrb[16].mxu1 }
 0x193   : > { %v3905_v59 = vpop.f32.mrb[17].mxu1 }
 0x194   : > { %v3906_v55 = vadd.f32 %v3905_v59, %v3904_v50  ;;  %v3907_v61 = vpop.f32.mrb[18].mxu1 }
 0x195   : > { %v3908_v62 = vpop.f32.mrb[19].mxu1 }
 0x196   : > { %v2462_v1 = vadd.f32 %v3906_v55, %v2422_v58 }
 0x198   : > { %v3926_v2 = vpop.f32.mrb[20].mxu0 }
 0x199   : > { %v3927_v3 = vpop.f32.mrb[21].mxu0 }
 0x19a   : > { %v3928_v6 = vadd.f32 %v3927_v3, %v3926_v2  ;;  %v3929_v4 = vpop.f32.mrb[22].mxu0 }
 0x19b   : > { %v3930_v7 = vpop.f32.mrb[23].mxu0 }
 0x19c   : > { %v2502_v13 = vadd.f32 %v3928_v6, %v2462_v1 }
 0x1b2   : > { %v3948_v8 = vpop.f32.mrb[20].mxu1 }
 0x1b3   : > { %v3949_v9 = vpop.f32.mrb[21].mxu1 }
 0x1b4   : > { %v3950_v10 = vadd.f32 %v3949_v9, %v3948_v8  ;;  %v3951_v11 = vpop.f32.mrb[22].mxu1 }
 0x1b5   : > { %v3952_v12 = vpop.f32.mrb[23].mxu1 }
 0x1b6   : > { %v2542_v14 = vadd.f32 %v3950_v10, %v2502_v13 }
 0x1b8   : > { %v3970_v15 = vpop.f32.mrb[24].mxu0 }
 0x1b9   : > { %v3971_v16 = vpop.f32.mrb[25].mxu0 }
 0x1ba   : > { %v3972_v47 = vadd.f32 %v3971_v16, %v3970_v15  ;;  %v3973_v18 = vpop.f32.mrb[26].mxu0  ;;  %v2621_v19 = vpop.f32.mrb[24].mxu1 }
 0x1bb   : > { %v3974_v20 = vpop.f32.mrb[27].mxu0  ;;  %v3996_v21 = vpop.f32.mrb[25].mxu1 }
 0x1bc   : > { %v2582_v23 = vadd.f32 %v3972_v47, %v2542_v14  ;;  %v2624_v52 = vpop.f32.mrb[26].mxu1 }
 0x1bd   : > { %v3997_v24 = vpop.f32.mrb[27].mxu1 }
 0x1be   : > { %v2622_v17 = vadd.f32 %v2621_v19, %v2582_v23 }
 0x1c0   : > { %v2628_v25 = vmul.f32 0.5, %v2622_v17  ;;  %3154 = vst.msk [vmem:[%s5511_s18] sm:$0x1] %vm3152_vm2, %v2622_v17  ;;  %s5513_s18 = sshll.u32 %s4471_s17, 4 }
 0x1c1   : > { %s5317_s11 = scalar_lea.hbm %s5507_s8, %s5513_s18 }
 0x1c2   : > { %v2629_v60 = vmul.f32 1.442695, %v2628_v25 }
 0x1c4   : > { %4291 = vpow2.f32 %v2629_v60 }
 0x1ce   : > { %v4292_v27 = vpop.eup %4291 }
 0x1cf   : > { %v2631_v28 = vmul.f32 %v4292_v27, %v2627_v26 }
 0x1d1   : > { %v2632_v22 = vadd.f32 %v2631_v28, %v1557_v38  ;;  %v4282_v38 = vld [vmem:[%s5505_s6 + $0x2c] ss:$52 sps:$4 sm:$0xff]  }
 0x1d3   : > { %v2633_v30 = vpack.c.bf16 %v2632_v22, %v2632_v22 }
 0x1d5   : > { %3692 = vmatmul.mubr.msk.bf16.vlgmr.msra.gmra.mrb[28].mxu0 %vm1278_vm1, %v2633_v30  ;;  %3693 = vmatmul.mubr.msk.bf16.vlgmr.msra.gmra.mrb[28].mxu1 %vm1278_vm1, %v2633_v30 }
 0x1d6   : > { %2949 = vmatpush1.bf16.msra.mxu0 %v4265_v29  ;;  %2990 = vmatpush1.bf16.msra.mxu1 %v4268_v63 }
 0x1d7   : > { %2950 = vmatprep.subr.bf16.mxu0 %v4273_v31  ;;  %2991 = vmatprep.subr.bf16.mxu1 %v4276_v32 }
 0x1d8   : > { %2980 = vmatprep.mubr.bf16.mxu0 %v4392_v33  ;;  %3021 = vmatprep.mubr.bf16.mxu1 %v4392_v33 }
 0x1da   : > { %2951 = vmatpush1.bf16.msra.mxu0 %v4271_v34  ;;  %2992 = vmatpush1.bf16.msra.mxu1 %v4274_v35 }
 0x1db   : > { %3030 = vmatprep.subr.bf16.mxu0 %v4279_v37  ;;  %3071 = vmatprep.subr.bf16.mxu1 %v4282_v38 }
 0x1dd   : > { %3694 = vmatmul.mubr.msk.bf16.vlgmr.msra.gmra.mrb[32].mxu0 %vm1278_vm1, %v2633_v30  ;;  %3695 = vmatmul.mubr.msk.bf16.vlgmr.msra.gmra.mrb[32].mxu1 %vm1278_vm1, %v2633_v30 }
 0x1de   : > { %3031 = vmatpush1.bf16.msra.mxu0 %v4277_v39  ;;  %3072 = vmatpush1.bf16.msra.mxu1 %v4280_v40 }
 0x1df   : > { %3032 = vmatprep.subr.bf16.mxu0 %v4285_v42  ;;  %3073 = vmatprep.subr.bf16.mxu1 %v4288_v43 }
 0x1e0   : > { %3062 = vmatprep.mubr.bf16.mxu0 %v4392_v33  ;;  %3103 = vmatprep.mubr.bf16.mxu1 %v4392_v33 }
 0x1e2   : > { %3033 = vmatpush1.bf16.msra.mxu0 %v4283_v44  ;;  %3074 = vmatpush1.bf16.msra.mxu1 %v4286_v46 }
 0x1e3   : > { %3998 = vmatprep.subr.bf16.mxu0 %v4390_v5 }
 0x1e5   : > { %3696 = vmatmul.mubr.msk.bf16.vlgmr.msra.gmra.mrb[36].mxu0 %vm1278_vm1, %v2633_v30  ;;  %3697 = vmatmul.mubr.msk.bf16.vlgmr.msra.gmra.mrb[36].mxu1 %vm1278_vm1, %v2633_v30 }
 0x1e6   : > { %3999 = vmatpush3.bf16.msra.mxu0 %v4289_v48  ;;  %4002 = vmatprep.mubr.msk.bf16.mxu0 %vm4391_vm0, %v4390_v5 }
 0x1e7   : > { %4000 = vmatprep.subr.bf16.mxu0 %v4390_v5 }
 0x1ea   : > { %4001 = vmatpush3.bf16.msra.mxu0 %v4290_v51 }
 0x1ed   : > { %4003 = vmatmul.mubr.msk.bf16.vlgmr.msra.gmra.mrb[40].mxu0 %vm1278_vm1, %v2633_v30 }
 0x1ee   : > { %4306 = shalt.err (!%p4303_p3)
}
 0x1ef   : > { %s4307_s21 = scalar_lea.hbm %s5317_s11, 16  ;;  %s4311_s29 = scalar_lea.hbm %s5507_s8, 32 }
 0x1f0   : > { %p4308_p4 = scmp.ne.s32.totalorder %s5317_s11, %s4307_s21  ;;  %p4312_p9 = scmp.lt.u32.totalorder %s5317_s11, %s5507_s8 }
 0x1f1   : > { %p4313_p10 = scmp.lt.u32.totalorder %s4311_s29, %s4307_s21  ;;  %p4315_p12 = scmp.lt.u32.totalorder %s4307_s21, %s5317_s11 }
 0x1f2   : > { %p4309_p7 = pnand %p4308_p4, %p4488_p5 }
 0x1f3   : > { %p4314_p11 = por %p4313_p10, %p4312_p9 }
 0x1f4   : > { %p4310_p8 = pneg %p4309_p7 }
 0x1f5   : > { %p4316_p13 = por %p4315_p12, %p4314_p11 }
 0x1f7   : > { %p4317_p0 = pnand %p4316_p13, %p4310_p8 }
 0x1f9   : > { %4320 = shalt.err (!%p4317_p0)
}
 0x1fa   : > { %4007 = dma.vmem_to_hbm [thread:$0]  (%p4488_p5), %s3333_s26, 16, %s5317_s11, %s3312_s27  }
 0x1fb   : > { %s5526_s0 = sshll.u32 %s4471_s17, 4  ;;  %s5527_s12 = scalar_lea.vmem [#allocation4], %s5231_s20 }
 0x1fc   : > { %s5344_s18 = scalar_lea.hbm %s5508_s9, %s5526_s0  ;;  %s3345_s29 = sshll.u32 %s5527_s12, 4  ;;  %s3346_s29 = int_to_ptr.vmem [resolvable:$true] %s3345_s29 }
 0x1fd   : > { %s3316_s21 = scalar_lea.sflag [#allocation5], %s5231_s20  ;;  %s4321_s22 = scalar_lea.vmem %s3346_s29, 16 }
 0x1fe   : > { %p4322_p1 = scmp.ne.s32.totalorder %s3346_s29, %s4321_s22  ;;  %s4394_s1 = smov [#allocation4]  }
 0x1ff   : > { %s4325_s2 = sshll.u32 %s4394_s1, 4  ;;  %s4326_s2 = int_to_ptr.vmem [resolvable:$false] %s4325_s2 }
 0x200   : > { %p4323_p2 = pnand %p4322_p1, %p4488_p5  ;;  %s4327_s3 = scalar_lea.vmem %s4326_s2, 32 }
 0x201   : > { %p4328_p4 = scmp.lt.s32.totalorder %s3346_s29, %s4326_s2  ;;  %p4329_p7 = scmp.lt.s32.totalorder %s4327_s3, %s4321_s22 }
 0x202   : > { %p4324_p3 = pneg %p4323_p2 }
 0x203   : > { %p4330_p8 = por %p4329_p7, %p4328_p4 }
 0x205   : > { %p4331_p9 = pnand %p4330_p8, %p4324_p3 }
 0x207   : > { %4334 = shalt.err (!%p4331_p9)
}
 0x208   : > { %s4335_s17 = scalar_lea.hbm %s5344_s18, 16  ;;  %s4339_s1 = scalar_lea.hbm %s5508_s9, 32 }
 0x209   : > { %p4336_p10 = scmp.ne.s32.totalorder %s5344_s18, %s4335_s17  ;;  %p4340_p13 = scmp.lt.u32.totalorder %s5344_s18, %s5508_s9 }
 0x20a   : > { %p4341_p0 = scmp.lt.u32.totalorder %s4339_s1, %s4335_s17  ;;  %p4343_p2 = scmp.lt.u32.totalorder %s4335_s17, %s5344_s18 }
 0x20b   : > { %p4337_p11 = pnand %p4336_p10, %p4488_p5 }
 0x20c   : > { %p4342_p1 = por %p4341_p0, %p4340_p13 }
 0x20d   : > { %p4338_p12 = pneg %p4337_p11 }
 0x20e   : > { %p4344_p3 = por %p4343_p2, %p4342_p1 }
 0x210   : > { %p4345_p4 = pnand %p4344_p3, %p4338_p12 }
 0x212   : > { %4348 = shalt.err (!%p4345_p4)
}
 0x213   : > { %4008 = dma.vmem_to_hbm [thread:$0]  (%p4488_p5), %s3346_s29, 16, %s5344_s18, %s3316_s21   ;;  %vm3271_vm3 = vcmask 1040384   ;;  %vm3272_vm4 = vsmask.f32 256  ;;  %vm3274_vm5 = vcmask 1041409   ;;  %v2800_v53 = vsub.s32 0, %v4607_v36 }
 0x214   : > { %vm3275_vm6 = vsmask.f32 1280  ;;  %vm5366_vm7 = vmand %vm3271_vm3, %vm3272_vm4  ;;  %v2808_v45 = vsub.s32 2, %v4607_v36  ;;  %vm3278_vm9 = vcmask 1042434   ;;  %vm3279_vm10 = vsmask.f32 2304 }
 0x215   : > { %vm5370_vm8 = vmand %vm3274_vm5, %vm3275_vm6  ;;  %v2662_v54 = vld [vmem:[%s5506_s7] sm:$0xff]  ;;  %v2804_v49 = vsub.s32 1, %v4607_v36  ;;  %v2812_v0 = vsub.s32 3, %v4607_v36  ;;  %vm3282_vm13 = vcmask 1043459   ;;  %vm3283_vm14 = vsmask.f32 3328 }
 0x216   : > { %vm3277_vm11 = vmor %vm5370_vm8, %vm5366_vm7  ;;  %v2801_v56 = vrot.slane %v2662_v54, %v2800_v53  ;;  %v2809_v57 = vrot.slane %v2662_v54, %v2808_v45  ;;  %v2816_v62 = vsub.s32 4, %v4607_v36  ;;  %v2824_v1 = vsub.s32 6, %v4607_v36  ;;  %v2663_v34 = vld [vmem:[%s5506_s7 + $0x8] sm:$0x1f]  ;;  %s5542_s28 = smul.u32 13, %s4566_s25 }
 0x217   : > { %vm3280_vm12 = vmand %vm3278_vm9, %vm3279_vm10  ;;  %v2805_v58 = vrot.slane %v2662_v54, %v2804_v49  ;;  %v2813_v50 = vrot.slane %v2662_v54, %v2812_v0  ;;  %vm3286_vm1 = vcmask 1044484   ;;  %vm3287_vm2 = vsmask.f32 4352 }
 0x218   : > { %vm5393_vm15 = vmor %vm3280_vm12, %vm3277_vm11  ;;  %v2820_v11 = vsub.s32 5, %v4607_v36  ;;  %v2828_v12 = vsub.s32 7, %v4607_v36  ;;  %v2817_v18 = vrot.slane %v2662_v54, %v2816_v62  ;;  %v2825_v19 = vrot.slane %v2662_v54, %v2824_v1  ;;  %s5453_s12 = scalar_lea.vmem %s5509_s10, %s5542_s28 }
 0x219   : > { %vm5399_vm0 = vmand %vm3282_vm13, %vm3283_vm14  ;;  %vm3290_vm5 = vcmask 1045509   ;;  %vm3291_vm6 = vsmask.f32 5376  ;;  %vm3294_vm9 = vcmask 1046534   ;;  %vm3295_vm10 = vsmask.f32 6400 }
 0x21a   : > { %vm3285_vm3 = vmor %vm5399_vm0, %vm5393_vm15  ;;  %v2821_v23 = vrot.slane %v2662_v54, %v2820_v11  ;;  %v2829_v52 = vrot.slane %v2662_v54, %v2828_v12  ;;  %v2833_v40 = vrot.slane %v2663_v34, %v2800_v53  ;;  %v2841_v42 = vrot.slane %v2663_v34, %v2808_v45 }
 0x21b   : > { %vm3288_vm4 = vmand %vm3286_vm1, %vm3287_vm2  ;;  %vm3298_vm13 = vcmask 1047559   ;;  %vm3299_vm14 = vsmask.f32 7424  ;;  %v2837_v46 = vrot.slane %v2663_v34, %v2804_v49  ;;  %v2845_v48 = vrot.slane %v2663_v34, %v2812_v0 }
 0x21c   : > { %vm5419_vm7 = vmor %vm3288_vm4, %vm3285_vm3 }
 0x21d   : > { %vm5423_vm8 = vmand %vm3290_vm5, %vm3291_vm6  ;;  %vm3305_vm6 = vcmask 258052  }
 0x21e   : > { %vm3293_vm11 = vmor %vm5423_vm8, %vm5419_vm7 }
 0x21f   : > { %vm3296_vm12 = vmand %vm3294_vm9, %vm3295_vm10 }
 0x220   : > { %vm5444_vm1 = vmor %vm3296_vm12, %vm3293_vm11 }
 0x221   : > { %vm5455_vm4 = vmand %vm3298_vm13, %vm3299_vm14 }
 0x222   : > { %vm3301_vm5 = vmor %vm5455_vm4, %vm5444_vm1 }
 0x223   : > { %vm3306_vm7 = vmand %vm3305_vm6, %vm3287_vm2 }
 0x224   : > { %vm3307_vm8 = vmor %vm3306_vm7, %vm3285_vm3 }
 0x2a8   : > { %v2900_v55 = vpop.f32.mrb[28].mxu0  ;;  %v2941_v61 = vpop.f32.mrb[28].mxu1 }
 0x2a9   : > { %v2901_v3 = vadd.f32 %v2900_v55, %v2801_v56  ;;  %v2942_v6 = vadd.f32 %v2941_v61, %v2809_v57  ;;  %v2902_v4 = vpop.f32.mrb[29].mxu0  ;;  %v2943_v7 = vpop.f32.mrb[29].mxu1 }
 0x2aa   : > { %v2903_v13 = vadd.f32 %v2902_v4, %v2805_v58  ;;  %v2944_v8 = vadd.f32 %v2943_v7, %v2813_v50  ;;  %v2904_v9 = vpop.f32.mrb[30].mxu0  ;;  %v2945_v10 = vpop.f32.mrb[30].mxu1 }
 0x2ab   : > { %v2905_v14 = vpop.f32.mrb[31].mxu0  ;;  %v2946_v15 = vpop.f32.mrb[31].mxu1  ;;  %v2849_v9 = vrot.slane %v2663_v34, %v2816_v62 }
 0x2ac   : > { %v3699_v16 = vpack.c.bf16 %v2903_v13, %v2901_v3  ;;  %v3700_v47 = vpack.c.bf16 %v2944_v8, %v2942_v6  ;;  %v3302_v3 = vld [vmem:[%s5453_s12] sm:$0xff] }
 0x2ae   : > { %v3191_v20 = vrot.slane %v3699_v16, %v4616_v41  ;;  %v3198_v21 = vrot.slane %v3700_v47, %v4616_v41 }
 0x2b0   : > { %v3213_v17 = vcombine.low %v3191_v20, %v3198_v21  ;;  %v2982_v25 = vpop.f32.mrb[32].mxu0  ;;  %v3023_v60 = vpop.f32.mrb[32].mxu1 }
 0x2b1   : > { %v2983_v27 = vadd.f32 %v2982_v25, %v2817_v18  ;;  %v3024_v28 = vadd.f32 %v3023_v60, %v2825_v19  ;;  %v2984_v22 = vpop.f32.mrb[33].mxu0  ;;  %v3025_v29 = vpop.f32.mrb[33].mxu1 }
 0x2b2   : > { %v2985_v63 = vadd.f32 %v2984_v22, %v2821_v23  ;;  %v3026_v30 = vadd.f32 %v3025_v29, %v2829_v52  ;;  %v2986_v31 = vpop.f32.mrb[34].mxu0  ;;  %v3027_v32 = vpop.f32.mrb[34].mxu1  ;;  %v3221_v57 = vrot.slane %v3213_v17, %v4616_v41  ;;  %v3308_v23 = vld [vmem:[%s5453_s12 + $0x8] sm:$0x1f] }
 0x2b3   : > { %v2987_v35 = vpop.f32.mrb[35].mxu0  ;;  %v3028_v37 = vpop.f32.mrb[35].mxu1 }
 0x2b4   : > { %v3701_v38 = vpack.c.bf16 %v2985_v63, %v2983_v27  ;;  %v3702_v39 = vpack.c.bf16 %v3026_v30, %v3024_v28 }
 0x2b6   : > { %v3205_v43 = vrot.slane %v3701_v38, %v4616_v41  ;;  %v3212_v44 = vrot.slane %v3702_v39, %v4616_v41 }
 0x2b8   : > { %v3214_v5 = vcombine.low %v3205_v43, %v3212_v44  ;;  %v3064_v33 = vpop.f32.mrb[36].mxu0  ;;  %v3105_v53 = vpop.f32.mrb[36].mxu1 }
 0x2b9   : > { %v3065_v54 = vadd.f32 %v3064_v33, %v2833_v40  ;;  %v3106_v49 = vadd.f32 %v3105_v53, %v2841_v42  ;;  %v3066_v0 = vpop.f32.mrb[37].mxu0  ;;  %v3107_v56 = vpop.f32.mrb[37].mxu1 }
 0x2ba   : > { %v3228_v58 = vrot.slane %v3214_v5, %v4616_v41  ;;  %v3067_v50 = vadd.f32 %v3066_v0, %v2837_v46  ;;  %v3108_v55 = vadd.f32 %v3107_v56, %v2845_v48  ;;  %v3068_v61 = vpop.f32.mrb[38].mxu0  ;;  %v3109_v1 = vpop.f32.mrb[38].mxu1 }
 0x2bb   : > { %v3069_v6 = vpop.f32.mrb[39].mxu0  ;;  %v3110_v4 = vpop.f32.mrb[39].mxu1 }
 0x2bc   : > { %v3229_v7 = vcombine.low %v3221_v57, %v3228_v58  ;;  %v3703_v13 = vpack.c.bf16 %v3067_v50, %v3065_v54  ;;  %v3704_v8 = vpack.c.bf16 %v3108_v55, %v3106_v49 }
 0x2be   : > { %v3238_v10 = vrot.slane %v3703_v13, %v4616_v41  ;;  %v3245_v11 = vrot.slane %v3704_v8, %v4616_v41  ;;  %v3303_v12 = vsel %vm3301_vm5, %v3229_v7, %v3302_v3 }
 0x2bf   : > { %3304 = vst [vmem:[%s5453_s12] sm:$0xff] %v3303_v12 }
 0x2c0   : > { %v3253_v14 = vcombine.low %v3238_v10, %v3245_v11  ;;  %v3146_v15 = vpop.f32.mrb[40].mxu0 }
 0x2c1   : > { %v3147_v16 = vadd.f32 %v3146_v15, %v2849_v9  ;;  %v4004_v47 = vpop.f32.mrb[41].mxu0 }
 0x2c2   : > { %v3149_v18 = vpop.f32.mrb[42].mxu0  ;;  %v3260_v36 = vrot.slane %v3253_v14, %v4616_v41 }
 0x2c3   : > { %v3167_v19 = vpack.c.bf16 %v3147_v16, %v3147_v16  ;;  %v4005_v20 = vpop.f32.mrb[43].mxu0 }
 0x2c5   : > { %v3252_v21 = vrot.slane %v3167_v19, %v4616_v41 }
 0x2c7   : > { %v3267_v62 = vrot.slane %v3252_v21, %v4616_v41 }
 0x2c9   : > { %v3268_v52 = vcombine.low %v3260_v36, %v3267_v62 }
 0x2cb   : > { %v3309_v24 = vsel %vm3307_vm8, %v3268_v52, %v3308_v23 }
 0x2cc   : > { %3310 = vst [vmem:[%s5453_s12 + $0x8] sm:$0x1f] %v3309_v24 }
 0x2cd PF: > { %p4018_p5 = scmp.ge.s32.totalorder %s4387_s16, 2  ;;  %s3360_s25 = sand.u32 1, %s4375_s13  }
 0x2ce   : > { %s3361_s29 = scalar_lea.sflag [#allocation3], %s3360_s25 }
 0x2cf   : > { %p4012_p7 = pnand %p4018_p5, %p4492_p6 }
 0x2d1   : > { %4366 = dma.done.wait (!%p4012_p7), %s3361_s29, 16  }
 0x2d2   : > { %4368 = vsyncadd (!%p4012_p7), %s3361_s29, 4294967280  ;;  %s3369_s21 = scalar_lea.sflag [#allocation5], %s3360_s25 }
 0x2d3   : > { %4370 = dma.done.wait (!%p4012_p7), %s3369_s21, 16  }
 0x2d4   : > { %4372 = vsyncadd (!%p4012_p7), %s3369_s21, 4294967280  ;;  %s5545_s22 = sld [smem:[#allocation8_spill]]  ;;  %p24_p8 = scmp.ge.s32.totalorder %s4475_s19, 4  }
 0x2d5   : > { %s5546_s13 = smov %s4379_s14  ;;  %s5547_s14 = smov %s4383_s15 }
 0x2d6   : > { %s5549_s16 = smov %s4475_s19  ;;  %26 = sbr.rel (!%p24_p8) target bundleno = 10 (0xa), region = 119 }
 0x2da   : > { %s5548_s15 = smov %s5545_s22 }
 0x2dd   :  { %3380 = vsyncpa [#allocation3], 1 }
 0x2de   :  { %3382 = vsyncpa [#allocation3 + $0x1], 1 }
 0x2df   :  { %3383 = vsyncpa [#allocation5], 1 }
 0x2e0   :  { %3385 = vsyncpa [#allocation5 + $0x1], 1 }

// kernel: conv_vae_forward.9
= control target key start
LH: loop header
LB: loop body
LE: loop exit
PB: predicated region body
PF: predicated region fallthrough
CT: control target
= control target key end

     0   :  { %s2302_s12 = smov 0   ;;  %s2781_s0 = inlined_call_operand.vmem [shape: bf16[2,2,210,16], index: 0, kind: input, shape index: {}]   ;;  %s2782_s1 = inlined_call_operand.vmem [shape: bf16[4,16,4], index: 1, kind: input, shape index: {}]   ;;  %s2783_s2 = inlined_call_operand.vmem [shape: f32[1,4], index: 2, kind: input, shape index: {}]   ;;  %s2784_s3 = inlined_call_operand.vmem [shape: f32[2,196,4], index: 3, kind: output, shape index: {}]  }
   0x1 LB: > { %s1632_s13 = sadd.s32 4294967295, %s2278_s12   ;;  %p1636_p0 = scmp.ge.s32.totalorder %s2278_s12, 1  ;;  %s2278_s12 = sphi %s2302_s12, %s13_s12  }
   0x2   : > { %p137_p1 = scmp.lt.s32.totalorder %s2278_s12, 3 }
   0x4   : > { %p138_p2 = pnand %p1636_p0, %p137_p1 }
   0x5   : > { %v2116_v0 = vld [vmem:[%s2782_s1 + $0x8] sm:$0xff] (!%p138_p2)   ;;  %v2280_v1 = vmov (!%p138_p2), 0.0   ;;  %v2117_v2 = vld [vmem:[%s2782_s1] sm:$0xff] (!%p138_p2)   ;;  %vm2281_vm0 = vmmov (!%p138_p2), 0   ;;  %p161_p3 = scmp.lt.s32.totalorder (!%p138_p2), %s1632_s13, 1  ;;  %vm297_vm1 = vcmask (!%p138_p2), 130048  }
   0x6   : > { %141 = sbr.rel (%p138_p2) target bundleno = 463 (0x1cf), region = 32  ;;  %1888 = vmatprep.subr.bf16.mxu0 (!%p138_p2), %v2280_v1  ;;  %1942 = vmatprep.subr.bf16.mxu1 (!%p138_p2), %v2280_v1  ;;  %v2120_v3 = vld [vmem:[%s2782_s1 + $0x10] sm:$0xff] (!%p138_p2)   ;;  %v2121_v4 = vld [vmem:[%s2782_s1 + $0x18] sm:$0xff] (!%p138_p2)   ;;  %vm811_vm2 = vcmask (!%p138_p2), 1044480   ;;  %vm1550_vm3 = vcmask (!%p138_p2), 31744   ;;  %vm1575_vm4 = vcmask (!%p138_p2), 27648  }
   0x7   : > { %1889 = vmatpush3.bf16.msra.mxu0 (!%p138_p2), %v2116_v0  ;;  %1890 = vmatprep.mubr.msk.bf16.mxu0 (!%p138_p2), %vm2281_vm0, %v2280_v1 }
   0x8   : > { %1943 = vmatpush3.bf16.msra.mxu1 (!%p138_p2), %v2117_v2  ;;  %1944 = vmatprep.mubr.msk.bf16.mxu1 (!%p138_p2), %vm2281_vm0, %v2280_v1 }
   0x9   : > { %1996 = vmatprep.subr.bf16.mxu0 (!%p138_p2), %v2280_v1  ;;  %2050 = vmatprep.subr.bf16.mxu1 (!%p138_p2), %v2280_v1 }
   0xd   : > { %s2786_s13 = smov (!%p161_p3, %s1632_s13), 1 }
   0xe   : > { %s2104_s18 = smul.u32 216, %s2786_s13 }
   0xf   : > { %s2105_s28 = smul.u32 200, %s2786_s13 }
  0x10   : > { %s2330_s21 = scalar_lea.vmem %s2781_s0, %s2104_s18 }
  0x11   : > { %v2118_v5 = vld [vmem:[%s2330_s21 + $0x6c] sm:$0xff]   ;;  %v2119_v6 = vld [vmem:[%s2330_s21] sm:$0xff]   ;;  %v2122_v7 = vld [vmem:[%s2330_s21 + $0x74] sm:$0xff]   ;;  %s2692_s4 = scalar_lea.vmem %s2784_s3, %s2105_s28 }
  0x12   : > { %1891 = vmatmul.mubr.msk.bf16.vlgmr.msra.gmra.mrb[0].mxu0 %vm297_vm1, %v2118_v5  ;;  %1945 = vmatmul.mubr.msk.bf16.vlgmr.msra.gmra.mrb[0].mxu1 %vm297_vm1, %v2119_v6  ;;  %v2123_v8 = vld [vmem:[%s2330_s21 + $0x8] sm:$0xff]   ;;  %v2124_v9 = vld [vmem:[%s2330_s21 + $0x7c] sm:$0xff]   ;;  %v2125_v10 = vld [vmem:[%s2330_s21 + $0x10] sm:$0xff]  }
  0x13   : > { %1997 = vmatpush3.bf16.msra.mxu0 %v2120_v3  ;;  %2051 = vmatpush3.bf16.msra.mxu1 %v2121_v4  ;;  %v2126_v11 = vld [vmem:[%s2330_s21 + $0x84] sm:$0xff]   ;;  %v2127_v12 = vld [vmem:[%s2330_s21 + $0x18] sm:$0xff]   ;;  %v2128_v13 = vld [vmem:[%s2330_s21 + $0x8c] sm:$0xff]  }
  0x14   : > { %1894 = vmatprep.mubr.msk.bf16.mxu0 %vm2281_vm0, %v2280_v1  ;;  %1948 = vmatprep.mubr.msk.bf16.mxu1 %vm2281_vm0, %v2280_v1  ;;  %v2129_v14 = vld [vmem:[%s2330_s21 + $0x20] sm:$0xff]   ;;  %v2130_v15 = vld [vmem:[%s2330_s21 + $0x94] sm:$0xff]   ;;  %v2131_v16 = vld [vmem:[%s2330_s21 + $0x28] sm:$0xff]  }
  0x15   : > { %v2381_v17 = vld [vmem:[%s2330_s21 + $0x44] sm:$0xff]   ;;  %v2388_v18 = vld [vmem:[%s2330_s21 + $0xb0] sm:$0xff]   ;;  %v2132_v20 = vld [vmem:[%s2330_s21 + $0x9c] sm:$0xff]  }
  0x16   : > { %v2164_v19 = vld [vmem:[%s2330_s21 + $0x4c] sm:$0xff]   ;;  %v827_v22 = vrot.slane %v2381_v17, 3  ;;  %v2165_v24 = vld [vmem:[%s2330_s21 + $0xb8] sm:$0xff]   ;;  %v1152_v26 = vrot.slane %v2388_v18, 3  ;;  %v2167_v30 = vld [vmem:[%s2330_s21 + $0xc0] sm:$0xff]  }
  0x17   : > { %v2133_v21 = vld [vmem:[%s2330_s21 + $0x30] sm:$0xff]   ;;  %v829_v23 = vrot.slane %v2164_v19, 3  ;;  %v1154_v28 = vrot.slane %v2165_v24, 3  ;;  %v1156_v33 = vrot.slane %v2167_v30, 3  ;;  %v2168_v35 = vld [vmem:[%s2330_s21 + $0x5c] sm:$0xff]   ;;  %v2134_v36 = vld [vmem:[%s2330_s21 + $0xa4] sm:$0xff]  }
  0x18   : > { %v2166_v25 = vld [vmem:[%s2330_s21 + $0x54] sm:$0xff]   ;;  %v833_v37 = vrot.slane %v2168_v35, 3  ;;  %v2169_v38 = vld [vmem:[%s2330_s21 + $0xc8] sm:$0xff]   ;;  %v2137_v47 = vld [vmem:[%s2330_s21 + $0x40] sm:$0xff]  }
  0x19   : > { %v2402_v27 = vsel %vm811_vm2, %v827_v22, %v829_v23  ;;  %v831_v29 = vrot.slane %v2166_v25, 3  ;;  %v2408_v31 = vsel %vm811_vm2, %v1152_v26, %v1154_v28  ;;  %v2418_v34 = vsel %vm811_vm2, %v1154_v28, %v1156_v33  ;;  %v2135_v39 = vld [vmem:[%s2330_s21 + $0x38] sm:$0xff]   ;;  %v2439_v43 = vld [vmem:[%s2330_s21 + $0x64] sm:$0x1f]   ;;  %v2136_v44 = vld [vmem:[%s2330_s21 + $0xac] sm:$0xff]  }
  0x1a   : > { %1895 = vmatmul.mubr.msk.bf16.gmra.mrb[4].mxu0 %vm297_vm1, %v2122_v7  ;;  %1949 = vmatmul.mubr.msk.bf16.gmra.mrb[4].mxu1 %vm297_vm1, %v2123_v8  ;;  %v1158_v41 = vrot.slane %v2169_v38, 3  ;;  %v835_v45 = vrot.slane %v2439_v43, 3  ;;  %v2444_v46 = vld [vmem:[%s2330_s21 + $0xd0] sm:$0x1f]   ;;  %v2139_v52 = vld [vmem:[%s2330_s21 + $0x48] sm:$0xff]   ;;  %v2140_v53 = vld [vmem:[%s2330_s21 + $0xbc] sm:$0xff]  }
  0x1b   : > { %1898 = vmatprep.mubr.msk.bf16.mxu0 %vm2281_vm0, %v2280_v1  ;;  %1952 = vmatprep.mubr.msk.bf16.mxu1 %vm2281_vm0, %v2280_v1  ;;  %v2411_v32 = vsel %vm811_vm2, %v829_v23, %v831_v29  ;;  %v2427_v40 = vsel %vm811_vm2, %v831_v29, %v833_v37  ;;  %v1160_v49 = vrot.slane %v2444_v46, 3  ;;  %v2138_v51 = vld [vmem:[%s2330_s21 + $0xb4] sm:$0xff]   ;;  %v2142_v55 = vld [vmem:[%s2330_s21 + $0xc4] sm:$0xff]   ;;  %v2144_v57 = vld [vmem:[%s2330_s21 + $0xcc] ss:$0 sps:$4 sm:$0x33]  }
  0x1c   : > { %v2431_v42 = vsel %vm811_vm2, %v1156_v33, %v1158_v41  ;;  %v2450_v48 = vsel %vm811_vm2, %v833_v37, %v835_v45  ;;  %v2141_v54 = vld [vmem:[%s2330_s21 + $0x50] sm:$0xff]   ;;  %v2143_v56 = vld [vmem:[%s2330_s21 + $0x58] sm:$0xff]   ;;  %v2145_v58 = vld [vmem:[%s2330_s21 + $0x60] ss:$0 sps:$4 sm:$0x33]  }
  0x1d   : > { %v2457_v50 = vsel %vm811_vm2, %v1158_v41, %v1160_v49  ;;  %v2146_v59 = vld [vmem:[%s2330_s21 + $0x4] sm:$0xf8]   ;;  %v2147_v60 = vld [vmem:[%s2330_s21 + $0xc] sm:$0xff]   ;;  %v2149_v62 = vld [vmem:[%s2330_s21 + $0x78] sm:$0xff]  }
  0x1e   : > { %v2148_v61 = vld [vmem:[%s2330_s21 + $0x70] sm:$0xf8]   ;;  %v812_v63 = vrot.slane %v2146_v59, 3  ;;  %v813_v0 = vrot.slane %v2147_v60, 3  ;;  %v1138_v3 = vrot.slane %v2149_v62, 3  ;;  %v2151_v7 = vld [vmem:[%s2330_s21 + $0x80] sm:$0xff]  }
  0x1f   : > { %v1137_v2 = vrot.slane %v2148_v61, 3  ;;  %v2150_v5 = vld [vmem:[%s2330_s21 + $0x14] sm:$0xff]   ;;  %v2154_v19 = vld [vmem:[%s2330_s21 + $0x24] sm:$0xff]   ;;  %v2156_v28 = vld [vmem:[%s2330_s21 + $0x2c] sm:$0xff]  }
  0x20   : > { %v814_v4 = vsel %vm811_vm2, %v812_v63, %v813_v0  ;;  %v815_v8 = vrot.slane %v2150_v5, 3  ;;  %v819_v23 = vrot.slane %v2154_v19, 3  ;;  %v2157_v30 = vld [vmem:[%s2330_s21 + $0x98] sm:$0xff]   ;;  %v821_v33 = vrot.slane %v2156_v28, 3 }
  0x21   : > { %v1139_v6 = vsel %vm811_vm2, %v1137_v2, %v1138_v3  ;;  %v1146_v35 = vrot.slane %v2157_v30, 3  ;;  %v2158_v37 = vld [vmem:[%s2330_s21 + $0x34] sm:$0xff]  }
  0x22   : > { %1899 = vmatmul.mubr.msk.bf16.gmra.mrb[8].mxu0 %vm297_vm1, %v2124_v9  ;;  %1953 = vmatmul.mubr.msk.bf16.gmra.mrb[8].mxu1 %vm297_vm1, %v2125_v10  ;;  %v1140_v9 = vrot.slane %v2151_v7, 3  ;;  %v816_v10 = vsel %vm811_vm2, %v813_v0, %v815_v8  ;;  %v823_v41 = vrot.slane %v2158_v37, 3 }
  0x23   : > { %1902 = vmatprep.mubr.msk.bf16.mxu0 %vm2281_vm0, %v2280_v1  ;;  %1956 = vmatprep.mubr.msk.bf16.mxu1 %vm2281_vm0, %v2280_v1 }
  0x2a   : > { %1903 = vmatmul.mubr.msk.bf16.gmra.mrb[12].mxu0 %vm297_vm1, %v2126_v11  ;;  %1957 = vmatmul.mubr.msk.bf16.gmra.mrb[12].mxu1 %vm297_vm1, %v2127_v12  ;;  %v2152_v11 = vld [vmem:[%s2330_s21 + $0x1c] sm:$0xff]   ;;  %v1141_v12 = vsel %vm811_vm2, %v1138_v3, %v1140_v9 }
  0x2b   : > { %1906 = vmatprep.mubr.msk.bf16.mxu0 %vm2281_vm0, %v2280_v1  ;;  %1960 = vmatprep.mubr.msk.bf16.mxu1 %vm2281_vm0, %v2280_v1 }
  0x32   : > { %1907 = vmatmul.mubr.msk.bf16.gmra.mrb[16].mxu0 %vm297_vm1, %v2128_v13  ;;  %1961 = vmatmul.mubr.msk.bf16.gmra.mrb[16].mxu1 %vm297_vm1, %v2129_v14  ;;  %v2153_v13 = vld [vmem:[%s2330_s21 + $0x88] sm:$0xff]   ;;  %v817_v14 = vrot.slane %v2152_v11, 3 }
  0x33   : > { %1910 = vmatprep.mubr.msk.bf16.mxu0 %vm2281_vm0, %v2280_v1  ;;  %1964 = vmatprep.mubr.msk.bf16.mxu1 %vm2281_vm0, %v2280_v1 }
  0x34   : > { %v820_v25 = vsel %vm811_vm2, %v817_v14, %v819_v23 }
  0x3a   : > { %1911 = vmatmul.mubr.msk.bf16.gmra.mrb[20].mxu0 %vm297_vm1, %v2130_v15  ;;  %1965 = vmatmul.mubr.msk.bf16.gmra.mrb[20].mxu1 %vm297_vm1, %v2131_v16  ;;  %v1142_v15 = vrot.slane %v2153_v13, 3  ;;  %v818_v16 = vsel %vm811_vm2, %v815_v8, %v817_v14 }
  0x3b   : > { %1914 = vmatprep.mubr.msk.bf16.mxu0 %vm2281_vm0, %v2280_v1  ;;  %1968 = vmatprep.mubr.msk.bf16.mxu1 %vm2281_vm0, %v2280_v1 }
  0x42   : > { %1915 = vmatmul.mubr.msk.bf16.gmra.mrb[24].mxu0 %vm297_vm1, %v2132_v20  ;;  %1969 = vmatmul.mubr.msk.bf16.gmra.mrb[24].mxu1 %vm297_vm1, %v2133_v21  ;;  %v1143_v20 = vsel %vm811_vm2, %v1140_v9, %v1142_v15  ;;  %v2155_v21 = vld [vmem:[%s2330_s21 + $0x90] sm:$0xff]  }
  0x43   : > { %1918 = vmatprep.mubr.msk.bf16.mxu0 %vm2281_vm0, %v2280_v1  ;;  %1972 = vmatprep.mubr.msk.bf16.mxu1 %vm2281_vm0, %v2280_v1  ;;  %v1144_v24 = vrot.slane %v2155_v21, 3 }
  0x45   : > { %v1145_v29 = vsel %vm811_vm2, %v1142_v15, %v1144_v24  ;;  %v1147_v38 = vsel %vm811_vm2, %v1144_v24, %v1146_v35 }
  0x4a   : > { %1919 = vmatmul.mubr.msk.bf16.gmra.mrb[28].mxu0 %vm297_vm1, %v2134_v36  ;;  %1973 = vmatmul.mubr.msk.bf16.gmra.mrb[28].mxu1 %vm297_vm1, %v2135_v39  ;;  %v822_v36 = vsel %vm811_vm2, %v819_v23, %v821_v33  ;;  %v2159_v39 = vld [vmem:[%s2330_s21 + $0xa0] sm:$0xff]  }
  0x4b   : > { %1922 = vmatprep.mubr.msk.bf16.mxu0 %vm2281_vm0, %v2280_v1  ;;  %1976 = vmatprep.mubr.msk.bf16.mxu1 %vm2281_vm0, %v2280_v1 }
  0x52   : > { %1923 = vmatmul.mubr.msk.bf16.gmra.mrb[32].mxu0 %vm297_vm1, %v2136_v44  ;;  %1977 = vmatmul.mubr.msk.bf16.gmra.mrb[32].mxu1 %vm297_vm1, %v2137_v47  ;;  %v1148_v44 = vrot.slane %v2159_v39, 3  ;;  %v824_v47 = vsel %vm811_vm2, %v821_v33, %v823_v41 }
  0x53   : > { %1926 = vmatprep.mubr.msk.bf16.mxu0 %vm2281_vm0, %v2280_v1  ;;  %1980 = vmatprep.mubr.msk.bf16.mxu1 %vm2281_vm0, %v2280_v1 }
  0x5a   : > { %1927 = vmatmul.mubr.msk.bf16.gmra.mrb[36].mxu0 %vm297_vm1, %v2138_v51  ;;  %1981 = vmatmul.mubr.msk.bf16.gmra.mrb[36].mxu1 %vm297_vm1, %v2139_v52  ;;  %v2160_v51 = vld [vmem:[%s2330_s21 + $0x3c] sm:$0xff]   ;;  %v1149_v52 = vsel %vm811_vm2, %v1146_v35, %v1148_v44 }
  0x5b   : > { %1930 = vmatprep.mubr.msk.bf16.mxu0 %vm2281_vm0, %v2280_v1  ;;  %1984 = vmatprep.mubr.msk.bf16.mxu1 %vm2281_vm0, %v2280_v1 }
  0x62   : > { %1931 = vmatmul.mubr.msk.bf16.gmra.mrb[40].mxu0 %vm297_vm1, %v2140_v53  ;;  %1985 = vmatmul.mubr.msk.bf16.gmra.mrb[40].mxu1 %vm297_vm1, %v2141_v54  ;;  %v2161_v53 = vld [vmem:[%s2330_s21 + $0xa8] sm:$0xff]   ;;  %v825_v54 = vrot.slane %v2160_v51, 3 }
  0x63   : > { %1934 = vmatprep.mubr.msk.bf16.mxu0 %vm2281_vm0, %v2280_v1  ;;  %1988 = vmatprep.mubr.msk.bf16.mxu1 %vm2281_vm0, %v2280_v1 }
  0x6a   : > { %1935 = vmatmul.mubr.msk.bf16.gmra.mrb[44].mxu0 %vm297_vm1, %v2142_v55  ;;  %1989 = vmatmul.mubr.msk.bf16.gmra.mrb[44].mxu1 %vm297_vm1, %v2143_v56  ;;  %v1150_v55 = vrot.slane %v2161_v53, 3  ;;  %v826_v56 = vsel %vm811_vm2, %v823_v41, %v825_v54 }
  0x6b   : > { %1938 = vmatprep.mubr.msk.bf16.mxu0 %vm2281_vm0, %v2280_v1  ;;  %1992 = vmatprep.mubr.msk.bf16.mxu1 %vm2281_vm0, %v2280_v1 }
  0x6c   : > { %v1153_v59 = vsel %vm811_vm2, %v1150_v55, %v1152_v26 }
  0x72   : > { %1939 = vmatmul.mubr.msk.bf16.gmra.mrb[48].mxu0 %vm297_vm1, %v2144_v57  ;;  %1993 = vmatmul.mubr.msk.bf16.gmra.mrb[48].mxu1 %vm297_vm1, %v2145_v58  ;;  %v1151_v57 = vsel %vm811_vm2, %v1148_v44, %v1150_v55  ;;  %v828_v58 = vsel %vm811_vm2, %v825_v54, %v827_v22 }
  0x73   : > { %1998 = vmatprep.mubr.msk.bf16.mxu0 %vm2281_vm0, %v2280_v1  ;;  %2052 = vmatprep.mubr.msk.bf16.mxu1 %vm2281_vm0, %v2280_v1 }
  0x7a   : > { %1999 = vmatmul.mubr.msk.bf16.vlgmr.msra.gmra.mrb[52].mxu0 %vm297_vm1, %v814_v4  ;;  %2053 = vmatmul.mubr.msk.bf16.vlgmr.msra.gmra.mrb[52].mxu1 %vm297_vm1, %v1139_v6 }
  0x7b   : > { %2002 = vmatprep.mubr.msk.bf16.mxu0 %vm2281_vm0, %v2280_v1  ;;  %2056 = vmatprep.mubr.msk.bf16.mxu1 %vm2281_vm0, %v2280_v1 }
  0x82   : > { %2003 = vmatmul.mubr.msk.bf16.gmra.mrb[56].mxu0 %vm297_vm1, %v816_v10  ;;  %2057 = vmatmul.mubr.msk.bf16.gmra.mrb[56].mxu1 %vm297_vm1, %v1141_v12 }
  0x83   : > { %2006 = vmatprep.mubr.msk.bf16.mxu0 %vm2281_vm0, %v2280_v1  ;;  %2060 = vmatprep.mubr.msk.bf16.mxu1 %vm2281_vm0, %v2280_v1 }
  0x8a   : > { %2007 = vmatmul.mubr.msk.bf16.gmra.mrb[60].mxu0 %vm297_vm1, %v818_v16  ;;  %2061 = vmatmul.mubr.msk.bf16.gmra.mrb[60].mxu1 %vm297_vm1, %v1143_v20 }
  0x8b   : > { %2010 = vmatprep.mubr.msk.bf16.mxu0 %vm2281_vm0, %v2280_v1  ;;  %2064 = vmatprep.mubr.msk.bf16.mxu1 %vm2281_vm0, %v2280_v1 }
  0x92   : > { %2011 = vmatmul.mubr.msk.bf16.gmra.mrb[64].mxu0 %vm297_vm1, %v820_v25  ;;  %2065 = vmatmul.mubr.msk.bf16.gmra.mrb[64].mxu1 %vm297_vm1, %v1145_v29 }
  0x93   : > { %2014 = vmatprep.mubr.msk.bf16.mxu0 %vm2281_vm0, %v2280_v1  ;;  %2068 = vmatprep.mubr.msk.bf16.mxu1 %vm2281_vm0, %v2280_v1 }
  0x9a   : > { %2015 = vmatmul.mubr.msk.bf16.gmra.mrb[68].mxu0 %vm297_vm1, %v822_v36  ;;  %2069 = vmatmul.mubr.msk.bf16.gmra.mrb[68].mxu1 %vm297_vm1, %v1147_v38 }
  0x9b   : > { %2018 = vmatprep.mubr.msk.bf16.mxu0 %vm2281_vm0, %v2280_v1  ;;  %2072 = vmatprep.mubr.msk.bf16.mxu1 %vm2281_vm0, %v2280_v1 }
  0xa2   : > { %2019 = vmatmul.mubr.msk.bf16.gmra.mrb[72].mxu0 %vm297_vm1, %v824_v47  ;;  %2073 = vmatmul.mubr.msk.bf16.gmra.mrb[72].mxu1 %vm297_vm1, %v1149_v52 }
  0xa3   : > { %2022 = vmatprep.mubr.msk.bf16.mxu0 %vm2281_vm0, %v2280_v1  ;;  %2076 = vmatprep.mubr.msk.bf16.mxu1 %vm2281_vm0, %v2280_v1 }
  0xaa   : > { %2023 = vmatmul.mubr.msk.bf16.gmra.mrb[76].mxu0 %vm297_vm1, %v826_v56  ;;  %2077 = vmatmul.mubr.msk.bf16.gmra.mrb[76].mxu1 %vm297_vm1, %v1151_v57 }
  0xab   : > { %2026 = vmatprep.mubr.msk.bf16.mxu0 %vm2281_vm0, %v2280_v1  ;;  %2080 = vmatprep.mubr.msk.bf16.mxu1 %vm2281_vm0, %v2280_v1 }
  0xb2   : > { %2027 = vmatmul.mubr.msk.bf16.gmra.mrb[80].mxu0 %vm297_vm1, %v828_v58  ;;  %2081 = vmatmul.mubr.msk.bf16.gmra.mrb[80].mxu1 %vm297_vm1, %v1153_v59 }
  0xb3   : > { %2030 = vmatprep.mubr.msk.bf16.mxu0 %vm2281_vm0, %v2280_v1  ;;  %2084 = vmatprep.mubr.msk.bf16.mxu1 %vm2281_vm0, %v2280_v1 }
  0xba   : > { %2031 = vmatmul.mubr.msk.bf16.gmra.mrb[84].mxu0 %vm297_vm1, %v2402_v27  ;;  %2085 = vmatmul.mubr.msk.bf16.gmra.mrb[84].mxu1 %vm297_vm1, %v2408_v31 }
  0xbb   : > { %2034 = vmatprep.mubr.msk.bf16.mxu0 %vm2281_vm0, %v2280_v1  ;;  %2088 = vmatprep.mubr.msk.bf16.mxu1 %vm2281_vm0, %v2280_v1 }
  0xc2   : > { %2035 = vmatmul.mubr.msk.bf16.gmra.mrb[88].mxu0 %vm297_vm1, %v2411_v32  ;;  %2089 = vmatmul.mubr.msk.bf16.gmra.mrb[88].mxu1 %vm297_vm1, %v2418_v34 }
  0xc3   : > { %2038 = vmatprep.mubr.msk.bf16.mxu0 %vm2281_vm0, %v2280_v1  ;;  %2092 = vmatprep.mubr.msk.bf16.mxu1 %vm2281_vm0, %v2280_v1 }
  0xca   : > { %2039 = vmatmul.mubr.msk.bf16.gmra.mrb[92].mxu0 %vm297_vm1, %v2427_v40  ;;  %2093 = vmatmul.mubr.msk.bf16.gmra.mrb[92].mxu1 %vm297_vm1, %v2431_v42 }
  0xcb   : > { %2042 = vmatprep.mubr.msk.bf16.mxu0 %vm2281_vm0, %v2280_v1  ;;  %2096 = vmatprep.mubr.msk.bf16.mxu1 %vm2281_vm0, %v2280_v1 }
  0xd2   : > { %2043 = vmatmul.mubr.msk.bf16.gmra.mrb[96].mxu0 %vm297_vm1, %v2450_v48  ;;  %2097 = vmatmul.mubr.msk.bf16.gmra.mrb[96].mxu1 %vm297_vm1, %v2457_v50 }
  0xd3   : > { %2046 = vmatprep.mubr.msk.bf16.mxu0 %vm2281_vm0, %v2280_v1  ;;  %2100 = vmatprep.mubr.msk.bf16.mxu1 %vm2281_vm0, %v2280_v1 }
  0xda   : > { %2047 = vmatmul.mubr.msk.bf16.gmra.mrb[100].mxu0 %vm297_vm1, %v835_v45  ;;  %2101 = vmatmul.mubr.msk.bf16.gmra.mrb[100].mxu1 %vm297_vm1, %v1160_v49 }
  0xe5   : > { %v371_v17 = vpop.f32.mrb[0].mxu0  ;;  %v615_v18 = vpop.f32.mrb[0].mxu1 }
  0xe6   : > { %v1892_v22 = vpop.f32.mrb[1].mxu0  ;;  %v2618_v26 = vadd.f32 %v615_v18, %v371_v17  ;;  %v1946_v27 = vpop.f32.mrb[1].mxu1 }
  0xe7   : > { %v374_v31 = vpop.f32.mrb[2].mxu0  ;;  %v618_v32 = vpop.f32.mrb[2].mxu1 }
  0xe8   : > { %v1893_v34 = vpop.f32.mrb[3].mxu0  ;;  %v2620_v40 = vadd.f32 %v618_v32, %v374_v31  ;;  %v1947_v1 = vpop.f32.mrb[3].mxu1 }
  0xed   : > { %v379_v42 = vpop.f32.mrb[4].mxu0  ;;  %v623_v43 = vpop.f32.mrb[4].mxu1 }
  0xee   : > { %v1896_v48 = vpop.f32.mrb[5].mxu0  ;;  %v2622_v45 = vadd.f32 %v623_v43, %v379_v42  ;;  %v1950_v46 = vpop.f32.mrb[5].mxu1 }
  0xef   : > { %v382_v50 = vpop.f32.mrb[6].mxu0  ;;  %v626_v49 = vpop.f32.mrb[6].mxu1 }
  0xf0   : > { %v1897_v60 = vpop.f32.mrb[7].mxu0  ;;  %v2624_v61 = vadd.f32 %v626_v49, %v382_v50  ;;  %v1951_v62 = vpop.f32.mrb[7].mxu1 }
  0xf5   : > { %v387_v63 = vpop.f32.mrb[8].mxu0  ;;  %v631_v0 = vpop.f32.mrb[8].mxu1 }
  0xf6   : > { %v1900_v2 = vpop.f32.mrb[9].mxu0  ;;  %v2626_v3 = vadd.f32 %v631_v0, %v387_v63  ;;  %v1954_v4 = vpop.f32.mrb[9].mxu1 }
  0xf7   : > { %v390_v5 = vpop.f32.mrb[10].mxu0  ;;  %v634_v6 = vpop.f32.mrb[10].mxu1 }
  0xf8   : > { %v1901_v7 = vpop.f32.mrb[11].mxu0  ;;  %v2628_v8 = vadd.f32 %v634_v6, %v390_v5  ;;  %v1955_v9 = vpop.f32.mrb[11].mxu1 }
  0xfd   : > { %v395_v10 = vpop.f32.mrb[12].mxu0  ;;  %v639_v11 = vpop.f32.mrb[12].mxu1 }
  0xfe   : > { %v1904_v12 = vpop.f32.mrb[13].mxu0  ;;  %v2630_v13 = vadd.f32 %v639_v11, %v395_v10  ;;  %v1958_v14 = vpop.f32.mrb[13].mxu1 }
  0xff   : > { %v398_v15 = vpop.f32.mrb[14].mxu0  ;;  %v642_v16 = vpop.f32.mrb[14].mxu1 }
 0x100   : > { %v1905_v19 = vpop.f32.mrb[15].mxu0  ;;  %v2632_v20 = vadd.f32 %v642_v16, %v398_v15  ;;  %v1959_v21 = vpop.f32.mrb[15].mxu1 }
 0x105   : > { %v403_v23 = vpop.f32.mrb[16].mxu0  ;;  %v647_v24 = vpop.f32.mrb[16].mxu1 }
 0x106   : > { %v1908_v25 = vpop.f32.mrb[17].mxu0  ;;  %v2634_v28 = vadd.f32 %v647_v24, %v403_v23  ;;  %v1962_v29 = vpop.f32.mrb[17].mxu1 }
 0x107   : > { %v406_v30 = vpop.f32.mrb[18].mxu0  ;;  %v650_v33 = vpop.f32.mrb[18].mxu1 }
 0x108   : > { %v1909_v35 = vpop.f32.mrb[19].mxu0  ;;  %v2636_v36 = vadd.f32 %v650_v33, %v406_v30  ;;  %v1963_v37 = vpop.f32.mrb[19].mxu1 }
 0x10d   : > { %v411_v38 = vpop.f32.mrb[20].mxu0  ;;  %v655_v39 = vpop.f32.mrb[20].mxu1 }
 0x10e   : > { %v1912_v41 = vpop.f32.mrb[21].mxu0  ;;  %v2638_v44 = vadd.f32 %v655_v39, %v411_v38  ;;  %v1966_v47 = vpop.f32.mrb[21].mxu1 }
 0x10f   : > { %v414_v51 = vpop.f32.mrb[22].mxu0  ;;  %v658_v52 = vpop.f32.mrb[22].mxu1 }
 0x110   : > { %v1913_v53 = vpop.f32.mrb[23].mxu0  ;;  %v2640_v54 = vadd.f32 %v658_v52, %v414_v51  ;;  %v1967_v55 = vpop.f32.mrb[23].mxu1 }
 0x115   : > { %v419_v56 = vpop.f32.mrb[24].mxu0  ;;  %v663_v57 = vpop.f32.mrb[24].mxu1 }
 0x116   : > { %v1916_v58 = vpop.f32.mrb[25].mxu0  ;;  %v2642_v59 = vadd.f32 %v663_v57, %v419_v56  ;;  %v1970_v17 = vpop.f32.mrb[25].mxu1 }
 0x117   : > { %v422_v18 = vpop.f32.mrb[26].mxu0  ;;  %v666_v22 = vpop.f32.mrb[26].mxu1 }
 0x118   : > { %v1917_v27 = vpop.f32.mrb[27].mxu0  ;;  %v2644_v31 = vadd.f32 %v666_v22, %v422_v18  ;;  %v1971_v32 = vpop.f32.mrb[27].mxu1 }
 0x11d   : > { %v427_v34 = vpop.f32.mrb[28].mxu0  ;;  %v671_v1 = vpop.f32.mrb[28].mxu1 }
 0x11e   : > { %v1920_v42 = vpop.f32.mrb[29].mxu0  ;;  %v2646_v43 = vadd.f32 %v671_v1, %v427_v34  ;;  %v1974_v48 = vpop.f32.mrb[29].mxu1 }
 0x11f   : > { %v430_v46 = vpop.f32.mrb[30].mxu0  ;;  %v674_v50 = vpop.f32.mrb[30].mxu1 }
 0x120   : > { %v1921_v49 = vpop.f32.mrb[31].mxu0  ;;  %v2648_v60 = vadd.f32 %v674_v50, %v430_v46  ;;  %v1975_v62 = vpop.f32.mrb[31].mxu1 }
 0x125   : > { %v435_v63 = vpop.f32.mrb[32].mxu0  ;;  %v679_v0 = vpop.f32.mrb[32].mxu1 }
 0x126   : > { %v1924_v2 = vpop.f32.mrb[33].mxu0  ;;  %v2650_v4 = vadd.f32 %v679_v0, %v435_v63  ;;  %v1978_v5 = vpop.f32.mrb[33].mxu1 }
 0x127   : > { %v438_v6 = vpop.f32.mrb[34].mxu0  ;;  %v682_v7 = vpop.f32.mrb[34].mxu1 }
 0x128   : > { %v1925_v9 = vpop.f32.mrb[35].mxu0  ;;  %v2652_v10 = vadd.f32 %v682_v7, %v438_v6  ;;  %v1979_v11 = vpop.f32.mrb[35].mxu1  ;;  %v2672_v7 = vld [vmem:[%s2783_s2] ss:$0 sm:$0xff] }
 0x12d   : > { %v443_v12 = vpop.f32.mrb[36].mxu0  ;;  %v687_v14 = vpop.f32.mrb[36].mxu1 }
 0x12e   : > { %v1928_v15 = vpop.f32.mrb[37].mxu0  ;;  %v2654_v16 = vadd.f32 %v687_v14, %v443_v12  ;;  %v1982_v19 = vpop.f32.mrb[37].mxu1 }
 0x12f   : > { %v446_v21 = vpop.f32.mrb[38].mxu0  ;;  %v690_v23 = vpop.f32.mrb[38].mxu1 }
 0x130   : > { %v1929_v24 = vpop.f32.mrb[39].mxu0  ;;  %v2656_v25 = vadd.f32 %v690_v23, %v446_v21  ;;  %v1983_v29 = vpop.f32.mrb[39].mxu1 }
 0x135   : > { %v451_v30 = vpop.f32.mrb[40].mxu0  ;;  %v695_v33 = vpop.f32.mrb[40].mxu1 }
 0x136   : > { %v1932_v35 = vpop.f32.mrb[41].mxu0  ;;  %v2658_v37 = vadd.f32 %v695_v33, %v451_v30  ;;  %v1986_v38 = vpop.f32.mrb[41].mxu1 }
 0x137   : > { %v454_v39 = vpop.f32.mrb[42].mxu0  ;;  %v698_v41 = vpop.f32.mrb[42].mxu1 }
 0x138   : > { %v1933_v47 = vpop.f32.mrb[43].mxu0  ;;  %v2660_v51 = vadd.f32 %v698_v41, %v454_v39  ;;  %v1987_v52 = vpop.f32.mrb[43].mxu1 }
 0x13d   : > { %v459_v53 = vpop.f32.mrb[44].mxu0  ;;  %v703_v55 = vpop.f32.mrb[44].mxu1 }
 0x13e   : > { %v1936_v56 = vpop.f32.mrb[45].mxu0  ;;  %v2662_v57 = vadd.f32 %v703_v55, %v459_v53  ;;  %v1990_v58 = vpop.f32.mrb[45].mxu1 }
 0x13f   : > { %v462_v17 = vpop.f32.mrb[46].mxu0  ;;  %v706_v18 = vpop.f32.mrb[46].mxu1 }
 0x140   : > { %v1937_v22 = vpop.f32.mrb[47].mxu0  ;;  %v2664_v27 = vadd.f32 %v706_v18, %v462_v17  ;;  %v1991_v32 = vpop.f32.mrb[47].mxu1 }
 0x145   : > { %v467_v34 = vpop.f32.mrb[48].mxu0  ;;  %v711_v1 = vpop.f32.mrb[48].mxu1 }
 0x146   : > { %v1940_v42 = vpop.f32.mrb[49].mxu0  ;;  %v2666_v48 = vadd.f32 %v711_v1, %v467_v34  ;;  %v1994_v46 = vpop.f32.mrb[49].mxu1 }
 0x147   : > { %v470_v50 = vpop.f32.mrb[50].mxu0  ;;  %v714_v49 = vpop.f32.mrb[50].mxu1 }
 0x148   : > { %v1941_v62 = vpop.f32.mrb[51].mxu0  ;;  %v1995_v63 = vpop.f32.mrb[51].mxu1 }
 0x14d   : > { %v916_v0 = vpop.f32.mrb[52].mxu0  ;;  %v1241_v5 = vpop.f32.mrb[52].mxu1 }
 0x14e   : > { %v1018_v2 = vadd.f32 %v916_v0, %v2618_v26  ;;  %v2000_v6 = vpop.f32.mrb[53].mxu0  ;;  %v2054_v9 = vpop.f32.mrb[53].mxu1 }
 0x14f   : > { %v919_v11 = vpop.f32.mrb[54].mxu0  ;;  %v1244_v15 = vpop.f32.mrb[54].mxu1 }
 0x150   : > { %v1343_v12 = vadd.f32 %v1241_v5, %v1018_v2  ;;  %v1019_v14 = vadd.f32 %v919_v11, %v2620_v40  ;;  %v2001_v19 = vpop.f32.mrb[55].mxu0  ;;  %v2055_v21 = vpop.f32.mrb[55].mxu1 }
 0x152   : > { %v1375_v23 = vadd.f32 %v2672_v7, %v1343_v12  ;;  %v1344_v24 = vadd.f32 %v1244_v15, %v1019_v14 }
 0x154   : > { %v1805_v29 = vmul.f32 -1.442695, %v1375_v23  ;;  %v1376_v26 = vadd.f32 %v2672_v7, %v1344_v24 }
 0x155   : > { %v924_v30 = vpop.f32.mrb[56].mxu0  ;;  %v1249_v38 = vpop.f32.mrb[56].mxu1 }
 0x156   : > { %2172 = vpow2.f32 %v1805_v29  ;;  %v1806_v33 = vmul.f32 -1.442695, %v1376_v26  ;;  %v1020_v35 = vadd.f32 %v924_v30, %v2622_v45  ;;  %v2004_v39 = vpop.f32.mrb[57].mxu0  ;;  %v2058_v41 = vpop.f32.mrb[57].mxu1 }
 0x157   : > { %v927_v47 = vpop.f32.mrb[58].mxu0  ;;  %v1252_v53 = vpop.f32.mrb[58].mxu1 }
 0x158   : > { %2174 = vpow2.f32 %v1806_v33  ;;  %v1345_v40 = vadd.f32 %v1249_v38, %v1020_v35  ;;  %v1021_v52 = vadd.f32 %v927_v47, %v2624_v61  ;;  %v2005_v55 = vpop.f32.mrb[59].mxu0  ;;  %v2059_v56 = vpop.f32.mrb[59].mxu1 }
 0x15a   : > { %v1377_v58 = vadd.f32 %v2672_v7, %v1345_v40  ;;  %v1346_v17 = vadd.f32 %v1252_v53, %v1021_v52 }
 0x15c   : > { %v1807_v18 = vmul.f32 -1.442695, %v1377_v58  ;;  %v1378_v22 = vadd.f32 %v2672_v7, %v1346_v17 }
 0x15d   : > { %v932_v32 = vpop.f32.mrb[60].mxu0  ;;  %v1257_v1 = vpop.f32.mrb[60].mxu1 }
 0x15e   : > { %2176 = vpow2.f32 %v1807_v18  ;;  %v1808_v45 = vmul.f32 -1.442695, %v1378_v22  ;;  %v1022_v34 = vadd.f32 %v932_v32, %v2626_v3  ;;  %v2008_v42 = vpop.f32.mrb[61].mxu0  ;;  %v2062_v46 = vpop.f32.mrb[61].mxu1 }
 0x15f   : > { %v935_v50 = vpop.f32.mrb[62].mxu0  ;;  %v1260_v63 = vpop.f32.mrb[62].mxu1 }
 0x160   : > { %v2173_v49 = vpop.eup %2172  ;;  %2178 = vpow2.f32 %v1808_v45  ;;  %v1347_v61 = vadd.f32 %v1257_v1, %v1022_v34  ;;  %v1023_v62 = vadd.f32 %v935_v50, %v2628_v8  ;;  %v2009_v0 = vpop.f32.mrb[63].mxu0 }
 0x161   : > { %v1475_v2 = vadd.f32 1.0, %v2173_v49  ;;  %v2063_v5 = vpop.f32.mrb[63].mxu1 }
 0x162   : > { %v2175_v6 = vpop.eup %2174  ;;  %v1379_v9 = vadd.f32 %v2672_v7, %v1347_v61  ;;  %v1348_v11 = vadd.f32 %v1260_v63, %v1023_v62 }
 0x163   : > { %2180 = vrcp.f32 %v1475_v2  ;;  %v1476_v3 = vadd.f32 1.0, %v2175_v6 }
 0x164   : > { %v1809_v12 = vmul.f32 -1.442695, %v1379_v9  ;;  %v1380_v14 = vadd.f32 %v2672_v7, %v1348_v11 }
 0x165   : > { %2182 = vrcp.f32 %v1476_v3  ;;  %v940_v15 = vpop.f32.mrb[64].mxu0  ;;  %v1265_v21 = vpop.f32.mrb[64].mxu1 }
 0x166   : > { %2184 = vpow2.f32 %v1809_v12  ;;  %v1810_v19 = vmul.f32 -1.442695, %v1380_v14  ;;  %v1024_v8 = vadd.f32 %v940_v15, %v2630_v13  ;;  %v2012_v23 = vpop.f32.mrb[65].mxu0  ;;  %v2066_v24 = vpop.f32.mrb[65].mxu1 }
 0x167   : > { %v943_v29 = vpop.f32.mrb[66].mxu0  ;;  %v1268_v35 = vpop.f32.mrb[66].mxu1 }
 0x168   : > { %v2177_v26 = vpop.eup %2176  ;;  %2186 = vpow2.f32 %v1810_v19  ;;  %v1349_v30 = vadd.f32 %v1265_v21, %v1024_v8  ;;  %v1025_v33 = vadd.f32 %v943_v29, %v2632_v20  ;;  %v2013_v38 = vpop.f32.mrb[67].mxu0 }
 0x169   : > { %v1477_v39 = vadd.f32 1.0, %v2177_v26  ;;  %v2067_v41 = vpop.f32.mrb[67].mxu1 }
 0x16a   : > { %v2179_v47 = vpop.eup %2178  ;;  %v1381_v40 = vadd.f32 %v2672_v7, %v1349_v30  ;;  %v1350_v52 = vadd.f32 %v1268_v35, %v1025_v33 }
 0x16b   : > { %2188 = vrcp.f32 %v1477_v39  ;;  %v1478_v13 = vadd.f32 1.0, %v2179_v47 }
 0x16c   : > { %v1811_v53 = vmul.f32 -1.442695, %v1381_v40  ;;  %v1382_v20 = vadd.f32 %v2672_v7, %v1350_v52 }
 0x16d   : > { %v2181_v55 = vpop.eup %2180  ;;  %2190 = vrcp.f32 %v1478_v13  ;;  %v948_v56 = vpop.f32.mrb[68].mxu0 }
 0x16e   : > { %1551 = vst.msk [vmem:[%s2692_s4] sm:$0xff] %vm1550_vm3, %v2181_v55  ;;  %2192 = vpow2.f32 %v1811_v53  ;;  %v1812_v58 = vmul.f32 -1.442695, %v1382_v20  ;;  %v1026_v17 = vadd.f32 %v948_v56, %v2634_v28  ;;  %v1273_v18 = vpop.f32.mrb[68].mxu1  ;;  %v2016_v22 = vpop.f32.mrb[69].mxu0 }
 0x16f   : > { %v2183_v32 = vpop.eup %2182  ;;  %v2070_v45 = vpop.f32.mrb[69].mxu1 }
 0x170   : > { %v951_v34 = vpop.f32.mrb[70].mxu0  ;;  %v2185_v1 = vpop.eup %2184  ;;  %1552 = vst.msk [vmem:[%s2692_s4 + $0x8] sm:$0xff] %vm1550_vm3, %v2183_v32  ;;  %2194 = vpow2.f32 %v1812_v58  ;;  %v1351_v42 = vadd.f32 %v1273_v18, %v1026_v17 }
 0x171   : > { %v1027_v46 = vadd.f32 %v951_v34, %v2636_v36  ;;  %v1276_v50 = vpop.f32.mrb[70].mxu1  ;;  %v2017_v49 = vpop.f32.mrb[71].mxu0  ;;  %v1479_v61 = vadd.f32 1.0, %v2185_v1 }
 0x172   : > { %v2071_v62 = vpop.f32.mrb[71].mxu1  ;;  %v2187_v63 = vpop.eup %2186  ;;  %v1383_v28 = vadd.f32 %v2672_v7, %v1351_v42 }
 0x173   : > { %v1352_v0 = vadd.f32 %v1276_v50, %v1027_v46  ;;  %2196 = vrcp.f32 %v1479_v61  ;;  %v1480_v2 = vadd.f32 1.0, %v2187_v63 }
 0x174   : > { %v1813_v5 = vmul.f32 -1.442695, %v1383_v28 }
 0x175   : > { %v1384_v6 = vadd.f32 %v2672_v7, %v1352_v0  ;;  %v2189_v9 = vpop.eup %2188  ;;  %2198 = vrcp.f32 %v1480_v2  ;;  %v956_v11 = vpop.f32.mrb[72].mxu0 }
 0x176   : > { %1553 = vst.msk [vmem:[%s2692_s4 + $0x10] sm:$0xff] %vm1550_vm3, %v2189_v9  ;;  %2200 = vpow2.f32 %v1813_v5  ;;  %v1028_v3 = vadd.f32 %v956_v11, %v2638_v44  ;;  %v1281_v12 = vpop.f32.mrb[72].mxu1  ;;  %v2020_v14 = vpop.f32.mrb[73].mxu0 }
 0x177   : > { %v1814_v36 = vmul.f32 -1.442695, %v1384_v6  ;;  %v2191_v15 = vpop.eup %2190  ;;  %v2074_v19 = vpop.f32.mrb[73].mxu1 }
 0x178   : > { %v959_v8 = vpop.f32.mrb[74].mxu0  ;;  %v2193_v21 = vpop.eup %2192  ;;  %1554 = vst.msk [vmem:[%s2692_s4 + $0x18] sm:$0xff] %vm1550_vm3, %v2191_v15  ;;  %v1353_v23 = vadd.f32 %v1281_v12, %v1028_v3 }
 0x179   : > { %2202 = vpow2.f32 %v1814_v36  ;;  %v1029_v24 = vadd.f32 %v959_v8, %v2640_v54  ;;  %v1284_v29 = vpop.f32.mrb[74].mxu1  ;;  %v2021_v26 = vpop.f32.mrb[75].mxu0  ;;  %v1481_v30 = vadd.f32 1.0, %v2193_v21 }
 0x17a   : > { %v2075_v33 = vpop.f32.mrb[75].mxu1  ;;  %v2195_v35 = vpop.eup %2194  ;;  %v1385_v44 = vadd.f32 %v2672_v7, %v1353_v23 }
 0x17b   : > { %v1354_v38 = vadd.f32 %v1284_v29, %v1029_v24  ;;  %2204 = vrcp.f32 %v1481_v30  ;;  %v1482_v39 = vadd.f32 1.0, %v2195_v35 }
 0x17c   : > { %v1815_v41 = vmul.f32 -1.442695, %v1385_v44 }
 0x17d   : > { %v1386_v47 = vadd.f32 %v2672_v7, %v1354_v38  ;;  %v2197_v40 = vpop.eup %2196  ;;  %2206 = vrcp.f32 %v1482_v39  ;;  %v964_v52 = vpop.f32.mrb[76].mxu0 }
 0x17e   : > { %1555 = vst.msk [vmem:[%s2692_s4 + $0x20] sm:$0xff] %vm1550_vm3, %v2197_v40  ;;  %2208 = vpow2.f32 %v1815_v41  ;;  %v1030_v13 = vadd.f32 %v964_v52, %v2642_v59  ;;  %v1289_v53 = vpop.f32.mrb[76].mxu1  ;;  %v2024_v20 = vpop.f32.mrb[77].mxu0 }
 0x17f   : > { %v1816_v54 = vmul.f32 -1.442695, %v1386_v47  ;;  %v2199_v55 = vpop.eup %2198  ;;  %v2078_v56 = vpop.f32.mrb[77].mxu1 }
 0x180   : > { %v967_v58 = vpop.f32.mrb[78].mxu0  ;;  %v2201_v17 = vpop.eup %2200  ;;  %1556 = vst.msk [vmem:[%s2692_s4 + $0x28] sm:$0xff] %vm1550_vm3, %v2199_v55  ;;  %v1355_v18 = vadd.f32 %v1289_v53, %v1030_v13 }
 0x181   : > { %2210 = vpow2.f32 %v1816_v54  ;;  %v1031_v22 = vadd.f32 %v967_v58, %v2644_v31  ;;  %v1292_v32 = vpop.f32.mrb[78].mxu1  ;;  %v2025_v45 = vpop.f32.mrb[79].mxu0  ;;  %v1483_v34 = vadd.f32 1.0, %v2201_v17 }
 0x182   : > { %v2079_v1 = vpop.f32.mrb[79].mxu1  ;;  %v1387_v59 = vadd.f32 %v2672_v7, %v1355_v18 }
 0x183   : > { %v2203_v42 = vpop.eup %2202  ;;  %v1356_v46 = vadd.f32 %v1292_v32, %v1031_v22  ;;  %2212 = vrcp.f32 %v1483_v34 }
 0x184   : > { %v1484_v50 = vadd.f32 1.0, %v2203_v42  ;;  %v1817_v49 = vmul.f32 -1.442695, %v1387_v59 }
 0x185   : > { %v1388_v61 = vadd.f32 %v2672_v7, %v1356_v46  ;;  %v2205_v62 = vpop.eup %2204  ;;  %v972_v63 = vpop.f32.mrb[80].mxu0 }
 0x186   : > { %2214 = vrcp.f32 %v1484_v50  ;;  %1557 = vst.msk [vmem:[%s2692_s4 + $0x30] sm:$0xff] %vm1550_vm3, %v2205_v62  ;;  %v1032_v28 = vadd.f32 %v972_v63, %v2646_v43  ;;  %v1297_v0 = vpop.f32.mrb[80].mxu1  ;;  %v2028_v2 = vpop.f32.mrb[81].mxu0 }
 0x187   : > { %2216 = vpow2.f32 %v1817_v49  ;;  %v1818_v31 = vmul.f32 -1.442695, %v1388_v61  ;;  %v2207_v5 = vpop.eup %2206  ;;  %v2082_v6 = vpop.f32.mrb[81].mxu1 }
 0x188   : > { %v975_v9 = vpop.f32.mrb[82].mxu0  ;;  %v2209_v11 = vpop.eup %2208  ;;  %1558 = vst.msk [vmem:[%s2692_s4 + $0x38] sm:$0xff] %vm1550_vm3, %v2207_v5  ;;  %v1357_v36 = vadd.f32 %v1297_v0, %v1032_v28 }
 0x189   : > { %2218 = vpow2.f32 %v1818_v31  ;;  %v1033_v3 = vadd.f32 %v975_v9, %v2648_v60  ;;  %v1300_v12 = vpop.f32.mrb[82].mxu1  ;;  %v2029_v14 = vpop.f32.mrb[83].mxu0  ;;  %v1485_v15 = vadd.f32 1.0, %v2209_v11 }
 0x18a   : > { %v2083_v19 = vpop.f32.mrb[83].mxu1  ;;  %v1389_v43 = vadd.f32 %v2672_v7, %v1357_v36 }
 0x18b   : > { %v2211_v8 = vpop.eup %2210  ;;  %v1358_v21 = vadd.f32 %v1300_v12, %v1033_v3  ;;  %2220 = vrcp.f32 %v1485_v15 }
 0x18c   : > { %v1486_v23 = vadd.f32 1.0, %v2211_v8  ;;  %v1819_v24 = vmul.f32 -1.442695, %v1389_v43 }
 0x18d   : > { %v1390_v29 = vadd.f32 %v2672_v7, %v1358_v21  ;;  %v2213_v26 = vpop.eup %2212  ;;  %v980_v30 = vpop.f32.mrb[84].mxu0 }
 0x18e   : > { %2222 = vrcp.f32 %v1486_v23  ;;  %1559 = vst.msk [vmem:[%s2692_s4 + $0x40] sm:$0xff] %vm1550_vm3, %v2213_v26  ;;  %v1034_v33 = vadd.f32 %v980_v30, %v2650_v4  ;;  %v1305_v35 = vpop.f32.mrb[84].mxu1  ;;  %v2032_v44 = vpop.f32.mrb[85].mxu0 }
 0x18f   : > { %2224 = vpow2.f32 %v1819_v24  ;;  %v1820_v60 = vmul.f32 -1.442695, %v1390_v29  ;;  %v2086_v39 = vpop.f32.mrb[85].mxu1  ;;  %v983_v41 = vpop.f32.mrb[86].mxu0 }
 0x190   : > { %v2215_v38 = vpop.eup %2214  ;;  %v1359_v40 = vadd.f32 %v1305_v35, %v1034_v33  ;;  %v1035_v52 = vadd.f32 %v983_v41, %v2652_v10  ;;  %v1308_v54 = vpop.f32.mrb[86].mxu1 }
 0x191   : > { %v2217_v47 = vpop.eup %2216  ;;  %1560 = vst.msk [vmem:[%s2692_s4 + $0x48] sm:$0xff] %vm1550_vm3, %v2215_v38  ;;  %2226 = vpow2.f32 %v1820_v60  ;;  %v2033_v13 = vpop.f32.mrb[87].mxu0 }
 0x192   : > { %v1487_v53 = vadd.f32 1.0, %v2217_v47  ;;  %v2087_v20 = vpop.f32.mrb[87].mxu1  ;;  %v1391_v4 = vadd.f32 %v2672_v7, %v1359_v40  ;;  %v1360_v56 = vadd.f32 %v1308_v54, %v1035_v52 }
 0x193   : > { %v2219_v55 = vpop.eup %2218 }
 0x194   : > { %2228 = vrcp.f32 %v1487_v53  ;;  %v1488_v58 = vadd.f32 1.0, %v2219_v55  ;;  %v1821_v17 = vmul.f32 -1.442695, %v1391_v4  ;;  %v1392_v18 = vadd.f32 %v2672_v7, %v1360_v56 }
 0x195   : > { %v2221_v22 = vpop.eup %2220  ;;  %v988_v32 = vpop.f32.mrb[88].mxu0 }
 0x196   : > { %2230 = vrcp.f32 %v1488_v58  ;;  %1561 = vst.msk [vmem:[%s2692_s4 + $0x50] sm:$0xff] %vm1550_vm3, %v2221_v22  ;;  %v1822_v10 = vmul.f32 -1.442695, %v1392_v18  ;;  %v1036_v45 = vadd.f32 %v988_v32, %v2654_v16  ;;  %v1313_v34 = vpop.f32.mrb[88].mxu1  ;;  %v2036_v1 = vpop.f32.mrb[89].mxu0 }
 0x197   : > { %2232 = vpow2.f32 %v1821_v17  ;;  %v2090_v59 = vpop.f32.mrb[89].mxu1  ;;  %v991_v46 = vpop.f32.mrb[90].mxu0 }
 0x198   : > { %v2223_v42 = vpop.eup %2222  ;;  %2234 = vpow2.f32 %v1822_v10  ;;  %v1361_v49 = vadd.f32 %v1313_v34, %v1036_v45  ;;  %v1037_v61 = vadd.f32 %v991_v46, %v2656_v25  ;;  %v1316_v62 = vpop.f32.mrb[90].mxu1 }
 0x199   : > { %v2225_v50 = vpop.eup %2224  ;;  %1562 = vst.msk [vmem:[%s2692_s4 + $0x58] sm:$0xff] %vm1550_vm3, %v2223_v42  ;;  %v2037_v63 = vpop.f32.mrb[91].mxu0 }
 0x19a   : > { %v1489_v31 = vadd.f32 1.0, %v2225_v50  ;;  %v2091_v28 = vpop.f32.mrb[91].mxu1  ;;  %v1393_v16 = vadd.f32 %v2672_v7, %v1361_v49  ;;  %v1362_v2 = vadd.f32 %v1316_v62, %v1037_v61 }
 0x19b   : > { %v2227_v0 = vpop.eup %2226 }
 0x19c   : > { %2236 = vrcp.f32 %v1489_v31  ;;  %v1490_v5 = vadd.f32 1.0, %v2227_v0  ;;  %v1823_v6 = vmul.f32 -1.442695, %v1393_v16  ;;  %v1394_v9 = vadd.f32 %v2672_v7, %v1362_v2 }
 0x19d   : > { %v996_v36 = vpop.f32.mrb[92].mxu0  ;;  %v1321_v12 = vpop.f32.mrb[92].mxu1 }
 0x19e   : > { %v2229_v11 = vpop.eup %2228  ;;  %2238 = vrcp.f32 %v1490_v5  ;;  %v1824_v25 = vmul.f32 -1.442695, %v1394_v9  ;;  %v1038_v3 = vadd.f32 %v996_v36, %v2658_v37  ;;  %v2040_v14 = vpop.f32.mrb[93].mxu0 }
 0x19f   : > { %1563 = vst.msk [vmem:[%s2692_s4 + $0x60] sm:$0xff] %vm1550_vm3, %v2229_v11  ;;  %2240 = vpow2.f32 %v1823_v6  ;;  %v2094_v19 = vpop.f32.mrb[93].mxu1  ;;  %v999_v8 = vpop.f32.mrb[94].mxu0 }
 0x1a0   : > { %v2231_v15 = vpop.eup %2230  ;;  %2242 = vpow2.f32 %v1824_v25  ;;  %v1363_v21 = vadd.f32 %v1321_v12, %v1038_v3  ;;  %v1039_v23 = vadd.f32 %v999_v8, %v2660_v51  ;;  %v1324_v24 = vpop.f32.mrb[94].mxu1 }
 0x1a1   : > { %v2233_v43 = vpop.eup %2232  ;;  %1564 = vst.msk [vmem:[%s2692_s4 + $0x68] sm:$0xff] %vm1550_vm3, %v2231_v15  ;;  %v2041_v29 = vpop.f32.mrb[95].mxu0 }
 0x1a2   : > { %v1491_v26 = vadd.f32 1.0, %v2233_v43  ;;  %v2095_v30 = vpop.f32.mrb[95].mxu1  ;;  %v2235_v60 = vpop.eup %2234  ;;  %v1395_v37 = vadd.f32 %v2672_v7, %v1363_v21  ;;  %v1364_v33 = vadd.f32 %v1324_v24, %v1039_v23 }
 0x1a3   : > { %v1492_v35 = vadd.f32 1.0, %v2235_v60 }
 0x1a4   : > { %2244 = vrcp.f32 %v1491_v26  ;;  %v1825_v44 = vmul.f32 -1.442695, %v1395_v37  ;;  %v1396_v38 = vadd.f32 %v2672_v7, %v1364_v33 }
 0x1a5   : > { %2246 = vrcp.f32 %v1492_v35  ;;  %v1004_v41 = vpop.f32.mrb[96].mxu0  ;;  %v1329_v40 = vpop.f32.mrb[96].mxu1 }
 0x1a6   : > { %v2237_v39 = vpop.eup %2236  ;;  %2248 = vpow2.f32 %v1825_v44  ;;  %v1826_v51 = vmul.f32 -1.442695, %v1396_v38  ;;  %v1040_v47 = vadd.f32 %v1004_v41, %v2662_v57  ;;  %v2044_v52 = vpop.f32.mrb[97].mxu0 }
 0x1a7   : > { %1565 = vst.msk [vmem:[%s2692_s4 + $0x70] sm:$0xff] %vm1550_vm3, %v2237_v39  ;;  %v2098_v13 = vpop.f32.mrb[97].mxu1  ;;  %v1007_v53 = vpop.f32.mrb[98].mxu0 }
 0x1a8   : > { %v2239_v54 = vpop.eup %2238  ;;  %2250 = vpow2.f32 %v1826_v51  ;;  %v1365_v55 = vadd.f32 %v1329_v40, %v1040_v47  ;;  %v1041_v4 = vadd.f32 %v1007_v53, %v2664_v27  ;;  %v1332_v56 = vpop.f32.mrb[98].mxu1 }
 0x1a9   : > { %v2241_v20 = vpop.eup %2240  ;;  %1566 = vst.msk [vmem:[%s2692_s4 + $0x78] sm:$0xff] %vm1550_vm3, %v2239_v54  ;;  %v2045_v58 = vpop.f32.mrb[99].mxu0 }
 0x1aa   : > { %v1493_v17 = vadd.f32 1.0, %v2241_v20  ;;  %v2099_v18 = vpop.f32.mrb[99].mxu1  ;;  %v2243_v22 = vpop.eup %2242  ;;  %v1397_v57 = vadd.f32 %v2672_v7, %v1365_v55  ;;  %v1366_v32 = vadd.f32 %v1332_v56, %v1041_v4 }
 0x1ab   : > { %v1494_v10 = vadd.f32 1.0, %v2243_v22 }
 0x1ac   : > { %2252 = vrcp.f32 %v1493_v17  ;;  %v1827_v45 = vmul.f32 -1.442695, %v1397_v57  ;;  %v1398_v34 = vadd.f32 %v2672_v7, %v1366_v32 }
 0x1ad   : > { %2254 = vrcp.f32 %v1494_v10  ;;  %v1012_v42 = vpop.f32.mrb[100].mxu0  ;;  %v1337_v46 = vpop.f32.mrb[100].mxu1 }
 0x1ae   : > { %v2245_v1 = vpop.eup %2244  ;;  %2256 = vpow2.f32 %v1827_v45  ;;  %v1828_v27 = vmul.f32 -1.442695, %v1398_v34  ;;  %v1042_v59 = vadd.f32 %v1012_v42, %v2666_v48  ;;  %v2048_v50 = vpop.f32.mrb[101].mxu0 }
 0x1af   : > { %1567 = vst.msk [vmem:[%s2692_s4 + $0x80] sm:$0xff] %vm1550_vm3, %v2245_v1  ;;  %v2247_v49 = vpop.eup %2246  ;;  %v2102_v61 = vpop.f32.mrb[101].mxu1 }
 0x1b0   : > { %v1015_v62 = vpop.f32.mrb[102].mxu0  ;;  %v2249_v63 = vpop.eup %2248  ;;  %1568 = vst.msk [vmem:[%s2692_s4 + $0x88] sm:$0xff] %vm1550_vm3, %v2247_v49  ;;  %2258 = vpow2.f32 %v1828_v27  ;;  %v1367_v31 = vadd.f32 %v1337_v46, %v1042_v59 }
 0x1b1   : > { %v1340_v28 = vpop.f32.mrb[102].mxu1  ;;  %v2049_v0 = vpop.f32.mrb[103].mxu0  ;;  %v1495_v16 = vadd.f32 1.0, %v2249_v63 }
 0x1b2   : > { %v2103_v2 = vpop.f32.mrb[103].mxu1  ;;  %v2251_v5 = vpop.eup %2250  ;;  %v1399_v6 = vadd.f32 %v2672_v7, %v1367_v31 }
 0x1b3   : > { %2260 = vrcp.f32 %v1495_v16  ;;  %v1496_v48 = vadd.f32 1.0, %v2251_v5 }
 0x1b4   : > { %v1829_v9 = vmul.f32 -1.442695, %v1399_v6 }
 0x1b5   : > { %2262 = vrcp.f32 %v1496_v48 }
 0x1b6   : > { %v2253_v11 = vpop.eup %2252  ;;  %2264 = vpow2.f32 %v1829_v9 }
 0x1b7   : > { %1569 = vst.msk [vmem:[%s2692_s4 + $0x90] sm:$0xff] %vm1550_vm3, %v2253_v11  ;;  %v2255_v36 = vpop.eup %2254 }
 0x1b8   : > { %v2257_v25 = vpop.eup %2256  ;;  %1570 = vst.msk [vmem:[%s2692_s4 + $0x98] sm:$0xff] %vm1550_vm3, %v2255_v36 }
 0x1b9   : > { %v1497_v3 = vadd.f32 1.0, %v2257_v25 }
 0x1ba   : > { %v2259_v12 = vpop.eup %2258 }
 0x1bb   : > { %2266 = vrcp.f32 %v1497_v3  ;;  %v1498_v7 = vadd.f32 1.0, %v2259_v12 }
 0x1bd   : > { %v2261_v14 = vpop.eup %2260  ;;  %2268 = vrcp.f32 %v1498_v7 }
 0x1be   : > { %1571 = vst.msk [vmem:[%s2692_s4 + $0xa0] sm:$0xff] %vm1550_vm3, %v2261_v14 }
 0x1bf   : > { %v2263_v15 = vpop.eup %2262 }
 0x1c0   : > { %v2265_v19 = vpop.eup %2264  ;;  %1572 = vst.msk [vmem:[%s2692_s4 + $0xa8] sm:$0xff] %vm1550_vm3, %v2263_v15 }
 0x1c1   : > { %v1499_v8 = vadd.f32 1.0, %v2265_v19 }
 0x1c3   : > { %2270 = vrcp.f32 %v1499_v8 }
 0x1c5   : > { %v2267_v43 = vpop.eup %2266 }
 0x1c6   : > { %1573 = vst.msk [vmem:[%s2692_s4 + $0xb0] sm:$0xff] %vm1550_vm3, %v2267_v43 }
 0x1c7   : > { %v2269_v21 = vpop.eup %2268 }
 0x1c8   : > { %1574 = vst.msk [vmem:[%s2692_s4 + $0xb8] sm:$0xff] %vm1550_vm3, %v2269_v21 }
 0x1cd   : > { %v2271_v23 = vpop.eup %2270 }
 0x1ce   : > { %1576 = vst.msk [vmem:[%s2692_s4 + $0xc0] sm:$0xf] %vm1575_vm4, %v2271_v23 }
 0x1cf PF: > { %s13_s12 = sadd.s32 1, %s2278_s12  }
 0x1d0   : > { %p10_p4 = scmp.ge.s32.totalorder %s13_s12, 4  }
 0x1d2   :  { %12 = sbr.rel (!%p10_p4) target bundleno = 1 (0x1), region = 66 }

</bundles_post_ra>
